<compile_context>
chip_gen: v6e
topology: v6e:2x2x1
jax: 0.10.0
libtpu: 0.0.40
codegen_flags: <defaults>
</compile_context>

<pallas_src>
import functools

import numpy as np
import jax
import jax.numpy as jnp
from jax import lax
from jax.experimental import pallas as pl
from jax.experimental.pallas import tpu as pltpu

PARALLEL = pltpu.CompilerParams(dimension_semantics=("parallel",))

# 3x3 tap order (dy-major, dx-minor) shared by masks, weights and the in-kernel shifts.
_OFFSETS = tuple((dy, dx) for dy in (-1, 0, 1) for dx in (-1, 0, 1))


def _bcast_spec(shape):
    """BlockSpec for a tensor that is identical for every grid step (weights / constants)."""
    return pl.BlockSpec(shape, lambda *_: (0,) * len(shape))


def _samples_per_block(n):
    """Fold the batch into the matmul M dim (review #1): sb*49 rows per grid step.
    sb=8 -> 392-row tiles (sublane-aligned) when the batch allows; otherwise one block."""
    if n > 8 and n % 8 == 0:
        return 8
    return n


def _tap_masks(sb):
    """(9, sb*49, 1) 0/1 masks: validity of each 3x3 tap on the flattened 7x7 grid (zero-pad conv),
    tiled across the samples of one block.  Pure numpy -> constant-folded under jit."""
    m = np.zeros((9, 49), np.float32)
    for k, (dy, dx) in enumerate(_OFFSETS):
        for p in range(49):
            y, x = divmod(p, 7)
            if 0 <= y + dy < 7 and 0 <= x + dx < 7:
                m[k, p] = 1.0
    m = np.tile(m, (1, sb)).reshape(9, sb * 49, 1)
    return jnp.asarray(m, jnp.bfloat16)


# ----------------------------------------------------------------------------
# Pallas kernel: fused ConvLSTM (peephole) + ResnetBlock(hs, 2), batch folded into M
# ----------------------------------------------------------------------------
def _lstm_res_kernel(px_ref, ph_ref, c0_ref,
                     wx_ref, wh_ref, b_ref,
                     wci_ref, wcf_ref, wco_ref, mask_ref,
                     rw1_ref, rb1_ref, rw2_ref, rb2_ref,
                     hx_ref, c_ref, *, hidden_size):
    hs = hidden_size
    mb = px_ref.shape[0]                                   # sb * 49 rows (batch folded into M)

    # Fused gate pre-activation: conv_x(x_pad) + conv_h(h_pad) as two big dots into one f32 acc.
    pre = (jnp.dot(px_ref[...], wx_ref[...], preferred_element_type=jnp.float32)
           + jnp.dot(ph_ref[...], wh_ref[...], preferred_element_type=jnp.float32)
           + b_ref[...])                                   # (mb, 4*hs) f32, gate order [i, f, g, o]

    c0 = c0_ref[...]                                       # (mb, hs) f32
    i_g = jax.nn.sigmoid(pre[:, 0 * hs:1 * hs] + c0 * wci_ref[...])
    f_g = jax.nn.sigmoid(pre[:, 1 * hs:2 * hs] + c0 * wcf_ref[...])
    g_g = jnp.tanh(pre[:, 2 * hs:3 * hs])
    c_t = f_g * c0 + i_g * g_g
    o_g = jax.nn.sigmoid(pre[:, 3 * hs:4 * hs] + c_t * wco_ref[...])
    h_t = o_g * jnp.tanh(c_t)
    c_ref[...] = c_t                                       # cell state stays f32 (review #11)

    # ResnetBlock(hs, 2) on the raw output gate o (matches torch: lstm returns o, conv4 eats o):
    #   x4 = o + relu(conv3x3(relu(conv3x3(o)))), 3x3 / zero-pad-1 convs on the flat 7x7 grid.
    # Neighbour gather = static sublane shift (slice + zero-fill) * boundary mask, then one
    # (mb, hs) @ (hs, hs) MXU dot per tap (review #2: no selector matmuls).
    def _shift(v, off):                                    # row p of result = v[p + off] (0 outside)
        if off == 0:
            return v
        pad = jnp.zeros((abs(off), v.shape[1]), v.dtype)
        if off > 0:
            return jnp.concatenate([v[off:, :], pad], axis=0)
        return jnp.concatenate([pad, v[:off, :]], axis=0)

    def _conv3x3(inp_f32, w_ref, bias_ref):
        inp = inp_f32.astype(jnp.bfloat16)
        acc = jnp.zeros((mb, hs), jnp.float32)
        for k, (dy, dx) in enumerate(_OFFSETS):
            off = dy * 7 + dx
            tap = inp if off == 0 else _shift(inp, off) * mask_ref[k]
            acc = acc + jnp.dot(tap, w_ref[k], preferred_element_type=jnp.float32)
        return acc + bias_ref[...]

    r = jnp.maximum(_conv3x3(o_g, rw1_ref, rb1_ref), 0.0)
    r = jnp.maximum(_conv3x3(r, rw2_ref, rb2_ref), 0.0)
    x4 = o_g + r

    # Lane-dense packed write: [x4 | h_t] -> one 2*hs-wide bf16 slab (review #9 / #11).
    hx_ref[...] = jnp.concatenate([x4, h_t], axis=1).astype(hx_ref.dtype)


def lstm_resblock(p_x, p_h, c0, params, *, hidden_size, samples_per_block):
    hs = hidden_size
    sb = samples_per_block
    mtot = p_x.shape[0]
    mb = sb * 49
    ngroups = mtot // mb
    kx, kh = p_x.shape[1], p_h.shape[1]

    masks = _tap_masks(sb)                                  # constant, group-sized
    wci = jnp.tile(params["lstm_wc_i"], (sb, 1))            # (mb, hs) — group-sized, not batch-sized
    wcf = jnp.tile(params["lstm_wc_f"], (sb, 1))
    wco = jnp.tile(params["lstm_wc_o"], (sb, 1))

    data = lambda c: pl.BlockSpec((mb, c), lambda g: (g, 0))
    # TODO(synk): for hidden_size >= 512 on v7x (64 MiB VMEM), single-buffer the constant-index
    #             weight specs (pipeline_mode=pl.Buffered(1)) to halve their footprint.
    return pl.pallas_call(
        functools.partial(_lstm_res_kernel, hidden_size=hs),
        out_shape=(jax.ShapeDtypeStruct((mtot, 2 * hs), jnp.bfloat16),   # [x4 | h_t]
                   jax.ShapeDtypeStruct((mtot, hs), jnp.float32)),       # c_t
        grid=(ngroups,),
        in_specs=[data(kx), data(kh), data(hs),
                  _bcast_spec((kx, 4 * hs)), _bcast_spec((kh, 4 * hs)), _bcast_spec((1, 4 * hs)),
                  _bcast_spec((mb, hs)), _bcast_spec((mb, hs)), _bcast_spec((mb, hs)),
                  _bcast_spec((9, mb, 1)),
                  _bcast_spec((9, hs, hs)), _bcast_spec((1, hs)),
                  _bcast_spec((9, hs, hs)), _bcast_spec((1, hs))],
        out_specs=(data(2 * hs), data(hs)),
        compiler_params=PARALLEL,                           # group axis is parallel (v7x 2 TCs)
    )(p_x, p_h, c0,
      params["lstm_wx"], params["lstm_wh"], params["lstm_b"],
      wci, wcf, wco, masks,
      params["res1_w"], params["res1_b"], params["res2_w"], params["res2_b"])


# ----------------------------------------------------------------------------
# Pallas kernel: fc + head + softmax, M-tiled, lane-dense 128-wide output slab
# ----------------------------------------------------------------------------
def _fc_head_kernel(x_ref, fw_ref, fb_ref, hw_ref, hb_ref, o_ref, *, action_size):
    feat = jnp.dot(x_ref[...], fw_ref[...], preferred_element_type=jnp.float32) + fb_ref[...]
    feat = jnp.maximum(feat, 0.01 * feat)                   # leaky_relu (review #10)
    logits = (jnp.dot(feat.astype(jnp.bfloat16), hw_ref[...],
                      preferred_element_type=jnp.float32) + hb_ref[...])     # (M, 128) padded slab
    lane = lax.broadcasted_iota(jnp.int32, logits.shape, 1)
    is_act = lane < action_size
    masked = jnp.where(is_act, logits, -1e30)
    z = masked - jnp.max(masked, axis=1, keepdims=True)     # matches torch `x - max(x)`
    e = jnp.where(is_act, jnp.exp(z), 0.0)
    probs = e / jnp.sum(e, axis=1, keepdims=True)           # exact division (review correctness #2)
    value = jnp.where(lane == action_size, logits, 0.0)
    o_ref[...] = probs + value                              # [probs | value | zeros], one dense store


def fc_head(x4_flat, params, action_size):
    n, k = x4_flat.shape
    fdim = params["fc_w"].shape[1]
    cols = params["head_w"].shape[1]
    tm = n if n <= 256 else 256                             # M-tiling for large batch (review #8)
    return pl.pallas_call(
        functools.partial(_fc_head_kernel, action_size=action_size),
        out_shape=jax.ShapeDtypeStruct((n, cols), jnp.float32),
        grid=(pl.cdiv(n, tm),),
        in_specs=[pl.BlockSpec((tm, k), lambda i: (i, 0)),
                  _bcast_spec((k, fdim)), _bcast_spec((1, fdim)),
                  _bcast_spec((fdim, cols)), _bcast_spec((1, cols))],
        out_specs=pl.BlockSpec((tm, cols), lambda i: (i, 0)),
        compiler_params=pltpu.CompilerParams(
            dimension_semantics=("parallel",),
            vmem_limit_bytes=32 * 1024 * 1024),
    )(x4_flat, params["fc_w"], params["fc_b"], params["head_w"], params["head_b"])


# ----------------------------------------------------------------------------
# XLA glue: feature convs (lax.conv, review #3) and the small 3x3 patch build for the LSTM
# ----------------------------------------------------------------------------
def conv_lrelu(x, w, b, stride, pad):
    y = lax.conv_general_dilated(
        x, w, window_strides=(stride, stride), padding=[(pad, pad), (pad, pad)],
        dimension_numbers=("NHWC", "HWIO", "NHWC"),
        preferred_element_type=jnp.float32)
    y = y + b
    y = jnp.maximum(y, 0.01 * y)                            # leaky_relu
    return y.astype(jnp.bfloat16)


def _im2col_3x3(x):
    """x: (N, 9, 9, C) already padded -> (N*49, 9*C) patches, tap order (dy, dx) row-major."""
    # TODO(synk): fuse this reflect-pad 3x3 patch build into the LSTM kernel (review item #4) to
    #             drop the (N*49, 9*C) HBM round-trip.
    n, _, _, c = x.shape
    cols = [x[:, i:i + 7, j:j + 7, :] for i in range(3) for j in range(3)]
    p = jnp.stack(cols, axis=3)                             # (N, 7, 7, 9, C)
    return p.reshape(n * 49, 9 * c)


# ----------------------------------------------------------------------------
# Parameters (deterministic, PyTorch-like uniform fan-in scaling), matmul-ready layouts
# ----------------------------------------------------------------------------
def init_params(key, action_size, hidden_size, depth):
    keys = iter(jax.random.split(key, 32))
    hs = hidden_size
    bf = jnp.bfloat16

    def unif(shape, fan_in, dtype=jnp.float32):
        s = 1.0 / float(fan_in) ** 0.5
        return jax.random.uniform(next(keys), shape, jnp.float32, -s, s).astype(dtype)

    head_cols = max(128, ((action_size + 1 + 127) // 128) * 128)   # lane-padded head (review #9)
    head_w = unif((512, action_size + 1), 512, bf)
    head_b = unif((1, action_size + 1), 512)

    return {
        # feature convs (HWIO, bf16) for lax.conv_general_dilated
        "conv1_w": unif((8, 8, depth, 32), 8 * 8 * depth, bf), "conv1_b": unif((32,), 8 * 8 * depth),
        "conv2_w": unif((4, 4, 32, 64), 4 * 4 * 32, bf),       "conv2_b": unif((64,), 4 * 4 * 32),
        "conv3_w": unif((4, 4, 64, 64), 4 * 4 * 64, bf),       "conv3_b": unif((64,), 4 * 4 * 64),
        # ConvLSTM: the 8 gate convs fused into two matmuls, gate column order [i, f, g, o];
        # x-conv and h-conv biases pre-summed; rows ordered (tap, cin), tap = (dy+1)*3 + (dx+1).
        "lstm_wx": unif((9 * 64, 4 * hs), 9 * 64, bf),
        "lstm_wh": unif((9 * hs, 4 * hs), 9 * hs, bf),
        "lstm_b": unif((1, 4 * hs), 9 * 64) + unif((1, 4 * hs), 9 * hs),
        # Peephole weights (torch inits them to zeros; small random here to exercise the path),
        # stored (49, hs); tiled to the group size in the wrapper (never batch-broadcast in HBM).
        "lstm_wc_i": 0.1 * jax.random.normal(next(keys), (49, hs), jnp.float32),
        "lstm_wc_f": 0.1 * jax.random.normal(next(keys), (49, hs), jnp.float32),
        "lstm_wc_o": 0.1 * jax.random.normal(next(keys), (49, hs), jnp.float32),
        # ResnetBlock 3x3 convs as 9 per-tap (hs, hs) matmuls (tap order matches _OFFSETS).
        "res1_w": unif((9, hs, hs), 9 * hs, bf), "res1_b": unif((1, hs), 9 * hs),
        "res2_w": unif((9, hs, hs), 9 * hs, bf), "res2_b": unif((1, hs), 9 * hs),
        "fc_w": unif((49 * hs, 512), 49 * hs, bf), "fc_b": unif((1, 512), 49 * hs),
        "head_w": jnp.pad(head_w, ((0, 0), (0, head_cols - (action_size + 1)))),
        "head_b": jnp.pad(head_b, ((0, 0), (0, head_cols - (action_size + 1)))),
    }


# ----------------------------------------------------------------------------
# Forward pass (PPO_LSTM.forward)
# ----------------------------------------------------------------------------
def ppo_lstm_forward(params, x_nchw, hidden_nchw, *, action_size, hidden_size):
    n = x_nchw.shape[0]
    hs = hidden_size

    # feature conv stack (bf16 activations; deviation from the f32 torch reference is documented)
    x = jnp.transpose(x_nchw, (0, 2, 3, 1)).astype(jnp.bfloat16)          # NCHW -> NHWC
    x = conv_lrelu(x, params["conv1_w"], params["conv1_b"], 4, 4)         # (N,22,22,32)
    x = conv_lrelu(x, params["conv2_w"], params["conv2_b"], 2, 2)         # (N,12,12,64)
    x = conv_lrelu(x, params["conv3_w"], params["conv3_b"], 2, 2)         # (N, 7, 7,64)

    # ConvLSTM + ResnetBlock (one fused Pallas kernel, batch folded into M)
    h0 = jnp.transpose(hidden_nchw[:, 0], (0, 2, 3, 1))                   # (N,7,7,hs)
    c0 = jnp.transpose(hidden_nchw[:, 1], (0, 2, 3, 1))
    xin = jnp.pad(x, ((0, 0), (1, 1), (1, 1), (0, 0)), mode="reflect")    # ReflectionPad2d(1)
    hin = jnp.pad(h0.astype(jnp.bfloat16), ((0, 0), (1, 1), (1, 1), (0, 0)), mode="reflect")
    p_x = _im2col_3x3(xin)                                                # (N*49, 576) bf16
    p_h = _im2col_3x3(hin)                                                # (N*49, 9*hs) bf16
    sb = _samples_per_block(n)
    hx, c_t = lstm_resblock(p_x, p_h, c0.reshape(n * 49, hs), params,
                            hidden_size=hs, samples_per_block=sb)
    x4, h_t = hx[:, :hs], hx[:, hs:]                                      # bf16

    # fc + head + softmax / value (one fused, M-tiled Pallas kernel)
    # x4 flattened in (H, W, C) order (weights generated for this layout; permute if porting torch).
    out = fc_head(x4.reshape(n, 49 * hs), params, action_size)            # (N, 128) slab
    probs = out[:, :action_size]
    val = out[:, action_size]

    hidden_out = jnp.stack(
        [jnp.transpose(h_t.astype(jnp.float32).reshape(n, 7, 7, hs), (0, 3, 1, 2)),
         jnp.transpose(c_t.reshape(n, 7, 7, hs), (0, 3, 1, 2))], axis=1)  # (N,2,hs,7,7)
    return probs, val, hidden_out


# ----------------------------------------------------------------------------
# Pure-JAX (f32 / lax.conv) reference of the same module, for numerical cross-checking
# ----------------------------------------------------------------------------
def ppo_lstm_reference(params, x_nchw, hidden_nchw, *, action_size, hidden_size):
    hs = hidden_size
    n = x_nchw.shape[0]
    x = jnp.transpose(x_nchw, (0, 2, 3, 1)).astype(jnp.bfloat16)
    x = conv_lrelu(x, params["conv1_w"], params["conv1_b"], 4, 4)
    x = conv_lrelu(x, params["conv2_w"], params["conv2_b"], 2, 2)
    x = conv_lrelu(x, params["conv3_w"], params["conv3_b"], 2, 2).astype(jnp.float32)

    h0 = jnp.transpose(hidden_nchw[:, 0], (0, 2, 3, 1))
    c0 = jnp.transpose(hidden_nchw[:, 1], (0, 2, 3, 1))
    xin = jnp.pad(x, ((0, 0), (1, 1), (1, 1), (0, 0)), mode="reflect")
    hin = jnp.pad(h0, ((0, 0), (1, 1), (1, 1), (0, 0)), mode="reflect")

    conv = lambda a, w, p: lax.conv_general_dilated(
        a, w, (1, 1), p, dimension_numbers=("NHWC", "HWIO", "NHWC"))
    wx = params["lstm_wx"].astype(jnp.float32).reshape(3, 3, 64, 4 * hs)
    wh = params["lstm_wh"].astype(jnp.float32).reshape(3, 3, hs, 4 * hs)
    pre = conv(xin, wx, "VALID") + conv(hin, wh, "VALID") + params["lstm_b"].reshape(1, 1, 1, 4 * hs)
    wci = params["lstm_wc_i"].reshape(7, 7, hs)
    wcf = params["lstm_wc_f"].reshape(7, 7, hs)
    wco = params["lstm_wc_o"].reshape(7, 7, hs)
    i = jax.nn.sigmoid(pre[..., :hs] + c0 * wci)
    f = jax.nn.sigmoid(pre[..., hs:2 * hs] + c0 * wcf)
    g = jnp.tanh(pre[..., 2 * hs:3 * hs])
    c_t = f * c0 + i * g
    o = jax.nn.sigmoid(pre[..., 3 * hs:] + c_t * wco)
    h_t = o * jnp.tanh(c_t)

    rconv = lambda a, w9: conv(a, w9.astype(jnp.float32).reshape(3, 3, hs, hs), [(1, 1), (1, 1)])
    r = jax.nn.relu(rconv(o, params["res1_w"]) + params["res1_b"].reshape(1, 1, 1, hs))
    r = jax.nn.relu(rconv(r, params["res2_w"]) + params["res2_b"].reshape(1, 1, 1, hs))
    x4 = o + r

    feat = x4.reshape(n, 49 * hs) @ params["fc_w"].astype(jnp.float32) + params["fc_b"]
    feat = jnp.maximum(feat, 0.01 * feat)
    logits = feat @ params["head_w"].astype(jnp.float32) + params["head_b"]
    a_l = logits[:, :action_size]
    probs = jax.nn.softmax(a_l - a_l.max(axis=1, keepdims=True), axis=-1)
    val = logits[:, action_size]
    hidden_out = jnp.stack([jnp.transpose(h_t, (0, 3, 1, 2)),
                            jnp.transpose(c_t, (0, 3, 1, 2))], axis=1)
    return probs, val, hidden_out


# ----------------------------------------------------------------------------
if __name__ == "__main__":
    action_size, hidden_size, depth = 4, 64, 1
    N = 2

    key = jax.random.PRNGKey(0)
    pkey, xkey, hkey = jax.random.split(key, 3)
    params = init_params(pkey, action_size, hidden_size, depth)

    x = jax.random.normal(xkey, (N, depth, 84, 84), jnp.float32)
    hidden = 0.1 * jax.random.normal(hkey, (N, 2, hidden_size, 7, 7), jnp.float32)

    fwd = jax.jit(functools.partial(ppo_lstm_forward,
                                    action_size=action_size, hidden_size=hidden_size))
    probs, val, hidden_out = fwd(params, x, hidden)
    jax.block_until_ready((probs, val, hidden_out))

    assert probs.shape == (N, action_size)
    assert val.shape == (N,)
    assert hidden_out.shape == (N, 2, hidden_size, 7, 7)
    assert bool(jnp.all(jnp.isfinite(probs))) and bool(jnp.all(jnp.isfinite(val)))
    assert bool(jnp.all(jnp.isfinite(hidden_out)))
    assert bool(jnp.all(probs >= 0.0))
    assert bool(jnp.allclose(jnp.sum(probs, axis=1), 1.0, atol=1e-4))

    # Cross-check against the pure-JAX / f32 reference (bf16 matmuls -> ~1e-2 worst-case abs diff).
    ref = jax.jit(functools.partial(ppo_lstm_reference,
                                    action_size=action_size, hidden_size=hidden_size))
    p_ref, v_ref, h_ref = ref(params, x, hidden)
    jax.block_until_ready((p_ref, v_ref, h_ref))
    assert bool(jnp.allclose(probs, p_ref, atol=3e-2))
    assert bool(jnp.allclose(val, v_ref, atol=3e-2))
    assert bool(jnp.allclose(hidden_out, h_ref, atol=3e-2))

    print("KERNEL_OK")
</pallas_src>

<mosaic_0001>
module attributes {stable_mosaic.version = 11 : i64} {
  func.func @_lstm_res_kernel(%arg0: i32, %arg1: memref<98x576xbf16, #tpu.memory_space<vmem>>, %arg2: memref<98x576xbf16, #tpu.memory_space<vmem>>, %arg3: memref<98x64xf32, #tpu.memory_space<vmem>>, %arg4: memref<576x256xbf16, #tpu.memory_space<vmem>>, %arg5: memref<576x256xbf16, #tpu.memory_space<vmem>>, %arg6: memref<1x256xf32, #tpu.memory_space<vmem>>, %arg7: memref<98x64xf32, #tpu.memory_space<vmem>>, %arg8: memref<98x64xf32, #tpu.memory_space<vmem>>, %arg9: memref<98x64xf32, #tpu.memory_space<vmem>>, %arg10: memref<9x98x1xbf16, #tpu.memory_space<vmem>>, %arg11: memref<9x64x64xbf16, #tpu.memory_space<vmem>>, %arg12: memref<1x64xf32, #tpu.memory_space<vmem>>, %arg13: memref<9x64x64xbf16, #tpu.memory_space<vmem>>, %arg14: memref<1x64xf32, #tpu.memory_space<vmem>>, %arg15: memref<98x128xbf16, #tpu.memory_space<vmem>>, %arg16: memref<98x64xf32, #tpu.memory_space<vmem>>) attributes {dimension_semantics = [#tpu.dimension_semantics<parallel>], iteration_bounds = array<i64: 1>, scalar_prefetch = 0 : i64, scratch_operands = 0 : i64, tpu.core_type = #tpu.core_type<tc>, window_params = [{transform_indices = @transform_0, window_bounds = array<i64: 98, 576>}, {transform_indices = @transform_1, window_bounds = array<i64: 98, 576>}, {transform_indices = @transform_2, window_bounds = array<i64: 98, 64>}, {pipeline_mode = #tpu.pipeline_mode<synchronous>, transform_indices = @transform_3, window_bounds = array<i64: 576, 256>}, {pipeline_mode = #tpu.pipeline_mode<synchronous>, transform_indices = @transform_4, window_bounds = array<i64: 576, 256>}, {pipeline_mode = #tpu.pipeline_mode<synchronous>, transform_indices = @transform_5, window_bounds = array<i64: 1, 256>}, {pipeline_mode = #tpu.pipeline_mode<synchronous>, transform_indices = @transform_6, window_bounds = array<i64: 98, 64>}, {pipeline_mode = #tpu.pipeline_mode<synchronous>, transform_indices = @transform_7, window_bounds = array<i64: 98, 64>}, {pipeline_mode = #tpu.pipeline_mode<synchronous>, transform_indices = @transform_8, window_bounds = array<i64: 98, 64>}, {pipeline_mode = #tpu.pipeline_mode<synchronous>, transform_indices = @transform_9, window_bounds = array<i64: 9, 98, 1>}, {pipeline_mode = #tpu.pipeline_mode<synchronous>, transform_indices = @transform_10, window_bounds = array<i64: 9, 64, 64>}, {pipeline_mode = #tpu.pipeline_mode<synchronous>, transform_indices = @transform_11, window_bounds = array<i64: 1, 64>}, {pipeline_mode = #tpu.pipeline_mode<synchronous>, transform_indices = @transform_12, window_bounds = array<i64: 9, 64, 64>}, {pipeline_mode = #tpu.pipeline_mode<synchronous>, transform_indices = @transform_13, window_bounds = array<i64: 1, 64>}, {transform_indices = @transform_14, window_bounds = array<i64: 98, 128>}, {transform_indices = @transform_15, window_bounds = array<i64: 98, 64>}]} {
    %c0 = arith.constant 0 : index
    %c0_0 = arith.constant 0 : index
    %0 = vector.load %arg1[%c0, %c0_0] : memref<98x576xbf16, #tpu.memory_space<vmem>>, vector<98x576xbf16>
    %c0_1 = arith.constant 0 : index
    %c0_2 = arith.constant 0 : index
    %1 = vector.load %arg4[%c0_1, %c0_2] : memref<576x256xbf16, #tpu.memory_space<vmem>>, vector<576x256xbf16>
    %cst = arith.constant dense<0.000000e+00> : vector<98x256xf32>
    %2 = tpu.matmul %0, %1, %cst {dimension_numbers = #tpu.dot_dimension_numbers<[1], [0], [0], [1], [0, 0, 1, 1], [], []>} : vector<98x576xbf16>, vector<576x256xbf16>, vector<98x256xf32> -> vector<98x256xf32>
    %c0_3 = arith.constant 0 : index
    %c0_4 = arith.constant 0 : index
    %3 = vector.load %arg2[%c0_3, %c0_4] : memref<98x576xbf16, #tpu.memory_space<vmem>>, vector<98x576xbf16>
    %c0_5 = arith.constant 0 : index
    %c0_6 = arith.constant 0 : index
    %4 = vector.load %arg5[%c0_5, %c0_6] : memref<576x256xbf16, #tpu.memory_space<vmem>>, vector<576x256xbf16>
    %cst_7 = arith.constant dense<0.000000e+00> : vector<98x256xf32>
    %5 = tpu.matmul %3, %4, %cst_7 {dimension_numbers = #tpu.dot_dimension_numbers<[1], [0], [0], [1], [0, 0, 1, 1], [], []>} : vector<98x576xbf16>, vector<576x256xbf16>, vector<98x256xf32> -> vector<98x256xf32>
    %6 = arith.addf %2, %5 : vector<98x256xf32>
    %c0_8 = arith.constant 0 : index
    %c0_9 = arith.constant 0 : index
    %7 = vector.load %arg6[%c0_8, %c0_9] : memref<1x256xf32, #tpu.memory_space<vmem>>, vector<1x256xf32>
    %8 = vector.broadcast %7 : vector<1x256xf32> to vector<98x256xf32>
    %9 = arith.addf %6, %8 : vector<98x256xf32>
    %c0_10 = arith.constant 0 : index
    %c0_11 = arith.constant 0 : index
    %10 = vector.load %arg3[%c0_10, %c0_11] : memref<98x64xf32, #tpu.memory_space<vmem>>, vector<98x64xf32>
    %11 = vector.extract_strided_slice %9 {offsets = [0, 0], sizes = [98, 64], strides = [1, 1]} : vector<98x256xf32> to vector<98x64xf32>
    %c0_12 = arith.constant 0 : index
    %c0_13 = arith.constant 0 : index
    %12 = vector.load %arg7[%c0_12, %c0_13] : memref<98x64xf32, #tpu.memory_space<vmem>>, vector<98x64xf32>
    %13 = arith.mulf %10, %12 : vector<98x64xf32>
    %14 = arith.addf %11, %13 : vector<98x64xf32>
    %15 = arith.negf %14 : vector<98x64xf32>
    %16 = math.exp %15 : vector<98x64xf32>
    %cst_14 = arith.constant 1.000000e+00 : f32
    %17 = vector.broadcast %cst_14 : f32 to vector<98x64xf32>
    %18 = arith.addf %17, %16 : vector<98x64xf32>
    %19 = arith.divf %17, %18 : vector<98x64xf32>
    %20 = vector.extract_strided_slice %9 {offsets = [0, 64], sizes = [98, 64], strides = [1, 1]} : vector<98x256xf32> to vector<98x64xf32>
    %c0_15 = arith.constant 0 : index
    %c0_16 = arith.constant 0 : index
    %21 = vector.load %arg8[%c0_15, %c0_16] : memref<98x64xf32, #tpu.memory_space<vmem>>, vector<98x64xf32>
    %22 = arith.mulf %10, %21 : vector<98x64xf32>
    %23 = arith.addf %20, %22 : vector<98x64xf32>
    %24 = arith.negf %23 : vector<98x64xf32>
    %25 = math.exp %24 : vector<98x64xf32>
    %cst_17 = arith.constant 1.000000e+00 : f32
    %26 = vector.broadcast %cst_17 : f32 to vector<98x64xf32>
    %27 = arith.addf %26, %25 : vector<98x64xf32>
    %28 = arith.divf %26, %27 : vector<98x64xf32>
    %29 = vector.extract_strided_slice %9 {offsets = [0, 128], sizes = [98, 64], strides = [1, 1]} : vector<98x256xf32> to vector<98x64xf32>
    %30 = math.tanh %29 : vector<98x64xf32>
    %31 = arith.mulf %28, %10 : vector<98x64xf32>
    %32 = arith.mulf %19, %30 : vector<98x64xf32>
    %33 = arith.addf %31, %32 : vector<98x64xf32>
    %34 = vector.extract_strided_slice %9 {offsets = [0, 192], sizes = [98, 64], strides = [1, 1]} : vector<98x256xf32> to vector<98x64xf32>
    %c0_18 = arith.constant 0 : index
    %c0_19 = arith.constant 0 : index
    %35 = vector.load %arg9[%c0_18, %c0_19] : memref<98x64xf32, #tpu.memory_space<vmem>>, vector<98x64xf32>
    %36 = arith.mulf %33, %35 : vector<98x64xf32>
    %37 = arith.addf %34, %36 : vector<98x64xf32>
    %38 = arith.negf %37 : vector<98x64xf32>
    %39 = math.exp %38 : vector<98x64xf32>
    %cst_20 = arith.constant 1.000000e+00 : f32
    %40 = vector.broadcast %cst_20 : f32 to vector<98x64xf32>
    %41 = arith.addf %40, %39 : vector<98x64xf32>
    %42 = arith.divf %40, %41 : vector<98x64xf32>
    %43 = math.tanh %33 : vector<98x64xf32>
    %44 = arith.mulf %42, %43 : vector<98x64xf32>
    %c0_21 = arith.constant 0 : index
    %c0_22 = arith.constant 0 : index
    %45 = vector.load %arg16[%c0_21, %c0_22] : memref<98x64xf32, #tpu.memory_space<vmem>>, vector<98x64xf32>
    tpu.vector_store %arg16[%c0_21, %c0_22], %33 {strides = array<i32>} : memref<98x64xf32, #tpu.memory_space<vmem>>, vector<98x64xf32>,
    %46 = arith.truncf %42 : vector<98x64xf32> to vector<98x64xbf16>
    %cst_23 = arith.constant 0.000000e+00 : f32
    %47 = vector.broadcast %cst_23 : f32 to vector<98x64xf32>
    %cst_24 = arith.constant 0.000000e+00 : bf16
    %48 = vector.broadcast %cst_24 : bf16 to vector<8x64xbf16>
    %49 = vector.extract_strided_slice %46 {offsets = [0, 0], sizes = [90, 64], strides = [1, 1]} : vector<98x64xbf16> to vector<90x64xbf16>
    %50 = tpu.concatenate %48, %49 in 0 : vector<8x64xbf16>, vector<90x64xbf16> -> vector<98x64xbf16>
    %c0_25 = arith.constant 0 : index
    %c0_26 = arith.constant 0 : index
    %c0_27 = arith.constant 0 : index
    %51 = vector.load %arg10[%c0_25, %c0_26, %c0_27] : memref<9x98x1xbf16, #tpu.memory_space<vmem>>, vector<1x98x1xbf16>
    %52 = vector.shape_cast %51 : vector<1x98x1xbf16> to vector<98x1xbf16>
    %53 = vector.broadcast %52 : vector<98x1xbf16> to vector<98x64xbf16>
    %54 = arith.mulf %50, %53 : vector<98x64xbf16>
    %c0_28 = arith.constant 0 : index
    %c0_29 = arith.constant 0 : index
    %c0_30 = arith.constant 0 : index
    %55 = vector.load %arg11[%c0_28, %c0_29, %c0_30] : memref<9x64x64xbf16, #tpu.memory_space<vmem>>, vector<1x64x64xbf16>
    %56 = vector.shape_cast %55 : vector<1x64x64xbf16> to vector<64x64xbf16>
    %cst_31 = arith.constant dense<0.000000e+00> : vector<98x64xf32>
    %57 = tpu.matmul %54, %56, %cst_31 {dimension_numbers = #tpu.dot_dimension_numbers<[1], [0], [0], [1], [0, 0, 1, 1], [], []>} : vector<98x64xbf16>, vector<64x64xbf16>, vector<98x64xf32> -> vector<98x64xf32>
    %58 = arith.addf %47, %57 : vector<98x64xf32>
    %cst_32 = arith.constant 0.000000e+00 : bf16
    %59 = vector.broadcast %cst_32 : bf16 to vector<7x64xbf16>
    %60 = vector.extract_strided_slice %46 {offsets = [0, 0], sizes = [91, 64], strides = [1, 1]} : vector<98x64xbf16> to vector<91x64xbf16>
    %61 = tpu.concatenate %59, %60 in 0 : vector<7x64xbf16>, vector<91x64xbf16> -> vector<98x64xbf16>
    %c1 = arith.constant 1 : index
    %c0_33 = arith.constant 0 : index
    %c0_34 = arith.constant 0 : index
    %62 = vector.load %arg10[%c1, %c0_33, %c0_34] : memref<9x98x1xbf16, #tpu.memory_space<vmem>>, vector<1x98x1xbf16>
    %63 = vector.shape_cast %62 : vector<1x98x1xbf16> to vector<98x1xbf16>
    %64 = vector.broadcast %63 : vector<98x1xbf16> to vector<98x64xbf16>
    %65 = arith.mulf %61, %64 : vector<98x64xbf16>
    %c1_35 = arith.constant 1 : index
    %c0_36 = arith.constant 0 : index
    %c0_37 = arith.constant 0 : index
    %66 = vector.load %arg11[%c1_35, %c0_36, %c0_37] : memref<9x64x64xbf16, #tpu.memory_space<vmem>>, vector<1x64x64xbf16>
    %67 = vector.shape_cast %66 : vector<1x64x64xbf16> to vector<64x64xbf16>
    %cst_38 = arith.constant dense<0.000000e+00> : vector<98x64xf32>
    %68 = tpu.matmul %65, %67, %cst_38 {dimension_numbers = #tpu.dot_dimension_numbers<[1], [0], [0], [1], [0, 0, 1, 1], [], []>} : vector<98x64xbf16>, vector<64x64xbf16>, vector<98x64xf32> -> vector<98x64xf32>
    %69 = arith.addf %58, %68 : vector<98x64xf32>
    %cst_39 = arith.constant 0.000000e+00 : bf16
    %70 = vector.broadcast %cst_39 : bf16 to vector<6x64xbf16>
    %71 = vector.extract_strided_slice %46 {offsets = [0, 0], sizes = [92, 64], strides = [1, 1]} : vector<98x64xbf16> to vector<92x64xbf16>
    %72 = tpu.concatenate %70, %71 in 0 : vector<6x64xbf16>, vector<92x64xbf16> -> vector<98x64xbf16>
    %c2 = arith.constant 2 : index
    %c0_40 = arith.constant 0 : index
    %c0_41 = arith.constant 0 : index
    %73 = vector.load %arg10[%c2, %c0_40, %c0_41] : memref<9x98x1xbf16, #tpu.memory_space<vmem>>, vector<1x98x1xbf16>
    %74 = vector.shape_cast %73 : vector<1x98x1xbf16> to vector<98x1xbf16>
    %75 = vector.broadcast %74 : vector<98x1xbf16> to vector<98x64xbf16>
    %76 = arith.mulf %72, %75 : vector<98x64xbf16>
    %c2_42 = arith.constant 2 : index
    %c0_43 = arith.constant 0 : index
    %c0_44 = arith.constant 0 : index
    %77 = vector.load %arg11[%c2_42, %c0_43, %c0_44] : memref<9x64x64xbf16, #tpu.memory_space<vmem>>, vector<1x64x64xbf16>
    %78 = vector.shape_cast %77 : vector<1x64x64xbf16> to vector<64x64xbf16>
    %cst_45 = arith.constant dense<0.000000e+00> : vector<98x64xf32>
    %79 = tpu.matmul %76, %78, %cst_45 {dimension_numbers = #tpu.dot_dimension_numbers<[1], [0], [0], [1], [0, 0, 1, 1], [], []>} : vector<98x64xbf16>, vector<64x64xbf16>, vector<98x64xf32> -> vector<98x64xf32>
    %80 = arith.addf %69, %79 : vector<98x64xf32>
    %cst_46 = arith.constant 0.000000e+00 : bf16
    %81 = vector.broadcast %cst_46 : bf16 to vector<1x64xbf16>
    %82 = vector.extract_strided_slice %46 {offsets = [0, 0], sizes = [97, 64], strides = [1, 1]} : vector<98x64xbf16> to vector<97x64xbf16>
    %83 = tpu.concatenate %81, %82 in 0 : vector<1x64xbf16>, vector<97x64xbf16> -> vector<98x64xbf16>
    %c3 = arith.constant 3 : index
    %c0_47 = arith.constant 0 : index
    %c0_48 = arith.constant 0 : index
    %84 = vector.load %arg10[%c3, %c0_47, %c0_48] : memref<9x98x1xbf16, #tpu.memory_space<vmem>>, vector<1x98x1xbf16>
    %85 = vector.shape_cast %84 : vector<1x98x1xbf16> to vector<98x1xbf16>
    %86 = vector.broadcast %85 : vector<98x1xbf16> to vector<98x64xbf16>
    %87 = arith.mulf %83, %86 : vector<98x64xbf16>
    %c3_49 = arith.constant 3 : index
    %c0_50 = arith.constant 0 : index
    %c0_51 = arith.constant 0 : index
    %88 = vector.load %arg11[%c3_49, %c0_50, %c0_51] : memref<9x64x64xbf16, #tpu.memory_space<vmem>>, vector<1x64x64xbf16>
    %89 = vector.shape_cast %88 : vector<1x64x64xbf16> to vector<64x64xbf16>
    %cst_52 = arith.constant dense<0.000000e+00> : vector<98x64xf32>
    %90 = tpu.matmul %87, %89, %cst_52 {dimension_numbers = #tpu.dot_dimension_numbers<[1], [0], [0], [1], [0, 0, 1, 1], [], []>} : vector<98x64xbf16>, vector<64x64xbf16>, vector<98x64xf32> -> vector<98x64xf32>
    %91 = arith.addf %80, %90 : vector<98x64xf32>
    %c4 = arith.constant 4 : index
    %c0_53 = arith.constant 0 : index
    %c0_54 = arith.constant 0 : index
    %92 = vector.load %arg11[%c4, %c0_53, %c0_54] : memref<9x64x64xbf16, #tpu.memory_space<vmem>>, vector<1x64x64xbf16>
    %93 = vector.shape_cast %92 : vector<1x64x64xbf16> to vector<64x64xbf16>
    %cst_55 = arith.constant dense<0.000000e+00> : vector<98x64xf32>
    %94 = tpu.matmul %46, %93, %cst_55 {dimension_numbers = #tpu.dot_dimension_numbers<[1], [0], [0], [1], [0, 0, 1, 1], [], []>} : vector<98x64xbf16>, vector<64x64xbf16>, vector<98x64xf32> -> vector<98x64xf32>
    %95 = arith.addf %91, %94 : vector<98x64xf32>
    %cst_56 = arith.constant 0.000000e+00 : bf16
    %96 = vector.broadcast %cst_56 : bf16 to vector<1x64xbf16>
    %97 = vector.extract_strided_slice %46 {offsets = [1, 0], sizes = [97, 64], strides = [1, 1]} : vector<98x64xbf16> to vector<97x64xbf16>
    %98 = tpu.concatenate %97, %96 in 0 : vector<97x64xbf16>, vector<1x64xbf16> -> vector<98x64xbf16>
    %c5 = arith.constant 5 : index
    %c0_57 = arith.constant 0 : index
    %c0_58 = arith.constant 0 : index
    %99 = vector.load %arg10[%c5, %c0_57, %c0_58] : memref<9x98x1xbf16, #tpu.memory_space<vmem>>, vector<1x98x1xbf16>
    %100 = vector.shape_cast %99 : vector<1x98x1xbf16> to vector<98x1xbf16>
    %101 = vector.broadcast %100 : vector<98x1xbf16> to vector<98x64xbf16>
    %102 = arith.mulf %98, %101 : vector<98x64xbf16>
    %c5_59 = arith.constant 5 : index
    %c0_60 = arith.constant 0 : index
    %c0_61 = arith.constant 0 : index
    %103 = vector.load %arg11[%c5_59, %c0_60, %c0_61] : memref<9x64x64xbf16, #tpu.memory_space<vmem>>, vector<1x64x64xbf16>
    %104 = vector.shape_cast %103 : vector<1x64x64xbf16> to vector<64x64xbf16>
    %cst_62 = arith.constant dense<0.000000e+00> : vector<98x64xf32>
    %105 = tpu.matmul %102, %104, %cst_62 {dimension_numbers = #tpu.dot_dimension_numbers<[1], [0], [0], [1], [0, 0, 1, 1], [], []>} : vector<98x64xbf16>, vector<64x64xbf16>, vector<98x64xf32> -> vector<98x64xf32>
    %106 = arith.addf %95, %105 : vector<98x64xf32>
    %cst_63 = arith.constant 0.000000e+00 : bf16
    %107 = vector.broadcast %cst_63 : bf16 to vector<6x64xbf16>
    %108 = vector.extract_strided_slice %46 {offsets = [6, 0], sizes = [92, 64], strides = [1, 1]} : vector<98x64xbf16> to vector<92x64xbf16>
    %109 = tpu.concatenate %108, %107 in 0 : vector<92x64xbf16>, vector<6x64xbf16> -> vector<98x64xbf16>
    %c6 = arith.constant 6 : index
    %c0_64 = arith.constant 0 : index
    %c0_65 = arith.constant 0 : index
    %110 = vector.load %arg10[%c6, %c0_64, %c0_65] : memref<9x98x1xbf16, #tpu.memory_space<vmem>>, vector<1x98x1xbf16>
    %111 = vector.shape_cast %110 : vector<1x98x1xbf16> to vector<98x1xbf16>
    %112 = vector.broadcast %111 : vector<98x1xbf16> to vector<98x64xbf16>
    %113 = arith.mulf %109, %112 : vector<98x64xbf16>
    %c6_66 = arith.constant 6 : index
    %c0_67 = arith.constant 0 : index
    %c0_68 = arith.constant 0 : index
    %114 = vector.load %arg11[%c6_66, %c0_67, %c0_68] : memref<9x64x64xbf16, #tpu.memory_space<vmem>>, vector<1x64x64xbf16>
    %115 = vector.shape_cast %114 : vector<1x64x64xbf16> to vector<64x64xbf16>
    %cst_69 = arith.constant dense<0.000000e+00> : vector<98x64xf32>
    %116 = tpu.matmul %113, %115, %cst_69 {dimension_numbers = #tpu.dot_dimension_numbers<[1], [0], [0], [1], [0, 0, 1, 1], [], []>} : vector<98x64xbf16>, vector<64x64xbf16>, vector<98x64xf32> -> vector<98x64xf32>
    %117 = arith.addf %106, %116 : vector<98x64xf32>
    %cst_70 = arith.constant 0.000000e+00 : bf16
    %118 = vector.broadcast %cst_70 : bf16 to vector<7x64xbf16>
    %119 = vector.extract_strided_slice %46 {offsets = [7, 0], sizes = [91, 64], strides = [1, 1]} : vector<98x64xbf16> to vector<91x64xbf16>
    %120 = tpu.concatenate %119, %118 in 0 : vector<91x64xbf16>, vector<7x64xbf16> -> vector<98x64xbf16>
    %c7 = arith.constant 7 : index
    %c0_71 = arith.constant 0 : index
    %c0_72 = arith.constant 0 : index
    %121 = vector.load %arg10[%c7, %c0_71, %c0_72] : memref<9x98x1xbf16, #tpu.memory_space<vmem>>, vector<1x98x1xbf16>
    %122 = vector.shape_cast %121 : vector<1x98x1xbf16> to vector<98x1xbf16>
    %123 = vector.broadcast %122 : vector<98x1xbf16> to vector<98x64xbf16>
    %124 = arith.mulf %120, %123 : vector<98x64xbf16>
    %c7_73 = arith.constant 7 : index
    %c0_74 = arith.constant 0 : index
    %c0_75 = arith.constant 0 : index
    %125 = vector.load %arg11[%c7_73, %c0_74, %c0_75] : memref<9x64x64xbf16, #tpu.memory_space<vmem>>, vector<1x64x64xbf16>
    %126 = vector.shape_cast %125 : vector<1x64x64xbf16> to vector<64x64xbf16>
    %cst_76 = arith.constant dense<0.000000e+00> : vector<98x64xf32>
    %127 = tpu.matmul %124, %126, %cst_76 {dimension_numbers = #tpu.dot_dimension_numbers<[1], [0], [0], [1], [0, 0, 1, 1], [], []>} : vector<98x64xbf16>, vector<64x64xbf16>, vector<98x64xf32> -> vector<98x64xf32>
    %128 = arith.addf %117, %127 : vector<98x64xf32>
    %cst_77 = arith.constant 0.000000e+00 : bf16
    %129 = vector.broadcast %cst_77 : bf16 to vector<8x64xbf16>
    %130 = vector.extract_strided_slice %46 {offsets = [8, 0], sizes = [90, 64], strides = [1, 1]} : vector<98x64xbf16> to vector<90x64xbf16>
    %131 = tpu.concatenate %130, %129 in 0 : vector<90x64xbf16>, vector<8x64xbf16> -> vector<98x64xbf16>
    %c8 = arith.constant 8 : index
    %c0_78 = arith.constant 0 : index
    %c0_79 = arith.constant 0 : index
    %132 = vector.load %arg10[%c8, %c0_78, %c0_79] : memref<9x98x1xbf16, #tpu.memory_space<vmem>>, vector<1x98x1xbf16>
    %133 = vector.shape_cast %132 : vector<1x98x1xbf16> to vector<98x1xbf16>
    %134 = vector.broadcast %133 : vector<98x1xbf16> to vector<98x64xbf16>
    %135 = arith.mulf %131, %134 : vector<98x64xbf16>
    %c8_80 = arith.constant 8 : index
    %c0_81 = arith.constant 0 : index
    %c0_82 = arith.constant 0 : index
    %136 = vector.load %arg11[%c8_80, %c0_81, %c0_82] : memref<9x64x64xbf16, #tpu.memory_space<vmem>>, vector<1x64x64xbf16>
    %137 = vector.shape_cast %136 : vector<1x64x64xbf16> to vector<64x64xbf16>
    %cst_83 = arith.constant dense<0.000000e+00> : vector<98x64xf32>
    %138 = tpu.matmul %135, %137, %cst_83 {dimension_numbers = #tpu.dot_dimension_numbers<[1], [0], [0], [1], [0, 0, 1, 1], [], []>} : vector<98x64xbf16>, vector<64x64xbf16>, vector<98x64xf32> -> vector<98x64xf32>
    %139 = arith.addf %128, %138 : vector<98x64xf32>
    %c0_84 = arith.constant 0 : index
    %c0_85 = arith.constant 0 : index
    %140 = vector.load %arg12[%c0_84, %c0_85] : memref<1x64xf32, #tpu.memory_space<vmem>>, vector<1x64xf32>
    %141 = vector.broadcast %140 : vector<1x64xf32> to vector<98x64xf32>
    %142 = arith.addf %139, %141 : vector<98x64xf32>
    %cst_86 = arith.constant 0.000000e+00 : f32
    %143 = vector.broadcast %cst_86 : f32 to vector<98x64xf32>
    %144 = arith.maximumf %142, %143 : vector<98x64xf32>
    %145 = arith.truncf %144 : vector<98x64xf32> to vector<98x64xbf16>
    %cst_87 = arith.constant 0.000000e+00 : f32
    %146 = vector.broadcast %cst_87 : f32 to vector<98x64xf32>
    %cst_88 = arith.constant 0.000000e+00 : bf16
    %147 = vector.broadcast %cst_88 : bf16 to vector<8x64xbf16>
    %148 = vector.extract_strided_slice %145 {offsets = [0, 0], sizes = [90, 64], strides = [1, 1]} : vector<98x64xbf16> to vector<90x64xbf16>
    %149 = tpu.concatenate %147, %148 in 0 : vector<8x64xbf16>, vector<90x64xbf16> -> vector<98x64xbf16>
    %c0_89 = arith.constant 0 : index
    %c0_90 = arith.constant 0 : index
    %c0_91 = arith.constant 0 : index
    %150 = vector.load %arg10[%c0_89, %c0_90, %c0_91] : memref<9x98x1xbf16, #tpu.memory_space<vmem>>, vector<1x98x1xbf16>
    %151 = vector.shape_cast %150 : vector<1x98x1xbf16> to vector<98x1xbf16>
    %152 = vector.broadcast %151 : vector<98x1xbf16> to vector<98x64xbf16>
    %153 = arith.mulf %149, %152 : vector<98x64xbf16>
    %c0_92 = arith.constant 0 : index
    %c0_93 = arith.constant 0 : index
    %c0_94 = arith.constant 0 : index
    %154 = vector.load %arg13[%c0_92, %c0_93, %c0_94] : memref<9x64x64xbf16, #tpu.memory_space<vmem>>, vector<1x64x64xbf16>
    %155 = vector.shape_cast %154 : vector<1x64x64xbf16> to vector<64x64xbf16>
    %cst_95 = arith.constant dense<0.000000e+00> : vector<98x64xf32>
    %156 = tpu.matmul %153, %155, %cst_95 {dimension_numbers = #tpu.dot_dimension_numbers<[1], [0], [0], [1], [0, 0, 1, 1], [], []>} : vector<98x64xbf16>, vector<64x64xbf16>, vector<98x64xf32> -> vector<98x64xf32>
    %157 = arith.addf %146, %156 : vector<98x64xf32>
    %cst_96 = arith.constant 0.000000e+00 : bf16
    %158 = vector.broadcast %cst_96 : bf16 to vector<7x64xbf16>
    %159 = vector.extract_strided_slice %145 {offsets = [0, 0], sizes = [91, 64], strides = [1, 1]} : vector<98x64xbf16> to vector<91x64xbf16>
    %160 = tpu.concatenate %158, %159 in 0 : vector<7x64xbf16>, vector<91x64xbf16> -> vector<98x64xbf16>
    %c1_97 = arith.constant 1 : index
    %c0_98 = arith.constant 0 : index
    %c0_99 = arith.constant 0 : index
    %161 = vector.load %arg10[%c1_97, %c0_98, %c0_99] : memref<9x98x1xbf16, #tpu.memory_space<vmem>>, vector<1x98x1xbf16>
    %162 = vector.shape_cast %161 : vector<1x98x1xbf16> to vector<98x1xbf16>
    %163 = vector.broadcast %162 : vector<98x1xbf16> to vector<98x64xbf16>
    %164 = arith.mulf %160, %163 : vector<98x64xbf16>
    %c1_100 = arith.constant 1 : index
    %c0_101 = arith.constant 0 : index
    %c0_102 = arith.constant 0 : index
    %165 = vector.load %arg13[%c1_100, %c0_101, %c0_102] : memref<9x64x64xbf16, #tpu.memory_space<vmem>>, vector<1x64x64xbf16>
    %166 = vector.shape_cast %165 : vector<1x64x64xbf16> to vector<64x64xbf16>
    %cst_103 = arith.constant dense<0.000000e+00> : vector<98x64xf32>
    %167 = tpu.matmul %164, %166, %cst_103 {dimension_numbers = #tpu.dot_dimension_numbers<[1], [0], [0], [1], [0, 0, 1, 1], [], []>} : vector<98x64xbf16>, vector<64x64xbf16>, vector<98x64xf32> -> vector<98x64xf32>
    %168 = arith.addf %157, %167 : vector<98x64xf32>
    %cst_104 = arith.constant 0.000000e+00 : bf16
    %169 = vector.broadcast %cst_104 : bf16 to vector<6x64xbf16>
    %170 = vector.extract_strided_slice %145 {offsets = [0, 0], sizes = [92, 64], strides = [1, 1]} : vector<98x64xbf16> to vector<92x64xbf16>
    %171 = tpu.concatenate %169, %170 in 0 : vector<6x64xbf16>, vector<92x64xbf16> -> vector<98x64xbf16>
    %c2_105 = arith.constant 2 : index
    %c0_106 = arith.constant 0 : index
    %c0_107 = arith.constant 0 : index
    %172 = vector.load %arg10[%c2_105, %c0_106, %c0_107] : memref<9x98x1xbf16, #tpu.memory_space<vmem>>, vector<1x98x1xbf16>
    %173 = vector.shape_cast %172 : vector<1x98x1xbf16> to vector<98x1xbf16>
    %174 = vector.broadcast %173 : vector<98x1xbf16> to vector<98x64xbf16>
    %175 = arith.mulf %171, %174 : vector<98x64xbf16>
    %c2_108 = arith.constant 2 : index
    %c0_109 = arith.constant 0 : index
    %c0_110 = arith.constant 0 : index
    %176 = vector.load %arg13[%c2_108, %c0_109, %c0_110] : memref<9x64x64xbf16, #tpu.memory_space<vmem>>, vector<1x64x64xbf16>
    %177 = vector.shape_cast %176 : vector<1x64x64xbf16> to vector<64x64xbf16>
    %cst_111 = arith.constant dense<0.000000e+00> : vector<98x64xf32>
    %178 = tpu.matmul %175, %177, %cst_111 {dimension_numbers = #tpu.dot_dimension_numbers<[1], [0], [0], [1], [0, 0, 1, 1], [], []>} : vector<98x64xbf16>, vector<64x64xbf16>, vector<98x64xf32> -> vector<98x64xf32>
    %179 = arith.addf %168, %178 : vector<98x64xf32>
    %cst_112 = arith.constant 0.000000e+00 : bf16
    %180 = vector.broadcast %cst_112 : bf16 to vector<1x64xbf16>
    %181 = vector.extract_strided_slice %145 {offsets = [0, 0], sizes = [97, 64], strides = [1, 1]} : vector<98x64xbf16> to vector<97x64xbf16>
    %182 = tpu.concatenate %180, %181 in 0 : vector<1x64xbf16>, vector<97x64xbf16> -> vector<98x64xbf16>
    %c3_113 = arith.constant 3 : index
    %c0_114 = arith.constant 0 : index
    %c0_115 = arith.constant 0 : index
    %183 = vector.load %arg10[%c3_113, %c0_114, %c0_115] : memref<9x98x1xbf16, #tpu.memory_space<vmem>>, vector<1x98x1xbf16>
    %184 = vector.shape_cast %183 : vector<1x98x1xbf16> to vector<98x1xbf16>
    %185 = vector.broadcast %184 : vector<98x1xbf16> to vector<98x64xbf16>
    %186 = arith.mulf %182, %185 : vector<98x64xbf16>
    %c3_116 = arith.constant 3 : index
    %c0_117 = arith.constant 0 : index
    %c0_118 = arith.constant 0 : index
    %187 = vector.load %arg13[%c3_116, %c0_117, %c0_118] : memref<9x64x64xbf16, #tpu.memory_space<vmem>>, vector<1x64x64xbf16>
    %188 = vector.shape_cast %187 : vector<1x64x64xbf16> to vector<64x64xbf16>
    %cst_119 = arith.constant dense<0.000000e+00> : vector<98x64xf32>
    %189 = tpu.matmul %186, %188, %cst_119 {dimension_numbers = #tpu.dot_dimension_numbers<[1], [0], [0], [1], [0, 0, 1, 1], [], []>} : vector<98x64xbf16>, vector<64x64xbf16>, vector<98x64xf32> -> vector<98x64xf32>
    %190 = arith.addf %179, %189 : vector<98x64xf32>
    %c4_120 = arith.constant 4 : index
    %c0_121 = arith.constant 0 : index
    %c0_122 = arith.constant 0 : index
    %191 = vector.load %arg13[%c4_120, %c0_121, %c0_122] : memref<9x64x64xbf16, #tpu.memory_space<vmem>>, vector<1x64x64xbf16>
    %192 = vector.shape_cast %191 : vector<1x64x64xbf16> to vector<64x64xbf16>
    %cst_123 = arith.constant dense<0.000000e+00> : vector<98x64xf32>
    %193 = tpu.matmul %145, %192, %cst_123 {dimension_numbers = #tpu.dot_dimension_numbers<[1], [0], [0], [1], [0, 0, 1, 1], [], []>} : vector<98x64xbf16>, vector<64x64xbf16>, vector<98x64xf32> -> vector<98x64xf32>
    %194 = arith.addf %190, %193 : vector<98x64xf32>
    %cst_124 = arith.constant 0.000000e+00 : bf16
    %195 = vector.broadcast %cst_124 : bf16 to vector<1x64xbf16>
    %196 = vector.extract_strided_slice %145 {offsets = [1, 0], sizes = [97, 64], strides = [1, 1]} : vector<98x64xbf16> to vector<97x64xbf16>
    %197 = tpu.concatenate %196, %195 in 0 : vector<97x64xbf16>, vector<1x64xbf16> -> vector<98x64xbf16>
    %c5_125 = arith.constant 5 : index
    %c0_126 = arith.constant 0 : index
    %c0_127 = arith.constant 0 : index
    %198 = vector.load %arg10[%c5_125, %c0_126, %c0_127] : memref<9x98x1xbf16, #tpu.memory_space<vmem>>, vector<1x98x1xbf16>
    %199 = vector.shape_cast %198 : vector<1x98x1xbf16> to vector<98x1xbf16>
    %200 = vector.broadcast %199 : vector<98x1xbf16> to vector<98x64xbf16>
    %201 = arith.mulf %197, %200 : vector<98x64xbf16>
    %c5_128 = arith.constant 5 : index
    %c0_129 = arith.constant 0 : index
    %c0_130 = arith.constant 0 : index
    %202 = vector.load %arg13[%c5_128, %c0_129, %c0_130] : memref<9x64x64xbf16, #tpu.memory_space<vmem>>, vector<1x64x64xbf16>
    %203 = vector.shape_cast %202 : vector<1x64x64xbf16> to vector<64x64xbf16>
    %cst_131 = arith.constant dense<0.000000e+00> : vector<98x64xf32>
    %204 = tpu.matmul %201, %203, %cst_131 {dimension_numbers = #tpu.dot_dimension_numbers<[1], [0], [0], [1], [0, 0, 1, 1], [], []>} : vector<98x64xbf16>, vector<64x64xbf16>, vector<98x64xf32> -> vector<98x64xf32>
    %205 = arith.addf %194, %204 : vector<98x64xf32>
    %cst_132 = arith.constant 0.000000e+00 : bf16
    %206 = vector.broadcast %cst_132 : bf16 to vector<6x64xbf16>
    %207 = vector.extract_strided_slice %145 {offsets = [6, 0], sizes = [92, 64], strides = [1, 1]} : vector<98x64xbf16> to vector<92x64xbf16>
    %208 = tpu.concatenate %207, %206 in 0 : vector<92x64xbf16>, vector<6x64xbf16> -> vector<98x64xbf16>
    %c6_133 = arith.constant 6 : index
    %c0_134 = arith.constant 0 : index
    %c0_135 = arith.constant 0 : index
    %209 = vector.load %arg10[%c6_133, %c0_134, %c0_135] : memref<9x98x1xbf16, #tpu.memory_space<vmem>>, vector<1x98x1xbf16>
    %210 = vector.shape_cast %209 : vector<1x98x1xbf16> to vector<98x1xbf16>
    %211 = vector.broadcast %210 : vector<98x1xbf16> to vector<98x64xbf16>
    %212 = arith.mulf %208, %211 : vector<98x64xbf16>
    %c6_136 = arith.constant 6 : index
    %c0_137 = arith.constant 0 : index
    %c0_138 = arith.constant 0 : index
    %213 = vector.load %arg13[%c6_136, %c0_137, %c0_138] : memref<9x64x64xbf16, #tpu.memory_space<vmem>>, vector<1x64x64xbf16>
    %214 = vector.shape_cast %213 : vector<1x64x64xbf16> to vector<64x64xbf16>
    %cst_139 = arith.constant dense<0.000000e+00> : vector<98x64xf32>
    %215 = tpu.matmul %212, %214, %cst_139 {dimension_numbers = #tpu.dot_dimension_numbers<[1], [0], [0], [1], [0, 0, 1, 1], [], []>} : vector<98x64xbf16>, vector<64x64xbf16>, vector<98x64xf32> -> vector<98x64xf32>
    %216 = arith.addf %205, %215 : vector<98x64xf32>
    %cst_140 = arith.constant 0.000000e+00 : bf16
    %217 = vector.broadcast %cst_140 : bf16 to vector<7x64xbf16>
    %218 = vector.extract_strided_slice %145 {offsets = [7, 0], sizes = [91, 64], strides = [1, 1]} : vector<98x64xbf16> to vector<91x64xbf16>
    %219 = tpu.concatenate %218, %217 in 0 : vector<91x64xbf16>, vector<7x64xbf16> -> vector<98x64xbf16>
    %c7_141 = arith.constant 7 : index
    %c0_142 = arith.constant 0 : index
    %c0_143 = arith.constant 0 : index
    %220 = vector.load %arg10[%c7_141, %c0_142, %c0_143] : memref<9x98x1xbf16, #tpu.memory_space<vmem>>, vector<1x98x1xbf16>
    %221 = vector.shape_cast %220 : vector<1x98x1xbf16> to vector<98x1xbf16>
    %222 = vector.broadcast %221 : vector<98x1xbf16> to vector<98x64xbf16>
    %223 = arith.mulf %219, %222 : vector<98x64xbf16>
    %c7_144 = arith.constant 7 : index
    %c0_145 = arith.constant 0 : index
    %c0_146 = arith.constant 0 : index
    %224 = vector.load %arg13[%c7_144, %c0_145, %c0_146] : memref<9x64x64xbf16, #tpu.memory_space<vmem>>, vector<1x64x64xbf16>
    %225 = vector.shape_cast %224 : vector<1x64x64xbf16> to vector<64x64xbf16>
    %cst_147 = arith.constant dense<0.000000e+00> : vector<98x64xf32>
    %226 = tpu.matmul %223, %225, %cst_147 {dimension_numbers = #tpu.dot_dimension_numbers<[1], [0], [0], [1], [0, 0, 1, 1], [], []>} : vector<98x64xbf16>, vector<64x64xbf16>, vector<98x64xf32> -> vector<98x64xf32>
    %227 = arith.addf %216, %226 : vector<98x64xf32>
    %cst_148 = arith.constant 0.000000e+00 : bf16
    %228 = vector.broadcast %cst_148 : bf16 to vector<8x64xbf16>
    %229 = vector.extract_strided_slice %145 {offsets = [8, 0], sizes = [90, 64], strides = [1, 1]} : vector<98x64xbf16> to vector<90x64xbf16>
    %230 = tpu.concatenate %229, %228 in 0 : vector<90x64xbf16>, vector<8x64xbf16> -> vector<98x64xbf16>
    %c8_149 = arith.constant 8 : index
    %c0_150 = arith.constant 0 : index
    %c0_151 = arith.constant 0 : index
    %231 = vector.load %arg10[%c8_149, %c0_150, %c0_151] : memref<9x98x1xbf16, #tpu.memory_space<vmem>>, vector<1x98x1xbf16>
    %232 = vector.shape_cast %231 : vector<1x98x1xbf16> to vector<98x1xbf16>
    %233 = vector.broadcast %232 : vector<98x1xbf16> to vector<98x64xbf16>
    %234 = arith.mulf %230, %233 : vector<98x64xbf16>
    %c8_152 = arith.constant 8 : index
    %c0_153 = arith.constant 0 : index
    %c0_154 = arith.constant 0 : index
    %235 = vector.load %arg13[%c8_152, %c0_153, %c0_154] : memref<9x64x64xbf16, #tpu.memory_space<vmem>>, vector<1x64x64xbf16>
    %236 = vector.shape_cast %235 : vector<1x64x64xbf16> to vector<64x64xbf16>
    %cst_155 = arith.constant dense<0.000000e+00> : vector<98x64xf32>
    %237 = tpu.matmul %234, %236, %cst_155 {dimension_numbers = #tpu.dot_dimension_numbers<[1], [0], [0], [1], [0, 0, 1, 1], [], []>} : vector<98x64xbf16>, vector<64x64xbf16>, vector<98x64xf32> -> vector<98x64xf32>
    %238 = arith.addf %227, %237 : vector<98x64xf32>
    %c0_156 = arith.constant 0 : index
    %c0_157 = arith.constant 0 : index
    %239 = vector.load %arg14[%c0_156, %c0_157] : memref<1x64xf32, #tpu.memory_space<vmem>>, vector<1x64xf32>
    %240 = vector.broadcast %239 : vector<1x64xf32> to vector<98x64xf32>
    %241 = arith.addf %238, %240 : vector<98x64xf32>
    %cst_158 = arith.constant 0.000000e+00 : f32
    %242 = vector.broadcast %cst_158 : f32 to vector<98x64xf32>
    %243 = arith.maximumf %241, %242 : vector<98x64xf32>
    %244 = arith.addf %42, %243 : vector<98x64xf32>
    %245 = tpu.concatenate %244, %44 in 1 : vector<98x64xf32>, vector<98x64xf32> -> vector<98x128xf32>
    %246 = arith.truncf %245 : vector<98x128xf32> to vector<98x128xbf16>
    %c0_159 = arith.constant 0 : index
    %c0_160 = arith.constant 0 : index
    %247 = vector.load %arg15[%c0_159, %c0_160] : memref<98x128xbf16, #tpu.memory_space<vmem>>, vector<98x128xbf16>
    tpu.vector_store %arg15[%c0_159, %c0_160], %246 {strides = array<i32>} : memref<98x128xbf16, #tpu.memory_space<vmem>>, vector<98x128xbf16>,
    return
  }
  func.func @transform_0(%arg0: i32) -> (i32, i32) {
    %c0_i32 = arith.constant 0 : i32
    %c0_i32_0 = arith.constant 0 : i32
    return %arg0, %c0_i32 : i32, i32
  }
  func.func @transform_1(%arg0: i32) -> (i32, i32) {
    %c0_i32 = arith.constant 0 : i32
    %c0_i32_0 = arith.constant 0 : i32
    return %arg0, %c0_i32 : i32, i32
  }
  func.func @transform_2(%arg0: i32) -> (i32, i32) {
    %c0_i32 = arith.constant 0 : i32
    %c0_i32_0 = arith.constant 0 : i32
    return %arg0, %c0_i32 : i32, i32
  }
  func.func @transform_3(%arg0: i32) -> (i32, i32) {
    %c0_i32 = arith.constant 0 : i32
    %c0_i32_0 = arith.constant 0 : i32
    %c0_i32_1 = arith.constant 0 : i32
    return %c0_i32, %c0_i32_0 : i32, i32
  }
  func.func @transform_4(%arg0: i32) -> (i32, i32) {
    %c0_i32 = arith.constant 0 : i32
    %c0_i32_0 = arith.constant 0 : i32
    %c0_i32_1 = arith.constant 0 : i32
    return %c0_i32, %c0_i32_0 : i32, i32
  }
  func.func @transform_5(%arg0: i32) -> (i32, i32) {
    %c0_i32 = arith.constant 0 : i32
    %c0_i32_0 = arith.constant 0 : i32
    %c0_i32_1 = arith.constant 0 : i32
    return %c0_i32, %c0_i32_0 : i32, i32
  }
  func.func @transform_6(%arg0: i32) -> (i32, i32) {
    %c0_i32 = arith.constant 0 : i32
    %c0_i32_0 = arith.constant 0 : i32
    %c0_i32_1 = arith.constant 0 : i32
    return %c0_i32, %c0_i32_0 : i32, i32
  }
  func.func @transform_7(%arg0: i32) -> (i32, i32) {
    %c0_i32 = arith.constant 0 : i32
    %c0_i32_0 = arith.constant 0 : i32
    %c0_i32_1 = arith.constant 0 : i32
    return %c0_i32, %c0_i32_0 : i32, i32
  }
  func.func @transform_8(%arg0: i32) -> (i32, i32) {
    %c0_i32 = arith.constant 0 : i32
    %c0_i32_0 = arith.constant 0 : i32
    %c0_i32_1 = arith.constant 0 : i32
    return %c0_i32, %c0_i32_0 : i32, i32
  }
  func.func @transform_9(%arg0: i32) -> (i32, i32, i32) {
    %c0_i32 = arith.constant 0 : i32
    %c0_i32_0 = arith.constant 0 : i32
    %c0_i32_1 = arith.constant 0 : i32
    %c0_i32_2 = arith.constant 0 : i32
    return %c0_i32, %c0_i32_0, %c0_i32_1 : i32, i32, i32
  }
  func.func @transform_10(%arg0: i32) -> (i32, i32, i32) {
    %c0_i32 = arith.constant 0 : i32
    %c0_i32_0 = arith.constant 0 : i32
    %c0_i32_1 = arith.constant 0 : i32
    %c0_i32_2 = arith.constant 0 : i32
    return %c0_i32, %c0_i32_0, %c0_i32_1 : i32, i32, i32
  }
  func.func @transform_11(%arg0: i32) -> (i32, i32) {
    %c0_i32 = arith.constant 0 : i32
    %c0_i32_0 = arith.constant 0 : i32
    %c0_i32_1 = arith.constant 0 : i32
    return %c0_i32, %c0_i32_0 : i32, i32
  }
  func.func @transform_12(%arg0: i32) -> (i32, i32, i32) {
    %c0_i32 = arith.constant 0 : i32
    %c0_i32_0 = arith.constant 0 : i32
    %c0_i32_1 = arith.constant 0 : i32
    %c0_i32_2 = arith.constant 0 : i32
    return %c0_i32, %c0_i32_0, %c0_i32_1 : i32, i32, i32
  }
  func.func @transform_13(%arg0: i32) -> (i32, i32) {
    %c0_i32 = arith.constant 0 : i32
    %c0_i32_0 = arith.constant 0 : i32
    %c0_i32_1 = arith.constant 0 : i32
    return %c0_i32, %c0_i32_0 : i32, i32
  }
  func.func @transform_14(%arg0: i32) -> (i32, i32) {
    %c0_i32 = arith.constant 0 : i32
    %c0_i32_0 = arith.constant 0 : i32
    return %arg0, %c0_i32 : i32, i32
  }
  func.func @transform_15(%arg0: i32) -> (i32, i32) {
    %c0_i32 = arith.constant 0 : i32
    %c0_i32_0 = arith.constant 0 : i32
    return %arg0, %c0_i32 : i32, i32
  }
}

module attributes {stable_mosaic.version = 11 : i64} {
  func.func @_fc_head_kernel(%arg0: i32, %arg1: memref<2x3136xbf16, #tpu.memory_space<vmem>>, %arg2: memref<3136x512xbf16, #tpu.memory_space<vmem>>, %arg3: memref<1x512xf32, #tpu.memory_space<vmem>>, %arg4: memref<512x128xbf16, #tpu.memory_space<vmem>>, %arg5: memref<1x128xf32, #tpu.memory_space<vmem>>, %arg6: memref<2x128xf32, #tpu.memory_space<vmem>>) attributes {dimension_semantics = [#tpu.dimension_semantics<parallel>], iteration_bounds = array<i64: 1>, scalar_prefetch = 0 : i64, scratch_operands = 0 : i64, tpu.core_type = #tpu.core_type<tc>, window_params = [{transform_indices = @transform_0, window_bounds = array<i64: 2, 3136>}, {pipeline_mode = #tpu.pipeline_mode<synchronous>, transform_indices = @transform_1, window_bounds = array<i64: 3136, 512>}, {pipeline_mode = #tpu.pipeline_mode<synchronous>, transform_indices = @transform_2, window_bounds = array<i64: 1, 512>}, {pipeline_mode = #tpu.pipeline_mode<synchronous>, transform_indices = @transform_3, window_bounds = array<i64: 512, 128>}, {pipeline_mode = #tpu.pipeline_mode<synchronous>, transform_indices = @transform_4, window_bounds = array<i64: 1, 128>}, {transform_indices = @transform_5, window_bounds = array<i64: 2, 128>}]} {
    %c0 = arith.constant 0 : index
    %c0_0 = arith.constant 0 : index
    %0 = vector.load %arg1[%c0, %c0_0] : memref<2x3136xbf16, #tpu.memory_space<vmem>>, vector<2x3136xbf16>
    %c0_1 = arith.constant 0 : index
    %c0_2 = arith.constant 0 : index
    %1 = vector.load %arg2[%c0_1, %c0_2] : memref<3136x512xbf16, #tpu.memory_space<vmem>>, vector<3136x512xbf16>
    %cst = arith.constant dense<0.000000e+00> : vector<2x512xf32>
    %2 = tpu.matmul %0, %1, %cst {dimension_numbers = #tpu.dot_dimension_numbers<[1], [0], [0], [1], [0, 0, 1, 1], [], []>} : vector<2x3136xbf16>, vector<3136x512xbf16>, vector<2x512xf32> -> vector<2x512xf32>
    %c0_3 = arith.constant 0 : index
    %c0_4 = arith.constant 0 : index
    %3 = vector.load %arg3[%c0_3, %c0_4] : memref<1x512xf32, #tpu.memory_space<vmem>>, vector<1x512xf32>
    %4 = vector.broadcast %3 : vector<1x512xf32> to vector<2x512xf32>
    %5 = arith.addf %2, %4 : vector<2x512xf32>
    %cst_5 = arith.constant 0.00999999977 : f32
    %6 = vector.broadcast %cst_5 : f32 to vector<2x512xf32>
    %7 = arith.mulf %6, %5 : vector<2x512xf32>
    %8 = arith.maximumf %5, %7 : vector<2x512xf32>
    %9 = arith.truncf %8 : vector<2x512xf32> to vector<2x512xbf16>
    %c0_6 = arith.constant 0 : index
    %c0_7 = arith.constant 0 : index
    %10 = vector.load %arg4[%c0_6, %c0_7] : memref<512x128xbf16, #tpu.memory_space<vmem>>, vector<512x128xbf16>
    %cst_8 = arith.constant dense<0.000000e+00> : vector<2x128xf32>
    %11 = tpu.matmul %9, %10, %cst_8 {dimension_numbers = #tpu.dot_dimension_numbers<[1], [0], [0], [1], [0, 0, 1, 1], [], []>} : vector<2x512xbf16>, vector<512x128xbf16>, vector<2x128xf32> -> vector<2x128xf32>
    %c0_9 = arith.constant 0 : index
    %c0_10 = arith.constant 0 : index
    %12 = vector.load %arg5[%c0_9, %c0_10] : memref<1x128xf32, #tpu.memory_space<vmem>>, vector<1x128xf32>
    %13 = vector.broadcast %12 : vector<1x128xf32> to vector<2x128xf32>
    %14 = arith.addf %11, %13 : vector<2x128xf32>
    %15 = tpu.iota {dimensions = array<i32: 1>} : vector<2x128xi32>
    %c4_i32 = arith.constant 4 : i32
    %16 = vector.broadcast %c4_i32 : i32 to vector<2x128xi32>
    %17 = arith.cmpi slt, %15, %16 : vector<2x128xi32>
    %cst_11 = arith.constant -1.000000e+30 : f32
    %18 = vector.broadcast %cst_11 : f32 to vector<2x128xf32>
    %19 = arith.select %17, %14, %18 : vector<2x128xi1>, vector<2x128xf32>
    %cst_12 = arith.constant dense<0xFF800000> : vector<2xf32>
    %20 = vector.multi_reduction <maximumf>, %19, %cst_12 [1] : vector<2x128xf32> to vector<2xf32>
    %21 = vector.shape_cast %20 : vector<2xf32> to vector<2x1xf32>
    %22 = vector.broadcast %21 : vector<2x1xf32> to vector<2x128xf32>
    %23 = arith.subf %19, %22 : vector<2x128xf32>
    %24 = math.exp %23 : vector<2x128xf32>
    %cst_13 = arith.constant 0.000000e+00 : f32
    %25 = vector.broadcast %cst_13 : f32 to vector<2x128xf32>
    %26 = arith.select %17, %24, %25 : vector<2x128xi1>, vector<2x128xf32>
    %cst_14 = arith.constant dense<0.000000e+00> : vector<2xf32>
    %27 = vector.multi_reduction <add>, %26, %cst_14 [1] : vector<2x128xf32> to vector<2xf32>
    %28 = vector.shape_cast %27 : vector<2xf32> to vector<2x1xf32>
    %29 = vector.broadcast %28 : vector<2x1xf32> to vector<2x128xf32>
    %30 = arith.divf %26, %29 : vector<2x128xf32>
    %c4_i32_15 = arith.constant 4 : i32
    %31 = vector.broadcast %c4_i32_15 : i32 to vector<2x128xi32>
    %32 = arith.cmpi eq, %15, %31 : vector<2x128xi32>
    %cst_16 = arith.constant 0.000000e+00 : f32
    %33 = vector.broadcast %cst_16 : f32 to vector<2x128xf32>
    %34 = arith.select %32, %14, %33 : vector<2x128xi1>, vector<2x128xf32>
    %35 = arith.addf %30, %34 : vector<2x128xf32>
    %c0_17 = arith.constant 0 : index
    %c0_18 = arith.constant 0 : index
    %36 = vector.load %arg6[%c0_17, %c0_18] : memref<2x128xf32, #tpu.memory_space<vmem>>, vector<2x128xf32>
    tpu.vector_store %arg6[%c0_17, %c0_18], %35 {strides = array<i32>} : memref<2x128xf32, #tpu.memory_space<vmem>>, vector<2x128xf32>,
    return
  }
  func.func @transform_0(%arg0: i32) -> (i32, i32) {
    %c0_i32 = arith.constant 0 : i32
    %c0_i32_0 = arith.constant 0 : i32
    return %arg0, %c0_i32 : i32, i32
  }
  func.func @transform_1(%arg0: i32) -> (i32, i32) {
    %c0_i32 = arith.constant 0 : i32
    %c0_i32_0 = arith.constant 0 : i32
    %c0_i32_1 = arith.constant 0 : i32
    return %c0_i32, %c0_i32_0 : i32, i32
  }
  func.func @transform_2(%arg0: i32) -> (i32, i32) {
    %c0_i32 = arith.constant 0 : i32
    %c0_i32_0 = arith.constant 0 : i32
    %c0_i32_1 = arith.constant 0 : i32
    return %c0_i32, %c0_i32_0 : i32, i32
  }
  func.func @transform_3(%arg0: i32) -> (i32, i32) {
    %c0_i32 = arith.constant 0 : i32
    %c0_i32_0 = arith.constant 0 : i32
    %c0_i32_1 = arith.constant 0 : i32
    return %c0_i32, %c0_i32_0 : i32, i32
  }
  func.func @transform_4(%arg0: i32) -> (i32, i32) {
    %c0_i32 = arith.constant 0 : i32
    %c0_i32_0 = arith.constant 0 : i32
    %c0_i32_1 = arith.constant 0 : i32
    return %c0_i32, %c0_i32_0 : i32, i32
  }
  func.func @transform_5(%arg0: i32) -> (i32, i32) {
    %c0_i32 = arith.constant 0 : i32
    %c0_i32_0 = arith.constant 0 : i32
    return %arg0, %c0_i32 : i32, i32
  }
}

</mosaic_0001>

<bundles_post_ra>
// kernel: tile.19
= control target key start
LH: loop header
LB: loop body
LE: loop exit
PB: predicated region body
PF: predicated region fallthrough
CT: control target
= control target key end

     0   :  { %vm323_vm0 = vcmask 1047556   ;;  %s617_s10 = smov 49   ;;  %vm325_vm1 = vcmask 400384   ;;  %vm398_vm2 = vcmask 802184   ;;  %s908_s0 = inlined_call_operand.vmem [shape: f32[2,49,64], index: 0, kind: input, shape index: {}]   ;;  %s909_s1 = inlined_call_operand.vmem [shape: f32[98,64], index: 1, kind: output, shape index: {}]  }
   0x1   :  { %v595_v0 = vld [vmem:[%s908_s0 + $0xe] sm:$0x3]  ;;  %v596_v1 = vld [vmem:[%s908_s0 + $0xc] sm:$0x3]  ;;  %v597_v2 = vld [vmem:[%s908_s0 + $0xa] sm:$0x3] }
   0x2   :  { %289 = vst [vmem:[#allocation0 + $0x38] sm:$0x3] %v595_v0  ;;  %294 = vst [vmem:[#allocation0 + $0x30] sm:$0x3] %v596_v1  ;;  %v598_v3 = vld [vmem:[%s908_s0 + $0x8] sm:$0x3] }
   0x3   :  { %299 = vst [vmem:[#allocation0 + $0x28] sm:$0x3] %v597_v2  ;;  %v599_v4 = vld [vmem:[%s908_s0 + $0x6] sm:$0x3]  ;;  %v600_v5 = vld [vmem:[%s908_s0 + $0x4] sm:$0x3] }
   0x4   :  { %304 = vst [vmem:[#allocation0 + $0x20] sm:$0x3] %v598_v3  ;;  %309 = vst [vmem:[#allocation0 + $0x18] sm:$0x3] %v599_v4  ;;  %v601_v6 = vld [vmem:[%s908_s0 + $0x2] sm:$0x3] }
   0x5   :  { %314 = vst [vmem:[#allocation0 + $0x10] sm:$0x3] %v600_v5  ;;  %v319_v7 = vld [vmem:[%s908_s0] sm:$0x3]  ;;  %318 = vst [vmem:[#allocation0 + $0x8] sm:$0x3] %v601_v6 }
   0x6   :  { %320 = vst [vmem:[#allocation0] sm:$0x3] %v319_v7  ;;  %v587_v8 = vld [vmem:[%s908_s0 + $0x1e] sm:$0x3]  ;;  %v588_v9 = vld [vmem:[%s908_s0 + $0x1c] sm:$0x3] }
   0x7   :  { %v589_v10 = vld [vmem:[%s908_s0 + $0x1a] sm:$0x3]  ;;  %249 = vst [vmem:[#allocation0 + $0x78] sm:$0x3] %v587_v8  ;;  %254 = vst [vmem:[#allocation0 + $0x70] sm:$0x3] %v588_v9 }
   0x8   :  { %259 = vst [vmem:[#allocation0 + $0x68] sm:$0x3] %v589_v10  ;;  %v590_v11 = vld [vmem:[%s908_s0 + $0x18] sm:$0x3]  ;;  %v591_v12 = vld [vmem:[%s908_s0 + $0x16] sm:$0x3] }
   0x9   :  { %v592_v13 = vld [vmem:[%s908_s0 + $0x14] sm:$0x3]  ;;  %264 = vst [vmem:[#allocation0 + $0x60] sm:$0x3] %v590_v11  ;;  %269 = vst [vmem:[#allocation0 + $0x58] sm:$0x3] %v591_v12 }
   0xa   :  { %274 = vst [vmem:[#allocation0 + $0x50] sm:$0x3] %v592_v13  ;;  %v593_v14 = vld [vmem:[%s908_s0 + $0x12] sm:$0x3]  ;;  %v594_v15 = vld [vmem:[%s908_s0 + $0x10] sm:$0x3] }
   0xb   :  { %v563_v16 = vld [vmem:[%s908_s0 + $0x4e] sm:$0x3]  ;;  %279 = vst [vmem:[#allocation0 + $0x48] sm:$0x3] %v593_v14  ;;  %284 = vst [vmem:[#allocation0 + $0x40] sm:$0x3] %v594_v15 }
   0xc   :  { %129 = vst [vmem:[#allocation0 + $0x138] sm:$0x3] %v563_v16  ;;  %v564_v17 = vld [vmem:[%s908_s0 + $0x4c] sm:$0x3]  ;;  %v565_v18 = vld [vmem:[%s908_s0 + $0x4a] sm:$0x3] }
   0xd   :  { %v566_v19 = vld [vmem:[%s908_s0 + $0x48] sm:$0x3]  ;;  %134 = vst [vmem:[#allocation0 + $0x130] sm:$0x3] %v564_v17  ;;  %139 = vst [vmem:[#allocation0 + $0x128] sm:$0x3] %v565_v18 }
   0xe   :  { %144 = vst [vmem:[#allocation0 + $0x120] sm:$0x3] %v566_v19  ;;  %v567_v20 = vld [vmem:[%s908_s0 + $0x46] sm:$0x3]  ;;  %v568_v21 = vld [vmem:[%s908_s0 + $0x44] sm:$0x3] }
   0xf   :  { %v569_v22 = vld [vmem:[%s908_s0 + $0x42] sm:$0x3]  ;;  %149 = vst [vmem:[#allocation0 + $0x118] sm:$0x3] %v567_v20  ;;  %154 = vst [vmem:[#allocation0 + $0x110] sm:$0x3] %v568_v21 }
  0x10   :  { %159 = vst [vmem:[#allocation0 + $0x108] sm:$0x3] %v569_v22  ;;  %v570_v23 = vld [vmem:[%s908_s0 + $0x40] sm:$0x3]  ;;  %v555_v24 = vld [vmem:[%s908_s0 + $0x5e] sm:$0x3] }
  0x11   :  { %v556_v25 = vld [vmem:[%s908_s0 + $0x5c] sm:$0x3]  ;;  %v393_v26 = vld [vmem:[#allocation0 + $0x1] ss:$8 sm:$0xf0]  }
  0x12   :  { %164 = vst [vmem:[#allocation0 + $0x100] sm:$0x3] %v570_v23  ;;  %89 = vst [vmem:[#allocation0 + $0x178] sm:$0x3] %v555_v24  ;;  %v557_v27 = vld [vmem:[%s908_s0 + $0x5a] sm:$0x3] }
  0x13   :  { %94 = vst [vmem:[#allocation0 + $0x170] sm:$0x3] %v556_v25  ;;  %v391_v28 = vld [vmem:[#allocation0 + $0x1] ss:$8 sm:$0xf]  }
  0x14   :  { %99 = vst [vmem:[#allocation0 + $0x168] sm:$0x3] %v557_v27  ;;  %v558_v29 = vld [vmem:[%s908_s0 + $0x58] sm:$0x3]  ;;  %v395_v30 = vsel %vm323_vm0, %v393_v26, %v391_v28  ;;  %v559_v31 = vld [vmem:[%s908_s0 + $0x56] sm:$0x3] }
  0x15   :  { %104 = vst [vmem:[#allocation0 + $0x160] sm:$0x3] %v558_v29  ;;  %v560_v32 = vld [vmem:[%s908_s0 + $0x54] sm:$0x3]  ;;  %v561_v33 = vld [vmem:[%s908_s0 + $0x52] sm:$0x3]  ;;  %396 = vrot.lane.b32.xlu0 %v395_v30, %s617_s10 }
  0x16   :  { %v414_v34 = vld [vmem:[#allocation0 + $0x41] ss:$8 sm:$0xf0]   ;;  %109 = vst [vmem:[#allocation0 + $0x158] sm:$0x3] %v559_v31 }
  0x17   :  { %114 = vst [vmem:[#allocation0 + $0x150] sm:$0x3] %v560_v32  ;;  %119 = vst [vmem:[#allocation0 + $0x148] sm:$0x3] %v561_v33  ;;  %v562_v35 = vld [vmem:[%s908_s0 + $0x50] sm:$0x3] }
  0x18   :  { %v412_v36 = vld [vmem:[#allocation0 + $0x41] ss:$8 sm:$0xf]   ;;  %124 = vst [vmem:[#allocation0 + $0x140] sm:$0x3] %v562_v35 }
  0x19   :  { %v579_v37 = vld [vmem:[%s908_s0 + $0x2e] sm:$0x3]  ;;  %v416_v38 = vsel %vm323_vm0, %v414_v34, %v412_v36  ;;  %v403_v39 = vld [vmem:[#allocation0 + $0x101] ss:$8 sm:$0xf0]  }
  0x1a   :  { %209 = vst [vmem:[#allocation0 + $0xb8] sm:$0x3] %v579_v37  ;;  %v580_v40 = vld [vmem:[%s908_s0 + $0x2c] sm:$0x3]  ;;  %417 = vrot.lane.b32.xlu1 %v416_v38, %s617_s10  ;;  %v581_v41 = vld [vmem:[%s908_s0 + $0x2a] sm:$0x3] }
  0x1b   :  { %214 = vst [vmem:[#allocation0 + $0xb0] sm:$0x3] %v580_v40  ;;  %v582_v42 = vld [vmem:[%s908_s0 + $0x28] sm:$0x3]  ;;  %v583_v43 = vld [vmem:[%s908_s0 + $0x26] sm:$0x3] }
  0x1c   :  { %v401_v44 = vld [vmem:[#allocation0 + $0x101] ss:$8 sm:$0xf]   ;;  %219 = vst [vmem:[#allocation0 + $0xa8] sm:$0x3] %v581_v41 }
  0x1d   :  { %224 = vst [vmem:[#allocation0 + $0xa0] sm:$0x3] %v582_v42  ;;  %229 = vst [vmem:[#allocation0 + $0x98] sm:$0x3] %v583_v43  ;;  %v584_v45 = vld [vmem:[%s908_s0 + $0x24] sm:$0x3]  ;;  %v405_v46 = vsel %vm323_vm0, %v403_v39, %v401_v44 }
  0x1e   :  { %234 = vst [vmem:[#allocation0 + $0x90] sm:$0x3] %v584_v45  ;;  %v585_v47 = vld [vmem:[%s908_s0 + $0x22] sm:$0x3]  ;;  %v586_v48 = vld [vmem:[%s908_s0 + $0x20] sm:$0x3]  ;;  %406 = vrot.lane.b32.xlu0 %v405_v46, %s617_s10 }
  0x1f   :  { %v547_v49 = vld [vmem:[%s908_s0 + $0x6e] sm:$0x3]  ;;  %v425_v50 = vld [vmem:[#allocation0 + $0x141] ss:$8 sm:$0xf0]  }
  0x20   :  { %239 = vst [vmem:[#allocation0 + $0x88] sm:$0x3] %v585_v47  ;;  %244 = vst [vmem:[#allocation0 + $0x80] sm:$0x3] %v586_v48  ;;  %v548_v51 = vld [vmem:[%s908_s0 + $0x6c] sm:$0x3] }
  0x21   :  { %49 = vst [vmem:[#allocation0 + $0x1b8] sm:$0x3] %v547_v49  ;;  %54 = vst [vmem:[#allocation0 + $0x1b0] sm:$0x3] %v548_v51  ;;  %v549_v52 = vld [vmem:[%s908_s0 + $0x6a] sm:$0x3] }
  0x22   :  { %v550_v53 = vld [vmem:[%s908_s0 + $0x68] sm:$0x3]  ;;  %v551_v54 = vld [vmem:[%s908_s0 + $0x66] sm:$0x3]  ;;  %59 = vst [vmem:[#allocation0 + $0x1a8] sm:$0x3] %v549_v52 }
  0x23   :  { %v423_v55 = vld [vmem:[#allocation0 + $0x141] ss:$8 sm:$0xf]   ;;  %64 = vst [vmem:[#allocation0 + $0x1a0] sm:$0x3] %v550_v53 }
  0x24   :  { %69 = vst [vmem:[#allocation0 + $0x198] sm:$0x3] %v551_v54  ;;  %v552_v56 = vld [vmem:[%s908_s0 + $0x64] sm:$0x3]  ;;  %v427_v57 = vsel %vm323_vm0, %v425_v50, %v423_v55  ;;  %v553_v58 = vld [vmem:[%s908_s0 + $0x62] sm:$0x3] }
  0x25   :  { %74 = vst [vmem:[#allocation0 + $0x190] sm:$0x3] %v552_v56  ;;  %v554_v59 = vld [vmem:[%s908_s0 + $0x60] sm:$0x3]  ;;  %v571_v60 = vld [vmem:[%s908_s0 + $0x3e] sm:$0x3]  ;;  %428 = vrot.lane.b32.xlu1 %v427_v57, %s617_s10 }
  0x26   :  { %79 = vst [vmem:[#allocation0 + $0x188] sm:$0x3] %v553_v58  ;;  %84 = vst [vmem:[#allocation0 + $0x180] sm:$0x3] %v554_v59  ;;  %v572_v61 = vld [vmem:[%s908_s0 + $0x3c] sm:$0x3] }
  0x27   :  { %169 = vst [vmem:[#allocation0 + $0xf8] sm:$0x3] %v571_v60  ;;  %v573_v62 = vld [vmem:[%s908_s0 + $0x3a] sm:$0x3]  ;;  %v574_v63 = vld [vmem:[%s908_s0 + $0x38] sm:$0x3] }
  0x28   :  { %v436_v0 = vld [vmem:[#allocation0 + $0x81] ss:$8 sm:$0xf0]   ;;  %174 = vst [vmem:[#allocation0 + $0xf0] sm:$0x3] %v572_v61 }
  0x29   :  { %179 = vst [vmem:[#allocation0 + $0xe8] sm:$0x3] %v573_v62  ;;  %184 = vst [vmem:[#allocation0 + $0xe0] sm:$0x3] %v574_v63  ;;  %v575_v1 = vld [vmem:[%s908_s0 + $0x36] sm:$0x3] }
  0x2a   :  { %189 = vst [vmem:[#allocation0 + $0xd8] sm:$0x3] %v575_v1  ;;  %v576_v2 = vld [vmem:[%s908_s0 + $0x34] sm:$0x3]  ;;  %v577_v3 = vld [vmem:[%s908_s0 + $0x32] sm:$0x3] }
  0x2b   :  { %v578_v4 = vld [vmem:[%s908_s0 + $0x30] sm:$0x3]  ;;  %194 = vst [vmem:[#allocation0 + $0xd0] sm:$0x3] %v576_v2  ;;  %199 = vst [vmem:[#allocation0 + $0xc8] sm:$0x3] %v577_v3 }
  0x2c   :  { %v434_v5 = vld [vmem:[#allocation0 + $0x81] ss:$8 sm:$0xf]   ;;  %204 = vst [vmem:[#allocation0 + $0xc0] sm:$0x3] %v578_v4 }
  0x2d   :  { %v539_v6 = vld [vmem:[%s908_s0 + $0x7e] sm:$0x3]  ;;  %v438_v7 = vsel %vm323_vm0, %v436_v0, %v434_v5  ;;  %v540_v8 = vld [vmem:[%s908_s0 + $0x7c] sm:$0x3]  ;;  %v541_v9 = vld [vmem:[%s908_s0 + $0x7a] sm:$0x3] }
  0x2e   :  { %9 = vst [vmem:[#allocation0 + $0x1f8] sm:$0x3] %v539_v6  ;;  %v542_v10 = vld [vmem:[%s908_s0 + $0x78] sm:$0x3]  ;;  %439 = vrot.lane.b32.xlu0 %v438_v7, %s617_s10  ;;  %14 = vst [vmem:[#allocation0 + $0x1f0] sm:$0x3] %v540_v8 }
  0x2f   :  { %v447_v11 = vld [vmem:[#allocation0 + $0x181] ss:$8 sm:$0xf0]   ;;  %19 = vst [vmem:[#allocation0 + $0x1e8] sm:$0x3] %v541_v9 }
  0x30   :  { %24 = vst [vmem:[#allocation0 + $0x1e0] sm:$0x3] %v542_v10  ;;  %v543_v12 = vld [vmem:[%s908_s0 + $0x76] sm:$0x3]  ;;  %v544_v13 = vld [vmem:[%s908_s0 + $0x74] sm:$0x3] }
  0x31   :  { %29 = vst [vmem:[#allocation0 + $0x1d8] sm:$0x3] %v543_v12  ;;  %v545_v14 = vld [vmem:[%s908_s0 + $0x72] sm:$0x3]  ;;  %v546_v15 = vld [vmem:[%s908_s0 + $0x70] sm:$0x3] }
  0x32   :  { %v445_v16 = vld [vmem:[#allocation0 + $0x181] ss:$8 sm:$0xf]   ;;  %34 = vst [vmem:[#allocation0 + $0x1d0] sm:$0x3] %v544_v13 }
  0x33   :  { %39 = vst [vmem:[#allocation0 + $0x1c8] sm:$0x3] %v545_v14  ;;  %44 = vst [vmem:[#allocation0 + $0x1c0] sm:$0x3] %v546_v15  ;;  %v449_v18 = vsel %vm323_vm0, %v447_v11, %v445_v16 }
  0x34   :  { %v321_v17 = vld [vmem:[#allocation0] ss:$8 sm:$0xf]   ;;  %v458_v19 = vld [vmem:[#allocation0 + $0xc1] ss:$8 sm:$0xf0]   ;;  %450 = vrot.lane.b32.xlu1 %v449_v18, %s617_s10 }
  0x35   :  { %v322_v20 = vld [vmem:[#allocation0] ss:$8 sm:$0xf0]   ;;  %v456_v24 = vld [vmem:[#allocation0 + $0xc1] ss:$8 sm:$0xf]  }
  0x36   :  { %v324_v21 = vsel %vm323_vm0, %v322_v20, %v321_v17  ;;  %v328_v22 = vld [vmem:[#allocation0 + $0x40] ss:$8 sm:$0xf]   ;;  %v460_v27 = vsel %vm323_vm0, %v458_v19, %v456_v24 }
  0x37   :  { %v330_v23 = vld [vmem:[#allocation0 + $0x40] ss:$8 sm:$0xf0]   ;;  %326 = vst.msk [vmem:[%s909_s1] sm:$0xff] %vm325_vm1, %v324_v21   ;;  %461 = vrot.lane.b32.xlu0 %v460_v27, %s617_s10 }
  0x38   :  { %v332_v25 = vsel %vm323_vm0, %v330_v23, %v328_v22  ;;  %v355_v26 = vld [vmem:[#allocation0 + $0x100] ss:$8 sm:$0xf]   ;;  %v469_v30 = vld [vmem:[#allocation0 + $0x1c1] ss:$8 sm:$0xf0]  }
  0x39   :  { %602 = vst.msk [vmem:[%s909_s1 + $0x8] sm:$0xff] %vm325_vm1, %v332_v25   ;;  %v357_v28 = vld [vmem:[#allocation0 + $0x100] ss:$8 sm:$0xf0]  }
  0x3a   :  { %v364_v29 = vld [vmem:[#allocation0 + $0x140] ss:$8 sm:$0xf]   ;;  %v359_v31 = vsel %vm323_vm0, %v357_v28, %v355_v26  ;;  %v467_v36 = vld [vmem:[#allocation0 + $0x1c1] ss:$8 sm:$0xf]  }
  0x3b   :  { %v366_v32 = vld [vmem:[#allocation0 + $0x140] ss:$8 sm:$0xf0]   ;;  %605 = vst.msk [vmem:[%s909_s1 + $0x20] sm:$0xff] %vm325_vm1, %v359_v31   ;;  %v471_v39 = vsel %vm323_vm0, %v469_v30, %v467_v36 }
  0x3c   :  { %v368_v33 = vsel %vm323_vm0, %v366_v32, %v364_v29  ;;  %v337_v34 = vld [vmem:[#allocation0 + $0x80] ss:$8 sm:$0xf]   ;;  %472 = vrot.lane.b32.xlu1 %v471_v39, %s617_s10 }
  0x3d   :  { %v339_v35 = vld [vmem:[#allocation0 + $0x80] ss:$8 sm:$0xf0]   ;;  %606 = vst.msk [vmem:[%s909_s1 + $0x28] sm:$0xff] %vm325_vm1, %v368_v33  }
  0x3e   :  { %v341_v37 = vsel %vm323_vm0, %v339_v35, %v337_v34  ;;  %v373_v38 = vld [vmem:[#allocation0 + $0x180] ss:$8 sm:$0xf]  }
  0x3f   :  { %603 = vst.msk [vmem:[%s909_s1 + $0x10] sm:$0xff] %vm325_vm1, %v341_v37   ;;  %v375_v40 = vld [vmem:[#allocation0 + $0x180] ss:$8 sm:$0xf0]  }
  0x40   :  { %v346_v41 = vld [vmem:[#allocation0 + $0xc0] ss:$8 sm:$0xf]   ;;  %v377_v42 = vsel %vm323_vm0, %v375_v40, %v373_v38 }
  0x41   :  { %v348_v43 = vld [vmem:[#allocation0 + $0xc0] ss:$8 sm:$0xf0]   ;;  %607 = vst.msk [vmem:[%s909_s1 + $0x30] sm:$0xff] %vm325_vm1, %v377_v42  }
  0x42   :  { %v382_v44 = vld [vmem:[#allocation0 + $0x1c0] ss:$8 sm:$0xf]   ;;  %v350_v45 = vsel %vm323_vm0, %v348_v43, %v346_v41 }
  0x43   :  { %v384_v46 = vld [vmem:[#allocation0 + $0x1c0] ss:$8 sm:$0xf0]   ;;  %604 = vst.msk [vmem:[%s909_s1 + $0x18] sm:$0xff] %vm325_vm1, %v350_v45  }
  0x44   :  { %v386_v47 = vsel %vm323_vm0, %v384_v46, %v382_v44 }
  0x45   :  { %608 = vst.msk [vmem:[%s909_s1 + $0x38] sm:$0xff] %vm325_vm1, %v386_v47  }
  0x87   :  { %v397_v48 = vpop.permute.xlu0 %396  }
  0x88   :  { %399 = vst.msk [vmem:[%s909_s1] sm:$0xff] %vm398_vm2, %v397_v48  }
  0x8c   :  { %v418_v49 = vpop.permute.xlu1 %417  }
  0x8d   :  { %610 = vst.msk [vmem:[%s909_s1 + $0x8] sm:$0xff] %vm398_vm2, %v418_v49  }
  0x90   :  { %v407_v50 = vpop.permute.xlu0 %406  }
  0x91   :  { %609 = vst.msk [vmem:[%s909_s1 + $0x20] sm:$0xff] %vm398_vm2, %v407_v50  }
  0x97   :  { %v429_v51 = vpop.permute.xlu1 %428  }
  0x98   :  { %611 = vst.msk [vmem:[%s909_s1 + $0x28] sm:$0xff] %vm398_vm2, %v429_v51  }
  0xa0   :  { %v440_v52 = vpop.permute.xlu0 %439  }
  0xa1   :  { %612 = vst.msk [vmem:[%s909_s1 + $0x10] sm:$0xff] %vm398_vm2, %v440_v52  }
  0xa6   :  { %v451_v53 = vpop.permute.xlu1 %450  }
  0xa7   :  { %613 = vst.msk [vmem:[%s909_s1 + $0x30] sm:$0xff] %vm398_vm2, %v451_v53  }
  0xa9   :  { %v462_v54 = vpop.permute.xlu0 %461  }
  0xaa   :  { %614 = vst.msk [vmem:[%s909_s1 + $0x18] sm:$0xff] %vm398_vm2, %v462_v54  }
  0xae   :  { %v473_v55 = vpop.permute.xlu1 %472  }
  0xaf   :  { %615 = vst.msk [vmem:[%s909_s1 + $0x38] sm:$0xff] %vm398_vm2, %v473_v55  }

// kernel: ppo_lstm_forward.2
= control target key start
LH: loop header
LB: loop body
LE: loop exit
PB: predicated region body
PF: predicated region fallthrough
CT: control target
= control target key end

     0   :  { %v10435_v1 = vmov 0   ;;  %vm799_vm0 = vcmask 523264   ;;  %s10436_s29 = smov 64   ;;  %vm10438_vm1 = vmmov 0   ;;  %vm3572_vm2 = vcmask 1042432   ;;  %s14697_s4 = inlined_call_operand.vmem [shape: bf16[576,256], index: 4, kind: input, shape index: {}]   ;;  %s14698_s1 = inlined_call_operand.vmem [shape: bf16[98,576], index: 1, kind: input, shape index: {}]   ;;  %s14699_s3 = inlined_call_operand.vmem [shape: bf16[576,256], index: 3, kind: input, shape index: {}]   ;;  %s14700_s0 = inlined_call_operand.vmem [shape: bf16[98,576], index: 0, kind: input, shape index: {}]   ;;  %s14701_s2 = inlined_call_operand.vmem [shape: f32[98,64], index: 2, kind: input, shape index: {}]   ;;  %s14702_s7 = inlined_call_operand.vmem [shape: f32[98,64], index: 7, kind: input, shape index: {}]   ;;  %s14703_s8 = inlined_call_operand.vmem [shape: f32[98,64], index: 8, kind: input, shape index: {}]   ;;  %s14704_s9 = inlined_call_operand.vmem [shape: bf16[9,98,1], index: 9, kind: input, shape index: {}]   ;;  %s14705_s5 = inlined_call_operand.vmem [shape: f32[1,256], index: 5, kind: input, shape index: {}]   ;;  %s14706_s6 = inlined_call_operand.vmem [shape: f32[98,64], index: 6, kind: input, shape index: {}]   ;;  %s14707_s10 = inlined_call_operand.vmem [shape: bf16[9,64,64], index: 10, kind: input, shape index: {}]   ;;  %s14708_s12 = inlined_call_operand.vmem [shape: bf16[9,64,64], index: 12, kind: input, shape index: {}]   ;;  %s14709_s11 = inlined_call_operand.vmem [shape: f32[1,64], index: 11, kind: input, shape index: {}]   ;;  %s14710_s13 = inlined_call_operand.vmem [shape: f32[1,64], index: 13, kind: input, shape index: {}]   ;;  %s14711_s15 = inlined_call_operand.vmem [shape: f32[98,64], index: 15, kind: output, shape index: {1}]   ;;  %s14712_s14 = inlined_call_operand.vmem [shape: bf16[98,128], index: 14, kind: output, shape index: {0}]  }
   0x1   :  { %v9845_v0 = vld [vmem:[%s14697_s4 + $0x74] ss:$8 sps:$4 sm:$0xff]   ;;  %9814 = vset.pattern.permute.xlu1 %v10435_v1  ;;  %9813 = vset.pattern.permute.xlu0 %v10435_v1  ;;  %v9849_v3 = vld [vmem:[%s14697_s4 + $0x70] ss:$8 sps:$4 sm:$0xff]   ;;  %v9851_v5 = vld [vmem:[%s14697_s4 + $0x64] ss:$8 sps:$4 sm:$0xff]  }
   0x2   :  { %v9847_v2 = vld [vmem:[%s14697_s4 + $0x174] ss:$8 sps:$4 sm:$0xff]   ;;  %821 = vmatprep.subr.bf16.mxu0 %v9845_v0  ;;  %v9850_v4 = vld [vmem:[%s14697_s4 + $0x170] ss:$8 sps:$4 sm:$0xff]   ;;  %v9853_v6 = vld [vmem:[%s14697_s4 + $0x164] ss:$8 sps:$4 sm:$0xff]  }
   0x3   :  { %922 = vmatprep.subr.bf16.mxu1 %v9847_v2  ;;  %822 = vmatpush1.bf16.msra.mxu0 %v9849_v3  ;;  %v9855_v7 = vld [vmem:[%s14697_s4 + $0x60] ss:$8 sps:$4 sm:$0xff]   ;;  %v9857_v9 = vld [vmem:[%s14697_s4 + $0x54] ss:$8 sps:$4 sm:$0xff]   ;;  %v9861_v11 = vld [vmem:[%s14697_s4 + $0x50] ss:$8 sps:$4 sm:$0xff]  }
   0x4   :  { %923 = vmatpush1.bf16.msra.mxu1 %v9850_v4  ;;  %823 = vmatprep.subr.bf16.mxu0 %v9851_v5  ;;  %v9856_v8 = vld [vmem:[%s14697_s4 + $0x160] ss:$8 sps:$4 sm:$0xff]   ;;  %v9859_v10 = vld [vmem:[%s14697_s4 + $0x154] ss:$8 sps:$4 sm:$0xff]   ;;  %v9862_v12 = vld [vmem:[%s14697_s4 + $0x150] ss:$8 sps:$4 sm:$0xff]  }
   0x5   :  { %924 = vmatprep.subr.bf16.mxu1 %v9853_v6  ;;  %v9863_v13 = vld [vmem:[%s14697_s4 + $0x44] ss:$8 sps:$4 sm:$0xff]   ;;  %v9867_v15 = vld [vmem:[%s14697_s4 + $0x40] ss:$8 sps:$4 sm:$0xff]   ;;  %v9869_v17 = vld [vmem:[%s14697_s4 + $0x34] ss:$8 sps:$4 sm:$0xff]  }
   0x6   :  { %v9865_v14 = vld [vmem:[%s14697_s4 + $0x144] ss:$8 sps:$4 sm:$0xff]   ;;  %v9868_v16 = vld [vmem:[%s14697_s4 + $0x140] ss:$8 sps:$4 sm:$0xff]   ;;  %v9871_v18 = vld [vmem:[%s14697_s4 + $0x134] ss:$8 sps:$4 sm:$0xff]  }
   0x7   :  { %824 = vmatpush1.bf16.msra.mxu0 %v9855_v7  ;;  %v9873_v19 = vld [vmem:[%s14697_s4 + $0x30] ss:$8 sps:$4 sm:$0xff]   ;;  %v9875_v21 = vld [vmem:[%s14697_s4 + $0x24] ss:$8 sps:$4 sm:$0xff]   ;;  %v9879_v23 = vld [vmem:[%s14697_s4 + $0x20] ss:$8 sps:$4 sm:$0xff]  }
   0x8   :  { %925 = vmatpush1.bf16.msra.mxu1 %v9856_v8  ;;  %825 = vmatprep.subr.bf16.mxu0 %v9857_v9  ;;  %v9874_v20 = vld [vmem:[%s14697_s4 + $0x130] ss:$8 sps:$4 sm:$0xff]   ;;  %v9877_v22 = vld [vmem:[%s14697_s4 + $0x124] ss:$8 sps:$4 sm:$0xff]   ;;  %v9880_v24 = vld [vmem:[%s14697_s4 + $0x120] ss:$8 sps:$4 sm:$0xff]  }
   0x9   :  { %926 = vmatprep.subr.bf16.mxu1 %v9859_v10  ;;  %v9881_v25 = vld [vmem:[%s14697_s4 + $0x14] ss:$8 sps:$4 sm:$0xff]   ;;  %v9885_v27 = vld [vmem:[%s14697_s4 + $0x10] ss:$8 sps:$4 sm:$0xff]   ;;  %v9887_v29 = vld [vmem:[%s14697_s4 + $0x4] ss:$8 sps:$4 sm:$0xff]  }
   0xa   :  { %v9883_v26 = vld [vmem:[%s14697_s4 + $0x114] ss:$8 sps:$4 sm:$0xff]   ;;  %v9886_v28 = vld [vmem:[%s14697_s4 + $0x110] ss:$8 sps:$4 sm:$0xff]   ;;  %v9889_v30 = vld [vmem:[%s14697_s4 + $0x104] ss:$8 sps:$4 sm:$0xff]  }
   0xb   :  { %826 = vmatpush1.bf16.msra.mxu0 %v9861_v11  ;;  %v9891_v31 = vld [vmem:[%s14697_s4] ss:$8 sps:$4 sm:$0xff]   ;;  %v9893_v33 = vld [vmem:[%s14697_s4 + $0xf4] ss:$8 sps:$4 sm:$0xff]   ;;  %v9897_v35 = vld [vmem:[%s14697_s4 + $0xf0] ss:$8 sps:$4 sm:$0xff]  }
   0xc   :  { %927 = vmatpush1.bf16.msra.mxu1 %v9862_v12  ;;  %827 = vmatprep.subr.bf16.mxu0 %v9863_v13  ;;  %v9892_v32 = vld [vmem:[%s14697_s4 + $0x100] ss:$8 sps:$4 sm:$0xff]   ;;  %v9895_v34 = vld [vmem:[%s14697_s4 + $0x1f4] ss:$8 sps:$4 sm:$0xff]   ;;  %v9898_v36 = vld [vmem:[%s14697_s4 + $0x1f0] ss:$8 sps:$4 sm:$0xff]  }
   0xd   :  { %928 = vmatprep.subr.bf16.mxu1 %v9865_v14  ;;  %v9899_v37 = vld [vmem:[%s14697_s4 + $0xe4] ss:$8 sps:$4 sm:$0xff]   ;;  %v9903_v39 = vld [vmem:[%s14697_s4 + $0xe0] ss:$8 sps:$4 sm:$0xff]   ;;  %v9905_v41 = vld [vmem:[%s14697_s4 + $0xd4] ss:$8 sps:$4 sm:$0xff]  }
   0xe   :  { %v9901_v38 = vld [vmem:[%s14697_s4 + $0x1e4] ss:$8 sps:$4 sm:$0xff]   ;;  %v9904_v40 = vld [vmem:[%s14697_s4 + $0x1e0] ss:$8 sps:$4 sm:$0xff]   ;;  %v9907_v42 = vld [vmem:[%s14697_s4 + $0x1d4] ss:$8 sps:$4 sm:$0xff]  }
   0xf   :  { %828 = vmatpush1.bf16.msra.mxu0 %v9867_v15  ;;  %v9909_v43 = vld [vmem:[%s14697_s4 + $0xd0] ss:$8 sps:$4 sm:$0xff]   ;;  %v9911_v45 = vld [vmem:[%s14697_s4 + $0xc4] ss:$8 sps:$4 sm:$0xff]   ;;  %v9915_v47 = vld [vmem:[%s14697_s4 + $0xc0] ss:$8 sps:$4 sm:$0xff]  }
  0x10   :  { %929 = vmatpush1.bf16.msra.mxu1 %v9868_v16  ;;  %829 = vmatprep.subr.bf16.mxu0 %v9869_v17  ;;  %v9910_v44 = vld [vmem:[%s14697_s4 + $0x1d0] ss:$8 sps:$4 sm:$0xff]   ;;  %v9913_v46 = vld [vmem:[%s14697_s4 + $0x1c4] ss:$8 sps:$4 sm:$0xff]   ;;  %v9916_v48 = vld [vmem:[%s14697_s4 + $0x1c0] ss:$8 sps:$4 sm:$0xff]  }
  0x11   :  { %930 = vmatprep.subr.bf16.mxu1 %v9871_v18  ;;  %v9917_v49 = vld [vmem:[%s14697_s4 + $0xb4] ss:$8 sps:$4 sm:$0xff]   ;;  %v9943_v50 = vld [vmem:[%s14698_s1 + $0x4] ss:$20 sps:$4 sm:$0xff]   ;;  %v9946_v52 = vld [vmem:[%s14698_s1 + $0xc] ss:$20 sps:$4 sm:$0xff]  }
  0x12   :  { %v9919_v51 = vld [vmem:[%s14697_s4 + $0x1b4] ss:$8 sps:$4 sm:$0xff]   ;;  %853 = vmatprep.mubr.bf16.mxu0 %v9943_v50  ;;  %v9921_v53 = vld [vmem:[%s14697_s4 + $0xb0] ss:$8 sps:$4 sm:$0xff]   ;;  %954 = vmatprep.mubr.bf16.mxu1 %v9946_v52  ;;  %v9923_v55 = vld [vmem:[%s14697_s4 + $0xa4] ss:$8 sps:$4 sm:$0xff]  }
  0x13   :  { %830 = vmatpush1.bf16.msra.mxu0 %v9873_v19  ;;  %v9922_v54 = vld [vmem:[%s14697_s4 + $0x1b0] ss:$8 sps:$4 sm:$0xff]   ;;  %v9925_v56 = vld [vmem:[%s14697_s4 + $0x1a4] ss:$8 sps:$4 sm:$0xff]   ;;  %v9927_v57 = vld [vmem:[%s14697_s4 + $0xa0] ss:$8 sps:$4 sm:$0xff]  }
  0x14   :  { %931 = vmatpush1.bf16.msra.mxu1 %v9874_v20  ;;  %831 = vmatprep.subr.bf16.mxu0 %v9875_v21  ;;  %v9928_v58 = vld [vmem:[%s14697_s4 + $0x1a0] ss:$8 sps:$4 sm:$0xff]   ;;  %v9929_v59 = vld [vmem:[%s14697_s4 + $0x94] ss:$8 sps:$4 sm:$0xff]   ;;  %v9933_v61 = vld [vmem:[%s14697_s4 + $0x90] ss:$8 sps:$4 sm:$0xff]  }
  0x15   :  { %932 = vmatprep.subr.bf16.mxu1 %v9877_v22  ;;  %v9931_v60 = vld [vmem:[%s14697_s4 + $0x194] ss:$8 sps:$4 sm:$0xff]   ;;  %v9934_v62 = vld [vmem:[%s14697_s4 + $0x190] ss:$8 sps:$4 sm:$0xff]   ;;  %v9935_v63 = vld [vmem:[%s14697_s4 + $0x84] ss:$8 sps:$4 sm:$0xff]  }
  0x16   :  { %v9937_v0 = vld [vmem:[%s14697_s4 + $0x184] ss:$8 sps:$4 sm:$0xff]   ;;  %v9939_v2 = vld [vmem:[%s14697_s4 + $0x80] ss:$8 sps:$4 sm:$0xff]   ;;  %v9949_v4 = vld [vmem:[%s14697_s4 + $0x234] ss:$8 sps:$4 sm:$0xff]  }
  0x17   :  { %832 = vmatpush1.bf16.msra.mxu0 %v9879_v23  ;;  %v9940_v3 = vld [vmem:[%s14697_s4 + $0x180] ss:$8 sps:$4 sm:$0xff]   ;;  %v9952_v5 = vld [vmem:[%s14699_s3 + $0x74] ss:$8 sps:$4 sm:$0xff]   ;;  %v9947_v8 = vld [vmem:[%s14697_s4 + $0x230] ss:$8 sps:$4 sm:$0xff]  }
  0x18   :  { %933 = vmatpush1.bf16.msra.mxu1 %v9880_v24  ;;  %833 = vmatprep.subr.bf16.mxu0 %v9881_v25  ;;  %v9941_v6 = vld [vmem:[%s14698_s1] ss:$20 sps:$4 sm:$0xff]   ;;  %v9944_v7 = vld [vmem:[%s14698_s1 + $0x8] ss:$20 sps:$4 sm:$0xff]   ;;  %v9950_v9 = vld [vmem:[%s14699_s3 + $0x70] ss:$8 sps:$4 sm:$0xff]  }
  0x19   :  { %934 = vmatprep.subr.bf16.mxu1 %v9883_v26  ;;  %v9955_v10 = vld [vmem:[%s14699_s3 + $0x64] ss:$8 sps:$4 sm:$0xff]   ;;  %v9958_v12 = vld [vmem:[%s14698_s1 + $0x34] ss:$20 sps:$4 sm:$0xff]   ;;  %v9962_v20 = vld [vmem:[%s14699_s3 + $0x50] ss:$8 sps:$4 sm:$0xff]  }
  0x1a   :  { %v9956_v11 = vld [vmem:[%s14698_s1 + $0x2c] ss:$20 sps:$4 sm:$0xff]   ;;  %v9964_v15 = vld [vmem:[%s14699_s3 + $0x54] ss:$8 sps:$4 sm:$0xff]   ;;  %v9961_v19 = vld [vmem:[%s14698_s1 + $0x30] ss:$20 sps:$4 sm:$0xff]  }
  0x1b   :  { %834 = vmatpush1.bf16.msra.mxu0 %v9885_v27  ;;  %v9970_v13 = vld [vmem:[%s14697_s4 + $0x224] ss:$8 sps:$4 sm:$0xff]   ;;  %v9953_v14 = vld [vmem:[%s14699_s3 + $0x60] ss:$8 sps:$4 sm:$0xff]   ;;  %v9994_v17 = vld [vmem:[%s14697_s4 + $0x214] ss:$8 sps:$4 sm:$0xff]  }
  0x1c   :  { %935 = vmatpush1.bf16.msra.mxu1 %v9886_v28  ;;  %835 = vmatprep.subr.bf16.mxu0 %v9887_v29  ;;  %v9968_v16 = vld [vmem:[%s14697_s4 + $0x220] ss:$8 sps:$4 sm:$0xff]   ;;  %v9967_v21 = vld [vmem:[%s14699_s3 + $0x44] ss:$8 sps:$4 sm:$0xff]   ;;  %v9973_v23 = vld [vmem:[%s14698_s1 + $0x5c] ss:$20 sps:$4 sm:$0xff]  }
  0x1d   :  { %936 = vmatprep.subr.bf16.mxu1 %v9889_v30  ;;  %v9960_v18 = vld [vmem:[%s14698_s1 + $0x28] ss:$20 sps:$4 sm:$0xff]   ;;  %v9992_v24 = vld [vmem:[%s14697_s4 + $0x210] ss:$8 sps:$4 sm:$0xff]   ;;  %v10021_v28 = vld [vmem:[%s14697_s4 + $0x204] ss:$8 sps:$4 sm:$0xff]  }
  0x1e   :  { %v9971_v22 = vld [vmem:[%s14698_s1 + $0x54] ss:$20 sps:$4 sm:$0xff]   ;;  %v9975_v29 = vld [vmem:[%s14698_s1 + $0x50] ss:$20 sps:$4 sm:$0xff]   ;;  %v9976_v30 = vld [vmem:[%s14698_s1 + $0x58] ss:$20 sps:$4 sm:$0xff]  }
  0x1f   :  { %836 = vmatpush1.bf16.msra.mxu0 %v9891_v31  ;;  %v9965_v25 = vld [vmem:[%s14699_s3 + $0x40] ss:$8 sps:$4 sm:$0xff]   ;;  %v9979_v26 = vld [vmem:[%s14699_s3 + $0x34] ss:$8 sps:$4 sm:$0xff]   ;;  %v9977_v31 = vld [vmem:[%s14699_s3 + $0x30] ss:$8 sps:$4 sm:$0xff]  }
  0x20   :  { %937 = vmatpush1.bf16.msra.mxu1 %v9892_v32  ;;  %837 = vmatprep.subr.bf16.mxu0 %v9893_v33  ;;  %v10019_v27 = vld [vmem:[%s14697_s4 + $0x200] ss:$8 sps:$4 sm:$0xff]   ;;  %v9983_v32 = vld [vmem:[%s14698_s1 + $0x7c] ss:$20 sps:$4 sm:$0xff]   ;;  %v9982_v33 = vld [vmem:[%s14699_s3 + $0x24] ss:$8 sps:$4 sm:$0xff]  }
  0x21   :  { %938 = vmatprep.subr.bf16.mxu1 %v9895_v34  ;;  %v9985_v34 = vld [vmem:[%s14698_s1 + $0x84] ss:$20 sps:$4 sm:$0xff]   ;;  %v10010_v50 = vld [vmem:[%s14698_s1 + $0xcc] ss:$20 sps:$4 sm:$0xff]   ;;  %vm2742_vm3 = vcmask 1043456   ;;  %vm4991_vm9 = vcmask 1044480  }
  0x22   :  { %v10007_v52 = vld [vmem:[%s14699_s3 + $0xe0] ss:$8 sps:$4 sm:$0xff]   ;;  %vm4568_vm4 = vsmask.f32 7424  ;;  %vm3003_vm5 = vsmask.f32 3328 }
  0x23   :  { %838 = vmatpush2.bf16.msra.mxu0 %v9897_v35  ;;  %v9980_v35 = vld [vmem:[%s14699_s3 + $0x20] ss:$8 sps:$4 sm:$0xff]   ;;  %vm3980_vm6 = vsmask.f32 256  ;;  %vm5407_vm7 = vsmask.f32 4352  ;;  %vm12668_vm8 = vmand %vm2742_vm3, %vm3003_vm5 }
  0x24   :  { %939 = vmatpush2.bf16.msra.mxu1 %v9898_v36  ;;  %839 = vmatprep.subr.bf16.mxu0 %v9899_v37  ;;  %v10037_v36 = vld [vmem:[%s14699_s3 + $0x174] ss:$8 sps:$4 sm:$0xff]   ;;  %vm4023_vm10 = vcmask 1040384   ;;  %vm5010_vm12 = vcmask 1045504   ;;  %vm5442_vm13 = vsmask.f32 5376 }
  0x25   :  { %940 = vmatprep.subr.bf16.mxu1 %v9901_v38  ;;  %v9991_v37 = vld [vmem:[%s14699_s3 + $0x14] ss:$8 sps:$4 sm:$0xff]   ;;  %v9987_v38 = vld [vmem:[%s14698_s1 + $0x78] ss:$20 sps:$4 sm:$0xff]   ;;  %vm12961_vm11 = vmand %vm4023_vm10, %vm3980_vm6  ;;  %vm2727_vm15 = vcmask 517120  }
  0x26   :  { %vm13468_vm14 = vmand %vm5010_vm12, %vm5442_vm13 }
  0x27   :  { %840 = vmatpush2.bf16.msra.mxu0 %v9903_v39  ;;  %v9988_v39 = vld [vmem:[%s14698_s1 + $0x80] ss:$20 sps:$4 sm:$0xff]  }
  0x28   :  { %941 = vmatpush2.bf16.msra.mxu1 %v9904_v40  ;;  %841 = vmatprep.subr.bf16.mxu0 %v9905_v41  ;;  %v9989_v40 = vld [vmem:[%s14699_s3 + $0x10] ss:$8 sps:$4 sm:$0xff]  }
  0x29   :  { %942 = vmatprep.subr.bf16.mxu1 %v9907_v42  ;;  %v9998_v41 = vld [vmem:[%s14698_s1 + $0xa4] ss:$20 sps:$4 sm:$0xff]  }
  0x2a   :  { %v9997_v42 = vld [vmem:[%s14699_s3 + $0x4] ss:$8 sps:$4 sm:$0xff]  }
  0x2b   :  { %842 = vmatpush2.bf16.msra.mxu0 %v9909_v43  ;;  %v10000_v43 = vld [vmem:[%s14698_s1 + $0xac] ss:$20 sps:$4 sm:$0xff]  }
  0x2c   :  { %943 = vmatpush2.bf16.msra.mxu1 %v9910_v44  ;;  %843 = vmatprep.subr.bf16.mxu0 %v9911_v45  ;;  %v9995_v44 = vld [vmem:[%s14699_s3] ss:$8 sps:$4 sm:$0xff]   ;;  %v10006_v45 = vld [vmem:[%s14699_s3 + $0xf4] ss:$8 sps:$4 sm:$0xff]  }
  0x2d   :  { %944 = vmatprep.subr.bf16.mxu1 %v9913_v46  ;;  %v10002_v46 = vld [vmem:[%s14698_s1 + $0xa0] ss:$20 sps:$4 sm:$0xff]  }
  0x2f   :  { %844 = vmatpush2.bf16.msra.mxu0 %v9915_v47  ;;  %v10003_v47 = vld [vmem:[%s14698_s1 + $0xa8] ss:$20 sps:$4 sm:$0xff]  }
  0x30   :  { %945 = vmatpush2.bf16.msra.mxu1 %v9916_v48  ;;  %845 = vmatprep.subr.bf16.mxu0 %v9917_v49  ;;  %v10004_v48 = vld [vmem:[%s14699_s3 + $0xf0] ss:$8 sps:$4 sm:$0xff]   ;;  %v10009_v49 = vld [vmem:[%s14699_s3 + $0xe4] ss:$8 sps:$4 sm:$0xff]  }
  0x31   :  { %946 = vmatprep.subr.bf16.mxu1 %v9919_v51  ;;  %v10012_v51 = vld [vmem:[%s14698_s1 + $0xd4] ss:$20 sps:$4 sm:$0xff]  }
  0x33   :  { %846 = vmatpush2.bf16.msra.mxu0 %v9921_v53  ;;  %v10018_v53 = vld [vmem:[%s14699_s3 + $0xd4] ss:$8 sps:$4 sm:$0xff]  }
  0x34   :  { %947 = vmatpush2.bf16.msra.mxu1 %v9922_v54  ;;  %847 = vmatprep.subr.bf16.mxu0 %v9923_v55  ;;  %v10014_v54 = vld [vmem:[%s14698_s1 + $0xc8] ss:$20 sps:$4 sm:$0xff]   ;;  %v197_v55 = vld [vmem:[%s14698_s1 + $0xf0] sm:$0x11] }
  0x35   :  { %948 = vmatprep.subr.bf16.mxu1 %v9925_v56  ;;  %v198_v56 = vld [vmem:[%s14698_s1 + $0xf8] sm:$0x11] }
  0x37   :  { %848 = vmatpush2.bf16.msra.mxu0 %v9927_v57  ;;  %v10015_v57 = vld [vmem:[%s14698_s1 + $0xd0] ss:$20 sps:$4 sm:$0xff]  }
  0x38   :  { %949 = vmatpush2.bf16.msra.mxu1 %v9928_v58  ;;  %849 = vmatprep.subr.bf16.mxu0 %v9929_v59  ;;  %v10016_v58 = vld [vmem:[%s14699_s3 + $0xd0] ss:$8 sps:$4 sm:$0xff]   ;;  %v8190_v59 = vcombine.high %v197_v55, %v197_v55 }
  0x39   :  { %950 = vmatprep.subr.bf16.mxu1 %v9931_v60  ;;  %v10024_v60 = vld [vmem:[%s14699_s3 + $0xc4] ss:$8 sps:$4 sm:$0xff]  }
  0x3b   :  { %850 = vmatpush2.bf16.msra.mxu0 %v9933_v61  ;;  %v8192_v61 = vcombine.high %v198_v56, %v198_v56 }
  0x3c   :  { %951 = vmatpush2.bf16.msra.mxu1 %v9934_v62  ;;  %851 = vmatprep.subr.bf16.mxu0 %v9935_v63  ;;  %v10022_v62 = vld [vmem:[%s14699_s3 + $0xc0] ss:$8 sps:$4 sm:$0xff]   ;;  %v10031_v63 = vld [vmem:[%s14699_s3 + $0xb4] ss:$8 sps:$4 sm:$0xff]  }
  0x3d   :  { %952 = vmatprep.subr.bf16.mxu1 %v9937_v0  ;;  %v8189_v0 = vcombine.low %v197_v55, %v197_v55  ;;  %v10090_v55 = vld [vmem:[%s14700_s0 + $0x78] ss:$20 sps:$4 sm:$0xff]  }
  0x3f   :  { %852 = vmatpush2.bf16.msra.mxu0 %v9939_v2  ;;  %v8191_v2 = vcombine.low %v198_v56, %v198_v56  ;;  %v10086_v56 = vld [vmem:[%s14699_s3 + $0x1f0] ss:$8 sps:$4 sm:$0xff]  }
  0x40   :  { %953 = vmatpush2.bf16.msra.mxu1 %v9940_v3  ;;  %1031 = vmatprep.subr.bf16.mxu0 %v9949_v4  ;;  %v10029_v3 = vld [vmem:[%s14699_s3 + $0xb0] ss:$8 sps:$4 sm:$0xff]   ;;  %v10034_v4 = vld [vmem:[%s14699_s3 + $0xa4] ss:$8 sps:$4 sm:$0xff]  }
  0x41   :  { %1672 = vmatprep.subr.bf16.mxu1 %v9952_v5  ;;  %v10050_v5 = vld [vmem:[%s14700_s0 + $0x4] ss:$20 sps:$4 sm:$0xff]  }
  0x42   :  { %854 = vmatmul.mubr.bf16.vlgmr.msra.gmra.mxu0 %v9941_v6  ;;  %v10032_v6 = vld [vmem:[%s14699_s3 + $0xa0] ss:$8 sps:$4 sm:$0xff]  }
  0x43   :  { %955 = vmatmul.mubr.bf16.vlgmr.msra.gmra.mxu1 %v9944_v7  ;;  %1032 = vmatpush1.bf16.msra.mxu0 %v9947_v8  ;;  %v10041_v7 = vld [vmem:[%s14699_s3 + $0x94] ss:$8 sps:$4 sm:$0xff]   ;;  %v10035_v8 = vld [vmem:[%s14699_s3 + $0x170] ss:$8 sps:$4 sm:$0xff]  }
  0x44   :  { %1673 = vmatpush1.bf16.msra.mxu1 %v9950_v9  ;;  %863 = vmatprep.mubr.bf16.mxu0 %v9956_v11  ;;  %v10038_v9 = vld [vmem:[%s14698_s1 + $0x10] ss:$20 sps:$4 sm:$0xff]  }
  0x45   :  { %1674 = vmatprep.subr.bf16.mxu1 %v9955_v10  ;;  %964 = vmatprep.mubr.bf16.mxu1 %v9958_v12  ;;  %v10039_v10 = vld [vmem:[%s14699_s3 + $0x90] ss:$8 sps:$4 sm:$0xff]   ;;  %v10044_v11 = vld [vmem:[%s14699_s3 + $0x164] ss:$8 sps:$4 sm:$0xff]  }
  0x46   :  { %1033 = vmatprep.subr.bf16.mxu0 %v9970_v13  ;;  %v10047_v12 = vld [vmem:[%s14699_s3 + $0x84] ss:$8 sps:$4 sm:$0xff]   ;;  %v10042_v13 = vld [vmem:[%s14699_s3 + $0x160] ss:$8 sps:$4 sm:$0xff]  }
  0x47   :  { %1034 = vmatpush1.bf16.msra.mxu0 %v9968_v16  ;;  %v10057_v16 = vld [vmem:[%s14699_s3 + $0x234] ss:$8 sps:$4 sm:$0xff]  }
  0x48   :  { %1675 = vmatpush1.bf16.msra.mxu1 %v9953_v14  ;;  %1035 = vmatprep.subr.bf16.mxu0 %v9994_v17  ;;  %v10045_v14 = vld [vmem:[%s14699_s3 + $0x80] ss:$8 sps:$4 sm:$0xff]  }
  0x49   :  { %1676 = vmatprep.subr.bf16.mxu1 %v9964_v15  ;;  %v10053_v15 = vld [vmem:[%s14699_s3 + $0x154] ss:$8 sps:$4 sm:$0xff]  }
  0x4a   :  { %864 = vmatmul.mubr.bf16.gmra.mxu0 %v9960_v18  ;;  %v10048_v17 = vld [vmem:[%s14700_s0] ss:$20 sps:$4 sm:$0xff]   ;;  %v10051_v18 = vld [vmem:[%s14699_s3 + $0x150] ss:$8 sps:$4 sm:$0xff]  }
  0x4b   :  { %965 = vmatmul.mubr.bf16.gmra.mxu1 %v9961_v19  ;;  %873 = vmatprep.mubr.bf16.mxu0 %v9971_v22  ;;  %v10054_v19 = vld [vmem:[%s14698_s1 + $0x38] ss:$20 sps:$4 sm:$0xff]  }
  0x4c   :  { %1677 = vmatpush1.bf16.msra.mxu1 %v9962_v20  ;;  %974 = vmatprep.mubr.bf16.mxu1 %v9973_v23  ;;  %v10055_v20 = vld [vmem:[%s14699_s3 + $0x230] ss:$8 sps:$4 sm:$0xff]   ;;  %v10061_v22 = vld [vmem:[%s14700_s0 + $0x2c] ss:$20 sps:$4 sm:$0xff]  }
  0x4d   :  { %1678 = vmatprep.subr.bf16.mxu1 %v9967_v21  ;;  %1036 = vmatpush1.bf16.msra.mxu0 %v9992_v24  ;;  %v10060_v21 = vld [vmem:[%s14699_s3 + $0x144] ss:$8 sps:$4 sm:$0xff]   ;;  %v10058_v24 = vld [vmem:[%s14699_s3 + $0x140] ss:$8 sps:$4 sm:$0xff]  }
  0x4e   :  { %1037 = vmatprep.subr.bf16.mxu0 %v10021_v28  ;;  %v10078_v23 = vld [vmem:[%s14699_s3 + $0x224] ss:$8 sps:$4 sm:$0xff]   ;;  %v10063_v28 = vld [vmem:[%s14699_s3 + $0x130] ss:$8 sps:$4 sm:$0xff]  }
  0x50   :  { %1679 = vmatpush1.bf16.msra.mxu1 %v9965_v25  ;;  %v10076_v25 = vld [vmem:[%s14699_s3 + $0x220] ss:$8 sps:$4 sm:$0xff]  }
  0x51   :  { %1680 = vmatprep.subr.bf16.mxu1 %v9979_v26  ;;  %1038 = vmatpush1.bf16.msra.mxu0 %v10019_v27  ;;  %v10065_v26 = vld [vmem:[%s14699_s3 + $0x134] ss:$8 sps:$4 sm:$0xff]  }
  0x52   :  { %874 = vmatmul.mubr.bf16.gmra.mxu0 %v9975_v29  ;;  %1773 = vmatprep.subr.bf16.mxu0 %v10037_v36  ;;  %v10096_v27 = vld [vmem:[%s14699_s3 + $0x214] ss:$8 sps:$4 sm:$0xff]  }
  0x53   :  { %975 = vmatmul.mubr.bf16.gmra.mxu1 %v9976_v30  ;;  %883 = vmatprep.mubr.bf16.mxu0 %v9983_v32  ;;  %v10066_v29 = vld [vmem:[%s14698_s1 + $0x60] ss:$20 sps:$4 sm:$0xff]   ;;  %v10067_v30 = vld [vmem:[%s14700_s0 + $0x28] ss:$20 sps:$4 sm:$0xff]  }
  0x54   :  { %1681 = vmatpush1.bf16.msra.mxu1 %v9977_v31  ;;  %984 = vmatprep.mubr.bf16.mxu1 %v9985_v34  ;;  %v10070_v31 = vld [vmem:[%s14699_s3 + $0x124] ss:$8 sps:$4 sm:$0xff]   ;;  %v10071_v32 = vld [vmem:[%s14700_s0 + $0x54] ss:$20 sps:$4 sm:$0xff]  }
  0x55   :  { %1682 = vmatprep.subr.bf16.mxu1 %v9982_v33  ;;  %v10094_v33 = vld [vmem:[%s14699_s3 + $0x210] ss:$8 sps:$4 sm:$0xff]   ;;  %v10119_v34 = vld [vmem:[%s14699_s3 + $0x204] ss:$8 sps:$4 sm:$0xff]   ;;  %v10075_v36 = vld [vmem:[%s14699_s3 + $0x114] ss:$8 sps:$4 sm:$0xff]  }
  0x58   :  { %1683 = vmatpush1.bf16.msra.mxu1 %v9980_v35  ;;  %v10068_v35 = vld [vmem:[%s14699_s3 + $0x120] ss:$8 sps:$4 sm:$0xff]  }
  0x59   :  { %1684 = vmatprep.subr.bf16.mxu1 %v9991_v37  ;;  %v10117_v37 = vld [vmem:[%s14699_s3 + $0x200] ss:$8 sps:$4 sm:$0xff]  }
  0x5a   :  { %884 = vmatmul.mubr.bf16.gmra.mxu0 %v9987_v38  ;;  %v11009_v38 = vld [vmem:[%s14701_s2] sm:$0xff] }
  0x5b   :  { %985 = vmatmul.mubr.bf16.gmra.mxu1 %v9988_v39  ;;  %893 = vmatprep.mubr.bf16.mxu0 %v9998_v41  ;;  %v10079_v39 = vld [vmem:[%s14698_s1 + $0x88] ss:$20 sps:$4 sm:$0xff]   ;;  %v2143_v41 = vld [vmem:[%s14702_s7] sm:$0xff] }
  0x5c   :  { %1685 = vmatpush1.bf16.msra.mxu1 %v9989_v40  ;;  %994 = vmatprep.mubr.bf16.mxu1 %v10000_v43  ;;  %v10080_v40 = vld [vmem:[%s14700_s0 + $0x50] ss:$20 sps:$4 sm:$0xff]   ;;  %v2156_v43 = vmul.f32 %v2143_v41, %v11009_v38 }
  0x5d   :  { %1686 = vmatprep.subr.bf16.mxu1 %v9997_v42  ;;  %v10073_v42 = vld [vmem:[%s14699_s3 + $0x110] ss:$8 sps:$4 sm:$0xff]  }
  0x5e   :  { %2182 = vrot.lane.b32.xlu0 %v2156_v43, %s10436_s29  ;;  %v2153_v41 = vld [vmem:[%s14702_s7 + $0x50] sm:$0xff]  ;;  %v10125_v43 = vld [vmem:[%s14699_s3 + $0x180] ss:$8 sps:$4 sm:$0xff]  }
  0x60   :  { %1687 = vmatpush1.bf16.msra.mxu1 %v9995_v44  ;;  %v11027_v44 = vld [vmem:[%s14701_s2 + $0x8] sm:$0xff] }
  0x61   :  { %1688 = vmatprep.subr.bf16.mxu1 %v10006_v45  ;;  %v2144_v45 = vld [vmem:[%s14702_s7 + $0x8] sm:$0xff] }
  0x62   :  { %894 = vmatmul.mubr.bf16.gmra.mxu0 %v10002_v46  ;;  %v10083_v46 = vld [vmem:[%s14699_s3 + $0x104] ss:$8 sps:$4 sm:$0xff]  }
  0x63   :  { %995 = vmatmul.mubr.bf16.gmra.mxu1 %v10003_v47  ;;  %903 = vmatprep.mubr.bf16.mxu0 %v10010_v50  ;;  %v10084_v47 = vld [vmem:[%s14700_s0 + $0x7c] ss:$20 sps:$4 sm:$0xff]  }
  0x64   :  { %1689 = vmatpush2.bf16.msra.mxu1 %v10004_v48  ;;  %1004 = vmatprep.mubr.bf16.mxu1 %v10012_v51  ;;  %v2157_v48 = vmul.f32 %v2144_v45, %v11027_v44  ;;  %v11048_v50 = vld [vmem:[%s14701_s2 + $0x10] sm:$0xff]  ;;  %v2469_v45 = vld [vmem:[%s14703_s8 + $0x8] sm:$0xff] }
  0x65   :  { %1690 = vmatprep.subr.bf16.mxu1 %v10009_v49  ;;  %v10081_v49 = vld [vmem:[%s14699_s3 + $0x100] ss:$8 sps:$4 sm:$0xff]   ;;  %v2145_v51 = vld [vmem:[%s14702_s7 + $0x10] sm:$0xff] }
  0x66   :  { %2184 = vrot.lane.b32.xlu0 %v2157_v48, %s10436_s29  ;;  %v10128_v48 = vld [vmem:[%s14700_s0 + $0x8] ss:$20 sps:$4 sm:$0xff]  }
  0x68   :  { %1691 = vmatpush2.bf16.msra.mxu1 %v10007_v52  ;;  %v10088_v52 = vld [vmem:[%s14699_s3 + $0x1f4] ss:$8 sps:$4 sm:$0xff]  }
  0x69   :  { %1692 = vmatprep.subr.bf16.mxu1 %v10018_v53  ;;  %v2158_v53 = vmul.f32 %v2145_v51, %v11048_v50 }
  0x6a   :  { %904 = vmatmul.mubr.bf16.gmra.mxu0 %v10014_v54  ;;  %v10089_v54 = vld [vmem:[%s14698_s1 + $0xb0] ss:$20 sps:$4 sm:$0xff]  }
  0x6b   :  { %1005 = vmatmul.mubr.bf16.gmra.mxu1 %v10015_v57  ;;  %913 = vmatprep.mubr.bf16.mxu0 %v8190_v59  ;;  %v11071_v57 = vld [vmem:[%s14701_s2 + $0x18] sm:$0xff]  ;;  %v10093_v59 = vld [vmem:[%s14699_s3 + $0x1e4] ss:$8 sps:$4 sm:$0xff]  }
  0x6c   :  { %1693 = vmatpush2.bf16.msra.mxu1 %v10016_v58  ;;  %1014 = vmatprep.mubr.bf16.mxu1 %v8192_v61  ;;  %v2146_v58 = vld [vmem:[%s14702_s7 + $0x18] sm:$0xff] }
  0x6d   :  { %1694 = vmatprep.subr.bf16.mxu1 %v10024_v60  ;;  %2186 = vrot.lane.b32.xlu1 %v2158_v53, %s10436_s29  ;;  %v10097_v60 = vld [vmem:[%s14700_s0 + $0xa4] ss:$20 sps:$4 sm:$0xff]   ;;  %v2159_v61 = vmul.f32 %v2146_v58, %v11071_v57  ;;  %v2470_v53 = vld [vmem:[%s14703_s8 + $0x10] sm:$0xff] }
  0x6e   :  { %v2471_v58 = vld [vmem:[%s14703_s8 + $0x18] sm:$0xff] }
  0x70   :  { %1695 = vmatpush2.bf16.msra.mxu1 %v10022_v62  ;;  %v10091_v62 = vld [vmem:[%s14699_s3 + $0x1e0] ss:$8 sps:$4 sm:$0xff]  }
  0x71   :  { %1696 = vmatprep.subr.bf16.mxu1 %v10031_v63  ;;  %v11091_v63 = vld [vmem:[%s14701_s2 + $0x20] sm:$0xff]  ;;  %2188 = vrot.lane.b32.xlu1 %v2159_v61, %s10436_s29 }
  0x72   :  { %914 = vmatmul.mubr.bf16.gmra.mxu0 %v8189_v0  ;;  %v2147_v0 = vld [vmem:[%s14702_s7 + $0x20] sm:$0xff] }
  0x73   :  { %1015 = vmatmul.mubr.bf16.gmra.mxu1 %v8191_v2  ;;  %1055 = vmatprep.mubr.bf16.mxu0 %v10435_v1  ;;  %v10101_v2 = vld [vmem:[%s14699_s3 + $0x1d4] ss:$8 sps:$4 sm:$0xff]  }
  0x74   :  { %1697 = vmatpush2.bf16.msra.mxu1 %v10029_v3  ;;  %1704 = vmatprep.mubr.bf16.mxu1 %v10050_v5  ;;  %v2160_v3 = vmul.f32 %v2147_v0, %v11091_v63  ;;  %v10103_v5 = vld [vmem:[%s14700_s0 + $0xa0] ss:$20 sps:$4 sm:$0xff]   ;;  %v2473_v0 = vld [vmem:[%s14703_s8 + $0x28] sm:$0xff] }
  0x75   :  { %1698 = vmatprep.subr.bf16.mxu1 %v10034_v4  ;;  %v10102_v4 = vld [vmem:[%s14698_s1 + $0xd8] ss:$20 sps:$4 sm:$0xff]   ;;  %v10139_v61 = vld [vmem:[%s14700_s0 + $0x60] ss:$20 sps:$4 sm:$0xff]  }
  0x76   :  { %2190 = vrot.lane.b32.xlu0 %v2160_v3, %s10436_s29  ;;  %v10142_v3 = vld [vmem:[%s14700_s0 + $0x80] ss:$20 sps:$4 sm:$0xff]  }
  0x78   :  { %1699 = vmatpush2.bf16.msra.mxu1 %v10032_v6  ;;  %v10099_v6 = vld [vmem:[%s14699_s3 + $0x1d0] ss:$8 sps:$4 sm:$0xff]  }
  0x79   :  { %1700 = vmatprep.subr.bf16.mxu1 %v10041_v7  ;;  %v11114_v7 = vld [vmem:[%s14701_s2 + $0x28] sm:$0xff] }
  0x7a   :  { %8266 = vmatmul.mubr.msk.bf16.vlgmr.msra.gmra.mxu0 %vm799_vm0, %v10038_v9  ;;  %v10106_v9 = vld [vmem:[%s14699_s3 + $0x1c4] ss:$8 sps:$4 sm:$0xff]  }
  0x7b   :  { %1774 = vmatpush1.bf16.msra.mxu0 %v10035_v8  ;;  %1065 = vmatprep.mubr.bf16.mxu0 %v10435_v1  ;;  %v2148_v8 = vld [vmem:[%s14702_s7 + $0x28] sm:$0xff] }
  0x7c   :  { %1701 = vmatpush2.bf16.msra.mxu1 %v10039_v10  ;;  %1775 = vmatprep.subr.bf16.mxu0 %v10044_v11  ;;  %v10107_v10 = vld [vmem:[%s14700_s0 + $0xcc] ss:$20 sps:$4 sm:$0xff]   ;;  %v2161_v11 = vmul.f32 %v2148_v8, %v11114_v7 }
  0x7d   :  { %1702 = vmatprep.subr.bf16.mxu1 %v10047_v12  ;;  %v11129_v12 = vld [vmem:[%s14701_s2 + $0x30] sm:$0xff]  ;;  %v2476_v8 = vld [vmem:[%s14703_s8 + $0x40] sm:$0xff] }
  0x7e   :  { %2192 = vrot.lane.b32.xlu1 %v2161_v11, %s10436_s29  ;;  %v10148_v11 = vld [vmem:[%s14700_s0 + $0xd4] ss:$20 sps:$4 sm:$0xff]  }
  0x7f   :  { %1776 = vmatpush1.bf16.msra.mxu0 %v10042_v13  ;;  %v2149_v13 = vld [vmem:[%s14702_s7 + $0x30] sm:$0xff] }
  0x80   :  { %1703 = vmatpush2.bf16.msra.mxu1 %v10045_v14  ;;  %1777 = vmatprep.subr.bf16.mxu0 %v10053_v15  ;;  %v2162_v14 = vmul.f32 %v2149_v13, %v11129_v12  ;;  %v10104_v15 = vld [vmem:[%s14699_s3 + $0x1c0] ss:$8 sps:$4 sm:$0xff]  }
  0x81   :  { %1882 = vmatprep.subr.bf16.mxu1 %v10057_v16  ;;  %v10111_v16 = vld [vmem:[%s14699_s3 + $0x1b4] ss:$8 sps:$4 sm:$0xff]   ;;  %v2477_v13 = vld [vmem:[%s14703_s8 + $0x48] sm:$0xff] }
  0x82   :  { %8267 = vmatmul.mubr.msk.bf16.gmra.mxu0 %vm799_vm0, %v10054_v19  ;;  %2194 = vrot.lane.b32.xlu0 %v2162_v14, %s10436_s29  ;;  %v11154_v19 = vld [vmem:[%s14701_s2 + $0x38] sm:$0xff] }
  0x83   :  { %1705 = vmatmul.mubr.bf16.vlgmr.msra.gmra.mxu1 %v10048_v17  ;;  %1778 = vmatpush1.bf16.msra.mxu0 %v10051_v18  ;;  %v10112_v17 = vld [vmem:[%s14698_s1 + $0x100] ss:$0 sps:$4 sm:$0x11]   ;;  %v86_v18 = vld [vmem:[%s14700_s0 + $0xf0] sm:$0x11] }
  0x84   :  { %1883 = vmatpush1.bf16.msra.mxu1 %v10055_v20  ;;  %1779 = vmatprep.subr.bf16.mxu0 %v10060_v21  ;;  %v2150_v20 = vld [vmem:[%s14702_s7 + $0x38] sm:$0xff] }
  0x85   :  { %1075 = vmatprep.mubr.bf16.mxu0 %v10435_v1  ;;  %1714 = vmatprep.mubr.bf16.mxu1 %v10061_v22  ;;  %v10113_v21 = vld [vmem:[%s14700_s0 + $0xc8] ss:$20 sps:$4 sm:$0xff]   ;;  %v2163_v22 = vmul.f32 %v2150_v20, %v11154_v19  ;;  %v10154_v20 = vld [vmem:[%s14700_s0 + $0x100] ss:$0 sps:$4 sm:$0x11]  }
  0x86   :  { %1884 = vmatprep.subr.bf16.mxu1 %v10078_v23  ;;  %v11166_v23 = vld [vmem:[%s14701_s2 + $0x40] sm:$0xff]  ;;  %v87_v14 = vld [vmem:[%s14700_s0 + $0xf8] sm:$0x11] }
  0x87   :  { %1780 = vmatpush1.bf16.msra.mxu0 %v10058_v24  ;;  %v2151_v24 = vld [vmem:[%s14702_s7 + $0x40] sm:$0xff]  ;;  %2196 = vrot.lane.b32.xlu1 %v2163_v22, %s10436_s29 }
  0x88   :  { %1885 = vmatpush1.bf16.msra.mxu1 %v10076_v25  ;;  %1781 = vmatprep.subr.bf16.mxu0 %v10065_v26  ;;  %v10109_v25 = vld [vmem:[%s14699_s3 + $0x1b0] ss:$8 sps:$4 sm:$0xff]   ;;  %v8304_v26 = vcombine.high %v86_v18, %v86_v18 }
  0x89   :  { %1886 = vmatprep.subr.bf16.mxu1 %v10096_v27  ;;  %v2164_v27 = vmul.f32 %v2151_v24, %v11166_v23 }
  0x8a   :  { %8268 = vmatmul.mubr.msk.bf16.gmra.mxu0 %vm799_vm0, %v10066_v29  ;;  %v10130_v29 = vld [vmem:[%s14700_s0 + $0xc] ss:$20 sps:$4 sm:$0xff]  }
  0x8b   :  { %1715 = vmatmul.mubr.bf16.gmra.mxu1 %v10067_v30  ;;  %1782 = vmatpush1.bf16.msra.mxu0 %v10063_v28  ;;  %v10116_v28 = vld [vmem:[%s14699_s3 + $0x1a4] ss:$8 sps:$4 sm:$0xff]  }
  0x8c   :  { %1085 = vmatprep.mubr.bf16.mxu0 %v10435_v1  ;;  %1783 = vmatprep.subr.bf16.mxu0 %v10070_v31  ;;  %v11186_v30 = vld [vmem:[%s14701_s2 + $0x48] sm:$0xff] }
  0x8d   :  { %1724 = vmatprep.mubr.bf16.mxu1 %v10071_v32  ;;  %1887 = vmatpush1.bf16.msra.mxu1 %v10094_v33  ;;  %14817 = vst [vmem:[#allocation2_spill] sm:$0xff] %v11186_v30  ;;  %v2152_v31 = vld [vmem:[%s14702_s7 + $0x48] sm:$0xff] }
  0x8e   :  { %1888 = vmatprep.subr.bf16.mxu1 %v10119_v34  ;;  %2198 = vrot.lane.b32.xlu0 %v2164_v27, %s10436_s29  ;;  %v2165_v32 = vmul.f32 %v2152_v31, %v11186_v30  ;;  %v10114_v33 = vld [vmem:[%s14699_s3 + $0x1a0] ss:$8 sps:$4 sm:$0xff]   ;;  %v10123_v34 = vld [vmem:[%s14699_s3 + $0x194] ss:$8 sps:$4 sm:$0xff]  }
  0x8f   :  { %1784 = vmatpush1.bf16.msra.mxu0 %v10068_v35  ;;  %v8303_v35 = vcombine.low %v86_v18, %v86_v18  ;;  %v8305_v18 = vcombine.low %v87_v14, %v87_v14 }
  0x90   :  { %1785 = vmatprep.subr.bf16.mxu0 %v10075_v36  ;;  %2200 = vrot.lane.b32.xlu1 %v2165_v32, %s10436_s29  ;;  %v10121_v36 = vld [vmem:[%s14699_s3 + $0x190] ss:$8 sps:$4 sm:$0xff]  }
  0x91   :  { %1889 = vmatpush1.bf16.msra.mxu1 %v10117_v37  ;;  %v2468_v37 = vld [vmem:[%s14703_s8] sm:$0xff] }
  0x92   :  { %8269 = vmatmul.mubr.msk.bf16.gmra.mxu0 %vm799_vm0, %v10079_v39  ;;  %2338 = vrot.lane.b32.xlu0 %v11009_v38, %s10436_s29  ;;  %v10127_v39 = vld [vmem:[%s14699_s3 + $0x184] ss:$8 sps:$4 sm:$0xff]  }
  0x93   :  { %1725 = vmatmul.mubr.bf16.gmra.mxu1 %v10080_v40  ;;  %1786 = vmatpush1.bf16.msra.mxu0 %v10073_v42  ;;  %v11217_v40 = vld [vmem:[%s14701_s2 + $0x50] sm:$0xff] }
  0x94   :  { %1095 = vmatprep.mubr.bf16.mxu0 %v10435_v1  ;;  %1787 = vmatprep.subr.bf16.mxu0 %v10083_v46  ;;  %14818 = vst [vmem:[#allocation3_spill] sm:$0xff] %v11217_v40  ;;  %v2166_v42 = vmul.f32 %v2153_v41, %v11217_v40  ;;  %v11235_v46 = vld [vmem:[%s14701_s2 + $0x58] sm:$0xff] }
  0x95   :  { %1734 = vmatprep.mubr.bf16.mxu1 %v10084_v47  ;;  %2340 = vrot.lane.b32.xlu1 %v11027_v44, %s10436_s29  ;;  %14819 = vst [vmem:[#allocation4_spill] sm:$0xff] %v11235_v46  ;;  %v2154_v47 = vld [vmem:[%s14702_s7 + $0x58] sm:$0xff] }
  0x96   :  { %2494 = vrot.lane.b32.xlu0 %v2468_v37, %s10436_s29  ;;  %v2167_v51 = vmul.f32 %v2154_v47, %v11235_v46  ;;  %v2479_v41 = vld [vmem:[%s14703_s8 + $0x58] sm:$0xff] }
  0x97   :  { %1788 = vmatpush1.bf16.msra.mxu0 %v10081_v49  ;;  %v10131_v49 = vld [vmem:[%s14700_s0 + $0x10] ss:$20 sps:$4 sm:$0xff]  }
  0x98   :  { %1789 = vmatprep.subr.bf16.mxu0 %v10088_v52  ;;  %v10132_v52 = vld [vmem:[%s14700_s0 + $0x34] ss:$20 sps:$4 sm:$0xff]  }
  0x99   :  { %2496 = vrot.lane.b32.xlu1 %v2469_v45, %s10436_s29 }
  0x9a   :  { %8270 = vmatmul.mubr.msk.bf16.gmra.mxu0 %vm799_vm0, %v10089_v54  ;;  %2202 = vrot.lane.b32.xlu0 %v2166_v42, %s10436_s29  ;;  %v10134_v54 = vld [vmem:[%s14700_s0 + $0x30] ss:$20 sps:$4 sm:$0xff]  }
  0x9b   :  { %1735 = vmatmul.mubr.bf16.gmra.mxu1 %v10090_v55  ;;  %1790 = vmatpush2.bf16.msra.mxu0 %v10086_v56  ;;  %v10135_v55 = vld [vmem:[%s14700_s0 + $0x38] ss:$20 sps:$4 sm:$0xff]   ;;  %v10136_v56 = vld [vmem:[%s14700_s0 + $0x5c] ss:$20 sps:$4 sm:$0xff]  }
  0x9c   :  { %1105 = vmatprep.mubr.bf16.mxu0 %v10435_v1  ;;  %1791 = vmatprep.subr.bf16.mxu0 %v10093_v59  ;;  %v2472_v59 = vld [vmem:[%s14703_s8 + $0x20] sm:$0xff]  ;;  %v2478_v42 = vld [vmem:[%s14703_s8 + $0x50] sm:$0xff] }
  0x9d   :  { %1744 = vmatprep.mubr.bf16.mxu1 %v10097_v60  ;;  %2204 = vrot.lane.b32.xlu1 %v2167_v51, %s10436_s29  ;;  %v10138_v60 = vld [vmem:[%s14700_s0 + $0x58] ss:$20 sps:$4 sm:$0xff]  }
  0x9e   :  { %2342 = vrot.lane.b32.xlu0 %v11048_v50, %s10436_s29  ;;  %v8434_v51 = vld [vmem:[%s14704_s9 + $0x38] sm:$0xf] }
  0x9f   :  { %1792 = vmatpush2.bf16.msra.mxu0 %v10091_v62  ;;  %v10140_v62 = vld [vmem:[%s14700_s0 + $0x84] ss:$20 sps:$4 sm:$0xff]  }
  0xa0   :  { %1793 = vmatprep.subr.bf16.mxu0 %v10101_v2  ;;  %v2474_v2 = vld [vmem:[%s14703_s8 + $0x30] sm:$0xff] }
  0xa1   :  { %2344 = vrot.lane.b32.xlu1 %v11071_v57, %s10436_s29 }
  0xa2   :  { %8271 = vmatmul.mubr.msk.bf16.gmra.mxu0 %vm799_vm0, %v10102_v4  ;;  %2498 = vrot.lane.b32.xlu0 %v2470_v53, %s10436_s29  ;;  %v10143_v4 = vld [vmem:[%s14700_s0 + $0x88] ss:$20 sps:$4 sm:$0xff]  }
  0xa3   :  { %1745 = vmatmul.mubr.bf16.gmra.mxu1 %v10103_v5  ;;  %1794 = vmatpush2.bf16.msra.mxu0 %v10099_v6  ;;  %v10144_v5 = vld [vmem:[%s14700_s0 + $0xac] ss:$20 sps:$4 sm:$0xff]   ;;  %v2475_v6 = vld [vmem:[%s14703_s8 + $0x38] sm:$0xff] }
  0xa4   :  { %1115 = vmatprep.mubr.bf16.mxu0 %v10435_v1  ;;  %1795 = vmatprep.subr.bf16.mxu0 %v10106_v9  ;;  %v10146_v9 = vld [vmem:[%s14700_s0 + $0xa8] ss:$20 sps:$4 sm:$0xff]  }
  0xa5   :  { %1754 = vmatprep.mubr.bf16.mxu1 %v10107_v10  ;;  %2500 = vrot.lane.b32.xlu1 %v2471_v58, %s10436_s29  ;;  %v10147_v10 = vld [vmem:[%s14700_s0 + $0xb0] ss:$20 sps:$4 sm:$0xff]  }
  0xa6   :  { %2346 = vrot.lane.b32.xlu0 %v11091_v63, %s10436_s29 }
  0xa7   :  { %1796 = vmatpush2.bf16.msra.mxu0 %v10104_v15  ;;  %v10150_v15 = vld [vmem:[%s14700_s0 + $0xd0] ss:$20 sps:$4 sm:$0xff]  }
  0xa8   :  { %1797 = vmatprep.subr.bf16.mxu0 %v10111_v16  ;;  %v10151_v16 = vld [vmem:[%s14700_s0 + $0xd8] ss:$20 sps:$4 sm:$0xff]  }
  0xa9   :  { %2348 = vrot.lane.b32.xlu1 %v11114_v7, %s10436_s29 }
  0xaa   :  { %8272 = vmatmul.mubr.msk.bf16.gmra.mxu0 %vm799_vm0, %v10112_v17  ;;  %2502 = vrot.lane.b32.xlu0 %v2472_v59, %s10436_s29  ;;  %v8306_v17 = vcombine.high %v87_v14, %v87_v14 }
  0xab   :  { %1755 = vmatmul.mubr.bf16.gmra.mxu1 %v10113_v21  ;;  %1798 = vmatpush2.bf16.msra.mxu0 %v10109_v25 }
  0xac   :  { %1764 = vmatprep.mubr.bf16.mxu1 %v8304_v26  ;;  %1799 = vmatprep.subr.bf16.mxu0 %v10116_v28 }
  0xad   :  { %1805 = vmatprep.mubr.bf16.mxu0 %v10130_v29  ;;  %2504 = vrot.lane.b32.xlu1 %v2473_v0, %s10436_s29 }
  0xae   :  { %2350 = vrot.lane.b32.xlu0 %v11129_v12, %s10436_s29 }
  0xaf   :  { %1800 = vmatpush2.bf16.msra.mxu0 %v10114_v33 }
  0xb0   :  { %1801 = vmatprep.subr.bf16.mxu0 %v10123_v34 }
  0xb1   :  { %2352 = vrot.lane.b32.xlu1 %v11154_v19, %s10436_s29 }
  0xb2   :  { %2506 = vrot.lane.b32.xlu0 %v2474_v2, %s10436_s29 }
  0xb3   :  { %1765 = vmatmul.mubr.bf16.gmra.mxu1 %v8303_v35  ;;  %1802 = vmatpush2.bf16.msra.mxu0 %v10121_v36 }
  0xb4   :  { %1906 = vmatprep.mubr.bf16.mxu1 %v10435_v1  ;;  %1803 = vmatprep.subr.bf16.mxu0 %v10127_v39 }
  0xb5   :  { %2508 = vrot.lane.b32.xlu1 %v2475_v6, %s10436_s29 }
  0xb6   :  { %2354 = vrot.lane.b32.xlu0 %v11166_v23, %s10436_s29 }
  0xb7   :  { %1804 = vmatpush2.bf16.msra.mxu0 %v10125_v43 }
  0xb9   :  { %2356 = vrot.lane.b32.xlu1 %v11186_v30, %s10436_s29 }
  0xba   :  { %1806 = vmatmul.mubr.bf16.vlgmr.msra.gmra.mxu0 %v10128_v48  ;;  %2510 = vrot.lane.b32.xlu0 %v2476_v8, %s10436_s29 }
  0xbb   :  { %8380 = vmatmul.mubr.msk.bf16.vlgmr.msra.gmra.mxu1 %vm799_vm0, %v10131_v49  ;;  %1815 = vmatprep.mubr.bf16.mxu0 %v10132_v52  ;;  %v8433_v52 = vld [vmem:[%s14704_s9 + $0x34] sm:$0xf] }
  0xbc   :  { %1916 = vmatprep.mubr.bf16.mxu1 %v10435_v1 }
  0xbd   :  { %2512 = vrot.lane.b32.xlu1 %v2477_v13, %s10436_s29 }
  0xbe   :  { %2358 = vrot.lane.b32.xlu0 %v11217_v40, %s10436_s29 }
  0xc1   :  { %2360 = vrot.lane.b32.xlu1 %v11235_v46, %s10436_s29 }
  0xc2   :  { %1816 = vmatmul.mubr.bf16.gmra.mxu0 %v10134_v54  ;;  %2514 = vrot.lane.b32.xlu0 %v2478_v42, %s10436_s29 }
  0xc3   :  { %8381 = vmatmul.mubr.msk.bf16.gmra.mxu1 %vm799_vm0, %v10135_v55  ;;  %1825 = vmatprep.mubr.bf16.mxu0 %v10136_v56 }
  0xc4   :  { %1926 = vmatprep.mubr.bf16.mxu1 %v10435_v1 }
  0xc5   :  { %2516 = vrot.lane.b32.xlu1 %v2479_v41, %s10436_s29 }
  0xc6   :  { %3096 = vperm.xlu0 %9813, %v8433_v52  }
  0xc9   :  { %3108 = vperm.xlu1 %9814, %v8434_v51  }
  0xca   :  { %1826 = vmatmul.mubr.bf16.gmra.mxu0 %v10138_v60 }
  0xcb   :  { %8382 = vmatmul.mubr.msk.bf16.gmra.mxu1 %vm799_vm0, %v10139_v61  ;;  %1835 = vmatprep.mubr.bf16.mxu0 %v10140_v62 }
  0xcc   :  { %1936 = vmatprep.mubr.bf16.mxu1 %v10435_v1 }
  0xd2   :  { %1836 = vmatmul.mubr.bf16.gmra.mxu0 %v10142_v3  ;;  %v8436_v3 = vld [vmem:[%s14704_s9 + $0x40] sm:$0xf] }
  0xd3   :  { %8383 = vmatmul.mubr.msk.bf16.gmra.mxu1 %vm799_vm0, %v10143_v4  ;;  %1845 = vmatprep.mubr.bf16.mxu0 %v10144_v5  ;;  %v8435_v4 = vld [vmem:[%s14704_s9 + $0x3c] sm:$0xf] }
  0xd4   :  { %1946 = vmatprep.mubr.bf16.mxu1 %v10435_v1  ;;  %3132 = vperm.xlu1 %9814, %v8436_v3  }
  0xd5   :  { %3120 = vperm.xlu0 %9813, %v8435_v4  }
  0xda   :  { %1846 = vmatmul.mubr.bf16.gmra.mxu0 %v10146_v9 }
  0xdb   :  { %8384 = vmatmul.mubr.msk.bf16.gmra.mxu1 %vm799_vm0, %v10147_v10  ;;  %1855 = vmatprep.mubr.bf16.mxu0 %v10148_v11 }
  0xdc   :  { %1956 = vmatprep.mubr.bf16.mxu1 %v10435_v1 }
  0xe2   :  { %1856 = vmatmul.mubr.bf16.gmra.mxu0 %v10150_v15 }
  0xe3   :  { %8385 = vmatmul.mubr.msk.bf16.gmra.mxu1 %vm799_vm0, %v10151_v16  ;;  %1865 = vmatprep.mubr.bf16.mxu0 %v8306_v17  ;;  %v8438_v16 = vld [vmem:[%s14704_s9 + $0x48] sm:$0xf]  ;;  %v8437_v17 = vld [vmem:[%s14704_s9 + $0x44] sm:$0xf] }
  0xe4   :  { %1966 = vmatprep.mubr.bf16.mxu1 %v10435_v1  ;;  %3156 = vperm.xlu1 %9814, %v8438_v16  }
  0xe5   :  { %3144 = vperm.xlu0 %9813, %v8437_v17  }
  0xea   :  { %1866 = vmatmul.mubr.bf16.gmra.mxu0 %v8305_v18 }
  0xeb   :  { %8386 = vmatmul.mubr.msk.bf16.gmra.mxu1 %vm799_vm0, %v10154_v20 }
 0x102   :  { %v855_v21 = vpop.f32.mrf.mxu0 }
 0x103   :  { %v956_v22 = vpop.f32.mrf.mxu1 }
 0x104   :  { %v11364_v24 = vadd.f32 %v956_v22, %v855_v21  ;;  %v857_v25 = vpop.f32.mrf.mxu0 }
 0x105   :  { %v958_v26 = vpop.f32.mrf.mxu1 }
 0x106   :  { %v11366_v27 = vadd.f32 %v958_v26, %v857_v25  ;;  %v859_v28 = vpop.f32.mrf.mxu0  ;;  %v8439_v26 = vld [vmem:[%s14704_s9 + $0x4c] sm:$0xf] }
 0x107   :  { %v960_v29 = vpop.f32.mrf.mxu1  ;;  %3168 = vperm.xlu1 %9814, %v8439_v26  }
 0x108   :  { %v11368_v31 = vadd.f32 %v960_v29, %v859_v28  ;;  %v11370_v1 = vpop.f32.mrf.mxu0 }
 0x109   :  { %v11372_v32 = vpop.f32.mrf.mxu1 }
 0x10a   :  { %v865_v33 = vpop.f32.mrf.mxu0 }
 0x10b   :  { %v966_v34 = vpop.f32.mrf.mxu1 }
 0x10c   :  { %v11374_v35 = vadd.f32 %v966_v34, %v865_v33  ;;  %v867_v36 = vpop.f32.mrf.mxu0 }
 0x10d   :  { %v968_v37 = vpop.f32.mrf.mxu1 }
 0x10e   :  { %v11376_v39 = vadd.f32 %v968_v37, %v867_v36  ;;  %v869_v43 = vpop.f32.mrf.mxu0 }
 0x10f   :  { %v970_v45 = vpop.f32.mrf.mxu1 }
 0x110   :  { %v11386_v47 = vadd.f32 %v970_v45, %v869_v43  ;;  %v11388_v48 = vpop.f32.mrf.mxu0 }
 0x111   :  { %v11390_v49 = vpop.f32.mrf.mxu1 }
 0x112   :  { %v875_v53 = vpop.f32.mrf.mxu0 }
 0x113   :  { %v976_v54 = vpop.f32.mrf.mxu1 }
 0x114   :  { %v11398_v55 = vadd.f32 %v976_v54, %v875_v53  ;;  %v877_v56 = vpop.f32.mrf.mxu0 }
 0x115   :  { %v978_v58 = vpop.f32.mrf.mxu1 }
 0x116   :  { %v11400_v59 = vadd.f32 %v978_v58, %v877_v56  ;;  %v879_v60 = vpop.f32.mrf.mxu0 }
 0x117   :  { %v980_v61 = vpop.f32.mrf.mxu1 }
 0x118   :  { %v11402_v62 = vadd.f32 %v980_v61, %v879_v60  ;;  %v11404_v0 = vpop.f32.mrf.mxu0 }
 0x119   :  { %v11406_v2 = vpop.f32.mrf.mxu1 }
 0x11a   :  { %v885_v5 = vpop.f32.mrf.mxu0 }
 0x11b   :  { %v986_v6 = vpop.f32.mrf.mxu1 }
 0x11c   :  { %v11414_v8 = vadd.f32 %v986_v6, %v885_v5  ;;  %v887_v9 = vpop.f32.mrf.mxu0 }
 0x11d   :  { %v988_v10 = vpop.f32.mrf.mxu1 }
 0x11e   :  { %v11416_v11 = vadd.f32 %v988_v10, %v887_v9  ;;  %v889_v13 = vpop.f32.mrf.mxu0 }
 0x11f   :  { %v990_v14 = vpop.f32.mrf.mxu1 }
 0x120   :  { %v11418_v15 = vadd.f32 %v990_v14, %v889_v13  ;;  %v11426_v18 = vpop.f32.mrf.mxu0 }
 0x121   :  { %14820 = vst [vmem:[#allocation5_spill] sm:$0xff] %v11426_v18  ;;  %v11428_v20 = vpop.f32.mrf.mxu1 }
 0x122   :  { %14821 = vst [vmem:[#allocation6_spill] sm:$0xff] %v11428_v20  ;;  %v895_v21 = vpop.f32.mrf.mxu0 }
 0x123   :  { %v996_v22 = vpop.f32.mrf.mxu1 }
 0x124   :  { %v11430_v25 = vadd.f32 %v996_v22, %v895_v21  ;;  %v897_v28 = vpop.f32.mrf.mxu0 }
 0x125   :  { %v998_v29 = vpop.f32.mrf.mxu1 }
 0x126   :  { %v11435_v33 = vadd.f32 %v998_v29, %v897_v28  ;;  %v899_v34 = vpop.f32.mrf.mxu0 }
 0x127   :  { %v1000_v36 = vpop.f32.mrf.mxu1 }
 0x128   :  { %v11437_v37 = vadd.f32 %v1000_v36, %v899_v34  ;;  %v11439_v41 = vpop.f32.mrf.mxu0 }
 0x129   :  { %14822 = vst [vmem:[#allocation7_spill] sm:$0xff] %v11439_v41  ;;  %v11441_v42 = vpop.f32.mrf.mxu1 }
 0x12a   :  { %14823 = vst [vmem:[#allocation8_spill] sm:$0xff] %v11441_v42  ;;  %v905_v43 = vpop.f32.mrf.mxu0 }
 0x12b   :  { %v1006_v45 = vpop.f32.mrf.mxu1 }
 0x12c   :  { %v11443_v51 = vadd.f32 %v1006_v45, %v905_v43  ;;  %v907_v52 = vpop.f32.mrf.mxu0 }
 0x12d   :  { %v1008_v53 = vpop.f32.mrf.mxu1 }
 0x12e   :  { %v11445_v54 = vadd.f32 %v1008_v53, %v907_v52  ;;  %v909_v56 = vpop.f32.mrf.mxu0 }
 0x12f   :  { %v1010_v58 = vpop.f32.mrf.mxu1 }
 0x130   :  { %v11447_v60 = vadd.f32 %v1010_v58, %v909_v56  ;;  %v11449_v61 = vpop.f32.mrf.mxu0 }
 0x131   :  { %14824 = vst [vmem:[#allocation9_spill] sm:$0xff] %v11449_v61  ;;  %v11451_v3 = vpop.f32.mrf.mxu1 }
 0x132   :  { %14825 = vst [vmem:[#allocation10_spill] sm:$0xff] %v11451_v3  ;;  %v915_v4 = vpop.f32.mrf.mxu0 }
 0x133   :  { %v1016_v5 = vpop.f32.mrf.mxu1 }
 0x134   :  { %v11453_v6 = vadd.f32 %v1016_v5, %v915_v4  ;;  %v917_v9 = vpop.f32.mrf.mxu0 }
 0x135   :  { %v1018_v10 = vpop.f32.mrf.mxu1 }
 0x136   :  { %v11455_v13 = vadd.f32 %v1018_v10, %v917_v9  ;;  %v919_v14 = vpop.f32.mrf.mxu0 }
 0x137   :  { %v1020_v16 = vpop.f32.mrf.mxu1 }
 0x138   :  { %v920_v17 = vpop.f32.mrf.mxu0 }
 0x139   :  { %v1021_v21 = vpop.f32.mrf.mxu1 }
 0x13a   :  { %v1057_v22 = vpop.f32.mrf.mxu0 }
 0x13b   :  { %v11458_v26 = vadd.f32 %v1057_v22, %v11364_v24 }
 0x13c   :  { %v1059_v28 = vpop.f32.mrf.mxu0 }
 0x13d   :  { %v1060_v29 = vadd.f32 %v1059_v28, %v11366_v27 }
 0x13e   :  { %v1061_v34 = vpop.f32.mrf.mxu0 }
 0x13f   :  { %v11462_v36 = vadd.f32 %v1061_v34, %v11368_v31 }
 0x140   :  { %v11464_v43 = vpop.f32.mrf.mxu0 }
 0x142   :  { %v1067_v45 = vpop.f32.mrf.mxu0 }
 0x143   :  { %v11466_v52 = vpop.f32.mrf.mxu1  ;;  %v11469_v53 = vadd.f32 %v1067_v45, %v11374_v35 }
 0x144   :  { %v1069_v56 = vpop.f32.mrf.mxu0 }
 0x145   :  { %v1708_v58 = vpop.f32.mrf.mxu1  ;;  %v1070_v24 = vadd.f32 %v1069_v56, %v11376_v39 }
 0x146   :  { %v11472_v4 = vadd.f32 %v1708_v58, %v1060_v29  ;;  %v1071_v5 = vpop.f32.mrf.mxu0 }
 0x147   :  { %v11474_v27 = vpop.f32.mrf.mxu1  ;;  %v11477_v31 = vadd.f32 %v1071_v5, %v11386_v47 }
 0x148   :  { %v11479_v9 = vpop.f32.mrf.mxu0 }
 0x149   :  { %v11481_v10 = vpop.f32.mrf.mxu1 }
 0x14a   :  { %v1077_v14 = vpop.f32.mrf.mxu0 }
 0x14b   :  { %v11483_v16 = vpop.f32.mrf.mxu1  ;;  %v11486_v35 = vadd.f32 %v1077_v14, %v11398_v55 }
 0x14c   :  { %v1079_v17 = vpop.f32.mrf.mxu0 }
 0x14d   :  { %v1718_v39 = vpop.f32.mrf.mxu1  ;;  %v1080_v21 = vadd.f32 %v1079_v17, %v11400_v59 }
 0x14e   :  { %v11489_v22 = vadd.f32 %v1718_v39, %v1070_v24  ;;  %v11491_v28 = vpop.f32.mrf.mxu0 }
 0x14f   :  { %v11493_v47 = vpop.f32.mrf.mxu1 }
 0x150   :  { %v11495_v29 = vpop.f32.mrf.mxu0 }
 0x151   :  { %v11497_v34 = vpop.f32.mrf.mxu1 }
 0x152   :  { %v1087_v45 = vpop.f32.mrf.mxu0 }
 0x153   :  { %v11499_v56 = vpop.f32.mrf.mxu1  ;;  %v11502_v55 = vadd.f32 %v1087_v45, %v11414_v8 }
 0x154   :  { %v1089_v58 = vpop.f32.mrf.mxu0 }
 0x155   :  { %v1728_v5 = vpop.f32.mrf.mxu1  ;;  %v1090_v59 = vadd.f32 %v1089_v58, %v11416_v11 }
 0x156   :  { %v11505_v24 = vadd.f32 %v1728_v5, %v1080_v21  ;;  %v1091_v14 = vpop.f32.mrf.mxu0 }
 0x157   :  { %v11507_v17 = vpop.f32.mrf.mxu1  ;;  %v11510_v39 = vadd.f32 %v1091_v14, %v11418_v15 }
 0x158   :  { %v11512_v3 = vpop.f32.mrf.mxu0 }
 0x159   :  { %14826 = vst [vmem:[#allocation11_spill] sm:$0xff] %v11512_v3  ;;  %v11514_v61 = vpop.f32.mrf.mxu1 }
 0x15a   :  { %v1097_v46 = vpop.f32.mrf.mxu0 }
 0x15b   :  { %v11516_v42 = vpop.f32.mrf.mxu1  ;;  %v11519_v8 = vadd.f32 %v1097_v46, %v11430_v25 }
 0x15c   :  { %v1099_v45 = vpop.f32.mrf.mxu0 }
 0x15d   :  { %v1738_v11 = vpop.f32.mrf.mxu1  ;;  %v1100_v21 = vadd.f32 %v1099_v45, %v11435_v33 }
 0x15e   :  { %v11522_v58 = vadd.f32 %v1738_v11, %v1090_v59  ;;  %v1101_v5 = vpop.f32.mrf.mxu0 }
 0x15f   :  { %v11524_v41 = vpop.f32.mrf.mxu1  ;;  %v11527_v15 = vadd.f32 %v1101_v5, %v11437_v37 }
 0x160   :  { %14827 = vst [vmem:[#allocation12_spill] sm:$0xff] %v11522_v58  ;;  %v11529_v14 = vpop.f32.mrf.mxu0 }
 0x161   :  { %14828 = vst [vmem:[#allocation13_spill] sm:$0xff] %v11529_v14  ;;  %v11531_v40 = vpop.f32.mrf.mxu1 }
 0x162   :  { %14829 = vst [vmem:[#allocation14_spill] sm:$0xff] %v11531_v40  ;;  %v1107_v3 = vpop.f32.mrf.mxu0 }
 0x163   :  { %v11533_v30 = vpop.f32.mrf.mxu1  ;;  %v11536_v46 = vadd.f32 %v1107_v3, %v11443_v51 }
 0x164   :  { %v1109_v25 = vpop.f32.mrf.mxu0 }
 0x165   :  { %v1748_v33 = vpop.f32.mrf.mxu1  ;;  %v1110_v59 = vadd.f32 %v1109_v25, %v11445_v54 }
 0x166   :  { %v11539_v45 = vadd.f32 %v1748_v33, %v1100_v21  ;;  %v1111_v11 = vpop.f32.mrf.mxu0 }
 0x167   :  { %v11541_v58 = vpop.f32.mrf.mxu1  ;;  %v11544_v37 = vadd.f32 %v1111_v11, %v11447_v60  ;;  %v1977_v60 = vlaneseq }
 0x168   :  { %14830 = vst [vmem:[#allocation15_spill] sm:$0xff] %v11539_v45  ;;  %v11546_v5 = vpop.f32.mrf.mxu0 }
 0x169   :  { %14831 = vst [vmem:[#allocation16_spill] sm:$0xff] %v11544_v37  ;;  %14832 = vst [vmem:[#allocation17_spill] sm:$0xff] %v11546_v5  ;;  %v11548_v14 = vpop.f32.mrf.mxu1  ;;  %v11562_v37 = vshrl.u32 %v1977_v60, 7 }
 0x16a   :  { %14833 = vst [vmem:[#allocation18_spill] sm:$0xff] %v11548_v14  ;;  %v1117_v40 = vpop.f32.mrf.mxu0 }
 0x16b   :  { %v11550_v20 = vpop.f32.mrf.mxu1  ;;  %v1118_v51 = vadd.f32 %v1117_v40, %v11453_v6  ;;  %14839 = vst [vmem:[#allocation24_spill] sm:$0xff] %v11562_v37 }
 0x16c   :  { %14834 = vst [vmem:[#allocation19_spill] sm:$0xff] %v11550_v20  ;;  %v1119_v3 = vpop.f32.mrf.mxu0 }
 0x16d   :  { %v1758_v18 = vpop.f32.mrf.mxu1  ;;  %v1120_v54 = vadd.f32 %v1119_v3, %v11455_v13  ;;  %v1979_v13 = vsub.s32 0, %v11562_v37 }
 0x16e   :  { %v11554_v21 = vadd.f32 %v1758_v18, %v1110_v59  ;;  %v1121_v33 = vpop.f32.mrf.mxu0  ;;  %v11570_v59 = vld [vmem:[%s14705_s5] sm:$0x3] }
 0x16f   :  { %v11556_v25 = vpop.f32.mrf.mxu1 }
 0x170   :  { %14835 = vst [vmem:[#allocation20_spill] sm:$0xff] %v11554_v21  ;;  %14836 = vst [vmem:[#allocation21_spill] sm:$0xff] %v11556_v25  ;;  %v1122_v5 = vpop.f32.mrf.mxu0  ;;  %v2027_v21 = vld [vmem:[%s14706_s6 + $0x8] sm:$0xff] }
 0x171   :  { %v11558_v11 = vpop.f32.mrf.mxu1  ;;  %v1707_v5 = vadd.f32 %v11466_v52, %v11458_v26 }
 0x172   :  { %14837 = vst [vmem:[#allocation22_spill] sm:$0xff] %v11558_v11 }
 0x173   :  { %v1766_v45 = vpop.f32.mrf.mxu1 }
 0x174   :  { %v11560_v14 = vadd.f32 %v1766_v45, %v1118_v51  ;;  %v2026_v45 = vld [vmem:[%s14706_s6] sm:$0xff] }
 0x175   :  { %v1768_v20 = vpop.f32.mrf.mxu1 }
 0x176   :  { %14838 = vst [vmem:[#allocation23_spill] sm:$0xff] %v11560_v14  ;;  %v11564_v40 = vadd.f32 %v1768_v20, %v1120_v54  ;;  %v11578_v54 = vrot.slane %v11570_v59, %v1979_v13 }
 0x177   :  { %v1770_v6 = vpop.f32.mrf.mxu1 }
 0x178   :  { %14840 = vst [vmem:[#allocation25_spill] sm:$0xff] %v11564_v40  ;;  %v2039_v6 = vmul.f32 %v2026_v45, %v11009_v38 }
 0x179   :  { %v1771_v18 = vpop.f32.mrf.mxu1 }
 0x17a   :  { %v1807_v51 = vpop.f32.mrf.mxu0  ;;  %v1711_v18 = vadd.f32 %v11474_v27, %v11462_v36  ;;  %v2040_v36 = vmul.f32 %v2027_v21, %v11027_v44  ;;  %v1717_v27 = vadd.f32 %v11483_v16, %v11469_v53  ;;  %v1721_v44 = vadd.f32 %v11493_v47, %v11477_v31 }
 0x17b   :  { %v1908_v3 = vpop.f32.mrf.mxu1  ;;  %v1808_v20 = vadd.f32 %v1807_v51, %v1707_v5  ;;  %v1727_v47 = vadd.f32 %v11499_v56, %v11486_v35  ;;  %v1082_v35 = vadd.f32 %v11491_v28, %v11402_v62  ;;  %v2031_v28 = vld [vmem:[%s14706_s6 + $0x28] sm:$0xff] }
 0x17c   :  { %v1809_v33 = vpop.f32.mrf.mxu0 }
 0x17d   :  { %v11580_v60 = vpop.f32.mrf.mxu1  ;;  %v1909_v11 = vadd.f32 %v1908_v3, %v1808_v20 }
 0x17e   :  { %v1811_v26 = vpop.f32.mrf.mxu0 }
 0x17f   :  { %v1912_v52 = vpop.f32.mrf.mxu1  ;;  %v11589_v5 = vadd.f32 %v11578_v54, %v1909_v11  ;;  %v1812_v13 = vadd.f32 %v1811_v26, %v1711_v18  ;;  %v2028_v11 = vld [vmem:[%s14706_s6 + $0x10] sm:$0xff] }
 0x180   :  { %v11591_v51 = vpop.f32.mrf.mxu0  ;;  %v2041_v16 = vmul.f32 %v2028_v11, %v11048_v50 }
 0x181   :  { %14841 = vst [vmem:[#allocation26_spill] sm:$0xff] %v11589_v5  ;;  %v11593_v40 = vpop.f32.mrf.mxu1  ;;  %v2052_v38 = vadd.f32 %v2039_v6, %v11589_v5  ;;  %v1913_v45 = vadd.f32 %v1912_v52, %v1812_v13 }
 0x182   :  { %v1817_v3 = vpop.f32.mrf.mxu0 }
 0x183   :  { %v1918_v20 = vpop.f32.mrf.mxu1  ;;  %v8387_v14 = vmul.f32 -1.442695, %v2052_v38  ;;  %v11603_v18 = vadd.f32 %v11578_v54, %v1913_v45  ;;  %v1818_v26 = vadd.f32 %v1817_v3, %v1717_v27  ;;  %v2029_v38 = vld [vmem:[%s14706_s6 + $0x18] sm:$0xff] }
 0x184   :  { %v11605_v25 = vpop.f32.mrf.mxu0 }
 0x185   :  { %v11607_v6 = vpop.f32.mrf.mxu1  ;;  %10227 = vpow2.f32 %v8387_v14  ;;  %v2053_v53 = vadd.f32 %v2040_v36, %v11603_v18  ;;  %v1919_v21 = vadd.f32 %v1918_v20, %v1818_v26  ;;  %v2042_v14 = vmul.f32 %v2029_v38, %v11071_v57  ;;  %v2030_v26 = vld [vmem:[%s14706_s6 + $0x20] sm:$0xff] }
 0x186   :  { %v1821_v52 = vpop.f32.mrf.mxu0 }
 0x187   :  { %v1922_v13 = vpop.f32.mrf.mxu1  ;;  %v8388_v45 = vmul.f32 -1.442695, %v2053_v53  ;;  %v1822_v27 = vadd.f32 %v1821_v52, %v1721_v44  ;;  %v11617_v3 = vadd.f32 %v11578_v54, %v1919_v21  ;;  %v963_v21 = vadd.f32 %v11372_v32, %v11370_v1 }
 0x188   :  { %v11619_v5 = vpop.f32.mrf.mxu0  ;;  %v1983_v52 = vsub.s32 1, %v11562_v37  ;;  %v1810_v1 = vadd.f32 %v1809_v33, %v11472_v4  ;;  %v2044_v33 = vmul.f32 %v2031_v28, %v11114_v7  ;;  %v983_v7 = vadd.f32 %v11406_v2, %v11404_v0 }
 0x189   :  { %v11621_v31 = vpop.f32.mrf.mxu1  ;;  %10229 = vpow2.f32 %v8388_v45  ;;  %v1923_v50 = vadd.f32 %v1922_v13, %v1822_v27  ;;  %v2054_v36 = vadd.f32 %v2041_v16, %v11617_v3  ;;  %v2043_v45 = vmul.f32 %v2030_v26, %v11091_v63 }
 0x18a   :  { %v1827_v20 = vpop.f32.mrf.mxu0  ;;  %v1064_v27 = vadd.f32 %v11464_v43, %v963_v21  ;;  %v11659_v4 = vrot.slane %v11570_v59, %v1983_v52  ;;  %v1737_v26 = vadd.f32 %v11516_v42, %v11502_v55  ;;  %v2032_v59 = vld [vmem:[%s14706_s6 + $0x30] sm:$0xff]  ;;  %v973_v52 = vadd.f32 %v11390_v49, %v11388_v48 }
 0x18b   :  { %v1928_v11 = vpop.f32.mrf.mxu1  ;;  %v11631_v44 = vadd.f32 %v11578_v54, %v1923_v50  ;;  %v1828_v53 = vadd.f32 %v1827_v20, %v1727_v47  ;;  %v8389_v56 = vmul.f32 -1.442695, %v2054_v36  ;;  %v1731_v47 = vadd.f32 %v11507_v17, %v1082_v35 }
 0x18c   :  { %v11637_v57 = vpop.f32.mrf.mxu0  ;;  %v1741_v48 = vadd.f32 %v11524_v41, %v11510_v39  ;;  %v1820_v49 = vadd.f32 %v11605_v25, %v11489_v22  ;;  %v2045_v0 = vmul.f32 %v2032_v59, %v11129_v12 }
 0x18d   :  { %v11639_v16 = vpop.f32.mrf.mxu1  ;;  %v2055_v13 = vadd.f32 %v2042_v14, %v11631_v44  ;;  %v1929_v38 = vadd.f32 %v1928_v11, %v1828_v53  ;;  %10231 = vpow2.f32 %v8389_v56  ;;  %v1713_v14 = vadd.f32 %v11481_v10, %v1064_v27 }
 0x18e   :  { %v1831_v32 = vpop.f32.mrf.mxu0  ;;  %v1911_v53 = vadd.f32 %v11580_v60, %v1810_v1  ;;  %v1074_v27 = vadd.f32 %v11479_v9, %v973_v52  ;;  %v1084_v9 = vadd.f32 %v11495_v29, %v983_v7  ;;  %v1921_v29 = vadd.f32 %v11607_v6, %v1820_v49  ;;  %v2034_v6 = vld [vmem:[%s14706_s6 + $0x40] sm:$0xff]  ;;  %v14842_v49 = vld [vmem:[#allocation19_spill] sm:$0xff] }
 0x18f   :  { %v1932_v62 = vpop.f32.mrf.mxu1  ;;  %v8390_v50 = vmul.f32 -1.442695, %v2055_v13  ;;  %v11651_v36 = vadd.f32 %v11578_v54, %v1929_v38  ;;  %v1832_v63 = vadd.f32 %v1831_v32, %v1731_v47  ;;  %v1814_v10 = vadd.f32 %v11591_v51, %v1713_v14 }
 0x190   :  { %v11654_v20 = vpop.f32.mrf.mxu0  ;;  %v11691_v47 = vadd.f32 %v11659_v4, %v1911_v53  ;;  %v1723_v22 = vadd.f32 %v11497_v34, %v1074_v27 }
 0x191   :  { %v11656_v43 = vpop.f32.mrf.mxu1  ;;  %10233 = vpow2.f32 %v8390_v50  ;;  %v2056_v17 = vadd.f32 %v2043_v45, %v11651_v36  ;;  %v1933_v21 = vadd.f32 %v1932_v62, %v1832_v63  ;;  %v2033_v45 = vld [vmem:[%s14706_s6 + $0x38] sm:$0xff]  ;;  %v1915_v1 = vadd.f32 %v11593_v40, %v1814_v10 }
 0x192   :  { %v10228_v11 = vpop.eup %10227  ;;  %v1837_v35 = vpop.f32.mrf.mxu0  ;;  %v2046_v39 = vmul.f32 %v2033_v45, %v11154_v19  ;;  %v1747_v63 = vadd.f32 %v11533_v30, %v11519_v8  ;;  %v1824_v34 = vadd.f32 %v11619_v5, %v1723_v22  ;;  %v1830_v5 = vadd.f32 %v11637_v57, %v11505_v24 }
 0x193   :  { %v1938_v56 = vpop.f32.mrf.mxu1  ;;  %v8391_v13 = vmul.f32 -1.442695, %v2056_v17  ;;  %v2104_v38 = vadd.f32 1.0, %v10228_v11  ;;  %v11675_v42 = vadd.f32 %v11578_v54, %v1933_v21  ;;  %v1838_v55 = vadd.f32 %v1837_v35, %v1737_v26 }
 0x194   :  { %v11677_v60 = vpop.f32.mrf.mxu0  ;;  %v11710_v19 = vadd.f32 %v11659_v4, %v1915_v1  ;;  %v1733_v21 = vadd.f32 %v11514_v61, %v1084_v9  ;;  %v11728_v61 = vadd.f32 %v11659_v4, %v1921_v29  ;;  %v2047_v24 = vmul.f32 %v2034_v6, %v11166_v23  ;;  %v2035_v23 = vld [vmem:[%s14706_s6 + $0x48] sm:$0xff]  ;;  %v14845_v9 = vld [vmem:[#allocation12_spill] sm:$0xff]  ;;  %v14846_v29 = vld [vmem:[#allocation2_spill] sm:$0xff] }
 0x195   :  { %v11679_v51 = vpop.f32.mrf.mxu1  ;;  %v2057_v32 = vadd.f32 %v2044_v33, %v11675_v42  ;;  %v1939_v62 = vadd.f32 %v1938_v56, %v1838_v55  ;;  %10235 = vpow2.f32 %v8391_v13  ;;  %v1925_v55 = vadd.f32 %v11621_v31, %v1824_v34 }
 0x196   :  { %v10230_v2 = vpop.eup %10229  ;;  %v1841_v28 = vpop.f32.mrf.mxu0  ;;  %10237 = vrcp.f32 %v2104_v38  ;;  %v1834_v13 = vadd.f32 %v11654_v20, %v1733_v21  ;;  %v2036_v21 = vld [vmem:[%s14706_s6 + $0x50] sm:$0xff] }
 0x197   :  { %v1942_v50 = vpop.f32.mrf.mxu1  ;;  %v1842_v41 = vadd.f32 %v1841_v28, %v1741_v48  ;;  %v8392_v12 = vmul.f32 -1.442695, %v2057_v32  ;;  %v11699_v25 = vadd.f32 %v11578_v54, %v1939_v62  ;;  %v2105_v17 = vadd.f32 1.0, %v10230_v2  ;;  %v14843_v62 = vld [vmem:[#allocation5_spill] sm:$0xff] }
 0x198   :  { %v11701_v14 = vpop.f32.mrf.mxu0  ;;  %10239 = vtanh.f32 %v11691_v47  ;;  %v1751_v48 = vadd.f32 %v11541_v58, %v11527_v15  ;;  %v1931_v2 = vadd.f32 %v11639_v16, %v1830_v5  ;;  %v1935_v58 = vadd.f32 %v11656_v43, %v1834_v13  ;;  %v14844_v16 = vld [vmem:[#allocation6_spill] sm:$0xff] }
 0x199   :  { %v11703_v40 = vpop.f32.mrf.mxu1  ;;  %v1943_v33 = vadd.f32 %v1942_v50, %v1842_v41  ;;  %v2058_v11 = vadd.f32 %v2045_v0, %v11699_v25  ;;  %10241 = vpow2.f32 %v8392_v12  ;;  %v1757_v0 = vadd.f32 %v14842_v49, %v11536_v46  ;;  %v14849_v49 = vld [vmem:[#allocation3_spill] sm:$0xff] }
 0x19a   :  { %v1847_v26 = vpop.f32.mrf.mxu0  ;;  %v10232_v10 = vpop.eup %10231  ;;  %10243 = vrcp.f32 %v2105_v17  ;;  %v993_v28 = vadd.f32 %v14844_v16, %v14843_v62  ;;  %v11755_v50 = vadd.f32 %v11659_v4, %v1925_v55  ;;  %v1840_v41 = vadd.f32 %v11677_v60, %v14845_v9 }
 0x19b   :  { %v1948_v53 = vpop.f32.mrf.mxu1  ;;  %v11716_v30 = vadd.f32 %v11578_v54, %v1943_v33  ;;  %v1848_v8 = vadd.f32 %v1847_v26, %v1747_v63  ;;  %v2106_v35 = vadd.f32 1.0, %v10232_v10  ;;  %v8393_v56 = vmul.f32 -1.442695, %v2058_v11  ;;  %v11760_v63 = vpop.permute.xlu0 %2182  ;;  %v14847_v26 = vld [vmem:[#allocation11_spill] sm:$0xff] }
 0x19c   :  { %v11723_v59 = vpop.f32.mrf.mxu0  ;;  %10245 = vtanh.f32 %v11710_v19  ;;  %v11762_v17 = vpop.permute.xlu1 %2186  ;;  %v2048_v33 = vmul.f32 %v2035_v23, %v14846_v29  ;;  %v11767_v10 = vadd.f32 %v11659_v4, %v1931_v2  ;;  %v11777_v5 = vadd.f32 %v11659_v4, %v1935_v58  ;;  %v14850_v2 = vld [vmem:[#allocation16_spill] sm:$0xff]  ;;  %v14851_v23 = vld [vmem:[#allocation21_spill] sm:$0xff] }
 0x19d   :  { %v11725_v52 = vpop.f32.mrf.mxu1  ;;  %v2059_v7 = vadd.f32 %v2046_v39, %v11716_v30  ;;  %v1949_v45 = vadd.f32 %v1948_v53, %v1848_v8  ;;  %10247 = vrcp.f32 %v2106_v35  ;;  %v1094_v53 = vadd.f32 %v14847_v26, %v993_v28  ;;  %v14853_v26 = vld [vmem:[#allocation8_spill] sm:$0xff] }
 0x19e   :  { %v10234_v38 = vpop.eup %10233  ;;  %v1851_v57 = vpop.f32.mrf.mxu0  ;;  %10249 = vpow2.f32 %v8393_v56  ;;  %v1941_v13 = vadd.f32 %v11679_v51, %v1840_v41  ;;  %v1761_v58 = vadd.f32 %v14851_v23, %v14850_v2 }
 0x19f   :  { %v1952_v27 = vpop.f32.mrf.mxu1  ;;  %v2107_v20 = vadd.f32 1.0, %v10234_v38  ;;  %v11741_v1 = vadd.f32 %v11578_v54, %v1949_v45  ;;  %10251 = vtanh.f32 %v11728_v61  ;;  %v8394_v15 = vmul.f32 -1.442695, %v2059_v7  ;;  %v11797_v16 = vpop.permute.xlu0 %2184 }
 0x1a0   :  { %v11743_v31 = vpop.f32.mrf.mxu0  ;;  %v1852_v46 = vadd.f32 %v1851_v57, %v1751_v48  ;;  %v14848_v57 = vld [vmem:[#allocation14_spill] sm:$0xff]  ;;  %v11799_v28 = vpop.permute.xlu1 %2188 }
 0x1a1   :  { %v11748_v32 = vpop.f32.mrf.mxu1  ;;  %v2060_v39 = vadd.f32 %v2047_v24, %v11741_v1  ;;  %10253 = vrcp.f32 %v2107_v20 }
 0x1a2   :  { %v1857_v22 = vpop.f32.mrf.mxu0  ;;  %v1953_v43 = vadd.f32 %v1952_v27, %v1852_v46  ;;  %v10236_v11 = vpop.eup %10235  ;;  %10255 = vpow2.f32 %v8394_v15  ;;  %v1743_v27 = vadd.f32 %v14848_v57, %v1094_v53 }
 0x1a3   :  { %v1958_v12 = vpop.f32.mrf.mxu1  ;;  %v1858_v34 = vadd.f32 %v1857_v22, %v1757_v0  ;;  %v10238_v6 = vpop.eup %10237  ;;  %v2108_v35 = vadd.f32 1.0, %v10236_v11  ;;  %10257 = vtanh.f32 %v11755_v50  ;;  %v8395_v7 = vmul.f32 -1.442695, %v2060_v39  ;;  %v2037_v39 = vld [vmem:[%s14706_s6 + $0x58] sm:$0xff]  ;;  %v14852_v11 = vld [vmem:[#allocation7_spill] sm:$0xff] }
 0x1a4   :  { %v11769_v60 = vpop.f32.mrf.mxu0  ;;  %v11780_v56 = vadd.f32 %v11578_v54, %v1953_v43  ;;  %v2049_v0 = vmul.f32 %v2036_v21, %v14849_v49  ;;  %v1844_v41 = vadd.f32 %v11701_v14, %v1743_v27  ;;  %v1003_v53 = vadd.f32 %v14853_v26, %v14852_v11  ;;  %v14855_v27 = vld [vmem:[#allocation13_spill] sm:$0xff]  ;;  %v11820_v2 = vpop.permute.xlu1 %2192 }
 0x1a5   :  { %v11774_v8 = vpop.f32.mrf.mxu1  ;;  %v1959_v38 = vadd.f32 %v1958_v12, %v1858_v34  ;;  %v10240_v24 = vpop.eup %10239  ;;  %10259 = vrcp.f32 %v2108_v35  ;;  %v11807_v12 = vadd.f32 %v11659_v4, %v1941_v13 }
 0x1a6   :  { %v1861_v55 = vpop.f32.mrf.mxu0  ;;  %v2061_v48 = vadd.f32 %v2048_v33, %v11780_v56  ;;  %v10242_v20 = vpop.eup %10241  ;;  %10261 = vtanh.f32 %v11767_v10  ;;  %v2390_v15 = vmul.f32 %v10240_v24, %v10238_v6  ;;  %v8440_v6 = vld [vmem:[%s14704_s9 + $0x50] sm:$0xf]  ;;  %v1104_v49 = vadd.f32 %v14855_v27, %v1003_v53 }
 0x1a7   :  { %v1962_v45 = vpop.f32.mrf.mxu1  ;;  %v11791_v51 = vadd.f32 %v11578_v54, %v1959_v38  ;;  %v2109_v9 = vadd.f32 1.0, %v10242_v20  ;;  %10263 = vtanh.f32 %v11777_v5  ;;  %v10244_v22 = vpop.eup %10243  ;;  %v1862_v43 = vadd.f32 %v1861_v55, %v1761_v58 }
 0x1a8   :  { %v11793_v46 = vpop.f32.mrf.mxu0  ;;  %10265 = vpow2.f32 %v8395_v7  ;;  %2416 = vrot.lane.b32.xlu0 %v2390_v15, %s10436_s29  ;;  %v8396_v14 = vmul.f32 -1.442695, %v2061_v48  ;;  %v14854_v7 = vld [vmem:[#allocation4_spill] sm:$0xff]  ;;  %v11818_v20 = vpop.permute.xlu0 %2190  ;;  %v1945_v48 = vadd.f32 %v11703_v40, %v1844_v41  ;;  %v14858_v40 = vld [vmem:[#allocation25_spill] sm:$0xff] }
 0x1a9   :  { %v11795_v62 = vpop.f32.mrf.mxu1  ;;  %v10246_v34 = vpop.eup %10245  ;;  %10267 = vrcp.f32 %v2109_v9  ;;  %v2062_v21 = vadd.f32 %v2049_v0, %v11791_v51  ;;  %v1963_v13 = vadd.f32 %v1962_v45, %v1862_v43  ;;  %v2050_v38 = vmul.f32 %v2037_v39, %v14854_v7  ;;  %v14856_v0 = vld [vmem:[#allocation15_spill] sm:$0xff] }
 0x1aa   :  { %v1867_v29 = vpop.f32.mrf.mxu0  ;;  %v10248_v35 = vpop.eup %10247  ;;  %v1850_v23 = vadd.f32 %v11723_v59, %v14856_v0  ;;  %v2391_v58 = vmul.f32 %v10246_v34, %v10244_v22  ;;  %10269 = vtanh.f32 %v11807_v12  ;;  %v14857_v39 = vld [vmem:[#allocation23_spill] sm:$0xff]  ;;  %v11835_v59 = vld [vmem:[%s14701_s2 + $0x60] sm:$0x3] }
 0x1ab   :  { %v1968_v33 = vpop.f32.mrf.mxu1  ;;  %v10250_v57 = vpop.eup %10249  ;;  %v11827_v45 = vadd.f32 %v11578_v54, %v1963_v13  ;;  %v1868_v43 = vadd.f32 %v1867_v29, %v14857_v39  ;;  %10271 = vpow2.f32 %v8396_v14  ;;  %v8397_v53 = vmul.f32 -1.442695, %v2062_v21  ;;  %v2155_v34 = vld [vmem:[%s14702_s7 + $0x60] sm:$0x3]  ;;  %v8441_v13 = vld [vmem:[%s14704_s9 + $0x54] sm:$0xf] }
 0x1ac   :  { %v1869_v24 = vpop.f32.mrf.mxu0  ;;  %v10252_v15 = vpop.eup %10251  ;;  %v2110_v9 = vadd.f32 1.0, %v10250_v57  ;;  %3180 = vperm.xlu0 %9813, %v8440_v6   ;;  %2418 = vrot.lane.b32.xlu1 %v2391_v58, %s10436_s29  ;;  %v14859_v6 = vld [vmem:[#allocation18_spill] sm:$0xff] }
 0x1ad   :  { %v1970_v55 = vpop.f32.mrf.mxu1  ;;  %v1870_v41 = vadd.f32 %v1869_v24, %v14858_v40  ;;  %v2392_v22 = vmul.f32 %v10252_v15, %v10248_v35  ;;  %v1753_v29 = vadd.f32 %v14859_v6, %v1104_v49  ;;  %v2063_v14 = vadd.f32 %v2050_v38, %v11827_v45  ;;  %v11845_v27 = vpop.permute.xlu1 %2196 }
 0x1ae   :  { %v1871_v11 = vpop.f32.mrf.mxu0  ;;  %10273 = vrcp.f32 %v2110_v9  ;;  %v1969_v21 = vadd.f32 %v1968_v33, %v1868_v43  ;;  %v10254_v57 = vpop.eup %10253  ;;  %v1951_v35 = vadd.f32 %v11725_v52, %v1850_v23  ;;  %v11851_v49 = vadd.f32 %v11659_v4, %v1945_v48 }
 0x1af   :  { %v1972_v26 = vpop.f32.mrf.mxu1  ;;  %v1971_v0 = vadd.f32 %v1970_v55, %v1870_v41  ;;  %v10256_v58 = vpop.eup %10255  ;;  %v1854_v33 = vadd.f32 %v11743_v31, %v1753_v29  ;;  %v2168_v38 = vmul.f32 %v2155_v34, %v11835_v59  ;;  %10275 = vpow2.f32 %v8397_v53  ;;  %v14863_v31 = vld [vmem:[#allocation10_spill] sm:$0xff] }
 0x1b0   :  { %v1872_v7 = vpop.f32.mrf.mxu0  ;;  %v11848_v15 = vpop.permute.xlu0 %2194  ;;  %2420 = vrot.lane.b32.xlu0 %v2392_v22, %s10436_s29  ;;  %v2111_v39 = vadd.f32 1.0, %v10256_v58  ;;  %v11857_v43 = vadd.f32 %v11578_v54, %v1969_v21  ;;  %3192 = vperm.xlu1 %9814, %v8441_v13   ;;  %v8398_v23 = vmul.f32 -1.442695, %v2063_v14  ;;  %v14862_v26 = vld [vmem:[#allocation9_spill] sm:$0xff]  ;;  %v11865_v41 = vadd.f32 %v11659_v4, %v1951_v35  ;;  %v14864_v54 = vld [vmem:[#allocation20_spill] sm:$0xff] }
 0x1b1   :  { %v1973_v24 = vpop.f32.mrf.mxu1  ;;  %v10258_v9 = vpop.eup %10257  ;;  %v11860_v52 = vadd.f32 %v11659_v4, %v1971_v0  ;;  %v1013_v40 = vadd.f32 %v14863_v31, %v14862_v26  ;;  %v1955_v53 = vadd.f32 %v11748_v32, %v1854_v33  ;;  %v1860_v34 = vadd.f32 %v11769_v60, %v14864_v54  ;;  %v14865_v14 = vld [vmem:[#allocation17_spill] sm:$0xff]  ;;  %v14866_v32 = vld [vmem:[#allocation22_spill] sm:$0xff] }
 0x1b2   :  { %14860 = vst [vmem:[#allocation19_spill] sm:$0xff] %v11857_v43  ;;  %v10260_v55 = vpop.eup %10259  ;;  %v2393_v48 = vmul.f32 %v10258_v9, %v10254_v57  ;;  %10277 = vrcp.f32 %v2111_v39  ;;  %v11873_v13 = vpop.permute.xlu1 %2200  ;;  %v8442_v9 = vld [vmem:[%s14704_s9 + $0x58] sm:$0xf] }
 0x1b3   :  { %14861 = vst [vmem:[#allocation5_spill] sm:$0xff] %v11860_v52  ;;  %v10262_v11 = vpop.eup %10261  ;;  %v1114_v21 = vadd.f32 %v14865_v14, %v1013_v40  ;;  %10279 = vtanh.f32 %v11851_v49  ;;  %v11881_v0 = vadd.f32 %v11659_v4, %v1955_v53  ;;  %v1961_v58 = vadd.f32 %v11774_v8, %v1860_v34 }
 0x1b4   :  { %v10264_v22 = vpop.eup %10263  ;;  %2206 = vrot.lane.b32.xlu0 %v2168_v38, %s10436_s29  ;;  %v2394_v6 = vmul.f32 %v10262_v11, %v10260_v55  ;;  %2422 = vrot.lane.b32.xlu1 %v2393_v48, %s10436_s29  ;;  %v11876_v24 = vpop.permute.xlu0 %2198  ;;  %10281 = vpow2.f32 %v8398_v23  ;;  %v8444_v55 = vld [vmem:[%s14704_s9 + $0x60] sm:$0xf] }
 0x1b5   :  { %v10266_v29 = vpop.eup %10265  ;;  %v1763_v35 = vadd.f32 %v14866_v32, %v1114_v21  ;;  %10283 = vtanh.f32 %v11865_v41 }
 0x1b6   :  { %v10268_v7 = vpop.eup %10267  ;;  %v2112_v57 = vadd.f32 1.0, %v10266_v29  ;;  %v11893_v11 = vpop.permute.xlu1 %2340 }
 0x1b7   :  { %v2395_v60 = vmul.f32 %v10268_v7, %v10264_v22  ;;  %v10270_v33 = vpop.eup %10269  ;;  %v1864_v38 = vadd.f32 %v11793_v46, %v1763_v35  ;;  %v11899_v46 = vadd.f32 %v11659_v4, %v1961_v58  ;;  %v8445_v22 = vld [vmem:[%s14704_s9 + $0x64] sm:$0x1] }
 0x1b8   :  { %10285 = vrcp.f32 %v2112_v57  ;;  %2424 = vrot.lane.b32.xlu0 %v2394_v6, %s10436_s29  ;;  %v10272_v39 = vpop.eup %10271  ;;  %v11895_v8 = vpop.permute.xlu0 %2338 }
 0x1b9   :  { %2426 = vrot.lane.b32.xlu1 %v2395_v60, %s10436_s29  ;;  %v2113_v48 = vadd.f32 1.0, %v10272_v39  ;;  %10287 = vtanh.f32 %v11881_v0  ;;  %v1965_v31 = vadd.f32 %v11795_v62, %v1864_v38  ;;  %v8443_v62 = vld [vmem:[%s14704_s9 + $0x5c] sm:$0xf]  ;;  %v2779_v60 = vld [vmem:[%s14704_s9] sm:$0xf] }
 0x1ba   :  { %v11907_v34 = vpop.permute.xlu1 %2496 }
 0x1bb   :  { %v10274_v23 = vpop.eup %10273  ;;  %10289 = vrcp.f32 %v2113_v48  ;;  %v11910_v6 = vadd.f32 %v11659_v4, %v1965_v31 }
 0x1bc   :  { %3204 = vperm.xlu0 %9813, %v8442_v9   ;;  %v2396_v26 = vmul.f32 %v10274_v23, %v10270_v33  ;;  %v10276_v40 = vpop.eup %10275  ;;  %10291 = vtanh.f32 %v11899_v46  ;;  %v11915_v14 = vpop.permute.xlu0 %2494  ;;  %v2780_v9 = vld [vmem:[%s14704_s9 + $0x4] sm:$0xf] }
 0x1bd   :  { %3228 = vperm.xlu1 %9814, %v8444_v55   ;;  %v2114_v53 = vadd.f32 1.0, %v10276_v40  ;;  %14867 = vst [vmem:[#allocation6_spill] sm:$0xff] %v11910_v6  ;;  %v8483_v40 = vld [vmem:[%s14704_s9 + $0x68] sm:$0xf] }
 0x1be   :  { %v11922_v58 = vpop.permute.xlu1 %2204 }
 0x1bf   :  { %v10278_v54 = vpop.eup %10277  ;;  %10293 = vrcp.f32 %v2114_v53 }
 0x1c0   :  { %2428 = vrot.lane.b32.xlu0 %v2396_v26, %s10436_s29  ;;  %v10280_v29 = vpop.eup %10279  ;;  %10295 = vtanh.f32 %v11910_v6  ;;  %v11924_v33 = vpop.permute.xlu0 %2202 }
 0x1c1   :  { %3240 = vperm.xlu1 %9814, %v8445_v22   ;;  %v10282_v21 = vpop.eup %10281  ;;  %v2397_v7 = vmul.f32 %v10280_v29, %v10278_v54  ;;  %v8484_v54 = vld [vmem:[%s14704_s9 + $0x6c] sm:$0xf] }
 0x1c2   :  { %v10284_v57 = vpop.eup %10283  ;;  %v2115_v32 = vadd.f32 1.0, %v10282_v21  ;;  %v11930_v48 = vpop.permute.xlu1 %2344 }
 0x1c4   :  { %3216 = vperm.xlu0 %9813, %v8443_v62   ;;  %10297 = vrcp.f32 %v2115_v32  ;;  %v11933_v31 = vpop.permute.xlu0 %2342  ;;  %v2781_v32 = vld [vmem:[%s14704_s9 + $0x8] sm:$0xf] }
 0x1c5   :  { %v10286_v35 = vpop.eup %10285  ;;  %2430 = vrot.lane.b32.xlu1 %v2397_v7, %s10436_s29 }
 0x1c6   :  { %v2398_v4 = vmul.f32 %v10286_v35, %v10284_v57  ;;  %v10288_v38 = vpop.eup %10287  ;;  %v11942_v29 = vpop.permute.xlu1 %2500  ;;  %v2782_v57 = vld [vmem:[%s14704_s9 + $0xc] sm:$0xf] }
 0x1c8   :  { %2432 = vrot.lane.b32.xlu0 %v2398_v4, %s10436_s29  ;;  %v10290_v39 = vpop.eup %10289  ;;  %v11944_v21 = vpop.permute.xlu0 %2498 }
 0x1c9   :  { %2794 = vperm.xlu1 %9814, %v2779_v60   ;;  %v2399_v55 = vmul.f32 %v10290_v39, %v10288_v38  ;;  %v10292_v23 = vpop.eup %10291  ;;  %v8486_v60 = vld [vmem:[%s14704_s9 + $0x74] sm:$0xf]  ;;  %v2038_v38 = vld [vmem:[%s14706_s6 + $0x60] sm:$0x3] }
 0x1ca   :  { %v11953_v35 = vpop.permute.xlu1 %2348 }
 0x1cc   :  { %2806 = vperm.xlu0 %9813, %v2780_v9   ;;  %v10294_v26 = vpop.eup %10293  ;;  %v11955_v4 = vpop.permute.xlu0 %2346  ;;  %v2480_v9 = vld [vmem:[%s14703_s8 + $0x60] sm:$0x3] }
 0x1cd   :  { %2434 = vrot.lane.b32.xlu1 %v2399_v55, %s10436_s29  ;;  %v2400_v22 = vmul.f32 %v10294_v26, %v10292_v23  ;;  %v10296_v53 = vpop.eup %10295  ;;  %v8485_v55 = vld [vmem:[%s14704_s9 + $0x70] sm:$0xf]  ;;  %v2051_v23 = vmul.f32 %v2038_v38, %v11835_v59  ;;  %v2785_v38 = vld [vmem:[%s14704_s9 + $0x18] sm:$0xf] }
 0x1ce   :  { %v11968_v39 = vpop.permute.xlu1 %2504 }
 0x1d0   :  { %2436 = vrot.lane.b32.xlu0 %v2400_v22, %s10436_s29  ;;  %v11974_v26 = vpop.permute.xlu0 %2502  ;;  %v2783_v22 = vld [vmem:[%s14704_s9 + $0x10] sm:$0xf] }
 0x1d1   :  { %3624 = vperm.xlu1 %9814, %v8483_v40   ;;  %v10298_v62 = vpop.eup %10297  ;;  %v2784_v40 = vld [vmem:[%s14704_s9 + $0x14] sm:$0xf] }
 0x1d2   :  { %v2401_v7 = vmul.f32 %v10298_v62, %v10296_v53  ;;  %v2064_v53 = vadd.f32 %v2051_v23, %v11857_v43  ;;  %v2225_v43 = vadd.f32 %v11818_v20, %v11651_v36 }
 0x1d4   :  { %3636 = vperm.xlu0 %9813, %v8484_v54   ;;  %v11984_v54 = vpop.permute.xlu1 %2352  ;;  %v11986_v62 = vpop.permute.xlu0 %2350 }
 0x1d5   :  { %2438 = vrot.lane.b32.xlu1 %v2401_v7, %s10436_s29  ;;  %v8488_v7 = vld [vmem:[%s14704_s9 + $0x7c] sm:$0xf] }
 0x1d8   :  { %2830 = vperm.xlu0 %9813, %v2782_v57   ;;  %v8399_v57 = vmul.f32 -1.442695, %v2064_v53 }
 0x1d9   :  { %2818 = vperm.xlu1 %9814, %v2781_v32   ;;  %v2786_v32 = vld [vmem:[%s14704_s9 + $0x1c] sm:$0xf] }
 0x1da   :  { %10299 = vpow2.f32 %v8399_v57 }
 0x1dc   :  { %3660 = vperm.xlu0 %9813, %v8486_v60   ;;  %v11997_v60 = vpop.permute.xlu1 %2508 }
 0x1dd   :  { %2362 = vrot.lane.b32.xlu1 %v11835_v59, %s10436_s29  ;;  %v8487_v59 = vld [vmem:[%s14704_s9 + $0x78] sm:$0xf] }
 0x1e0   :  { %2518 = vrot.lane.b32.xlu0 %v2480_v9, %s10436_s29  ;;  %v12002_v9 = vpop.permute.xlu0 %2506 }
 0x1e1   :  { %3648 = vperm.xlu1 %9814, %v8485_v55   ;;  %v14868_v55 = vld [vmem:[#allocation26_spill] sm:$0xff] }
 0x1e2   :  { %v2221_v23 = vadd.f32 %v11760_v63, %v14868_v55  ;;  %v2788_v63 = vld [vmem:[%s14704_s9 + $0x24] sm:$0xf]  ;;  %v8491_v55 = vld [vmem:[%s14704_s9 + $0x88] sm:$0xf] }
 0x1e4   :  { %2854 = vperm.xlu0 %9813, %v2784_v40   ;;  %v8489_v40 = vld [vmem:[%s14704_s9 + $0x80] sm:$0xf]  ;;  %v8400_v53 = vmul.f32 -1.442695, %v2221_v23  ;;  %v12016_v57 = vpop.permute.xlu0 %2354 }
 0x1e5   :  { %2842 = vperm.xlu1 %9814, %v2783_v22   ;;  %v8490_v22 = vld [vmem:[%s14704_s9 + $0x84] sm:$0xf] }
 0x1e6   :  { %10301 = vpow2.f32 %v8400_v53  ;;  %v2789_v53 = vld [vmem:[%s14704_s9 + $0x28] sm:$0xf] }
 0x1e8   :  { %3672 = vperm.xlu0 %9813, %v8487_v59   ;;  %v12012_v59 = vpop.permute.xlu1 %2356  ;;  %v12032_v23 = vpop.permute.xlu0 %2510 }
 0x1e9   :  { %3684 = vperm.xlu1 %9814, %v8488_v7   ;;  %v2222_v7 = vadd.f32 %v11797_v16, %v11603_v18  ;;  %v8492_v16 = vld [vmem:[%s14704_s9 + $0x8c] sm:$0xf] }
 0x1ec   :  { %2878 = vperm.xlu0 %9813, %v2786_v32   ;;  %v2787_v32 = vld [vmem:[%s14704_s9 + $0x20] sm:$0xf]  ;;  %v12027_v18 = vpop.permute.xlu1 %2512  ;;  %v12044_v37 = vpop.permute.xlu0 %2358 }
 0x1ed   :  { %2866 = vperm.xlu1 %9814, %v2785_v38   ;;  %v8401_v38 = vmul.f32 -1.442695, %v2222_v7 }
 0x1ef   :  { %10303 = vpow2.f32 %v8401_v38  ;;  %v8493_v38 = vld [vmem:[%s14704_s9 + $0x90] sm:$0xf] }
 0x1f0   :  { %3696 = vperm.xlu0 %9813, %v8489_v40   ;;  %v10300_v40 = vpop.eup %10299 }
 0x1f1   :  { %3708 = vperm.xlu1 %9814, %v8490_v22   ;;  %v2790_v22 = vld [vmem:[%s14704_s9 + $0x2c] sm:$0xf]  ;;  %v2116_v7 = vadd.f32 1.0, %v10300_v40 }
 0x1f3   :  { %10305 = vrcp.f32 %v2116_v7  ;;  %v2226_v7 = vadd.f32 %v11820_v2, %v11675_v42  ;;  %v8580_v42 = vld [vmem:[%s14704_s9 + $0x104] sm:$0xf] }
 0x1f4   :  { %2902 = vperm.xlu0 %9813, %v2788_v63   ;;  %v12040_v63 = vpop.permute.xlu1 %2360  ;;  %10307 = vtanh.f32 %v11860_v52  ;;  %v8495_v52 = vld [vmem:[%s14704_s9 + $0x98] sm:$0x1] }
 0x1f5   :  { %2890 = vperm.xlu1 %9814, %v2787_v32   ;;  %v2223_v32 = vadd.f32 %v11762_v17, %v11617_v3  ;;  %v8581_v17 = vld [vmem:[%s14704_s9 + $0x108] sm:$0xf]  ;;  %v8405_v36 = vmul.f32 -1.442695, %v2226_v7  ;;  %v2228_v7 = vadd.f32 %v11845_v27, %v11716_v30  ;;  %v2230_v30 = vadd.f32 %v11873_v13, %v11780_v56 }
 0x1f7   :  { %v8402_v3 = vmul.f32 -1.442695, %v2223_v32 }
 0x1f8   :  { %3720 = vperm.xlu0 %9813, %v8491_v55   ;;  %v8494_v55 = vld [vmem:[%s14704_s9 + $0x94] sm:$0xf]  ;;  %v12054_v40 = vpop.permute.xlu1 %2516 }
 0x1f9   :  { %3732 = vperm.xlu1 %9814, %v8492_v16   ;;  %v2224_v16 = vadd.f32 %v11799_v28, %v11631_v44  ;;  %v2791_v44 = vld [vmem:[%s14704_s9 + $0x30] sm:$0x1]  ;;  %10309 = vpow2.f32 %v8402_v3 }
 0x1fb   :  { %v8403_v28 = vmul.f32 -1.442695, %v2224_v16 }
 0x1fc   :  { %2926 = vperm.xlu0 %9813, %v2790_v22   ;;  %v10302_v22 = vpop.eup %10301  ;;  %v12072_v6 = vpop.permute.xlu1 %3108 }
 0x1fd   :  { %2914 = vperm.xlu1 %9814, %v2789_v53   ;;  %v12060_v53 = vpop.permute.xlu0 %2514  ;;  %v2273_v32 = vadd.f32 1.0, %v10302_v22  ;;  %10311 = vpow2.f32 %v8403_v28  ;;  %v2227_v22 = vadd.f32 %v11848_v15, %v11699_v25  ;;  %v2229_v25 = vadd.f32 %v11876_v24, %v11741_v1 }
 0x1fe   :  { %v8407_v15 = vmul.f32 -1.442695, %v2228_v7  ;;  %v8409_v7 = vmul.f32 -1.442695, %v2230_v30  ;;  %v14721_v30 = vmov 0.0  }
 0x1ff   :  { %10313 = vrcp.f32 %v2273_v32  ;;  %v8406_v28 = vmul.f32 -1.442695, %v2227_v22  ;;  %9196 = vmatprep.subr.bf16.mxu1 %v14721_v30  ;;  %9160 = vmatprep.subr.bf16.mxu0 %v14721_v30 }
 0x200   :  { %3744 = vperm.xlu0 %9813, %v8493_v38   ;;  %v10304_v38 = vpop.eup %10303  ;;  %9204 = vmatprep.mubr.msk.bf16.mxu1 %vm10438_vm1, %v14721_v30 }
 0x201   :  { %3756 = vperm.xlu1 %9814, %v8494_v55   ;;  %v8404_v55 = vmul.f32 -1.442695, %v2225_v43  ;;  %v12074_v20 = vpop.permute.xlu0 %3096  ;;  %v2274_v16 = vadd.f32 1.0, %v10304_v38  ;;  %v10306_v2 = vpop.eup %10305  ;;  %9168 = vmatprep.mubr.msk.bf16.mxu0 %vm10438_vm1, %v14721_v30 }
 0x202   :  { %v12079_v43 = vpop.permute.xlu1 %3132 }
 0x203   :  { %10315 = vpow2.f32 %v8404_v55 }
 0x204   :  { %4626 = vperm.xlu0 %9813, %v8581_v17   ;;  %10317 = vpow2.f32 %v8405_v36  ;;  %v10308_v17 = vpop.eup %10307 }
 0x205   :  { %2938 = vperm.xlu1 %9814, %v2791_v44   ;;  %10319 = vrcp.f32 %v2274_v16  ;;  %v12083_v3 = vpop.permute.xlu0 %3120  ;;  %v2402_v44 = vmul.f32 %v10308_v17, %v10306_v2 }
 0x206   :  { %v12088_v32 = vpop.permute.xlu1 %3156  ;;  %10321 = vpow2.f32 %v8406_v28 }
 0x207   :  { %14869 = vst [vmem:[#allocation12_spill] sm:$0xff] %v12088_v32 }
 0x209   :  { %3768 = vperm.xlu1 %9814, %v8495_v52   ;;  %v10310_v52 = vpop.eup %10309  ;;  %v12090_v38 = vpop.permute.xlu0 %3144 }
 0x20a   :  { %14870 = vst [vmem:[#allocation2_spill] sm:$0xff] %v12090_v38  ;;  %v10312_v55 = vpop.eup %10311  ;;  %v2275_v16 = vadd.f32 1.0, %v10310_v52  ;;  %v12097_v27 = vpop.permute.xlu1 %3168  ;;  %v2231_v52 = vadd.f32 %v11924_v33, %v11791_v51  ;;  %v2232_v51 = vadd.f32 %v11922_v58, %v11827_v45 }
 0x20b   :  { %v2276_v22 = vadd.f32 1.0, %v10312_v55 }
 0x20c   :  { %v10314_v36 = vpop.eup %10313  ;;  %10323 = vrcp.f32 %v2275_v16  ;;  %v8410_v13 = vmul.f32 -1.442695, %v2231_v52 }
 0x20d   :  { %4614 = vperm.xlu1 %9814, %v8580_v42   ;;  %v2377_v17 = vmul.f32 %v10314_v36, %v11895_v8  ;;  %10325 = vpow2.f32 %v8407_v15  ;;  %v8411_v15 = vmul.f32 -1.442695, %v2232_v51  ;;  %v10155_v51 = vld [vmem:[%s14707_s10 + $0x18] sm:$0xff]  }
 0x20e   :  { %10327 = vrcp.f32 %v2276_v22  ;;  %9197 = vmatpush3.bf16.msra.mxu1 %v10155_v51 }
 0x20f   :  { %9198 = vmatprep.subr.bf16.mxu1 %v14721_v30 }
 0x210   :  { %v10316_v42 = vpop.eup %10315 }
 0x211   :  { %2440 = vrot.lane.b32.xlu1 %v2402_v44, %s10436_s29  ;;  %v10318_v2 = vpop.eup %10317  ;;  %v8408_v44 = vmul.f32 -1.442695, %v2229_v25  ;;  %v2277_v32 = vadd.f32 1.0, %v10316_v42 }
 0x212   :  { %v10320_v38 = vpop.eup %10319  ;;  %v2278_v24 = vadd.f32 1.0, %v10318_v2 }
 0x213   :  { %10329 = vpow2.f32 %v8408_v44  ;;  %v2378_v56 = vmul.f32 %v10320_v38, %v11893_v11  ;;  %v10322_v25 = vpop.eup %10321 }
 0x214   :  { %10331 = vrcp.f32 %v2277_v32  ;;  %v2279_v32 = vadd.f32 1.0, %v10322_v25 }
 0x215   :  { %10333 = vrcp.f32 %v2278_v24 }
 0x216   :  { %10335 = vpow2.f32 %v8409_v7 }
 0x217   :  { %10337 = vpow2.f32 %v8410_v13 }
 0x219   :  { %v10324_v45 = vpop.eup %10323 }
 0x21a   :  { %v2417_v28 = vpop.permute.xlu0 %2416  ;;  %v10326_v58 = vpop.eup %10325  ;;  %v2379_v2 = vmul.f32 %v10324_v45, %v11933_v31 }
 0x21b   :  { %v12101_v1 = vadd.f32 %v2417_v28, %v2377_v17  ;;  %v10328_v42 = vpop.eup %10327  ;;  %v2280_v17 = vadd.f32 1.0, %v10326_v58  ;;  %v10157_v58 = vld [vmem:[%s14707_s10 + $0x10] sm:$0xff]  }
 0x21c   :  { %9199 = vmatpush3.bf16.msra.mxu1 %v10157_v58 }
 0x21d   :  { %14871 = vst [vmem:[#allocation11_spill] sm:$0xff] %v12101_v1  ;;  %v2533_v8 = vmul.f32 %v11915_v14, %v12101_v1  ;;  %9200 = vmatprep.subr.bf16.mxu1 %v14721_v30 }
 0x21e   :  { %v2419_v55 = vpop.permute.xlu1 %2418 }
 0x21f   :  { %v2546_v33 = vadd.f32 %v2533_v8, %v11691_v47  ;;  %v12109_v36 = vadd.f32 %v2419_v55, %v2378_v56  ;;  %v2380_v56 = vmul.f32 %v10328_v42, %v11930_v48 }
 0x220   :  { %v10330_v22 = vpop.eup %10329 }
 0x221   :  { %14872 = vst [vmem:[#allocation14_spill] sm:$0xff] %v12109_v36  ;;  %v8413_v16 = vmul.f32 -1.442695, %v2546_v33  ;;  %v2534_v14 = vmul.f32 %v11907_v34, %v12109_v36  ;;  %v2281_v7 = vadd.f32 1.0, %v10330_v22 }
 0x223   :  { %10339 = vpow2.f32 %v8413_v16  ;;  %v2547_v11 = vadd.f32 %v2534_v14, %v11710_v19  ;;  %v10332_v19 = vpop.eup %10331 }
 0x224   :  { %10341 = vpow2.f32 %v8411_v15  ;;  %v10334_v28 = vpop.eup %10333  ;;  %v2381_v15 = vmul.f32 %v10332_v19, %v11955_v4  ;;  %v10158_v19 = vld [vmem:[%s14707_s10 + $0x30] sm:$0xff]  }
 0x225   :  { %v8414_v38 = vmul.f32 -1.442695, %v2547_v11  ;;  %v10336_v24 = vpop.eup %10335  ;;  %v2382_v48 = vmul.f32 %v10334_v28, %v11953_v35 }
 0x226   :  { %v10338_v31 = vpop.eup %10337  ;;  %v2282_v14 = vadd.f32 1.0, %v10336_v24 }
 0x227   :  { %v12114_v47 = vpop.permute.xlu0 %3180  ;;  %10343 = vpow2.f32 %v8414_v38 }
 0x228   :  { %10345 = vrcp.f32 %v2279_v32 }
 0x229   :  { %10347 = vrcp.f32 %v2280_v17 }
 0x22a   :  { %10349 = vrcp.f32 %v2281_v7 }
 0x22b   :  { %v2421_v34 = vpop.permute.xlu0 %2420  ;;  %v12119_v44 = vpop.permute.xlu1 %3192 }
 0x22c   :  { %v12121_v52 = vadd.f32 %v2421_v34, %v2379_v2 }
 0x22e   :  { %14873 = vst [vmem:[#allocation3_spill] sm:$0xff] %v12121_v52  ;;  %v2535_v8 = vmul.f32 %v11944_v21, %v12121_v52  ;;  %v2283_v21 = vadd.f32 1.0, %v10338_v31 }
 0x22f   :  { %v12126_v13 = vpop.permute.xlu0 %2206  ;;  %v2423_v16 = vpop.permute.xlu1 %2422 }
 0x230   :  { %v10340_v33 = vpop.eup %10339  ;;  %v2548_v55 = vadd.f32 %v2535_v8, %v11728_v61  ;;  %v12132_v25 = vadd.f32 %v2423_v16, %v2380_v56  ;;  %v10156_v61 = vld [vmem:[%s14707_s10 + $0x38] sm:$0xff]  }
 0x231   :  { %v2598_v32 = vadd.f32 1.0, %v10340_v33  ;;  %v10342_v42 = vpop.eup %10341  ;;  %9161 = vmatpush3.bf16.msra.mxu0 %v10156_v61 }
 0x232   :  { %14874 = vst [vmem:[#allocation16_spill] sm:$0xff] %v12132_v25  ;;  %v8415_v11 = vmul.f32 -1.442695, %v2548_v55  ;;  %v2536_v38 = vmul.f32 %v11942_v29, %v12132_v25  ;;  %9162 = vmatprep.subr.bf16.mxu0 %v14721_v30  ;;  %v2284_v24 = vadd.f32 1.0, %v10342_v42 }
 0x233   :  { %v2425_v45 = vpop.permute.xlu0 %2424  ;;  %v2427_v4 = vpop.permute.xlu1 %2426 }
 0x234   :  { %10351 = vpow2.f32 %v8415_v11  ;;  %v12145_v2 = vadd.f32 %v2425_v45, %v2381_v15  ;;  %v10344_v22 = vpop.eup %10343  ;;  %v2549_v35 = vadd.f32 %v2536_v38, %v11755_v50  ;;  %v12148_v17 = vadd.f32 %v2427_v4, %v2382_v48  ;;  %v10159_v50 = vld [vmem:[%s14707_s10 + $0x8] sm:$0xff]   ;;  %v10161_v15 = vld [vmem:[%s14707_s10] sm:$0xff]  }
 0x235   :  { %10353 = vrcp.f32 %v2282_v14  ;;  %v2599_v29 = vadd.f32 1.0, %v10344_v22  ;;  %v10346_v28 = vpop.eup %10345  ;;  %9163 = vmatpush3.bf16.msra.mxu0 %v10158_v19  ;;  %9201 = vmatpush3.bf16.msra.mxu1 %v10159_v50  ;;  %v10162_v50 = vld [vmem:[%s14707_s10 + $0x20] sm:$0xff]  }
 0x236   :  { %14875 = vst [vmem:[#allocation21_spill] sm:$0xff] %v12145_v2  ;;  %14876 = vst [vmem:[#allocation7_spill] sm:$0xff] %v12148_v17  ;;  %10355 = vrcp.f32 %v2283_v21  ;;  %v2537_v34 = vmul.f32 %v11974_v26, %v12145_v2  ;;  %v8416_v7 = vmul.f32 -1.442695, %v2549_v35  ;;  %v2538_v8 = vmul.f32 %v11968_v39, %v12148_v17  ;;  %9164 = vmatprep.subr.bf16.mxu0 %v14721_v30  ;;  %v10348_v14 = vpop.eup %10347 }
 0x237   :  { %10357 = vrcp.f32 %v2598_v32  ;;  %v12162_v26 = vpop.permute.xlu0 %3204  ;;  %v2383_v33 = vmul.f32 %v10346_v28, %v11986_v62  ;;  %9202 = vmatprep.subr.bf16.mxu1 %v14721_v30  ;;  %v10160_v62 = vld [vmem:[%s14707_s10 + $0x28] sm:$0xff]   ;;  %v10350_v11 = vpop.eup %10349  ;;  %v2384_v48 = vmul.f32 %v10348_v14, %v11984_v54 }
 0x238   :  { %10359 = vrcp.f32 %v2599_v29  ;;  %v2550_v31 = vadd.f32 %v2537_v34, %v11767_v10  ;;  %v12165_v56 = vpop.permute.xlu1 %3228  ;;  %v2551_v51 = vadd.f32 %v2538_v8, %v11777_v5  ;;  %v2385_v58 = vmul.f32 %v10350_v11, %v12016_v57 }
 0x239   :  { %10361 = vpow2.f32 %v8416_v7  ;;  %9165 = vmatpush3.bf16.msra.mxu0 %v10160_v62  ;;  %9203 = vmatpush3.bf16.msra.mxu1 %v10161_v15 }
 0x23a   :  { %v8417_v55 = vmul.f32 -1.442695, %v2550_v31  ;;  %v8418_v39 = vmul.f32 -1.442695, %v2551_v51  ;;  %9166 = vmatprep.subr.bf16.mxu0 %v14721_v30  ;;  %9268 = vmatprep.subr.bf16.mxu1 %v14721_v30 }
 0x23b   :  { %v2429_v16 = vpop.permute.xlu0 %2428 }
 0x23c   :  { %10363 = vpow2.f32 %v8417_v55  ;;  %v12171_v21 = vadd.f32 %v2429_v16, %v2383_v33  ;;  %v12173_v10 = vpop.permute.xlu1 %3240 }
 0x23d   :  { %10365 = vpow2.f32 %v8418_v39  ;;  %9167 = vmatpush3.bf16.msra.mxu0 %v10162_v50 }
 0x23e   :  { %14877 = vst [vmem:[#allocation8_spill] sm:$0xff] %v12171_v21  ;;  %v2539_v5 = vmul.f32 %v12002_v9, %v12171_v21  ;;  %10367 = vrcp.f32 %v2284_v24  ;;  %9232 = vmatprep.subr.bf16.mxu0 %v14721_v30 }
 0x23f   :  { %v12184_v32 = vpop.permute.xlu0 %3216 }
 0x240   :  { %v2552_v9 = vadd.f32 %v2539_v5, %v11807_v12  ;;  %v2431_v38 = vpop.permute.xlu1 %2430 }
 0x241   :  { %v10352_v45 = vpop.eup %10351  ;;  %v12191_v61 = vadd.f32 %v2431_v38, %v2384_v48 }
 0x242   :  { %v10354_v54 = vpop.eup %10353  ;;  %v8419_v42 = vmul.f32 -1.442695, %v2552_v9  ;;  %v2600_v29 = vadd.f32 1.0, %v10352_v45 }
 0x243   :  { %14878 = vst [vmem:[#allocation4_spill] sm:$0xff] %v12191_v61  ;;  %v10356_v4 = vpop.eup %10355  ;;  %v2540_v22 = vmul.f32 %v11997_v60, %v12191_v61  ;;  %v2433_v35 = vpop.permute.xlu0 %2432  ;;  %v2386_v8 = vmul.f32 %v10354_v54, %v12012_v59 }
 0x244   :  { %v12198_v12 = vpop.eup %10357  ;;  %v12200_v34 = vadd.f32 %v2433_v35, %v2385_v58  ;;  %v12202_v19 = vpop.permute.xlu1 %2794  ;;  %10369 = vpow2.f32 %v8419_v42  ;;  %v2387_v14 = vmul.f32 %v10356_v4, %v12044_v37 }
 0x245   :  { %14879 = vst [vmem:[#allocation13_spill] sm:$0xff] %v12198_v12  ;;  %v12207_v28 = vpop.eup %10359  ;;  %v2553_v57 = vadd.f32 %v2540_v22, %v11851_v49  ;;  %10371 = vrcp.f32 %v2600_v29 }
 0x246   :  { %14880 = vst [vmem:[#allocation15_spill] sm:$0xff] %v12200_v34  ;;  %14881 = vst [vmem:[#allocation23_spill] sm:$0xff] %v12207_v28  ;;  %v10362_v24 = vpop.eup %10361  ;;  %v2541_v60 = vmul.f32 %v12032_v23, %v12200_v34  ;;  %v12214_v7 = vpack.c.bf16 %v12207_v28, %v12198_v12 }
 0x247   :  { %v2601_v31 = vadd.f32 1.0, %v10362_v24  ;;  %v8420_v51 = vmul.f32 -1.442695, %v2553_v57  ;;  %v12217_v33 = vpop.permute.xlu0 %2806  ;;  %v8523_v24 = vld [vmem:[%s14704_s9 + $0xa0] sm:$0xf] }
 0x248   :  { %v2554_v49 = vadd.f32 %v2541_v60, %v11865_v41  ;;  %v2743_v55 = vrot.slane %v12214_v7, 4  ;;  %v2435_v39 = vpop.permute.xlu1 %2434  ;;  %v12223_v23 = vshrl.u32 %v12214_v7, 16  ;;  %v12229_v5 = vshll.u32 %v12214_v7, 16 }
 0x249   :  { %v10364_v16 = vpop.eup %10363  ;;  %10373 = vrcp.f32 %v2601_v31  ;;  %v12226_v59 = vadd.f32 %v2435_v39, %v2386_v8  ;;  %v3573_v41 = vrot.slane %v12214_v7, 5 }
 0x24a   :  { %v10366_v62 = vpop.eup %10365  ;;  %v2602_v15 = vadd.f32 1.0, %v10364_v16  ;;  %10375 = vpow2.f32 %v8420_v51  ;;  %v8421_v11 = vmul.f32 -1.442695, %v2554_v49  ;;  %2754 = vrot.lane.b32.xlu0 %v2743_v55, %s10436_s29  ;;  %v3007_v38 = vrot.slane %v12223_v23, 4 }
 0x24b   :  { %14882 = vst [vmem:[#allocation25_spill] sm:$0xff] %v12226_v59  ;;  %v2603_v48 = vadd.f32 1.0, %v10366_v62  ;;  %v2542_v37 = vmul.f32 %v12027_v18, %v12226_v59  ;;  %v2437_v9 = vpop.permute.xlu0 %2436  ;;  %v10368_v45 = vpop.eup %10367  ;;  %v3010_v58 = vrot.slane %v12229_v5, 5  ;;  %v4569_v4 = vrot.slane %v12229_v5, 1  ;;  %v14886_v62 = vld [vmem:[#allocation6_spill] sm:$0xff] }
 0x24c   :  { %10377 = vrcp.f32 %v2602_v15  ;;  %v12238_v54 = vadd.f32 %v2437_v9, %v2387_v14  ;;  %v12241_v42 = vpop.permute.xlu1 %3624  ;;  %v2388_v50 = vmul.f32 %v10368_v45, %v12040_v63  ;;  %v5409_v8 = vrot.slane %v12229_v5, 4  ;;  %v8522_v63 = vld [vmem:[%s14704_s9 + $0x9c] sm:$0xf] }
 0x24d   :  { %10379 = vrcp.f32 %v2603_v48  ;;  %v2555_v22 = vadd.f32 %v2542_v37, %v11881_v0  ;;  %v12247_v35 = vor.u32 %v3010_v58, %v3007_v38  ;;  %v4570_v29 = vor.u32 %v4569_v4, %v12223_v23 }
 0x24e   :  { %14883 = vst [vmem:[#allocation18_spill] sm:$0xff] %v12238_v54  ;;  %10381 = vpow2.f32 %v8421_v11  ;;  %v2543_v18 = vmul.f32 %v12060_v53, %v12238_v54  ;;  %3584 = vrot.lane.b32.xlu0 %v3573_v41, %s10436_s29  ;;  %v5408_v53 = vrot.slane %v12223_v23, 3 }
 0x24f   :  { %v8422_v57 = vmul.f32 -1.442695, %v2555_v22  ;;  %3057 = vrot.lane.b32.xlu1 %v12247_v35, %s10436_s29  ;;  %v12404_v59 = vpop.permute.xlu0 %3636 }
 0x250   :  { %v2556_v60 = vadd.f32 %v2543_v18, %v11899_v46  ;;  %v2439_v0 = vpop.permute.xlu1 %2438  ;;  %v12265_v39 = vor.u32 %v5409_v8, %v5408_v53 }
 0x251   :  { %10383 = vpow2.f32 %v8422_v57  ;;  %v12263_v31 = vadd.f32 %v2439_v0, %v2388_v50  ;;  %v10370_v51 = vpop.eup %10369 }
 0x252   :  { %v8423_v49 = vmul.f32 -1.442695, %v2556_v60  ;;  %4054 = vperm.xlu0 %9813, %v8523_v24   ;;  %v2604_v16 = vadd.f32 1.0, %v10370_v51  ;;  %v12269_v14 = vpop.eup %10371 }
 0x253   :  { %14884 = vst [vmem:[#allocation9_spill] sm:$0xff] %v12263_v31  ;;  %v2544_v46 = vmul.f32 %v12054_v40, %v12263_v31  ;;  %4042 = vperm.xlu1 %9814, %v8522_v63   ;;  %14885 = vst [vmem:[#allocation10_spill] sm:$0xff] %v12269_v14  ;;  %v12434_v36 = vpop.permute.xlu0 %2830 }
 0x254   :  { %10385 = vpow2.f32 %v8423_v49  ;;  %v12272_v11 = vpop.permute.xlu1 %2818 }
 0x255   :  { %v2557_v15 = vadd.f32 %v2544_v46, %v14886_v62  ;;  %10387 = vrcp.f32 %v2604_v16 }
 0x256   :  { %v12274_v48 = vpop.eup %10373 }
 0x257   :  { %14887 = vst [vmem:[#allocation20_spill] sm:$0xff] %v12274_v48  ;;  %v10376_v37 = vpop.eup %10375  ;;  %v8424_v9 = vmul.f32 -1.442695, %v2557_v15  ;;  %v12278_v38 = vpack.c.bf16 %v12274_v48, %v12269_v14 }
 0x258   :  { %v2605_v45 = vadd.f32 1.0, %v10376_v37  ;;  %v12282_v58 = vpop.permute.xlu1 %2362 }
 0x259   :  { %v12280_v40 = vpop.eup %10377  ;;  %10389 = vpow2.f32 %v8424_v9  ;;  %v3574_v4 = vrot.slane %v12278_v38, 5  ;;  %v2744_v22 = vrot.slane %v12278_v38, 4  ;;  %v12289_v50 = vshrl.u32 %v12278_v38, 16 }
 0x25a   :  { %14888 = vst [vmem:[#allocation17_spill] sm:$0xff] %v12280_v40  ;;  %v12286_v18 = vpop.eup %10379  ;;  %10391 = vrcp.f32 %v2605_v45  ;;  %v12292_v57 = vshll.u32 %v12278_v38, 16 }
 0x25b   :  { %14889 = vst [vmem:[#allocation22_spill] sm:$0xff] %v12286_v18  ;;  %v10382_v24 = vpop.eup %10381  ;;  %v3575_v60 = vsel %vm3572_vm2, %v3573_v41, %v3574_v4  ;;  %v12298_v0 = vsel %vm2742_vm3, %v2743_v55, %v2744_v22  ;;  %v12302_v53 = vpack.c.bf16 %v12286_v18, %v12280_v40  ;;  %v3015_v63 = vrot.slane %v12289_v50, 4 }
 0x25c   :  { %14890 = vst [vmem:[#allocation26_spill] sm:$0xff] %v12298_v0  ;;  %v2606_v8 = vadd.f32 1.0, %v10382_v24  ;;  %3586 = vrot.lane.b32.xlu0 %v3575_v60, %s10436_s29  ;;  %2756 = vrot.lane.b32.xlu1 %v12298_v0, %s10436_s29  ;;  %v3018_v41 = vrot.slane %v12292_v57, 5  ;;  %v4571_v51 = vrot.slane %v12292_v57, 1  ;;  %v12310_v49 = vpop.permute.xlu1 %3648 }
 0x25d   :  { %v2746_v55 = vrot.slane %v12302_v53, 4  ;;  %v12314_v46 = vshrl.u32 %v12302_v53, 16  ;;  %v3025_v16 = vshll.u32 %v12302_v53, 16  ;;  %v3576_v37 = vrot.slane %v12302_v53, 5 }
 0x25e   :  { %v10384_v62 = vpop.eup %10383  ;;  %v3019_v15 = vor.u32 %v3018_v41, %v3015_v63  ;;  %v12319_v9 = vsel %vm4568_vm4, %v4570_v29, %v4571_v51  ;;  %10393 = vrcp.f32 %v2606_v8  ;;  %v3983_v63 = vrot.slane %v12289_v50, 7 }
 0x25f   :  { %v2607_v45 = vadd.f32 1.0, %v10384_v62  ;;  %v12322_v24 = vsel %vm2742_vm3, %v2744_v22, %v2746_v55  ;;  %v3024_v60 = vrot.slane %v12314_v46, 4  ;;  %v3027_v31 = vrot.slane %v3025_v16, 5  ;;  %v14892_v22 = vld [vmem:[#allocation19_spill] sm:$0xff] }
 0x260   :  { %14891 = vst [vmem:[#allocation6_spill] sm:$0xff] %v12322_v24  ;;  %v3020_v30 = vsel %vm3003_vm5, %v12247_v35, %v3019_v15  ;;  %2758 = vrot.lane.b32.xlu1 %v12322_v24, %s10436_s29  ;;  %v14737_v41 = vrot.slane %v12314_v46, 7  ;;  %v12332_v8 = vpop.permute.xlu1 %2842  ;;  %v2233_v62 = vadd.f32 %v12126_v13, %v14892_v22  ;;  %v12337_v35 = vor.u32 %v3983_v63, %v12292_v57 }
 0x261   :  { %v10386_v29 = vpop.eup %10385  ;;  %10395 = vrcp.f32 %v2607_v45  ;;  %3059 = vrot.lane.b32.xlu0 %v3020_v30, %s10436_s29  ;;  %v3028_v18 = vor.u32 %v3027_v31, %v3024_v60  ;;  %v4573_v48 = vor.u32 %v4571_v51, %v12289_v50  ;;  %v4574_v14 = vrot.slane %v3025_v16, 1 }
 0x262   :  { %v3987_v40 = vor.u32 %v14737_v41, %v3025_v16  ;;  %v2608_v28 = vadd.f32 1.0, %v10386_v29  ;;  %v3577_v45 = vsel %vm3572_vm2, %v3574_v4, %v3576_v37  ;;  %v12344_v12 = vpop.eup %10387  ;;  %v5411_v60 = vrot.slane %v12289_v50, 3 }
 0x263   :  { %v3029_v30 = vsel %vm3003_vm5, %v3019_v15, %v3028_v18  ;;  %14893 = vst [vmem:[#allocation19_spill] sm:$0xff] %v12344_v12  ;;  %v12354_v51 = vsel %vm4568_vm4, %v4573_v48, %v4574_v14  ;;  %v8412_v29 = vmul.f32 -1.442695, %v2233_v62  ;;  %v4576_v15 = vor.u32 %v4574_v14, %v12314_v46 }
 0x264   :  { %3061 = vrot.lane.b32.xlu1 %v3029_v30, %s10436_s29  ;;  %v12348_v13 = vpop.permute.xlu1 %3684  ;;  %v12351_v31 = vsel %vm3980_vm6, %v3983_v63, %v3987_v40  ;;  %v5412_v22 = vrot.slane %v12292_v57, 4  ;;  %v5415_v30 = vrot.slane %v12314_v46, 3  ;;  %v5416_v54 = vrot.slane %v3025_v16, 4 }
 0x265   :  { %3588 = vrot.lane.b32.xlu0 %v3577_v45, %s10436_s29  ;;  %10397 = vrcp.f32 %v2608_v28  ;;  %v14900_v2 = vrot.slane %v12314_v46, 7  ;;  %v8619_v46 = vld [vmem:[%s14704_s9 + $0x138] sm:$0xf] }
 0x266   :  { %v10390_v4 = vpop.eup %10389  ;;  %v5413_v48 = vor.u32 %v5412_v22, %v5411_v60  ;;  %v5417_v63 = vor.u32 %v5416_v54, %v5415_v30 }
 0x267   :  { %v12359_v41 = vpop.eup %10391  ;;  %v2609_v45 = vadd.f32 1.0, %v10390_v4 }
 0x268   :  { %14894 = vst [vmem:[#allocation27_spill] sm:$0xff] %v12359_v41  ;;  %v12364_v40 = vpack.c.bf16 %v12359_v41, %v12344_v12  ;;  %v12366_v50 = vpop.permute.xlu1 %2866  ;;  %v12374_v28 = vsel %vm5407_vm7, %v12265_v39, %v5413_v48  ;;  %v12377_v4 = vsel %vm5407_vm7, %v5413_v48, %v5417_v63 }
 0x269   :  { %10399 = vrcp.f32 %v2609_v45  ;;  %14895 = vst [vmem:[#allocation28_spill] sm:$0xff] %v12374_v28  ;;  %14896 = vst [vmem:[#allocation29_spill] sm:$0xff] %v12377_v4 }
 0x26a   :  { %10401 = vpow2.f32 %v8412_v29  ;;  %v3578_v14 = vrot.slane %v12364_v40, 5  ;;  %v14744_v57 = vrot.slane %v12364_v40, 4  ;;  %v3031_v62 = vshrl.u32 %v12364_v40, 16 }
 0x26b   :  { %v3034_v16 = vshll.u32 %v12364_v40, 16  ;;  %v12379_v60 = vpop.eup %10393  ;;  %v14907_v4 = vrot.slane %v12364_v40, 4 }
 0x26c   :  { %14897 = vst [vmem:[#allocation30_spill] sm:$0xff] %v12379_v60  ;;  %v3579_v54 = vsel %vm3572_vm2, %v3576_v37, %v3578_v14  ;;  %v12385_v29 = vsel %vm2742_vm3, %v2746_v55, %v14744_v57  ;;  %v3033_v22 = vrot.slane %v3031_v62, 4  ;;  %v3989_v45 = vrot.slane %v3031_v62, 7  ;;  %v12387_v30 = vpop.permute.xlu1 %3708  ;;  %v8620_v37 = vld [vmem:[%s14704_s9 + $0x13c] sm:$0xf] }
 0x26d   :  { %14898 = vst [vmem:[#allocation31_spill] sm:$0xff] %v12385_v29  ;;  %3590 = vrot.lane.b32.xlu0 %v3579_v54, %s10436_s29  ;;  %2760 = vrot.lane.b32.xlu1 %v12385_v29, %s10436_s29  ;;  %v3036_v39 = vrot.slane %v3034_v16, 5  ;;  %v4577_v48 = vrot.slane %v3034_v16, 1  ;;  %v5419_v55 = vrot.slane %v3031_v62, 3  ;;  %v5420_v52 = vrot.slane %v3034_v16, 4 }
 0x26e   :  { %v12392_v41 = vpop.eup %10395  ;;  %v3990_v12 = vor.u32 %v3989_v45, %v3034_v16  ;;  %v8582_v29 = vld [vmem:[%s14704_s9 + $0x10c] sm:$0xf] }
 0x26f   :  { %14899 = vst [vmem:[#allocation32_spill] sm:$0xff] %v12392_v41  ;;  %v3037_v57 = vor.u32 %v3036_v39, %v3033_v22  ;;  %v12399_v34 = vpack.c.bf16 %v12392_v41, %v12379_v60  ;;  %v12402_v54 = vsel %vm4568_vm4, %v4576_v15, %v4577_v48  ;;  %v4579_v21 = vor.u32 %v4577_v48, %v3031_v62 }
 0x270   :  { %v12409_v61 = vsel %vm3980_vm6, %v14900_v2, %v3990_v12  ;;  %v12411_v17 = vpop.permute.xlu1 %2890  ;;  %v5421_v16 = vor.u32 %v5420_v52, %v5419_v55 }
 0x271   :  { %5042 = vperm.xlu0 %9813, %v8620_v37   ;;  %v3038_v22 = vsel %vm3003_vm5, %v3028_v18, %v3037_v57  ;;  %v14769_v39 = vrot.slane %v12399_v34, 5  ;;  %v3040_v41 = vshrl.u32 %v12399_v34, 16  ;;  %v3043_v15 = vshll.u32 %v12399_v34, 16 }
 0x272   :  { %3063 = vrot.lane.b32.xlu1 %v3038_v22, %s10436_s29  ;;  %v12424_v37 = vpop.eup %10397  ;;  %v12430_v1 = vsel %vm5407_vm7, %v5417_v63, %v5421_v16 }
 0x273   :  { %v3581_v2 = vsel %vm3572_vm2, %v3578_v14, %v14769_v39  ;;  %v3042_v12 = vrot.slane %v3040_v41, 4  ;;  %v3992_v62 = vrot.slane %v3040_v41, 7  ;;  %v3045_v18 = vrot.slane %v3043_v15, 5  ;;  %14901 = vst [vmem:[#allocation33_spill] sm:$0xff] %v12424_v37  ;;  %14903 = vst [vmem:[#allocation35_spill] sm:$0xff] %v12430_v1 }
 0x274   :  { %v4580_v48 = vrot.slane %v3043_v15, 1  ;;  %v12426_v60 = vpop.permute.xlu1 %3732  ;;  %v5423_v1 = vrot.slane %v3040_v41, 3  ;;  %v5424_v24 = vrot.slane %v3043_v15, 4 }
 0x275   :  { %14902 = vst [vmem:[#allocation34_spill] sm:$0xff] %v12426_v60  ;;  %3592 = vrot.lane.b32.xlu0 %v3581_v2, %s10436_s29  ;;  %v3993_v22 = vor.u32 %v3992_v62, %v3043_v15  ;;  %v3046_v14 = vor.u32 %v3045_v18, %v3042_v12  ;;  %v12460_v15 = vpop.permute.xlu0 %3660 }
 0x276   :  { %v12432_v25 = vpop.eup %10399  ;;  %5030 = vperm.xlu1 %9814, %v8619_v46   ;;  %v12437_v52 = vsel %vm4568_vm4, %v4579_v21, %v4580_v48  ;;  %v4582_v55 = vor.u32 %v4580_v48, %v3040_v41  ;;  %v2750_v21 = vrot.slane %v12399_v34, 4 }
 0x277   :  { %14904 = vst [vmem:[#allocation36_spill] sm:$0xff] %v12432_v25  ;;  %14905 = vst [vmem:[#allocation37_spill] sm:$0xff] %v12437_v52  ;;  %v10402_v39 = vpop.eup %10401  ;;  %v12444_v2 = vpack.c.bf16 %v12432_v25, %v12424_v37  ;;  %v12447_v63 = vsel %vm3980_vm6, %v3989_v45, %v3993_v22  ;;  %v3047_v46 = vsel %vm3003_vm5, %v3037_v57, %v3046_v14 }
 0x278   :  { %v12450_v12 = vpop.permute.xlu1 %2914  ;;  %v2285_v25 = vadd.f32 1.0, %v10402_v39  ;;  %v5425_v22 = vor.u32 %v5424_v24, %v5423_v1  ;;  %v12470_v0 = vsel %vm2742_vm3, %v14907_v4, %v2750_v21 }
 0x279   :  { %3065 = vrot.lane.b32.xlu0 %v3047_v46, %s10436_s29  ;;  %v3582_v18 = vrot.slane %v12444_v2, 5  ;;  %v12456_v48 = vshrl.u32 %v12444_v2, 16  ;;  %v3052_v45 = vshll.u32 %v12444_v2, 16  ;;  %v12463_v57 = vrot.slane %v12444_v2, 4  ;;  %14908 = vst [vmem:[#allocation39_spill] sm:$0xff] %v12470_v0 }
 0x27a   :  { %4638 = vperm.xlu1 %9814, %v8582_v29   ;;  %v12476_v24 = vsel %vm5407_vm7, %v5421_v16, %v5425_v22  ;;  %10403 = vrcp.f32 %v2285_v25 }
 0x27b   :  { %v14777_v41 = vrot.slane %v12456_v48, 7  ;;  %v4583_v46 = vrot.slane %v3052_v45, 1  ;;  %14909 = vst [vmem:[#allocation40_spill] sm:$0xff] %v12476_v24  ;;  %v5427_v29 = vrot.slane %v12456_v48, 3  ;;  %v12492_v16 = vsel %vm2742_vm3, %v2750_v21, %v12463_v57 }
 0x27c   :  { %v12465_v37 = vpop.permute.xlu1 %3756  ;;  %14911 = vst [vmem:[#allocation42_spill] sm:$0xff] %v12492_v16  ;;  %v3054_v25 = vrot.slane %v3052_v45, 5 }
 0x27d   :  { %14906 = vst [vmem:[#allocation38_spill] sm:$0xff] %v12465_v37  ;;  %3596 = vrot.lane.b32.xlu0 %v3582_v18, %s10436_s29  ;;  %v3996_v1 = vor.u32 %v14777_v41, %v3052_v45  ;;  %v12482_v39 = vsel %vm4568_vm4, %v4582_v55, %v4583_v46  ;;  %v12485_v4 = vor.u32 %v4583_v46, %v12456_v48  ;;  %v5428_v37 = vrot.slane %v3052_v45, 4  ;;  %v2519_v46 = vpop.permute.xlu0 %2518 }
 0x27e   :  { %2762 = vrot.lane.b32.xlu1 %v12470_v0, %s10436_s29  ;;  %14910 = vst [vmem:[#allocation41_spill] sm:$0xff] %v12482_v39  ;;  %v3051_v41 = vrot.slane %v12456_v48, 4  ;;  %v3981_v0 = vrot.slane %v12223_v23, 7  ;;  %v8583_v23 = vld [vmem:[%s14704_s9 + $0x110] sm:$0xf] }
 0x27f   :  { %v12488_v28 = vsel %vm3980_vm6, %v3992_v62, %v3996_v1  ;;  %v12499_v55 = vor.u32 %v5428_v37, %v5427_v29  ;;  %v14913_v1 = vrot.slane %v12399_v34, 5 }
 0x280   :  { %v12495_v24 = vpop.permute.xlu1 %2938  ;;  %v3055_v21 = vor.u32 %v3054_v25, %v3051_v41  ;;  %v3982_v29 = vor.u32 %v3981_v0, %v12229_v5  ;;  %v8525_v41 = vld [vmem:[%s14704_s9 + $0xa8] sm:$0xf] }
 0x281   :  { %2764 = vrot.lane.b32.xlu0 %v12492_v16, %s10436_s29  ;;  %v12505_v62 = vsel %vm5407_vm7, %v5425_v22, %v12499_v55  ;;  %v3583_v45 = vsel %vm3572_vm2, %v14913_v1, %v3582_v18  ;;  %v12515_v37 = vpop.permute.xlu0 %2854  ;;  %v8524_v1 = vld [vmem:[%s14704_s9 + $0xa4] sm:$0xf] }
 0x282   :  { %2766 = vrot.lane.b32.xlu1 %v12463_v57, %s10436_s29  ;;  %14912 = vst [vmem:[#allocation43_spill] sm:$0xff] %v12505_v62  ;;  %v3056_v22 = vsel %vm3003_vm5, %v3046_v14, %v3055_v21 }
 0x284   :  { %v12511_v39 = vpop.permute.xlu1 %3768 }
 0x285   :  { %14914 = vst [vmem:[#allocation44_spill] sm:$0xff] %v12511_v39  ;;  %3594 = vrot.lane.b32.xlu0 %v3583_v45, %s10436_s29  ;;  %v12530_v14 = vpop.permute.xlu0 %3672  ;;  %v8622_v45 = vld [vmem:[%s14704_s9 + $0x144] sm:$0xf]  ;;  %v8530_v39 = vld [vmem:[%s14704_s9 + $0xbc] sm:$0xf] }
 0x286   :  { %3069 = vrot.lane.b32.xlu1 %v3055_v21, %s10436_s29 }
 0x287   :  { %v10404_v18 = vpop.eup %10403 }
 0x288   :  { %v12519_v16 = vpop.permute.xlu1 %4614  ;;  %v2389_v25 = vmul.f32 %v10404_v18, %v12282_v58  ;;  %v8584_v18 = vld [vmem:[%s14704_s9 + $0x114] sm:$0xf] }
 0x289   :  { %3067 = vrot.lane.b32.xlu0 %v3056_v22, %s10436_s29  ;;  %v14916_v22 = vld [vmem:[#allocation5_spill] sm:$0xff] }
 0x28a   :  { %4002 = vrot.lane.b32.xlu1 %v3982_v29, %s10436_s29 }
 0x28c   :  { %v2441_v5 = vpop.permute.xlu1 %2440 }
 0x28d   :  { %4650 = vperm.xlu0 %9813, %v8583_v23   ;;  %v12532_v21 = vadd.f32 %v2441_v5, %v2389_v25  ;;  %v8621_v23 = vld [vmem:[%s14704_s9 + $0x140] sm:$0xf] }
 0x28e   :  { %4078 = vperm.xlu1 %9814, %v8525_v41   ;;  %v12548_v41 = vpop.permute.xlu0 %2878 }
 0x28f   :  { %14915 = vst [vmem:[#allocation45_spill] sm:$0xff] %v12532_v21  ;;  %v2545_v29 = vmul.f32 %v2519_v46, %v12532_v21  ;;  %v8526_v46 = vld [vmem:[%s14704_s9 + $0xac] sm:$0xf] }
 0x291   :  { %4066 = vperm.xlu0 %9813, %v8524_v1   ;;  %v2558_v58 = vadd.f32 %v2545_v29, %v14916_v22  ;;  %v8585_v1 = vld [vmem:[%s14704_s9 + $0x118] sm:$0xf]  ;;  %v8527_v29 = vld [vmem:[%s14704_s9 + $0xb0] sm:$0xf] }
 0x292   :  { %5066 = vperm.xlu1 %9814, %v8622_v45   ;;  %v12555_v5 = vpop.permute.xlu0 %3696  ;;  %v8623_v45 = vld [vmem:[%s14704_s9 + $0x148] sm:$0xf] }
 0x293   :  { %v8425_v25 = vmul.f32 -1.442695, %v2558_v58  ;;  %14917 = vst [vmem:[#allocation5_spill] sm:$0xff] %v12555_v5  ;;  %v3985_v58 = vsel %vm3980_vm6, %v3981_v0, %v12337_v35  ;;  %v8528_v0 = vld [vmem:[%s14704_s9 + $0xb4] sm:$0xf] }
 0x294   :  { %v8587_v35 = vld [vmem:[%s14704_s9 + $0x120] sm:$0xf] }
 0x295   :  { %5054 = vperm.xlu0 %9813, %v8621_v23   ;;  %10405 = vpow2.f32 %v8425_v25  ;;  %v8624_v23 = vld [vmem:[%s14704_s9 + $0x14c] sm:$0xf]  ;;  %v8586_v25 = vld [vmem:[%s14704_s9 + $0x11c] sm:$0xf] }
 0x296   :  { %4662 = vperm.xlu1 %9814, %v8584_v18   ;;  %v12566_v22 = vpop.permute.xlu0 %2902 }
 0x299   :  { %4408 = vrot.lane.b32.xlu0 %v12214_v7, %s10436_s29 }
 0x29a   :  { %4090 = vperm.xlu1 %9814, %v8526_v46  }
 0x29d   :  { %4674 = vperm.xlu0 %9813, %v8585_v1   ;;  %v12577_v1 = vpop.permute.xlu0 %3720 }
 0x29e   :  { %5078 = vperm.xlu1 %9814, %v8623_v45   ;;  %14918 = vst [vmem:[#allocation46_spill] sm:$0xff] %v12577_v1  ;;  %v8625_v45 = vld [vmem:[%s14704_s9 + $0x150] sm:$0xf] }
 0x2a1   :  { %4102 = vperm.xlu0 %9813, %v8527_v29   ;;  %v12590_v29 = vpop.permute.xlu0 %2926 }
 0x2a2   :  { %4004 = vrot.lane.b32.xlu1 %v3985_v58, %s10436_s29  ;;  %v10406_v18 = vpop.eup %10405  ;;  %v10439_v58 = vmov 839922192  }
 0x2a3   :  { %v2610_v46 = vadd.f32 1.0, %v10406_v18  ;;  %v8529_v18 = vld [vmem:[%s14704_s9 + $0xb8] sm:$0xf] }
 0x2a5   :  { %5090 = vperm.xlu0 %9813, %v8624_v23   ;;  %10407 = vrcp.f32 %v2610_v46  ;;  %v2798_v23 = vunpack.c.l.s4 %v10439_v58  ;;  %v12595_v46 = vpop.permute.xlu0 %3744  ;;  %v14921_v58 = vld [vmem:[#allocation24_spill] sm:$0xff] }
 0x2a6   :  { %4686 = vperm.xlu1 %9814, %v8586_v25   ;;  %14919 = vst [vmem:[#allocation47_spill] sm:$0xff] %v12595_v46 }
 0x2a7   :  { %v2799_v25 = vunpack.c.0.s8 %v2798_v23 }
 0x2a9   :  { %4410 = vrot.lane.b32.xlu0 %v12278_v38, %s10436_s29  ;;  %v12612_v23 = vsub.s32 %v2799_v25, %v14921_v58  ;;  %v12626_v25 = vpop.permute.xlu0 %4626 }
 0x2aa   :  { %4114 = vperm.xlu1 %9814, %v8528_v0   ;;  %v8626_v0 = vld [vmem:[%s14704_s9 + $0x154] sm:$0xf] }
 0x2ad   :  { %4698 = vperm.xlu0 %9813, %v8587_v35   ;;  %v8588_v35 = vld [vmem:[%s14704_s9 + $0x124] sm:$0xf] }
 0x2ae   :  { %5102 = vperm.xlu1 %9814, %v8625_v45  }
 0x2b1   :  { %4126 = vperm.xlu0 %9813, %v8529_v18  }
 0x2b2   :  { %4006 = vrot.lane.b32.xlu1 %v12351_v31, %s10436_s29  ;;  %v12602_v21 = vpop.eup %10407 }
 0x2b3   :  { %14920 = vst [vmem:[#allocation48_spill] sm:$0xff] %v12602_v21  ;;  %v12609_v45 = vpack.c.bf16 %v12602_v21, %v12602_v21  ;;  %v2803_v21 = vrot.slane %v12202_v19, %v12612_v23  ;;  %v8589_v19 = vld [vmem:[%s14704_s9 + $0x128] sm:$0xf] }
 0x2b5   :  { %5114 = vperm.xlu0 %9813, %v8626_v0   ;;  %v12615_v31 = vshll.u32 %v12609_v45, 16  ;;  %v14784_v18 = vshrl.u32 %v12609_v45, 16  ;;  %v5838_v62 = vrot.slane %v12609_v45, 4  ;;  %v2815_v0 = vrot.slane %v12217_v33, %v12612_v23 }
 0x2b6   :  { %4710 = vperm.xlu1 %9814, %v8588_v35  }
 0x2b7   :  { %v4586_v35 = vrot.slane %v12615_v31, 1  ;;  %v5431_v58 = vrot.slane %v14784_v18, 3  ;;  %v5432_v46 = vrot.slane %v12615_v31, 4  ;;  %v12636_v1 = vsel %vm2742_vm3, %v12463_v57, %v5838_v62  ;;  %v8627_v18 = vld [vmem:[%s14704_s9 + $0x158] sm:$0xf] }
 0x2b8   :  { %v12648_v52 = vcombine.low %v2803_v21, %v2815_v0  ;;  %v3117_v62 = vrot.slane %v12072_v6, %v12612_v23  ;;  %v8531_v21 = vld [vmem:[%s14704_s9 + $0xc0] sm:$0xf]  ;;  %v14924_v6 = vmov 0.0   ;;  %v8590_v0 = vld [vmem:[%s14704_s9 + $0x12c] sm:$0xf] }
 0x2b9   :  { %4412 = vrot.lane.b32.xlu0 %v12302_v53, %s10436_s29  ;;  %v12643_v33 = vsel %vm4568_vm4, %v12485_v4, %v4586_v35  ;;  %v5433_v60 = vor.u32 %v5432_v46, %v5431_v58  ;;  %v3105_v4 = vrot.slane %v12074_v20, %v12612_v23  ;;  %v8628_v46 = vld [vmem:[%s14704_s9 + $0x15c] sm:$0xf] }
 0x2ba   :  { %4138 = vperm.xlu1 %9814, %v8530_v39   ;;  %v10164_v58 = vld [vmem:[%s14707_s10 + $0x58] sm:$0xff]  }
 0x2bb   :  { %v12653_v39 = vsel %vm5407_vm7, %v12499_v55, %v5433_v60  ;;  %v12675_v20 = vcombine.low %v3105_v4, %v3117_v62  ;;  %v10166_v62 = vld [vmem:[%s14707_s10 + $0x50] sm:$0xff]   ;;  %v10167_v4 = vld [vmem:[%s14707_s10 + $0x68] sm:$0xff]  }
 0x2bc   :  { %v2755_v5 = vpop.permute.xlu0 %2754 }
 0x2bd   :  { %v2777_v57 = vsel %vm2742_vm3, 0, %v2755_v5  ;;  %4722 = vperm.xlu0 %9813, %v8589_v19   ;;  %v10163_v5 = vld [vmem:[%s14707_s10 + $0x78] sm:$0xff]   ;;  %v10165_v19 = vld [vmem:[%s14707_s10 + $0x70] sm:$0xff]  }
 0x2be   :  { %v2988_v35 = vmul.bf16 %v12648_v52, %v2777_v57  ;;  %5126 = vperm.xlu1 %9814, %v8627_v18   ;;  %v8532_v57 = vld [vmem:[%s14704_s9 + $0xc4] sm:$0xf] }
 0x2c0   :  { %9205 = vmatmul.mubr.msk.bf16.vlgmr.msra.gmra.mxu1 %vm799_vm0, %v2988_v35  ;;  %v12708_v35 = vpop.permute.xlu0 %3584 }
 0x2c1   :  { %4150 = vperm.xlu0 %9813, %v8531_v21   ;;  %9208 = vmatprep.mubr.msk.bf16.mxu1 %vm10438_vm1, %v14924_v6  ;;  %v3058_v55 = vpop.permute.xlu1 %3057  ;;  %v8591_v21 = vld [vmem:[%s14704_s9 + $0x130] sm:$0xf] }
 0x2c2   :  { %4008 = vrot.lane.b32.xlu1 %v12409_v61, %s10436_s29  ;;  %9269 = vmatpush3.bf16.msra.mxu1 %v10163_v5  ;;  %v3079_v18 = vsel %vm12668_vm8, 0, %v3058_v55  ;;  %v8629_v5 = vld [vmem:[%s14704_s9 + $0x160] sm:$0xf]  ;;  %v10168_v55 = vld [vmem:[%s14707_s10 + $0x48] sm:$0xff]  }
 0x2c3   :  { %9270 = vmatprep.subr.bf16.mxu1 %v14924_v6  ;;  %v3290_v61 = vmul.bf16 %v12675_v20, %v3079_v18 }
 0x2c5   :  { %5138 = vperm.xlu0 %9813, %v8628_v46   ;;  %9169 = vmatmul.mubr.msk.bf16.vlgmr.msra.gmra.mxu0 %vm799_vm0, %v3290_v61  ;;  %v10169_v46 = vld [vmem:[%s14707_s10 + $0x60] sm:$0xff]  }
 0x2c6   :  { %4734 = vperm.xlu1 %9814, %v8590_v0   ;;  %9172 = vmatprep.mubr.msk.bf16.mxu0 %vm10438_vm1, %v14924_v6  ;;  %v2827_v0 = vrot.slane %v12272_v11, %v12612_v23  ;;  %v2839_v11 = vrot.slane %v12434_v36, %v12612_v23  ;;  %v8592_v36 = vld [vmem:[%s14704_s9 + $0x134] sm:$0x1] }
 0x2c7   :  { %9233 = vmatpush3.bf16.msra.mxu0 %v10164_v58  ;;  %9271 = vmatpush3.bf16.msra.mxu1 %v10165_v19  ;;  %v8533_v58 = vld [vmem:[%s14704_s9 + $0xc8] sm:$0xf]  ;;  %v10170_v19 = vld [vmem:[%s14707_s10 + $0x40] sm:$0xff]  }
 0x2c8   :  { %9234 = vmatprep.subr.bf16.mxu0 %v14924_v6  ;;  %9272 = vmatprep.subr.bf16.mxu1 %v14924_v6 }
 0x2c9   :  { %4414 = vrot.lane.b32.xlu0 %v12364_v40, %s10436_s29 }
 0x2ca   :  { %4162 = vperm.xlu1 %9814, %v8532_v57   ;;  %v3141_v57 = vrot.slane %v12079_v43, %v12612_v23  ;;  %v8630_v43 = vld [vmem:[%s14704_s9 + $0x164] sm:$0xf] }
 0x2cb   :  { %9235 = vmatpush3.bf16.msra.mxu0 %v10166_v62  ;;  %9273 = vmatpush3.bf16.msra.mxu1 %v10167_v4  ;;  %v3129_v62 = vrot.slane %v12083_v3, %v12612_v23 }
 0x2cc   :  { %9236 = vmatprep.subr.bf16.mxu0 %v14924_v6  ;;  %9274 = vmatprep.subr.bf16.mxu1 %v14924_v6 }
 0x2cd   :  { %v12726_v18 = vpop.permute.xlu0 %4054  ;;  %4746 = vperm.xlu0 %9813, %v8591_v21   ;;  %v12749_v21 = vcombine.low %v2827_v0, %v2839_v11  ;;  %v14926_v11 = vld [vmem:[#allocation2_spill] sm:$0xff] }
 0x2ce   :  { %5150 = vperm.xlu1 %9814, %v8629_v5   ;;  %v12734_v61 = vpop.permute.xlu1 %4042 }
 0x2cf   :  { %9237 = vmatpush3.bf16.msra.mxu0 %v10168_v55  ;;  %9275 = vmatpush3.bf16.msra.mxu1 %v10169_v46  ;;  %v12760_v55 = vcombine.low %v3129_v62, %v3141_v57  ;;  %v14925_v57 = vld [vmem:[#allocation12_spill] sm:$0xff] }
 0x2d0   :  { %9238 = vmatprep.subr.bf16.mxu0 %v14924_v6  ;;  %9340 = vmatprep.subr.bf16.mxu1 %v14924_v6  ;;  %v3165_v62 = vrot.slane %v14925_v57, %v12612_v23  ;;  %v2887_v57 = vrot.slane %v12548_v41, %v12612_v23 }
 0x2d1   :  { %v12746_v4 = vpop.permute.xlu0 %3586  ;;  %4174 = vperm.xlu0 %9813, %v8533_v58  }
 0x2d2   :  { %4010 = vrot.lane.b32.xlu1 %v12447_v63, %s10436_s29  ;;  %v2757_v3 = vpop.permute.xlu1 %2756  ;;  %v2851_v63 = vrot.slane %v12332_v8, %v12612_v23  ;;  %v2863_v8 = vrot.slane %v12515_v37, %v12612_v23 }
 0x2d3   :  { %9239 = vmatpush3.bf16.msra.mxu0 %v10170_v19  ;;  %v2989_v5 = vmul.bf16 %v12749_v21, %v2757_v3  ;;  %v8631_v19 = vld [vmem:[%s14704_s9 + $0x168] sm:$0x1] }
 0x2d4   :  { %9304 = vmatprep.subr.bf16.mxu0 %v14924_v6  ;;  %v12783_v3 = vcombine.low %v2851_v63, %v2863_v8 }
 0x2d5   :  { %v3060_v46 = vpop.permute.xlu0 %3059  ;;  %5162 = vperm.xlu0 %9813, %v8630_v43   ;;  %9209 = vmatmul.mubr.msk.bf16.gmra.mxu1 %vm799_vm0, %v2989_v5  ;;  %v3153_v43 = vrot.slane %v14926_v11, %v12612_v23  ;;  %v3177_v11 = vrot.slane %v12097_v27, %v12612_v23 }
 0x2d6   :  { %v3291_v0 = vmul.bf16 %v12760_v55, %v3060_v46  ;;  %4758 = vperm.xlu1 %9814, %v8592_v36   ;;  %v2759_v58 = vpop.permute.xlu1 %2758  ;;  %9212 = vmatprep.mubr.msk.bf16.mxu1 %vm10438_vm1, %v14924_v6  ;;  %v8534_v36 = vld [vmem:[%s14704_s9 + $0xcc] sm:$0x1]  ;;  %v2875_v46 = vrot.slane %v12366_v50, %v12612_v23  ;;  %v3189_v50 = vrot.slane %v12114_v47, %v12612_v23 }
 0x2d7   :  { %v2990_v37 = vmul.bf16 %v12783_v3, %v2759_v58 }
 0x2d8   :  { %9173 = vmatmul.mubr.msk.bf16.gmra.mxu0 %vm799_vm0, %v3291_v0  ;;  %v12791_v0 = vcombine.low %v3153_v43, %v3165_v62  ;;  %v8659_v62 = vld [vmem:[%s14704_s9 + $0x170] sm:$0xf]  ;;  %v12810_v41 = vcombine.low %v2875_v46, %v2887_v57  ;;  %v8697_v43 = vld [vmem:[%s14704_s9 + $0x1a0] sm:$0xf]  ;;  %v12820_v8 = vcombine.low %v3177_v11, %v3189_v50  ;;  %v4623_v57 = vrot.slane %v12519_v16, %v12612_v23  ;;  %v8699_v16 = vld [vmem:[%s14704_s9 + $0x1a8] sm:$0xf] }
 0x2d9   :  { %4416 = vrot.lane.b32.xlu0 %v12399_v34, %s10436_s29  ;;  %9176 = vmatprep.mubr.msk.bf16.mxu0 %vm10438_vm1, %v14924_v6 }
 0x2da   :  { %5174 = vperm.xlu1 %9814, %v8631_v19   ;;  %v3062_v5 = vpop.permute.xlu1 %3061  ;;  %v8658_v19 = vld [vmem:[%s14704_s9 + $0x16c] sm:$0xf] }
 0x2db   :  { %v3292_v63 = vmul.bf16 %v12791_v0, %v3062_v5  ;;  %v12825_v5 = vpop.permute.xlu0 %3588 }
 0x2dd   :  { %4186 = vperm.xlu0 %9813, %v8534_v36   ;;  %9213 = vmatmul.mubr.msk.bf16.gmra.mxu1 %vm799_vm0, %v2990_v37  ;;  %v8698_v36 = vld [vmem:[%s14704_s9 + $0x1a4] sm:$0xf]  ;;  %v8660_v37 = vld [vmem:[%s14704_s9 + $0x174] sm:$0xf] }
 0x2de   :  { %4418 = vrot.lane.b32.xlu1 %v12444_v2, %s10436_s29  ;;  %9216 = vmatprep.mubr.msk.bf16.mxu1 %vm10438_vm1, %v14924_v6 }
 0x2df   :  { %v2761_v58 = vpop.permute.xlu1 %2760 }
 0x2e0   :  { %9177 = vmatmul.mubr.msk.bf16.gmra.mxu0 %vm799_vm0, %v3292_v63  ;;  %v2991_v47 = vmul.bf16 %v12810_v41, %v2761_v58  ;;  %v12836_v63 = vpop.permute.xlu0 %3590  ;;  %v8661_v58 = vld [vmem:[%s14704_s9 + $0x178] sm:$0xf] }
 0x2e1   :  { %5461 = vperm.xlu0 %9813, %v8658_v19   ;;  %9180 = vmatprep.mubr.msk.bf16.mxu0 %vm10438_vm1, %v14924_v6  ;;  %v4635_v19 = vrot.slane %v12626_v25, %v12612_v23  ;;  %v3213_v25 = vrot.slane %v12162_v26, %v12612_v23 }
 0x2e2   :  { %5473 = vperm.xlu1 %9814, %v8659_v62  }
 0x2e3   :  { %v12848_v50 = vcombine.low %v4623_v57, %v4635_v19  ;;  %v2899_v19 = vrot.slane %v12411_v17, %v12612_v23  ;;  %v8662_v17 = vld [vmem:[%s14704_s9 + $0x17c] sm:$0xf] }
 0x2e4   :  { %v3064_v27 = vpop.permute.xlu1 %3063 }
 0x2e5   :  { %v3293_v46 = vmul.bf16 %v12820_v8, %v3064_v27  ;;  %5865 = vperm.xlu0 %9813, %v8697_v43   ;;  %9217 = vmatmul.mubr.msk.bf16.gmra.mxu1 %vm799_vm0, %v2991_v47  ;;  %14927 = vst [vmem:[#allocation24_spill] sm:$0xff] %v12848_v50  ;;  %v4808_v11 = vmul.bf16 %v12848_v50, %v12319_v9  ;;  %v8700_v47 = vld [vmem:[%s14704_s9 + $0x1ac] sm:$0xf]  ;;  %v4993_v27 = vrot.slane %v12278_v38, 3  ;;  %v4992_v9 = vrot.slane %v12214_v7, 3  ;;  %v10171_v38 = vld [vmem:[%s14707_s10 + $0x98] sm:$0xff]  }
 0x2e6   :  { %5877 = vperm.xlu1 %9814, %v8698_v36   ;;  %9220 = vmatprep.mubr.msk.bf16.mxu1 %vm10438_vm1, %v14924_v6  ;;  %v3201_v36 = vrot.slane %v12119_v44, %v12612_v23  ;;  %v2911_v7 = vrot.slane %v12566_v22, %v12612_v23  ;;  %v8663_v22 = vld [vmem:[%s14704_s9 + $0x180] sm:$0xf] }
 0x2e8   :  { %9181 = vmatmul.mubr.msk.bf16.gmra.mxu0 %vm799_vm0, %v3293_v46  ;;  %v12869_v57 = vcombine.low %v3201_v36, %v3213_v25 }
 0x2e9   :  { %5485 = vperm.xlu0 %9813, %v8660_v37   ;;  %9184 = vmatprep.mubr.msk.bf16.mxu0 %vm10438_vm1, %v14924_v6 }
 0x2ea   :  { %4420 = vrot.lane.b32.xlu1 %v12609_v45, %s10436_s29 }
 0x2ec   :  { %v5043_v62 = vpop.permute.xlu0 %5042 }
 0x2ed   :  { %5889 = vperm.xlu0 %9813, %v8699_v16   ;;  %v5051_v37 = vrot.slane %v5043_v62, %v12612_v23 }
 0x2ee   :  { %5497 = vperm.xlu1 %9814, %v8661_v58   ;;  %v4994_v58 = vsel %vm4991_vm9, %v4992_v9, %v4993_v27  ;;  %v14929_v9 = vrot.slane %v12456_v48, 7  ;;  %v3225_v48 = vrot.slane %v12184_v32, %v12612_v23 }
 0x2f0   :  { %v12860_v43 = vpop.permute.xlu0 %3592 }
 0x2f1   :  { %v5031_v46 = vpop.permute.xlu1 %5030  ;;  %4831 = vrot.lane.b32.xlu0 %v4808_v11, %s10436_s29 }
 0x2f2   :  { %v5039_v26 = vrot.slane %v5031_v46, %v12612_v23  ;;  %5901 = vperm.xlu1 %9814, %v8700_v47   ;;  %v12889_v47 = vcombine.low %v2899_v19, %v2911_v7  ;;  %v4001_v19 = vsel %vm3980_vm6, %v14929_v9, %v12615_v31 }
 0x2f4   :  { %v12873_v16 = vcombine.low %v5039_v26, %v5051_v37  ;;  %v3066_v44 = vpop.permute.xlu0 %3065  ;;  %v2923_v37 = vrot.slane %v12450_v12, %v12612_v23  ;;  %v2935_v12 = vrot.slane %v12590_v29, %v12612_v23 }
 0x2f5   :  { %v4639_v11 = vpop.permute.xlu1 %4638  ;;  %v3294_v62 = vmul.bf16 %v12869_v57, %v3066_v44  ;;  %4012 = vrot.lane.b32.xlu0 %v12488_v28, %s10436_s29 }
 0x2f6   :  { %14928 = vst [vmem:[#allocation12_spill] sm:$0xff] %v12873_v16  ;;  %v5224_v25 = vmul.bf16 %v12873_v16, %v4994_v58  ;;  %v8702_v58 = vld [vmem:[%s14704_s9 + $0x1b4] sm:$0xf]  ;;  %v12919_v31 = vcombine.low %v2923_v37, %v2935_v12 }
 0x2f7   :  { %9185 = vmatmul.mubr.msk.bf16.gmra.mxu0 %vm799_vm0, %v3294_v62  ;;  %v8701_v62 = vld [vmem:[%s14704_s9 + $0x1b0] sm:$0xf] }
 0x2f8   :  { %5247 = vrot.lane.b32.xlu1 %v5224_v25, %s10436_s29  ;;  %v12891_v36 = vpop.permute.xlu0 %3596  ;;  %9188 = vmatprep.mubr.msk.bf16.mxu0 %vm10438_vm1, %v14924_v6  ;;  %v3237_v25 = vrot.slane %v12165_v56, %v12612_v23  ;;  %v3249_v56 = vrot.slane %v12173_v10, %v12612_v23 }
 0x2f9   :  { %v2763_v28 = vpop.permute.xlu1 %2762  ;;  %5509 = vperm.xlu0 %9813, %v8662_v17  }
 0x2fa   :  { %v2992_v46 = vmul.bf16 %v12889_v47, %v2763_v28  ;;  %v12926_v29 = vcombine.low %v3225_v48, %v3237_v25  ;;  %v4051_v48 = vrot.slane %v12734_v61, %v12612_v23  ;;  %v4063_v25 = vrot.slane %v12726_v18, %v12612_v23 }
 0x2fb   :  { %v3633_v18 = vrot.slane %v12241_v42, %v12612_v23  ;;  %v3645_v61 = vrot.slane %v12404_v59, %v12612_v23 }
 0x2fc   :  { %9221 = vmatmul.mubr.msk.bf16.gmra.mxu1 %vm799_vm0, %v2992_v46  ;;  %5521 = vperm.xlu1 %9814, %v8663_v22   ;;  %v2765_v26 = vpop.permute.xlu0 %2764  ;;  %v2947_v22 = vrot.slane %v12495_v24, %v12612_v23  ;;  %v4647_v24 = vrot.slane %v4639_v11, %v12612_v23 }
 0x2fd   :  { %v2767_v44 = vpop.permute.xlu1 %2766  ;;  %4014 = vrot.lane.b32.xlu0 %v4001_v19, %s10436_s29  ;;  %9224 = vmatprep.mubr.msk.bf16.mxu1 %vm10438_vm1, %v14924_v6  ;;  %v2993_v28 = vmul.bf16 %v12919_v31, %v2765_v26 }
 0x2fe   :  { %v12937_v26 = vcombine.low %v2947_v22, %v2947_v22 }
 0x300   :  { %5925 = vperm.xlu1 %9814, %v8702_v58   ;;  %v12921_v7 = vpop.permute.xlu0 %3594  ;;  %v2994_v12 = vmul.bf16 %v12937_v26, %v2767_v44 }
 0x301   :  { %v3070_v17 = vpop.permute.xlu1 %3069  ;;  %5913 = vperm.xlu0 %9813, %v8701_v62   ;;  %v12946_v62 = vcombine.low %v3249_v56, %v3249_v56 }
 0x304   :  { %9225 = vmatmul.mubr.msk.bf16.gmra.mxu1 %vm799_vm0, %v2993_v28  ;;  %v3068_v32 = vpop.permute.xlu0 %3067  ;;  %v3296_v28 = vmul.bf16 %v12946_v62, %v3070_v17 }
 0x305   :  { %v4003_v46 = vpop.permute.xlu1 %4002  ;;  %v3295_v37 = vmul.bf16 %v12926_v29, %v3068_v32  ;;  %9228 = vmatprep.mubr.msk.bf16.mxu1 %vm10438_vm1, %v14924_v6 }
 0x306   :  { %v4025_v17 = vsel %vm12961_vm11, 0, %v4003_v46 }
 0x307   :  { %9189 = vmatmul.mubr.msk.bf16.gmra.mxu0 %vm799_vm0, %v3295_v37  ;;  %v4995_v37 = vrot.slane %v12302_v53, 3  ;;  %v3717_v53 = vrot.slane %v12387_v30, %v12612_v23  ;;  %v8667_v30 = vld [vmem:[%s14704_s9 + $0x190] sm:$0xf] }
 0x308   :  { %v4651_v9 = vpop.permute.xlu0 %4650  ;;  %9192 = vmatprep.mubr.msk.bf16.mxu0 %vm10438_vm1, %v14924_v6 }
 0x309   :  { %v12942_v19 = vpop.permute.xlu1 %4078  ;;  %v4659_v58 = vrot.slane %v4651_v9, %v12612_v23  ;;  %v8664_v9 = vld [vmem:[%s14704_s9 + $0x184] sm:$0xf] }
 0x30b   :  { %v12948_v10 = vcombine.low %v4647_v24, %v4659_v58  ;;  %v10175_v24 = vld [vmem:[%s14707_s10 + $0xb8] sm:$0xff]   ;;  %v3606_v58 = vsel %vm3572_vm2, 0, %v12708_v35 }
 0x30c   :  { %9229 = vmatmul.mubr.msk.bf16.gmra.mxu1 %vm799_vm0, %v2994_v12  ;;  %v4067_v11 = vpop.permute.xlu0 %4066  ;;  %v8703_v35 = vld [vmem:[%s14704_s9 + $0x1b8] sm:$0xf] }
 0x30d   :  { %14930 = vst [vmem:[#allocation2_spill] sm:$0xff] %v12948_v10  ;;  %v4809_v22 = vmul.bf16 %v12948_v10, %v12354_v51  ;;  %v5067_v44 = vpop.permute.xlu1 %5066  ;;  %9276 = vmatprep.mubr.msk.bf16.mxu1 %vm10438_vm1, %v14924_v6  ;;  %v12973_v51 = vcombine.low %v4051_v48, %v4063_v25  ;;  %v12989_v48 = vcombine.low %v3633_v18, %v3645_v61 }
 0x30e   :  { %v5075_v59 = vrot.slane %v5067_v44, %v12612_v23 }
 0x30f   :  { %9193 = vmatmul.mubr.msk.bf16.gmra.mxu0 %vm799_vm0, %v3296_v28  ;;  %4833 = vrot.lane.b32.xlu0 %v4809_v22, %s10436_s29  ;;  %v4236_v12 = vmul.bf16 %v12973_v51, %v4025_v17  ;;  %v4996_v28 = vsel %vm4991_vm9, %v4993_v27, %v4995_v37  ;;  %v3818_v44 = vmul.bf16 %v12989_v48, %v3606_v58  ;;  %v10176_v27 = vld [vmem:[%s14707_s10 + $0xb0] sm:$0xff]  }
 0x310   :  { %v5055_v56 = vpop.permute.xlu0 %5054  ;;  %9240 = vmatprep.mubr.msk.bf16.mxu0 %vm10438_vm1, %v14924_v6  ;;  %v3657_v17 = vrot.slane %v12310_v49, %v12612_v23  ;;  %v8665_v49 = vld [vmem:[%s14704_s9 + $0x188] sm:$0xf] }
 0x311   :  { %v4663_v42 = vpop.permute.xlu1 %4662  ;;  %v5063_v46 = vrot.slane %v5055_v56, %v12612_v23  ;;  %v4075_v56 = vrot.slane %v4067_v11, %v12612_v23  ;;  %v10172_v11 = vld [vmem:[%s14707_s10 + $0x90] sm:$0xff]  }
 0x313   :  { %v12991_v25 = vcombine.low %v5063_v46, %v5075_v59  ;;  %5533 = vperm.xlu0 %9813, %v8664_v9   ;;  %v3669_v59 = vrot.slane %v12460_v15, %v12612_v23  ;;  %v4671_v46 = vrot.slane %v4663_v42, %v12612_v23  ;;  %v4087_v15 = vrot.slane %v12942_v19, %v12612_v23  ;;  %v8704_v19 = vld [vmem:[%s14704_s9 + $0x1bc] sm:$0xf] }
 0x314   :  { %9277 = vmatmul.mubr.msk.bf16.vlgmr.msra.gmra.mxu1 %vm799_vm0, %v4236_v12  ;;  %v12999_v22 = vpop.permute.xlu0 %4408  ;;  %v10178_v12 = vld [vmem:[%s14707_s10 + $0xa8] sm:$0xff]  }
 0x315   :  { %14933 = vst [vmem:[#allocation49_spill] sm:$0xff] %v12991_v25  ;;  %v5225_v18 = vmul.bf16 %v12991_v25, %v4996_v28  ;;  %v13006_v61 = vpop.permute.xlu1 %4090  ;;  %9280 = vmatprep.mubr.msk.bf16.mxu1 %vm10438_vm1, %v14924_v6  ;;  %9341 = vmatpush3.bf16.msra.mxu1 %v10175_v24  ;;  %v13041_v42 = vcombine.low %v3657_v17, %v3669_v59 }
 0x316   :  { %9342 = vmatprep.subr.bf16.mxu1 %v14924_v6 }
 0x317   :  { %9241 = vmatmul.mubr.msk.bf16.vlgmr.msra.gmra.mxu0 %vm799_vm0, %v3818_v44  ;;  %5937 = vperm.xlu0 %9813, %v8703_v35   ;;  %v13045_v35 = vcombine.low %v4075_v56, %v4087_v15  ;;  %v10173_v56 = vld [vmem:[%s14707_s10 + $0x88] sm:$0xff]  }
 0x318   :  { %5249 = vrot.lane.b32.xlu1 %v5225_v18, %s10436_s29  ;;  %v4675_v9 = vpop.permute.xlu0 %4674  ;;  %9244 = vmatprep.mubr.msk.bf16.mxu0 %vm10438_vm1, %v14924_v6  ;;  %v3819_v18 = vmul.bf16 %v13041_v42, %v12746_v4  ;;  %v3693_v4 = vrot.slane %v12348_v13, %v12612_v23 }
 0x319   :  { %v5079_v24 = vpop.permute.xlu1 %5078  ;;  %v4683_v58 = vrot.slane %v4675_v9, %v12612_v23  ;;  %9305 = vmatpush3.bf16.msra.mxu0 %v10171_v38  ;;  %9343 = vmatpush3.bf16.msra.mxu1 %v10176_v27  ;;  %v4997_v9 = vrot.slane %v12364_v40, 3 }
 0x31a   :  { %9306 = vmatprep.subr.bf16.mxu0 %v14924_v6  ;;  %9344 = vmatprep.subr.bf16.mxu1 %v14924_v6 }
 0x31b   :  { %v13043_v28 = vcombine.low %v4671_v46, %v4683_v58  ;;  %v8666_v46 = vld [vmem:[%s14704_s9 + $0x18c] sm:$0xf]  ;;  %v3681_v58 = vrot.slane %v12530_v14, %v12612_v23 }
 0x31c   :  { %5545 = vperm.xlu1 %9814, %v8665_v49   ;;  %v4103_v44 = vpop.permute.xlu0 %4102  ;;  %v5087_v49 = vrot.slane %v5079_v24, %v12612_v23  ;;  %v4998_v24 = vsel %vm4991_vm9, %v4995_v37, %v4997_v9 }
 0x31d   :  { %14934 = vst [vmem:[#allocation50_spill] sm:$0xff] %v13043_v28  ;;  %v4810_v38 = vmul.bf16 %v13043_v28, %v12402_v54  ;;  %v4005_v27 = vpop.permute.xlu1 %4004  ;;  %9307 = vmatpush3.bf16.msra.mxu0 %v10172_v11  ;;  %9345 = vmatpush3.bf16.msra.mxu1 %v10178_v12  ;;  %v10180_v54 = vld [vmem:[%s14707_s10 + $0xa0] sm:$0xff]   ;;  %v13083_v15 = vcombine.low %v3681_v58, %v3693_v4 }
 0x31e   :  { %v4237_v17 = vmul.bf16 %v13045_v35, %v4005_v27  ;;  %9308 = vmatprep.subr.bf16.mxu0 %v14924_v6  ;;  %9346 = vmatprep.subr.bf16.mxu1 %v14924_v6  ;;  %v10174_v12 = vld [vmem:[%s14707_s10 + $0x80] sm:$0xff]   ;;  %v4111_v37 = vrot.slane %v4103_v44, %v12612_v23  ;;  %v4099_v44 = vrot.slane %v13006_v61, %v12612_v23 }
 0x31f   :  { %9245 = vmatmul.mubr.msk.bf16.gmra.mxu0 %vm799_vm0, %v3819_v18  ;;  %4835 = vrot.lane.b32.xlu0 %v4810_v38, %s10436_s29  ;;  %v8705_v38 = vld [vmem:[%s14704_s9 + $0x1c0] sm:$0xf]  ;;  %v3820_v27 = vmul.bf16 %v13083_v15, %v12825_v5  ;;  %v14936_v5 = vld [vmem:[#allocation5_spill] sm:$0xff] }
 0x320   :  { %9281 = vmatmul.mubr.msk.bf16.gmra.mxu1 %vm799_vm0, %v4237_v17  ;;  %5949 = vperm.xlu1 %9814, %v8704_v19   ;;  %v5091_v59 = vpop.permute.xlu0 %5090 }
 0x321   :  { %v4687_v13 = vpop.permute.xlu1 %4686  ;;  %v5099_v11 = vrot.slane %v5091_v59, %v12612_v23  ;;  %9248 = vmatprep.mubr.msk.bf16.mxu0 %vm10438_vm1, %v14924_v6  ;;  %9284 = vmatprep.mubr.msk.bf16.mxu1 %vm10438_vm1, %v14924_v6 }
 0x322   :  { %9309 = vmatpush3.bf16.msra.mxu0 %v10173_v56  ;;  %9347 = vmatpush3.bf16.msra.mxu1 %v10180_v54  ;;  %v3705_v54 = vrot.slane %v14936_v5, %v12612_v23  ;;  %v4695_v4 = vrot.slane %v4687_v13, %v12612_v23  ;;  %v8668_v5 = vld [vmem:[%s14704_s9 + $0x194] sm:$0xf] }
 0x323   :  { %v13085_v14 = vcombine.low %v5087_v49, %v5099_v11  ;;  %5557 = vperm.xlu0 %9813, %v8666_v46   ;;  %9310 = vmatprep.subr.bf16.mxu0 %v14924_v6  ;;  %v13125_v11 = vcombine.low %v4099_v44, %v4111_v37 }
 0x324   :  { %v13093_v18 = vpop.permute.xlu0 %4410  ;;  %9412 = vmatprep.subr.bf16.mxu1 %v14924_v6  ;;  %v13121_v58 = vcombine.low %v3705_v54, %v3717_v53  ;;  %v14939_v53 = vld [vmem:[#allocation34_spill] sm:$0xff] }
 0x325   :  { %14935 = vst [vmem:[#allocation51_spill] sm:$0xff] %v13085_v14  ;;  %v5226_v19 = vmul.bf16 %v13085_v14, %v4998_v24  ;;  %v13102_v17 = vpop.permute.xlu1 %4114  ;;  %v14938_v24 = vld [vmem:[#allocation37_spill] sm:$0xff]  ;;  %v14940_v54 = vld [vmem:[#allocation46_spill] sm:$0xff] }
 0x326   :  { %9311 = vmatpush3.bf16.msra.mxu0 %v10174_v12  ;;  %v3821_v12 = vmul.bf16 %v13121_v58, %v12836_v63  ;;  %v4999_v63 = vrot.slane %v12399_v34, 3 }
 0x327   :  { %9249 = vmatmul.mubr.msk.bf16.gmra.mxu0 %vm799_vm0, %v3820_v27  ;;  %5961 = vperm.xlu0 %9813, %v8705_v38  }
 0x328   :  { %5251 = vrot.lane.b32.xlu1 %v5226_v19, %s10436_s29  ;;  %v4699_v56 = vpop.permute.xlu0 %4698  ;;  %9252 = vmatprep.mubr.msk.bf16.mxu0 %vm10438_vm1, %v14924_v6  ;;  %v8706_v19 = vld [vmem:[%s14704_s9 + $0x1c4] sm:$0xf] }
 0x329   :  { %v5103_v59 = vpop.permute.xlu1 %5102  ;;  %v4707_v46 = vrot.slane %v4699_v56, %v12612_v23  ;;  %9376 = vmatprep.subr.bf16.mxu0 %v14924_v6  ;;  %v3741_v56 = vrot.slane %v14939_v53, %v12612_v23  ;;  %v14942_v53 = vld [vmem:[#allocation38_spill] sm:$0xff] }
 0x32b   :  { %v13123_v49 = vcombine.low %v4695_v4, %v4707_v46  ;;  %v3729_v4 = vrot.slane %v14940_v54, %v12612_v23  ;;  %v5111_v46 = vrot.slane %v5103_v59, %v12612_v23  ;;  %v8707_v59 = vld [vmem:[%s14704_s9 + $0x1c8] sm:$0xf] }
 0x32c   :  { %5569 = vperm.xlu1 %9814, %v8667_v30   ;;  %v4127_v13 = vpop.permute.xlu0 %4126 }
 0x32d   :  { %14937 = vst [vmem:[#allocation5_spill] sm:$0xff] %v13123_v49  ;;  %v4811_v38 = vmul.bf16 %v13123_v49, %v14938_v24  ;;  %v4007_v27 = vpop.permute.xlu1 %4006  ;;  %v13152_v34 = vcombine.low %v3729_v4, %v3741_v56  ;;  %v5000_v24 = vsel %vm4991_vm9, %v4997_v9, %v4999_v63  ;;  %v3765_v56 = vrot.slane %v14942_v53, %v12612_v23 }
 0x32e   :  { %v4238_v61 = vmul.bf16 %v13125_v11, %v4007_v27  ;;  %v4135_v40 = vrot.slane %v4127_v13, %v12612_v23  ;;  %v4123_v13 = vrot.slane %v13102_v17, %v12612_v23 }
 0x32f   :  { %9253 = vmatmul.mubr.msk.bf16.gmra.mxu0 %vm799_vm0, %v3821_v12  ;;  %4837 = vrot.lane.b32.xlu0 %v4811_v38, %s10436_s29  ;;  %v3822_v27 = vmul.bf16 %v13152_v34, %v12860_v43 }
 0x330   :  { %9285 = vmatmul.mubr.msk.bf16.gmra.mxu1 %vm799_vm0, %v4238_v61  ;;  %5973 = vperm.xlu1 %9814, %v8706_v19   ;;  %v5115_v37 = vpop.permute.xlu0 %5114 }
 0x331   :  { %v4711_v30 = vpop.permute.xlu1 %4710  ;;  %v5123_v44 = vrot.slane %v5115_v37, %v12612_v23  ;;  %9256 = vmatprep.mubr.msk.bf16.mxu0 %vm10438_vm1, %v14924_v6  ;;  %9288 = vmatprep.mubr.msk.bf16.mxu1 %vm10438_vm1, %v14924_v6  ;;  %v14943_v37 = vld [vmem:[#allocation47_spill] sm:$0xff] }
 0x332   :  { %v3753_v43 = vrot.slane %v14943_v37, %v12612_v23  ;;  %v8708_v37 = vld [vmem:[%s14704_s9 + $0x1cc] sm:$0xf] }
 0x333   :  { %v13154_v12 = vcombine.low %v5111_v46, %v5123_v44  ;;  %5581 = vperm.xlu0 %9813, %v8668_v5   ;;  %v4719_v5 = vrot.slane %v4711_v30, %v12612_v23  ;;  %v8669_v46 = vld [vmem:[%s14704_s9 + $0x198] sm:$0xf] }
 0x334   :  { %v13159_v38 = vpop.permute.xlu0 %4412  ;;  %v13183_v44 = vcombine.low %v3753_v43, %v3765_v56  ;;  %v14946_v56 = vld [vmem:[#allocation44_spill] sm:$0xff] }
 0x335   :  { %14941 = vst [vmem:[#allocation37_spill] sm:$0xff] %v13154_v12  ;;  %v5227_v19 = vmul.bf16 %v13154_v12, %v5000_v24  ;;  %v4139_v61 = vpop.permute.xlu1 %4138  ;;  %v3777_v43 = vrot.slane %v14946_v56, %v12612_v23 }
 0x336   :  { %v3823_v30 = vmul.bf16 %v13183_v44, %v12921_v7  ;;  %v5001_v7 = vrot.slane %v12444_v2, 3 }
 0x337   :  { %9257 = vmatmul.mubr.msk.bf16.gmra.mxu0 %vm799_vm0, %v3822_v27  ;;  %5985 = vperm.xlu0 %9813, %v8707_v59   ;;  %v13187_v59 = vcombine.low %v4123_v13, %v4135_v40  ;;  %v13209_v13 = vcombine.low %v3777_v43, %v3777_v43 }
 0x338   :  { %5253 = vrot.lane.b32.xlu1 %v5227_v19, %s10436_s29  ;;  %v4723_v9 = vpop.permute.xlu0 %4722  ;;  %9260 = vmatprep.mubr.msk.bf16.mxu0 %vm10438_vm1, %v14924_v6  ;;  %v14945_v19 = vld [vmem:[#allocation41_spill] sm:$0xff] }
 0x339   :  { %v5127_v54 = vpop.permute.xlu1 %5126  ;;  %v4731_v4 = vrot.slane %v4723_v9, %v12612_v23  ;;  %v3824_v2 = vmul.bf16 %v13209_v13, %v12891_v36  ;;  %v4147_v36 = vrot.slane %v4139_v61, %v12612_v23 }
 0x33b   :  { %v13185_v24 = vcombine.low %v4719_v5, %v4731_v4  ;;  %v5135_v5 = vrot.slane %v5127_v54, %v12612_v23 }
 0x33c   :  { %5593 = vperm.xlu1 %9814, %v8669_v46   ;;  %v4151_v27 = vpop.permute.xlu0 %4150 }
 0x33d   :  { %14944 = vst [vmem:[#allocation34_spill] sm:$0xff] %v13185_v24  ;;  %v4812_v53 = vmul.bf16 %v13185_v24, %v14945_v19  ;;  %v4009_v9 = vpop.permute.xlu1 %4008  ;;  %v5002_v19 = vsel %vm4991_vm9, %v4999_v63, %v5001_v7 }
 0x33e   :  { %v4239_v17 = vmul.bf16 %v13187_v59, %v4009_v9 }
 0x33f   :  { %9261 = vmatmul.mubr.msk.bf16.gmra.mxu0 %vm799_vm0, %v3823_v30  ;;  %4839 = vrot.lane.b32.xlu0 %v4812_v53, %s10436_s29 }
 0x340   :  { %9289 = vmatmul.mubr.msk.bf16.gmra.mxu1 %vm799_vm0, %v4239_v17  ;;  %5997 = vperm.xlu1 %9814, %v8708_v37   ;;  %v5139_v40 = vpop.permute.xlu0 %5138  ;;  %v4159_v37 = vrot.slane %v4151_v27, %v12612_v23 }
 0x341   :  { %v4735_v4 = vpop.permute.xlu1 %4734  ;;  %v5147_v46 = vrot.slane %v5139_v40, %v12612_v23  ;;  %9264 = vmatprep.mubr.msk.bf16.mxu0 %vm10438_vm1, %v14924_v6  ;;  %9292 = vmatprep.mubr.msk.bf16.mxu1 %vm10438_vm1, %v14924_v6 }
 0x342   :  { %v4743_v63 = vrot.slane %v4735_v4, %v12612_v23  ;;  %v10177_v4 = vld [vmem:[%s14707_s10 + $0xd8] sm:$0xff]  }
 0x343   :  { %v13211_v30 = vcombine.low %v5135_v5, %v5147_v46  ;;  %v13231_v5 = vcombine.low %v4147_v36, %v4159_v37 }
 0x344   :  { %v13214_v53 = vpop.permute.xlu0 %4414 }
 0x345   :  { %14947 = vst [vmem:[#allocation46_spill] sm:$0xff] %v13211_v30  ;;  %v5228_v54 = vmul.bf16 %v13211_v30, %v5002_v19  ;;  %v13219_v9 = vpop.permute.xlu1 %4162 }
 0x347   :  { %9265 = vmatmul.mubr.msk.bf16.gmra.mxu0 %vm799_vm0, %v3824_v2  ;;  %5255 = vrot.lane.b32.xlu1 %v5228_v54, %s10436_s29  ;;  %v5003_v2 = vrot.slane %v12609_v45, 3 }
 0x348   :  { %v4747_v17 = vpop.permute.xlu0 %4746  ;;  %9312 = vmatprep.mubr.msk.bf16.mxu0 %vm10438_vm1, %v14924_v6 }
 0x349   :  { %v5151_v56 = vpop.permute.xlu1 %5150  ;;  %v4755_v43 = vrot.slane %v4747_v17, %v12612_v23  ;;  %v5004_v17 = vsel %vm4991_vm9, %v5001_v7, %v5003_v2 }
 0x34a   :  { %v5012_v7 = vsel %vm5010_vm12, %v5004_v17, 0 }
 0x34b   :  { %v13229_v40 = vcombine.low %v4743_v63, %v4755_v43 }
 0x34c   :  { %v13233_v46 = vpop.permute.xlu0 %4174 }
 0x34d   :  { %14948 = vst [vmem:[#allocation38_spill] sm:$0xff] %v13229_v40  ;;  %v4813_v27 = vmul.bf16 %v13229_v40, %v12643_v33  ;;  %v4011_v19 = vpop.permute.xlu1 %4010  ;;  %v5159_v33 = vrot.slane %v5151_v56, %v12612_v23 }
 0x34e   :  { %v4240_v54 = vmul.bf16 %v13231_v5, %v4011_v19  ;;  %v14951_v19 = vshrl.u32 %v12609_v45, 16 }
 0x34f   :  { %9313 = vmatmul.mubr.msk.bf16.vlgmr.msra.gmra.mxu0 %vm799_vm0, %v12999_v22  ;;  %4841 = vrot.lane.b32.xlu0 %v4813_v27, %s10436_s29  ;;  %v10179_v22 = vld [vmem:[%s14707_s10 + $0xd0] sm:$0xff]  }
 0x350   :  { %9293 = vmatmul.mubr.msk.bf16.gmra.mxu1 %vm799_vm0, %v4240_v54  ;;  %v5163_v61 = vpop.permute.xlu0 %5162  ;;  %9316 = vmatprep.mubr.msk.bf16.mxu0 %vm10438_vm1, %v14924_v6  ;;  %v4597_v2 = vsel %vm12961_vm11, %v14951_v19, 0 }
 0x351   :  { %v4759_v37 = vpop.permute.xlu1 %4758  ;;  %v5171_v63 = vrot.slane %v5163_v61, %v12612_v23  ;;  %9296 = vmatprep.mubr.msk.bf16.mxu1 %vm10438_vm1, %v14924_v6  ;;  %9377 = vmatpush3.bf16.msra.mxu0 %v10177_v4  ;;  %v10181_v61 = vld [vmem:[%s14707_s10 + $0xc8] sm:$0xff]  }
 0x352   :  { %v4767_v43 = vrot.slane %v4759_v37, %v12612_v23  ;;  %9378 = vmatprep.subr.bf16.mxu0 %v14924_v6 }
 0x353   :  { %v13258_v36 = vcombine.low %v5159_v33, %v5171_v63 }
 0x354   :  { %v13260_v56 = vcombine.low %v4767_v43, %v4767_v43  ;;  %v4417_v27 = vpop.permute.xlu0 %4416 }
 0x355   :  { %14949 = vst [vmem:[#allocation47_spill] sm:$0xff] %v13258_v36  ;;  %v5229_v4 = vmul.bf16 %v13258_v36, %v5012_v7  ;;  %v5175_v54 = vpop.permute.xlu1 %5174  ;;  %9379 = vmatpush3.bf16.msra.mxu0 %v10179_v22  ;;  %v10182_v22 = vld [vmem:[%s14707_s10 + $0xc0] sm:$0xff]  }
 0x356   :  { %14950 = vst [vmem:[#allocation41_spill] sm:$0xff] %v13260_v56  ;;  %v4814_v33 = vmul.bf16 %v13260_v56, %v4597_v2  ;;  %v5183_v37 = vrot.slane %v5175_v54, %v12612_v23  ;;  %9380 = vmatprep.subr.bf16.mxu0 %v14924_v6 }
 0x357   :  { %9317 = vmatmul.mubr.msk.bf16.gmra.mxu0 %vm799_vm0, %v13093_v18  ;;  %5257 = vrot.lane.b32.xlu1 %v5229_v4, %s10436_s29 }
 0x358   :  { %v8638_v45 = vcombine.low %v5183_v37, %v5183_v37  ;;  %4843 = vrot.lane.b32.xlu0 %v4814_v33, %s10436_s29  ;;  %v4187_v17 = vpop.permute.xlu0 %4186  ;;  %9320 = vmatprep.mubr.msk.bf16.mxu0 %vm10438_vm1, %v14924_v6  ;;  %v14954_v37 = vld [vmem:[#allocation28_spill] sm:$0xff] }
 0x359   :  { %v4419_v63 = vpop.permute.xlu1 %4418  ;;  %9381 = vmatpush3.bf16.msra.mxu0 %v10181_v61 }
 0x35a   :  { %v13283_v43 = vmul.bf16 0, %v8638_v45  ;;  %9382 = vmatprep.subr.bf16.mxu0 %v14924_v6 }
 0x35c   :  { %14952 = vst [vmem:[#allocation44_spill] sm:$0xff] %v13283_v43  ;;  %5259 = vrot.lane.b32.xlu1 %v13283_v43, %s10436_s29  ;;  %v5462_v18 = vpop.permute.xlu0 %5461 }
 0x35d   :  { %v5474_v7 = vpop.permute.xlu1 %5473  ;;  %v5470_v19 = vrot.slane %v5462_v18, %v12612_v23  ;;  %9383 = vmatpush3.bf16.msra.mxu0 %v10182_v22 }
 0x35e   :  { %v5482_v2 = vrot.slane %v5474_v7, %v12612_v23  ;;  %9448 = vmatprep.subr.bf16.mxu0 %v14924_v6 }
 0x35f   :  { %9321 = vmatmul.mubr.msk.bf16.gmra.mxu0 %vm799_vm0, %v13159_v38 }
 0x360   :  { %v13293_v4 = vcombine.low %v5470_v19, %v5482_v2  ;;  %v5866_v54 = vpop.permute.xlu0 %5865  ;;  %9324 = vmatprep.mubr.msk.bf16.mxu0 %vm10438_vm1, %v14924_v6  ;;  %v14956_v19 = vld [vmem:[#allocation26_spill] sm:$0xff] }
 0x361   :  { %v5878_v61 = vpop.permute.xlu1 %5877  ;;  %v5874_v33 = vrot.slane %v5866_v54, %v12612_v23 }
 0x362   :  { %14953 = vst [vmem:[#allocation52_spill] sm:$0xff] %v13293_v4  ;;  %v5655_v45 = vmul.bf16 %v13293_v4, %v14954_v37  ;;  %v5886_v22 = vrot.slane %v5878_v61, %v12612_v23 }
 0x364   :  { %v13301_v18 = vcombine.low %v5874_v33, %v5886_v22  ;;  %5678 = vrot.lane.b32.xlu0 %v5655_v45, %s10436_s29  ;;  %v5486_v7 = vpop.permute.xlu0 %5485  ;;  %v4183_v45 = vrot.slane %v13233_v46, %v12612_v23 }
 0x365   :  { %v4421_v38 = vpop.permute.xlu1 %4420  ;;  %v5494_v61 = vrot.slane %v5486_v7, %v12612_v23 }
 0x366   :  { %14955 = vst [vmem:[#allocation28_spill] sm:$0xff] %v13301_v18  ;;  %v6059_v2 = vmul.bf16 %v13301_v18, %v14956_v19 }
 0x367   :  { %9325 = vmatmul.mubr.msk.bf16.gmra.mxu0 %vm799_vm0, %v13214_v53  ;;  %v4171_v53 = vrot.slane %v13219_v9, %v12612_v23 }
 0x368   :  { %6082 = vrot.lane.b32.xlu1 %v6059_v2, %s10436_s29  ;;  %v5890_v54 = vpop.permute.xlu0 %5889  ;;  %9328 = vmatprep.mubr.msk.bf16.mxu0 %vm10438_vm1, %v14924_v6  ;;  %v14958_v2 = vld [vmem:[#allocation29_spill] sm:$0xff] }
 0x369   :  { %v5498_v37 = vpop.permute.xlu1 %5497  ;;  %v5898_v56 = vrot.slane %v5890_v54, %v12612_v23  ;;  %v13324_v7 = vcombine.low %v4171_v53, %v4183_v45  ;;  %v4195_v54 = vrot.slane %v4187_v17, %v12612_v23 }
 0x36a   :  { %v5506_v33 = vrot.slane %v5498_v37, %v12612_v23 }
 0x36c   :  { %v13315_v22 = vcombine.low %v5494_v61, %v5506_v33  ;;  %v4832_v19 = vpop.permute.xlu0 %4831  ;;  %v14960_v61 = vld [vmem:[#allocation6_spill] sm:$0xff] }
 0x36d   :  { %v5902_v4 = vpop.permute.xlu1 %5901 }
 0x36e   :  { %14957 = vst [vmem:[#allocation26_spill] sm:$0xff] %v13315_v22  ;;  %v5656_v18 = vmul.bf16 %v13315_v22, %v14958_v2  ;;  %v5910_v43 = vrot.slane %v5902_v4, %v12612_v23 }
 0x36f   :  { %9329 = vmatmul.mubr.msk.bf16.gmra.mxu0 %vm799_vm0, %v4417_v27  ;;  %v13339_v27 = vcombine.low %v4195_v54, %v4195_v54 }
 0x370   :  { %v13326_v37 = vcombine.low %v5898_v56, %v5910_v43  ;;  %5680 = vrot.lane.b32.xlu0 %v5656_v18, %s10436_s29  ;;  %v4013_v46 = vpop.permute.xlu0 %4012  ;;  %9332 = vmatprep.mubr.msk.bf16.mxu0 %vm10438_vm1, %v14924_v6 }
 0x371   :  { %v4241_v9 = vmul.bf16 %v13324_v7, %v4013_v46  ;;  %v5248_v4 = vpop.permute.xlu1 %5247  ;;  %14961 = vst [vmem:[#allocation6_spill] sm:$0xff] %v13339_v27 }
 0x372   :  { %14959 = vst [vmem:[#allocation29_spill] sm:$0xff] %v13326_v37  ;;  %v6060_v33 = vmul.bf16 %v13326_v37, %v14960_v61  ;;  %v14967_v37 = vld [vmem:[#allocation40_spill] sm:$0xff] }
 0x373   :  { %9297 = vmatmul.mubr.msk.bf16.gmra.mxu1 %vm799_vm0, %v4241_v9  ;;  %v14963_v9 = vld [vmem:[#allocation35_spill] sm:$0xff] }
 0x374   :  { %6084 = vrot.lane.b32.xlu1 %v6060_v33, %s10436_s29  ;;  %v5510_v56 = vpop.permute.xlu0 %5509  ;;  %9300 = vmatprep.mubr.msk.bf16.mxu1 %vm10438_vm1, %v14924_v6 }
 0x375   :  { %v5518_v18 = vrot.slane %v5510_v56, %v12612_v23 }
 0x377   :  { %v5522_v43 = vpop.permute.xlu1 %5521  ;;  %9333 = vmatmul.mubr.msk.bf16.gmra.mxu0 %vm799_vm0, %v4419_v63 }
 0x378   :  { %v5530_v45 = vrot.slane %v5522_v43, %v12612_v23  ;;  %v4015_v53 = vpop.permute.xlu0 %4014  ;;  %9336 = vmatprep.mubr.msk.bf16.mxu0 %vm10438_vm1, %v14924_v6 }
 0x379   :  { %v4242_v17 = vmul.bf16 %v13339_v27, %v4015_v53 }
 0x37a   :  { %v13347_v2 = vcombine.low %v5518_v18, %v5530_v45  ;;  %v10183_v18 = vld [vmem:[%s14707_s10 + $0xf8] sm:$0xff]   ;;  %v14965_v45 = vld [vmem:[#allocation31_spill] sm:$0xff] }
 0x37b   :  { %v5926_v46 = vpop.permute.xlu1 %5925  ;;  %9301 = vmatmul.mubr.msk.bf16.gmra.mxu1 %vm799_vm0, %v4242_v17 }
 0x37c   :  { %14962 = vst [vmem:[#allocation53_spill] sm:$0xff] %v13347_v2  ;;  %v5657_v61 = vmul.bf16 %v13347_v2, %v14963_v9  ;;  %v5914_v33 = vpop.permute.xlu0 %5913  ;;  %9348 = vmatprep.mubr.msk.bf16.mxu1 %vm10438_vm1, %v14924_v6  ;;  %v5934_v63 = vrot.slane %v5926_v46, %v12612_v23  ;;  %v10185_v9 = vld [vmem:[%s14707_s10 + $0x118] sm:$0xff]  }
 0x37d   :  { %v5922_v54 = vrot.slane %v5914_v33, %v12612_v23 }
 0x37e   :  { %5682 = vrot.lane.b32.xlu0 %v5657_v61, %s10436_s29 }
 0x37f   :  { %v13357_v56 = vcombine.low %v5922_v54, %v5934_v63  ;;  %9337 = vmatmul.mubr.msk.bf16.gmra.mxu0 %vm799_vm0, %v4421_v38  ;;  %v10184_v38 = vld [vmem:[%s14707_s10 + $0xf0] sm:$0xff]   ;;  %v10186_v54 = vld [vmem:[%s14707_s10 + $0xe8] sm:$0xff]  }
 0x380   :  { %v3518_v43 = vpop.f32.mrf.mxu1  ;;  %9384 = vmatprep.mubr.msk.bf16.mxu0 %vm10438_vm1, %v14924_v6 }
 0x381   :  { %14964 = vst [vmem:[#allocation35_spill] sm:$0xff] %v13357_v56  ;;  %v6061_v53 = vmul.bf16 %v13357_v56, %v14965_v45 }
 0x382   :  { %v9206_v17 = vpop.f32.mrf.mxu1 }
 0x383   :  { %9349 = vmatmul.mubr.msk.bf16.vlgmr.msra.gmra.mxu1 %vm799_vm0, %v4832_v19  ;;  %6086 = vrot.lane.b32.xlu1 %v6061_v53, %s10436_s29  ;;  %v10188_v17 = vld [vmem:[%s14707_s10 + $0xe0] sm:$0xff]  }
 0x384   :  { %v3521_v46 = vpop.f32.mrf.mxu1  ;;  %9352 = vmatprep.mubr.msk.bf16.mxu1 %vm10438_vm1, %v14924_v6  ;;  %9413 = vmatpush3.bf16.msra.mxu1 %v10183_v18  ;;  %v10187_v18 = vld [vmem:[%s14707_s10 + $0x110] sm:$0xff]  }
 0x385   :  { %9414 = vmatprep.subr.bf16.mxu1 %v14924_v6  ;;  %v3385_v61 = vpop.f32.mrf.mxu0 }
 0x386   :  { %v9207_v33 = vpop.f32.mrf.mxu1  ;;  %v13378_v19 = vadd.f32 %v3518_v43, %v3385_v61  ;;  %v4834_v43 = vpop.permute.xlu0 %4833  ;;  %v10190_v61 = vld [vmem:[%s14707_s10 + $0x100] sm:$0xff]  }
 0x387   :  { %9385 = vmatmul.mubr.msk.bf16.vlgmr.msra.gmra.mxu0 %vm799_vm0, %v5248_v4  ;;  %v9170_v63 = vpop.f32.mrf.mxu0 }
 0x388   :  { %9388 = vmatprep.mubr.msk.bf16.mxu0 %vm10438_vm1, %v14924_v6  ;;  %9415 = vmatpush3.bf16.msra.mxu1 %v10184_v38  ;;  %v10189_v38 = vld [vmem:[%s14707_s10 + $0x108] sm:$0xff]  }
 0x389   :  { %9449 = vmatpush3.bf16.msra.mxu0 %v10185_v9  ;;  %9416 = vmatprep.subr.bf16.mxu1 %v14924_v6  ;;  %v3388_v45 = vpop.f32.mrf.mxu0 }
 0x38a   :  { %9450 = vmatprep.subr.bf16.mxu0 %v14924_v6  ;;  %v13391_v4 = vadd.f32 %v3521_v46, %v3388_v45  ;;  %v5250_v46 = vpop.permute.xlu1 %5249 }
 0x38b   :  { %9353 = vmatmul.mubr.msk.bf16.gmra.mxu1 %vm799_vm0, %v4834_v43  ;;  %v9171_v53 = vpop.f32.mrf.mxu0 }
 0x38c   :  { %9356 = vmatprep.mubr.msk.bf16.mxu1 %vm10438_vm1, %v14924_v6  ;;  %9417 = vmatpush3.bf16.msra.mxu1 %v10186_v54 }
 0x38d   :  { %9451 = vmatpush3.bf16.msra.mxu0 %v10187_v18  ;;  %9418 = vmatprep.subr.bf16.mxu1 %v14924_v6 }
 0x38e   :  { %v5534_v9 = vpop.permute.xlu0 %5533  ;;  %9452 = vmatprep.subr.bf16.mxu0 %v14924_v6 }
 0x38f   :  { %9389 = vmatmul.mubr.msk.bf16.gmra.mxu0 %vm799_vm0, %v5250_v46  ;;  %v5542_v43 = vrot.slane %v5534_v9, %v12612_v23 }
 0x390   :  { %9392 = vmatprep.mubr.msk.bf16.mxu0 %vm10438_vm1, %v14924_v6  ;;  %9419 = vmatpush3.bf16.msra.mxu1 %v10188_v17 }
 0x391   :  { %9453 = vmatpush3.bf16.msra.mxu0 %v10189_v38  ;;  %9484 = vmatprep.subr.bf16.mxu1 %v14924_v6 }
 0x392   :  { %v5938_v33 = vpop.permute.xlu0 %5937  ;;  %9454 = vmatprep.subr.bf16.mxu0 %v14924_v6 }
 0x393   :  { %v5946_v22 = vrot.slane %v5938_v33, %v12612_v23 }
 0x395   :  { %9455 = vmatpush3.bf16.msra.mxu0 %v10190_v61  ;;  %v3526_v63 = vpop.f32.mrf.mxu1 }
 0x396   :  { %v4836_v54 = vpop.permute.xlu0 %4835  ;;  %9520 = vmatprep.subr.bf16.mxu0 %v14924_v6 }
 0x397   :  { %v5546_v18 = vpop.permute.xlu1 %5545  ;;  %9357 = vmatmul.mubr.msk.bf16.gmra.mxu1 %vm799_vm0, %v4836_v54  ;;  %v9210_v45 = vpop.f32.mrf.mxu1 }
 0x398   :  { %v3393_v53 = vpop.f32.mrf.mxu0  ;;  %v5554_v17 = vrot.slane %v5546_v18, %v12612_v23  ;;  %9360 = vmatprep.mubr.msk.bf16.mxu1 %vm10438_vm1, %v14924_v6 }
 0x399   :  { %v13418_v38 = vadd.f32 %v3526_v63, %v3393_v53  ;;  %v3529_v46 = vpop.f32.mrf.mxu1  ;;  %v14969_v53 = vld [vmem:[#allocation39_spill] sm:$0xff] }
 0x39a   :  { %v13420_v61 = vcombine.low %v5542_v43, %v5554_v17  ;;  %v9174_v2 = vpop.f32.mrf.mxu0 }
 0x39b   :  { %v5950_v56 = vpop.permute.xlu1 %5949  ;;  %v9211_v9 = vpop.f32.mrf.mxu1 }
 0x39c   :  { %14966 = vst [vmem:[#allocation31_spill] sm:$0xff] %v13420_v61  ;;  %v5658_v54 = vmul.bf16 %v13420_v61, %v14967_v37  ;;  %v3396_v45 = vpop.f32.mrf.mxu0  ;;  %v5958_v40 = vrot.slane %v5950_v56, %v12612_v23 }
 0x39d   :  { %v13426_v18 = vadd.f32 %v3529_v46, %v3396_v45  ;;  %v3534_v36 = vpop.f32.mrf.mxu1 }
 0x39e   :  { %v13428_v24 = vcombine.low %v5946_v22, %v5958_v40  ;;  %v9175_v63 = vpop.f32.mrf.mxu0  ;;  %5684 = vrot.lane.b32.xlu0 %v5658_v54, %s10436_s29  ;;  %v5558_v2 = vpop.permute.xlu0 %5557 }
 0x39f   :  { %v5252_v43 = vpop.permute.xlu1 %5251  ;;  %v9214_v17 = vpop.f32.mrf.mxu1 }
 0x3a0   :  { %14968 = vst [vmem:[#allocation40_spill] sm:$0xff] %v13428_v24  ;;  %v6062_v33 = vmul.bf16 %v13428_v24, %v14969_v53  ;;  %v3401_v30 = vpop.f32.mrf.mxu0  ;;  %9393 = vmatmul.mubr.msk.bf16.gmra.mxu0 %vm799_vm0, %v5252_v43  ;;  %v5566_v43 = vrot.slane %v5558_v2, %v12612_v23  ;;  %v14971_v24 = vld [vmem:[#allocation43_spill] sm:$0xff] }
 0x3a1   :  { %v13434_v37 = vadd.f32 %v3534_v36, %v3401_v30  ;;  %9396 = vmatprep.mubr.msk.bf16.mxu0 %vm10438_vm1, %v14924_v6  ;;  %v3537_v56 = vpop.f32.mrf.mxu1 }
 0x3a2   :  { %v9178_v40 = vpop.f32.mrf.mxu0  ;;  %6088 = vrot.lane.b32.xlu1 %v6062_v33, %s10436_s29  ;;  %v5962_v22 = vpop.permute.xlu0 %5961 }
 0x3a3   :  { %v9215_v46 = vpop.f32.mrf.mxu1 }
 0x3a4   :  { %v3404_v54 = vpop.f32.mrf.mxu0 }
 0x3a5   :  { %v13439_v9 = vadd.f32 %v3537_v56, %v3404_v54  ;;  %v3542_v45 = vpop.f32.mrf.mxu1 }
 0x3a6   :  { %v9179_v63 = vpop.f32.mrf.mxu0  ;;  %v4838_v17 = vpop.permute.xlu0 %4837 }
 0x3a7   :  { %v5570_v53 = vpop.permute.xlu1 %5569  ;;  %v9218_v30 = vpop.f32.mrf.mxu1  ;;  %9361 = vmatmul.mubr.msk.bf16.gmra.mxu1 %vm799_vm0, %v4838_v17  ;;  %v5970_v63 = vrot.slane %v5962_v22, %v12612_v23 }
 0x3a8   :  { %v3409_v36 = vpop.f32.mrf.mxu0  ;;  %v5578_v61 = vrot.slane %v5570_v53, %v12612_v23  ;;  %9364 = vmatprep.mubr.msk.bf16.mxu1 %vm10438_vm1, %v14924_v6 }
 0x3a9   :  { %v13444_v40 = vadd.f32 %v3542_v45, %v3409_v36  ;;  %v3545_v33 = vpop.f32.mrf.mxu1 }
 0x3aa   :  { %v13448_v56 = vcombine.low %v5566_v43, %v5578_v61  ;;  %v9182_v46 = vpop.f32.mrf.mxu0 }
 0x3ab   :  { %v5974_v54 = vpop.permute.xlu1 %5973  ;;  %v9219_v30 = vpop.f32.mrf.mxu1  ;;  %v14973_v46 = vld [vmem:[#allocation42_spill] sm:$0xff] }
 0x3ac   :  { %14970 = vst [vmem:[#allocation39_spill] sm:$0xff] %v13448_v56  ;;  %v5659_v2 = vmul.bf16 %v13448_v56, %v14971_v24  ;;  %v3412_v49 = vpop.f32.mrf.mxu0  ;;  %v5982_v53 = vrot.slane %v5974_v54, %v12612_v23 }
 0x3ad   :  { %v13454_v17 = vadd.f32 %v3545_v33, %v3412_v49 }
 0x3ae   :  { %v13456_v45 = vcombine.low %v5970_v63, %v5982_v53  ;;  %v9183_v36 = vpop.f32.mrf.mxu0  ;;  %5686 = vrot.lane.b32.xlu0 %v5659_v2, %s10436_s29  ;;  %v5582_v61 = vpop.permute.xlu0 %5581  ;;  %v14974_v63 = vmov 0  ;;  %v5444_v53 = vsel %vm13468_vm14, %v12653_v39, 0  ;;  %v5847_v39 = vsel %vm4991_vm9, %v12636_v1, 0  ;;  %v8709_v1 = vld [vmem:[%s14704_s9 + $0x1d0] sm:$0x1] }
 0x3af   :  { %v5254_v43 = vpop.permute.xlu1 %5253  ;;  %v5590_v54 = vrot.slane %v5582_v61, %v12612_v23  ;;  %v14975_v63 = vsel %vm13468_vm14, 4294967295, %v14974_v63 }
 0x3b0   :  { %14972 = vst [vmem:[#allocation43_spill] sm:$0xff] %v13456_v45  ;;  %v6063_v12 = vmul.bf16 %v13456_v45, %v14973_v46  ;;  %9397 = vmatmul.mubr.msk.bf16.gmra.mxu0 %vm799_vm0, %v5254_v43  ;;  %14976 = vst [vmem:[#allocation42_spill] sm:$0xff] %v14975_v63 }
 0x3b1   :  { %9400 = vmatprep.mubr.msk.bf16.mxu0 %vm10438_vm1, %v14924_v6 }
 0x3b2   :  { %6090 = vrot.lane.b32.xlu1 %v6063_v12, %s10436_s29  ;;  %v5986_v24 = vpop.permute.xlu0 %5985 }
 0x3b3   :  { %v5994_v61 = vrot.slane %v5986_v24, %v12612_v23  ;;  %v8670_v24 = vld [vmem:[%s14704_s9 + $0x19c] sm:$0x1] }
 0x3b6   :  { %v4840_v49 = vpop.permute.xlu0 %4839 }
 0x3b7   :  { %v5594_v22 = vpop.permute.xlu1 %5593  ;;  %v3417_v33 = vpop.f32.mrf.mxu0  ;;  %9365 = vmatmul.mubr.msk.bf16.gmra.mxu1 %vm799_vm0, %v4840_v49 }
 0x3b8   :  { %v5602_v2 = vrot.slane %v5594_v22, %v12612_v23  ;;  %9368 = vmatprep.mubr.msk.bf16.mxu1 %vm10438_vm1, %v14924_v6 }
 0x3b9   :  { %v9186_v12 = vpop.f32.mrf.mxu0 }
 0x3ba   :  { %v13475_v30 = vcombine.low %v5590_v54, %v5602_v2 }
 0x3bb   :  { %v5998_v36 = vpop.permute.xlu1 %5997  ;;  %v3420_v43 = vpop.f32.mrf.mxu0 }
 0x3bc   :  { %14977 = vst [vmem:[#allocation54_spill] sm:$0xff] %v13475_v30  ;;  %v5660_v46 = vmul.bf16 %v13475_v30, %v5444_v53  ;;  %v6006_v49 = vrot.slane %v5998_v36, %v12612_v23  ;;  %v3550_v56 = vpop.f32.mrf.mxu1 }
 0x3bd   :  { %v13483_v22 = vadd.f32 %v3550_v56, %v3417_v33  ;;  %v9187_v45 = vpop.f32.mrf.mxu0 }
 0x3be   :  { %v13485_v28 = vcombine.low %v5994_v61, %v6006_v49  ;;  %v9222_v54 = vpop.f32.mrf.mxu1  ;;  %5688 = vrot.lane.b32.xlu0 %v5660_v46, %s10436_s29 }
 0x3bf   :  { %v5256_v2 = vpop.permute.xlu1 %5255 }
 0x3c0   :  { %14978 = vst [vmem:[#allocation55_spill] sm:$0xff] %v13485_v28  ;;  %v6064_v12 = vmul.bf16 %v13485_v28, %v5847_v39  ;;  %v3553_v53 = vpop.f32.mrf.mxu1  ;;  %9401 = vmatmul.mubr.msk.bf16.gmra.mxu0 %vm799_vm0, %v5256_v2 }
 0x3c1   :  { %v13495_v56 = vadd.f32 %v3553_v53, %v3420_v43  ;;  %v4842_v45 = vpop.permute.xlu0 %4841  ;;  %9404 = vmatprep.mubr.msk.bf16.mxu0 %vm10438_vm1, %v14924_v6 }
 0x3c2   :  { %v9223_v33 = vpop.f32.mrf.mxu1  ;;  %5605 = vperm.xlu0 %9813, %v8670_v24   ;;  %6092 = vrot.lane.b32.xlu1 %v6064_v12, %s10436_s29 }
 0x3c3   :  { %9369 = vmatmul.mubr.msk.bf16.gmra.mxu1 %vm799_vm0, %v4842_v45 }
 0x3c4   :  { %v3558_v36 = vpop.f32.mrf.mxu1  ;;  %9372 = vmatprep.mubr.msk.bf16.mxu1 %vm10438_vm1, %v14924_v6 }
 0x3c6   :  { %v9226_v43 = vpop.f32.mrf.mxu1  ;;  %6009 = vperm.xlu1 %9814, %v8709_v1  }
 0x3c7   :  { %v3425_v61 = vpop.f32.mrf.mxu0 }
 0x3c8   :  { %v13506_v46 = vadd.f32 %v3558_v36, %v3425_v61  ;;  %v3561_v49 = vpop.f32.mrf.mxu1 }
 0x3c9   :  { %v9190_v54 = vpop.f32.mrf.mxu0  ;;  %v5258_v39 = vpop.permute.xlu1 %5257 }
 0x3ca   :  { %v9227_v2 = vpop.f32.mrf.mxu1  ;;  %v4844_v24 = vpop.permute.xlu0 %4843  ;;  %9405 = vmatmul.mubr.msk.bf16.gmra.mxu0 %vm799_vm0, %v5258_v39 }
 0x3cb   :  { %9373 = vmatmul.mubr.msk.bf16.gmra.mxu1 %vm799_vm0, %v4844_v24  ;;  %v3428_v12 = vpop.f32.mrf.mxu0  ;;  %9408 = vmatprep.mubr.msk.bf16.mxu0 %vm10438_vm1, %v14924_v6 }
 0x3cc   :  { %v13512_v53 = vadd.f32 %v3561_v49, %v3428_v12  ;;  %v3566_v45 = vpop.f32.mrf.mxu1  ;;  %9420 = vmatprep.mubr.msk.bf16.mxu1 %vm10438_vm1, %v14924_v6 }
 0x3cd   :  { %v9191_v33 = vpop.f32.mrf.mxu0 }
 0x3ce   :  { %v9230_v1 = vpop.f32.mrf.mxu1  ;;  %v5260_v54 = vpop.permute.xlu1 %5259 }
 0x3cf   :  { %v3433_v36 = vpop.f32.mrf.mxu0 }
 0x3d0   :  { %v13516_v43 = vadd.f32 %v3566_v45, %v3433_v36  ;;  %v3569_v61 = vpop.f32.mrf.mxu1 }
 0x3d1   :  { %v9194_v39 = vpop.f32.mrf.mxu0 }
 0x3d2   :  { %v9231_v2 = vpop.f32.mrf.mxu1  ;;  %9409 = vmatmul.mubr.msk.bf16.gmra.mxu0 %vm799_vm0, %v5260_v54 }
 0x3d3   :  { %v3436_v24 = vpop.f32.mrf.mxu0  ;;  %9456 = vmatprep.mubr.msk.bf16.mxu0 %vm10438_vm1, %v14924_v6 }
 0x3d4   :  { %v4331_v49 = vpop.f32.mrf.mxu1 }
 0x3d5   :  { %v9195_v12 = vpop.f32.mrf.mxu0 }
 0x3d6   :  { %v9278_v30 = vpop.f32.mrf.mxu1  ;;  %v5679_v63 = vpop.permute.xlu0 %5678 }
 0x3d7   :  { %9421 = vmatmul.mubr.msk.bf16.vlgmr.msra.gmra.mxu1 %vm799_vm0, %v5679_v63  ;;  %v3913_v33 = vpop.f32.mrf.mxu0 }
 0x3d8   :  { %v3967_v45 = vadd.f32 %v3913_v33, %v13378_v19  ;;  %v4334_v1 = vpop.f32.mrf.mxu1  ;;  %9424 = vmatprep.mubr.msk.bf16.mxu1 %vm10438_vm1, %v14924_v6 }
 0x3d9   :  { %v9242_v36 = vpop.f32.mrf.mxu0 }
 0x3da   :  { %v9279_v61 = vpop.f32.mrf.mxu1  ;;  %v6083_v54 = vpop.permute.xlu1 %6082  ;;  %v13525_v39 = vadd.f32 %v4331_v49, %v3967_v45 }
 0x3db   :  { %9457 = vmatmul.mubr.msk.bf16.vlgmr.msra.gmra.mxu0 %vm799_vm0, %v6083_v54  ;;  %v3916_v2 = vpop.f32.mrf.mxu0 }
 0x3dc   :  { %v3968_v30 = vadd.f32 %v3916_v2, %v13391_v4  ;;  %9460 = vmatprep.mubr.msk.bf16.mxu0 %vm10438_vm1, %v14924_v6 }
 0x3dd   :  { %v9243_v63 = vpop.f32.mrf.mxu0 }
 0x3de   :  { %v13531_v24 = vadd.f32 %v4334_v1, %v3968_v30 }
 0x3df   :  { %v3921_v19 = vpop.f32.mrf.mxu0 }
 0x3e0   :  { %v3969_v12 = vadd.f32 %v3921_v19, %v13418_v38  ;;  %v4339_v33 = vpop.f32.mrf.mxu1 }
 0x3e1   :  { %v9246_v36 = vpop.f32.mrf.mxu0 }
 0x3e2   :  { %v13534_v61 = vadd.f32 %v4339_v33, %v3969_v12  ;;  %v9282_v49 = vpop.f32.mrf.mxu1  ;;  %v5681_v45 = vpop.permute.xlu0 %5680 }
 0x3e3   :  { %9425 = vmatmul.mubr.msk.bf16.gmra.mxu1 %vm799_vm0, %v5681_v45  ;;  %v3924_v54 = vpop.f32.mrf.mxu0 }
 0x3e4   :  { %v3970_v4 = vadd.f32 %v3924_v54, %v13426_v18  ;;  %v4342_v2 = vpop.f32.mrf.mxu1  ;;  %9428 = vmatprep.mubr.msk.bf16.mxu1 %vm10438_vm1, %v14924_v6 }
 0x3e5   :  { %v9247_v1 = vpop.f32.mrf.mxu0 }
 0x3e6   :  { %v13540_v30 = vadd.f32 %v4342_v2, %v3970_v4  ;;  %v9283_v63 = vpop.f32.mrf.mxu1  ;;  %v6085_v38 = vpop.permute.xlu1 %6084 }
 0x3e7   :  { %9461 = vmatmul.mubr.msk.bf16.gmra.mxu0 %vm799_vm0, %v6085_v38  ;;  %v3929_v19 = vpop.f32.mrf.mxu0 }
 0x3e8   :  { %v3971_v12 = vadd.f32 %v3929_v19, %v13434_v37  ;;  %9464 = vmatprep.mubr.msk.bf16.mxu0 %vm10438_vm1, %v14924_v6 }
 0x3e9   :  { %v9250_v33 = vpop.f32.mrf.mxu0 }
 0x3eb   :  { %v3932_v36 = vpop.f32.mrf.mxu0 }
 0x3ec   :  { %v3972_v18 = vadd.f32 %v3932_v36, %v13439_v9 }
 0x3ed   :  { %v9251_v49 = vpop.f32.mrf.mxu0 }
 0x3ef   :  { %v3937_v45 = vpop.f32.mrf.mxu0 }
 0x3f0   :  { %v3973_v54 = vadd.f32 %v3937_v45, %v13444_v40  ;;  %v4347_v4 = vpop.f32.mrf.mxu1  ;;  %v5683_v2 = vpop.permute.xlu0 %5682 }
 0x3f1   :  { %v4389_v1 = vadd.f32 %v4347_v4, %v3971_v12  ;;  %9429 = vmatmul.mubr.msk.bf16.gmra.mxu1 %vm799_vm0, %v5683_v2  ;;  %v9254_v63 = vpop.f32.mrf.mxu0 }
 0x3f2   :  { %v9286_v38 = vpop.f32.mrf.mxu1  ;;  %9432 = vmatprep.mubr.msk.bf16.mxu1 %vm10438_vm1, %v14924_v6 }
 0x3f3   :  { %v3940_v37 = vpop.f32.mrf.mxu0 }
 0x3f4   :  { %v3974_v19 = vadd.f32 %v3940_v37, %v13454_v17  ;;  %v4350_v33 = vpop.f32.mrf.mxu1 }
 0x3f5   :  { %v4390_v28 = vadd.f32 %v4350_v33, %v3972_v18  ;;  %v9255_v9 = vpop.f32.mrf.mxu0  ;;  %v6087_v36 = vpop.permute.xlu1 %6086 }
 0x3f6   :  { %v9287_v49 = vpop.f32.mrf.mxu1  ;;  %9465 = vmatmul.mubr.msk.bf16.gmra.mxu0 %vm799_vm0, %v6087_v36 }
 0x3f7   :  { %v3945_v40 = vpop.f32.mrf.mxu0  ;;  %9468 = vmatprep.mubr.msk.bf16.mxu0 %vm10438_vm1, %v14924_v6 }
 0x3f8   :  { %v3975_v12 = vadd.f32 %v3945_v40, %v13483_v22 }
 0x3f9   :  { %v9258_v45 = vpop.f32.mrf.mxu0 }
 0x3fb   :  { %v3948_v4 = vpop.f32.mrf.mxu0 }
 0x3fc   :  { %v3976_v2 = vadd.f32 %v3948_v4, %v13495_v56 }
 0x3fd   :  { %v9259_v63 = vpop.f32.mrf.mxu0 }
 0x3ff   :  { %v3953_v38 = vpop.f32.mrf.mxu0 }
 0x400   :  { %v13558_v17 = vadd.f32 %v3953_v38, %v13506_v46  ;;  %v4355_v18 = vpop.f32.mrf.mxu1 }
 0x401   :  { %v4391_v37 = vadd.f32 %v4355_v18, %v3973_v54  ;;  %v9262_v33 = vpop.f32.mrf.mxu0 }
 0x402   :  { %v9290_v9 = vpop.f32.mrf.mxu1 }
 0x403   :  { %v3956_v36 = vpop.f32.mrf.mxu0 }
 0x404   :  { %v13561_v49 = vadd.f32 %v3956_v36, %v13512_v53  ;;  %v4358_v14 = vpop.f32.mrf.mxu1 }
 0x405   :  { %v4392_v10 = vadd.f32 %v4358_v14, %v3974_v19  ;;  %v9263_v22 = vpop.f32.mrf.mxu0 }
 0x406   :  { %v9291_v40 = vpop.f32.mrf.mxu1 }
 0x407   :  { %v3961_v45 = vpop.f32.mrf.mxu0 }
 0x408   :  { %v13564_v56 = vadd.f32 %v3961_v45, %v13516_v43 }
 0x409   :  { %v9266_v4 = vpop.f32.mrf.mxu0 }
 0x40b   :  { %v3964_v63 = vpop.f32.mrf.mxu0 }
 0x40d   :  { %v9267_v46 = vpop.f32.mrf.mxu0 }
 0x40f   :  { %v4501_v38 = vpop.f32.mrf.mxu0 }
 0x410   :  { %v4363_v25 = vpop.f32.mrf.mxu1  ;;  %v13567_v54 = vadd.f32 %v4501_v38, %v13525_v39  ;;  %v5685_v18 = vpop.permute.xlu0 %5684 }
 0x411   :  { %v4393_v33 = vadd.f32 %v4363_v25, %v3975_v12  ;;  %9433 = vmatmul.mubr.msk.bf16.gmra.mxu1 %vm799_vm0, %v5685_v18  ;;  %v9314_v53 = vpop.f32.mrf.mxu0 }
 0x412   :  { %v9294_v14 = vpop.f32.mrf.mxu1  ;;  %9436 = vmatprep.mubr.msk.bf16.mxu1 %vm10438_vm1, %v14924_v6 }
 0x413   :  { %v4504_v19 = vpop.f32.mrf.mxu0 }
 0x414   :  { %v4366_v43 = vpop.f32.mrf.mxu1  ;;  %v13573_v9 = vadd.f32 %v4504_v19, %v13531_v24  ;;  %v6089_v36 = vpop.permute.xlu1 %6088 }
 0x415   :  { %v4394_v22 = vadd.f32 %v4366_v43, %v3976_v2  ;;  %9469 = vmatmul.mubr.msk.bf16.gmra.mxu0 %vm799_vm0, %v6089_v36  ;;  %v9315_v39 = vpop.f32.mrf.mxu0 }
 0x416   :  { %v9295_v40 = vpop.f32.mrf.mxu1  ;;  %9472 = vmatprep.mubr.msk.bf16.mxu0 %vm10438_vm1, %v14924_v6 }
 0x417   :  { %v4509_v25 = vpop.f32.mrf.mxu0 }
 0x418   :  { %v13579_v12 = vadd.f32 %v4509_v25, %v13534_v61 }
 0x419   :  { %v9318_v45 = vpop.f32.mrf.mxu0 }
 0x41b   :  { %v4512_v4 = vpop.f32.mrf.mxu0 }
 0x41c   :  { %v13582_v63 = vadd.f32 %v4512_v4, %v13540_v30 }
 0x41d   :  { %v9319_v24 = vpop.f32.mrf.mxu0 }
 0x41f   :  { %v4517_v46 = vpop.f32.mrf.mxu0 }
 0x420   :  { %v13584_v38 = vadd.f32 %v4517_v46, %v4389_v1  ;;  %v5687_v2 = vpop.permute.xlu0 %5686 }
 0x421   :  { %9437 = vmatmul.mubr.msk.bf16.gmra.mxu1 %vm799_vm0, %v5687_v2  ;;  %v9322_v18 = vpop.f32.mrf.mxu0 }
 0x422   :  { %9440 = vmatprep.mubr.msk.bf16.mxu1 %vm10438_vm1, %v14924_v6 }
 0x423   :  { %v4520_v53 = vpop.f32.mrf.mxu0 }
 0x424   :  { %v13589_v14 = vadd.f32 %v4520_v53, %v4390_v28  ;;  %v6091_v61 = vpop.permute.xlu1 %6090 }
 0x425   :  { %9473 = vmatmul.mubr.msk.bf16.gmra.mxu0 %vm799_vm0, %v6091_v61  ;;  %v9323_v19 = vpop.f32.mrf.mxu0 }
 0x426   :  { %9476 = vmatprep.mubr.msk.bf16.mxu0 %vm10438_vm1, %v14924_v6  ;;  %v10191_v19 = vld [vmem:[%s14708_s12 + $0x38] sm:$0xff]  }
 0x427   :  { %v4525_v30 = vpop.f32.mrf.mxu0  ;;  %9485 = vmatpush3.bf16.msra.mxu1 %v10191_v19 }
 0x428   :  { %v13594_v1 = vadd.f32 %v4525_v30, %v4391_v37  ;;  %9486 = vmatprep.subr.bf16.mxu1 %v14924_v6 }
 0x429   :  { %v9326_v43 = vpop.f32.mrf.mxu0 }
 0x42b   :  { %v4528_v36 = vpop.f32.mrf.mxu0 }
 0x42c   :  { %v13596_v39 = vadd.f32 %v4528_v36, %v4392_v10 }
 0x42d   :  { %v9327_v40 = vpop.f32.mrf.mxu0 }
 0x42e   :  { %v10193_v40 = vld [vmem:[%s14708_s12 + $0x18] sm:$0xff]  }
 0x42f   :  { %v4533_v25 = vpop.f32.mrf.mxu0  ;;  %9521 = vmatpush3.bf16.msra.mxu0 %v10193_v40 }
 0x430   :  { %v13598_v45 = vadd.f32 %v4533_v25, %v4393_v33  ;;  %v5689_v28 = vpop.permute.xlu0 %5688  ;;  %9522 = vmatprep.subr.bf16.mxu0 %v14924_v6 }
 0x431   :  { %9441 = vmatmul.mubr.msk.bf16.gmra.mxu1 %vm799_vm0, %v5689_v28  ;;  %v9330_v4 = vpop.f32.mrf.mxu0 }
 0x432   :  { %9444 = vmatprep.mubr.msk.bf16.mxu1 %vm10438_vm1, %v14924_v6  ;;  %v10195_v4 = vld [vmem:[%s14708_s12 + $0x10] sm:$0xff]  }
 0x433   :  { %v4371_v24 = vpop.f32.mrf.mxu1  ;;  %v4536_v46 = vpop.f32.mrf.mxu0  ;;  %9523 = vmatpush3.bf16.msra.mxu0 %v10195_v4  ;;  %v10197_v4 = vld [vmem:[%s14708_s12 + $0x8] sm:$0xff]  }
 0x434   :  { %v4395_v37 = vadd.f32 %v4371_v24, %v13558_v17  ;;  %v13604_v2 = vadd.f32 %v4536_v46, %v4394_v22  ;;  %v6093_v18 = vpop.permute.xlu1 %6092  ;;  %v10192_v17 = vld [vmem:[%s14708_s12 + $0x30] sm:$0xff]   ;;  %9524 = vmatprep.subr.bf16.mxu0 %v14924_v6 }
 0x435   :  { %9477 = vmatmul.mubr.msk.bf16.gmra.mxu0 %vm799_vm0, %v6093_v18  ;;  %v9298_v10 = vpop.f32.mrf.mxu1  ;;  %v9331_v53 = vpop.f32.mrf.mxu0  ;;  %9487 = vmatpush3.bf16.msra.mxu1 %v10192_v17 }
 0x436   :  { %9480 = vmatprep.mubr.msk.bf16.mxu0 %vm10438_vm1, %v14924_v6  ;;  %9488 = vmatprep.subr.bf16.mxu1 %v14924_v6 }
 0x437   :  { %v4374_v33 = vpop.f32.mrf.mxu1  ;;  %v4541_v61 = vpop.f32.mrf.mxu0  ;;  %9525 = vmatpush3.bf16.msra.mxu0 %v10197_v4 }
 0x438   :  { %v4396_v30 = vadd.f32 %v4374_v33, %v13561_v49  ;;  %v13613_v43 = vadd.f32 %v4541_v61, %v4395_v37  ;;  %v10194_v49 = vld [vmem:[%s14708_s12 + $0x28] sm:$0xff]   ;;  %9526 = vmatprep.subr.bf16.mxu0 %v14924_v6 }
 0x439   :  { %v9299_v22 = vpop.f32.mrf.mxu1  ;;  %v9334_v36 = vpop.f32.mrf.mxu0  ;;  %9489 = vmatpush3.bf16.msra.mxu1 %v10194_v49  ;;  %v10198_v49 = vld [vmem:[%s14708_s12] sm:$0xff]  }
 0x43a   :  { %9490 = vmatprep.subr.bf16.mxu1 %v14924_v6 }
 0x43b   :  { %v4379_v25 = vpop.f32.mrf.mxu1  ;;  %v4544_v28 = vpop.f32.mrf.mxu0  ;;  %9527 = vmatpush3.bf16.msra.mxu0 %v10198_v49 }
 0x43c   :  { %v4397_v24 = vadd.f32 %v4379_v25, %v13564_v56  ;;  %v13629_v46 = vadd.f32 %v4544_v28, %v4396_v30  ;;  %v10196_v28 = vld [vmem:[%s14708_s12 + $0x20] sm:$0xff]   ;;  %9592 = vmatprep.subr.bf16.mxu0 %v14924_v6 }
 0x43d   :  { %v5606_v37 = vpop.permute.xlu0 %5605  ;;  %v9302_v18 = vpop.f32.mrf.mxu1  ;;  %9491 = vmatpush3.bf16.msra.mxu1 %v10196_v28 }
 0x43e   :  { %v5614_v10 = vrot.slane %v5606_v37, %v12612_v23  ;;  %v9335_v53 = vpop.f32.mrf.mxu0  ;;  %9556 = vmatprep.subr.bf16.mxu1 %v14924_v6 }
 0x43f   :  { %v4382_v33 = vpop.f32.mrf.mxu1 }
 0x440   :  { %v8677_v61 = vcombine.low %v5614_v10, %v5614_v10  ;;  %v4549_v19 = vpop.f32.mrf.mxu0 }
 0x441   :  { %v13635_v22 = vadd.f32 %v4549_v19, %v4397_v24  ;;  %v6010_v56 = vpop.permute.xlu1 %6009  ;;  %v9303_v30 = vpop.f32.mrf.mxu1 }
 0x442   :  { %v13637_v36 = vmul.bf16 0, %v8677_v61  ;;  %v6018_v17 = vrot.slane %v6010_v56, %v12612_v23  ;;  %v9338_v40 = vpop.f32.mrf.mxu0 }
 0x443   :  { %v4924_v25 = vpop.f32.mrf.mxu1 }
 0x444   :  { %14979 = vst [vmem:[#allocation56_spill] sm:$0xff] %v13637_v36  ;;  %v8716_v24 = vcombine.low %v6018_v17, %v6018_v17  ;;  %v4552_v37 = vpop.f32.mrf.mxu0  ;;  %v4978_v23 = vadd.f32 %v4924_v25, %v13567_v54  ;;  %5690 = vrot.lane.b32.xlu0 %v13637_v36, %s10436_s29 }
 0x445   :  { %v9350_v18 = vpop.f32.mrf.mxu1 }
 0x446   :  { %v13653_v10 = vmul.bf16 0, %v8716_v24  ;;  %v9339_v53 = vpop.f32.mrf.mxu0 }
 0x447   :  { %v4927_v33 = vpop.f32.mrf.mxu1 }
 0x448   :  { %14980 = vst [vmem:[#allocation57_spill] sm:$0xff] %v13653_v10  ;;  %v4979_v61 = vadd.f32 %v4927_v33, %v13573_v9  ;;  %v5340_v19 = vpop.f32.mrf.mxu0  ;;  %6094 = vrot.lane.b32.xlu1 %v13653_v10, %s10436_s29 }
 0x449   :  { %v13660_v54 = vadd.f32 %v5340_v19, %v4978_v23  ;;  %v9351_v56 = vpop.f32.mrf.mxu1 }
 0x44a   :  { %v9386_v30 = vpop.f32.mrf.mxu0 }
 0x44b   :  { %v4932_v17 = vpop.f32.mrf.mxu1 }
 0x44c   :  { %v4980_v40 = vadd.f32 %v4932_v17, %v13579_v12  ;;  %v5343_v25 = vpop.f32.mrf.mxu0 }
 0x44d   :  { %v13664_v28 = vadd.f32 %v5343_v25, %v4979_v61  ;;  %v9354_v4 = vpop.f32.mrf.mxu1 }
 0x44e   :  { %v9387_v24 = vpop.f32.mrf.mxu0 }
 0x44f   :  { %v4935_v9 = vpop.f32.mrf.mxu1 }
 0x450   :  { %v4981_v37 = vadd.f32 %v4935_v9, %v13582_v63  ;;  %v5348_v18 = vpop.f32.mrf.mxu0 }
 0x451   :  { %v13667_v53 = vadd.f32 %v5348_v18, %v4980_v40  ;;  %v9355_v23 = vpop.f32.mrf.mxu1 }
 0x452   :  { %v9390_v33 = vpop.f32.mrf.mxu0 }
 0x454   :  { %v5351_v49 = vpop.f32.mrf.mxu0 }
 0x455   :  { %v13669_v19 = vadd.f32 %v5351_v49, %v4981_v37 }
 0x456   :  { %v9391_v56 = vpop.f32.mrf.mxu0 }
 0x457   :  { %v4940_v30 = vpop.f32.mrf.mxu1 }
 0x458   :  { %v4982_v12 = vadd.f32 %v4940_v30, %v13584_v38 }
 0x459   :  { %v9358_v17 = vpop.f32.mrf.mxu1 }
 0x45b   :  { %v4943_v61 = vpop.f32.mrf.mxu1 }
 0x45c   :  { %v4983_v25 = vadd.f32 %v4943_v61, %v13589_v14 }
 0x45d   :  { %v9359_v4 = vpop.f32.mrf.mxu1 }
 0x460   :  { %v5356_v24 = vpop.f32.mrf.mxu0 }
 0x461   :  { %v13673_v36 = vadd.f32 %v5356_v24, %v4982_v12 }
 0x462   :  { %v9394_v63 = vpop.f32.mrf.mxu0 }
 0x464   :  { %v5359_v40 = vpop.f32.mrf.mxu0 }
 0x465   :  { %v13675_v9 = vadd.f32 %v5359_v40, %v4983_v25 }
 0x466   :  { %v9395_v18 = vpop.f32.mrf.mxu0 }
 0x467   :  { %v4948_v23 = vpop.f32.mrf.mxu1 }
 0x468   :  { %v4984_v37 = vadd.f32 %v4948_v23, %v13594_v1 }
 0x469   :  { %v9362_v33 = vpop.f32.mrf.mxu1 }
 0x46b   :  { %v4951_v49 = vpop.f32.mrf.mxu1 }
 0x46c   :  { %v4985_v38 = vadd.f32 %v4951_v49, %v13596_v39 }
 0x46d   :  { %v9363_v56 = vpop.f32.mrf.mxu1 }
 0x470   :  { %v5364_v30 = vpop.f32.mrf.mxu0 }
 0x471   :  { %v13679_v17 = vadd.f32 %v5364_v30, %v4984_v37 }
 0x472   :  { %v9398_v14 = vpop.f32.mrf.mxu0 }
 0x474   :  { %v5367_v61 = vpop.f32.mrf.mxu0 }
 0x475   :  { %v13681_v12 = vadd.f32 %v5367_v61, %v4985_v38 }
 0x476   :  { %v9399_v4 = vpop.f32.mrf.mxu0 }
 0x477   :  { %v4956_v24 = vpop.f32.mrf.mxu1 }
 0x478   :  { %v4986_v25 = vadd.f32 %v4956_v24, %v13598_v45 }
 0x479   :  { %v9366_v63 = vpop.f32.mrf.mxu1 }
 0x47b   :  { %v4959_v40 = vpop.f32.mrf.mxu1 }
 0x47c   :  { %v4987_v1 = vadd.f32 %v4959_v40, %v13604_v2 }
 0x47d   :  { %v9367_v18 = vpop.f32.mrf.mxu1 }
 0x480   :  { %v5372_v23 = vpop.f32.mrf.mxu0 }
 0x481   :  { %v13685_v33 = vadd.f32 %v5372_v23, %v4986_v25 }
 0x482   :  { %v9402_v39 = vpop.f32.mrf.mxu0 }
 0x483   :  { %v4964_v49 = vpop.f32.mrf.mxu1 }
 0x484   :  { %v4988_v37 = vadd.f32 %v4964_v49, %v13613_v43  ;;  %v5375_v56 = vpop.f32.mrf.mxu0 }
 0x485   :  { %v13688_v30 = vadd.f32 %v5375_v56, %v4987_v1  ;;  %v9370_v38 = vpop.f32.mrf.mxu1 }
 0x486   :  { %v9403_v14 = vpop.f32.mrf.mxu0 }
 0x487   :  { %v4967_v61 = vpop.f32.mrf.mxu1 }
 0x488   :  { %v4989_v45 = vadd.f32 %v4967_v61, %v13629_v46 }
 0x489   :  { %v9371_v4 = vpop.f32.mrf.mxu1 }
 0x48a   :  { %v5380_v24 = vpop.f32.mrf.mxu0 }
 0x48b   :  { %v4972_v63 = vpop.f32.mrf.mxu1  ;;  %v13691_v2 = vadd.f32 %v5380_v24, %v4988_v37 }
 0x48c   :  { %v4990_v25 = vadd.f32 %v4972_v63, %v13635_v22  ;;  %v9406_v40 = vpop.f32.mrf.mxu0 }
 0x48d   :  { %v9374_v18 = vpop.f32.mrf.mxu1 }
 0x48e   :  { %v5383_v23 = vpop.f32.mrf.mxu0 }
 0x48f   :  { %v4975_v39 = vpop.f32.mrf.mxu1  ;;  %v13694_v43 = vadd.f32 %v5383_v23, %v4989_v45  ;;  %v13702_v45 = vld [vmem:[%s14709_s11] ss:$0 sm:$0xff] }
 0x490   :  { %v9407_v1 = vpop.f32.mrf.mxu0 }
 0x491   :  { %v9375_v49 = vpop.f32.mrf.mxu1 }
 0x492   :  { %v5388_v56 = vpop.f32.mrf.mxu0 }
 0x493   :  { %v13696_v38 = vadd.f32 %v5388_v56, %v4990_v25 }
 0x494   :  { %v9410_v14 = vpop.f32.mrf.mxu0 }
 0x495   :  { %14981 = vst [vmem:[#allocation58_spill] sm:$0xff] %v13696_v38 }
 0x496   :  { %v5391_v46 = vpop.f32.mrf.mxu0 }
 0x497   :  { %v5771_v61 = vpop.f32.mrf.mxu1 }
 0x498   :  { %v9411_v4 = vpop.f32.mrf.mxu0  ;;  %v5825_v37 = vadd.f32 %v5771_v61, %v13660_v54 }
 0x499   :  { %v9422_v10 = vpop.f32.mrf.mxu1 }
 0x49b   :  { %v5774_v24 = vpop.f32.mrf.mxu1  ;;  %v6175_v22 = vpop.f32.mrf.mxu0 }
 0x49c   :  { %v6229_v63 = vadd.f32 %v6175_v22, %v5825_v37  ;;  %v5826_v25 = vadd.f32 %v5774_v24, %v13664_v28 }
 0x49d   :  { %v9423_v40 = vpop.f32.mrf.mxu1  ;;  %v9458_v18 = vpop.f32.mrf.mxu0 }
 0x49e   :  { %v6249_v39 = vadd.f32 %v13702_v45, %v6229_v63 }
 0x49f   :  { %v6178_v23 = vpop.f32.mrf.mxu0 }
 0x4a0   :  { %v6230_v1 = vadd.f32 %v6178_v23, %v5826_v25  ;;  %v6262_v56 = vmax.f32 %v6249_v39, 0.0 }
 0x4a1   :  { %v9459_v49 = vpop.f32.mrf.mxu0 }
 0x4a2   :  { %v6250_v10 = vadd.f32 %v13702_v45, %v6230_v1 }
 0x4a3   :  { %v5779_v54 = vpop.f32.mrf.mxu1 }
 0x4a4   :  { %v6263_v14 = vmax.f32 %v6250_v10, 0.0  ;;  %v5827_v4 = vadd.f32 %v5779_v54, %v13667_v53 }
 0x4a5   :  { %v9426_v46 = vpop.f32.mrf.mxu1 }
 0x4a6   :  { %v13707_v61 = vpack.c.bf16 %v6263_v14, %v6262_v56 }
 0x4a7   :  { %v5782_v37 = vpop.f32.mrf.mxu1  ;;  %v6183_v22 = vpop.f32.mrf.mxu0 }
 0x4a8   :  { %v6324_v40 = vshrl.u32 %v13707_v61, 16  ;;  %v6327_v28 = vshll.u32 %v13707_v61, 16  ;;  %v6231_v24 = vadd.f32 %v6183_v22, %v5827_v4  ;;  %v5828_v39 = vadd.f32 %v5782_v37, %v13669_v19 }
 0x4a9   :  { %v9427_v63 = vpop.f32.mrf.mxu1  ;;  %v9462_v18 = vpop.f32.mrf.mxu0 }
 0x4aa   :  { %v7187_v25 = vrot.slane %v6327_v28, 1  ;;  %v7561_v23 = vrot.slane %v6324_v40, 3  ;;  %v7562_v1 = vrot.slane %v6327_v28, 4  ;;  %v6848_v10 = vrot.slane %v6324_v40, 7 }
 0x4ab   :  { %v6186_v49 = vpop.f32.mrf.mxu0  ;;  %v6251_v56 = vadd.f32 %v13702_v45, %v6231_v24  ;;  %v6326_v18 = vrot.slane %v6324_v40, 4  ;;  %v6329_v27 = vrot.slane %v6327_v28, 5 }
 0x4ac   :  { %v6232_v14 = vadd.f32 %v6186_v49, %v5828_v39  ;;  %v7188_v53 = vor.u32 %v7187_v25, %v6324_v40  ;;  %v13714_v46 = vor.u32 %v6848_v10, %v6327_v28  ;;  %v7563_v16 = vor.u32 %v7562_v1, %v7561_v23 }
 0x4ad   :  { %v9463_v54 = vpop.f32.mrf.mxu0  ;;  %v6264_v4 = vmax.f32 %v6251_v56, 0.0  ;;  %v6330_v49 = vor.u32 %v6329_v27, %v6326_v18 }
 0x4ae   :  { %v6252_v50 = vadd.f32 %v13702_v45, %v6232_v14 }
 0x4af   :  { %v6383_v27 = vsel %vm12668_vm8, 0, %v6330_v49 }
 0x4b0   :  { %v6265_v22 = vmax.f32 %v6252_v50, 0.0 }
 0x4b1   :  { %v5787_v63 = vpop.f32.mrf.mxu1 }
 0x4b2   :  { %v13717_v38 = vpack.c.bf16 %v6265_v22, %v6264_v4  ;;  %v5829_v25 = vadd.f32 %v5787_v63, %v13673_v36  ;;  %v6288_v4 = vrot.slane %v13707_v61, 4 }
 0x4b3   :  { %v9430_v19 = vpop.f32.mrf.mxu1 }
 0x4b4   :  { %v13720_v37 = vshrl.u32 %v13717_v38, 16  ;;  %v6335_v24 = vshll.u32 %v13717_v38, 16 }
 0x4b5   :  { %v5790_v39 = vpop.f32.mrf.mxu1 }
 0x4b6   :  { %v7564_v14 = vrot.slane %v13720_v37, 3  ;;  %v7565_v23 = vrot.slane %v6335_v24, 4  ;;  %v5691_v1 = vpop.permute.xlu0 %5690  ;;  %v6191_v50 = vpop.f32.mrf.mxu0  ;;  %v6850_v28 = vrot.slane %v13720_v37, 7  ;;  %v5830_v36 = vadd.f32 %v5790_v39, %v13675_v9  ;;  %v10199_v39 = vld [vmem:[%s14708_s12 + $0x58] sm:$0xff]  }
 0x4b7   :  { %v9431_v56 = vpop.f32.mrf.mxu1  ;;  %9445 = vmatmul.mubr.msk.bf16.gmra.mxu1 %vm799_vm0, %v5691_v1  ;;  %v6233_v40 = vadd.f32 %v6191_v50, %v5829_v25  ;;  %v6334_v19 = vrot.slane %v13720_v37, 4  ;;  %v6337_v25 = vrot.slane %v6335_v24, 5  ;;  %v7189_v1 = vrot.slane %v6335_v24, 1 }
 0x4b8   :  { %v9466_v54 = vpop.f32.mrf.mxu0  ;;  %9492 = vmatprep.mubr.msk.bf16.mxu1 %vm10438_vm1, %v14924_v6  ;;  %v6851_v22 = vor.u32 %v6850_v28, %v6335_v24  ;;  %v13736_v50 = vor.u32 %v7565_v23, %v7564_v14 }
 0x4b9   :  { %v6253_v56 = vadd.f32 %v13702_v45, %v6233_v40  ;;  %v13749_v24 = vsel %vm4568_vm4, %v7188_v53, %v7189_v1  ;;  %v7191_v14 = vor.u32 %v7189_v1, %v13720_v37  ;;  %v6384_v40 = vmul.bf16 %v12675_v20, %v6383_v27  ;;  %v10200_v53 = vld [vmem:[%s14708_s12 + $0x50] sm:$0xff]   ;;  %v10202_v27 = vld [vmem:[%s14708_s12 + $0x78] sm:$0xff]  }
 0x4ba   :  { %v6095_v63 = vpop.permute.xlu1 %6094  ;;  %v6194_v18 = vpop.f32.mrf.mxu0  ;;  %v13741_v9 = vsel %vm3980_vm6, %v6848_v10, %v6851_v22  ;;  %v13756_v10 = vsel %vm5407_vm7, %v7563_v16, %v13736_v50  ;;  %v6338_v22 = vor.u32 %v6337_v25, %v6334_v19  ;;  %v6289_v25 = vrot.slane %v13717_v38, 4 }
 0x4bb   :  { %v6234_v54 = vadd.f32 %v6194_v18, %v5830_v36  ;;  %9481 = vmatmul.mubr.msk.bf16.gmra.mxu0 %vm799_vm0, %v6095_v63  ;;  %v6306_v36 = vsel %vm2742_vm3, 0, %v6288_v4  ;;  %v6266_v63 = vmax.f32 %v6253_v56, 0.0 }
 0x4bc   :  { %v9467_v60 = vpop.f32.mrf.mxu0  ;;  %9528 = vmatprep.mubr.msk.bf16.mxu0 %vm10438_vm1, %v14924_v6  ;;  %v6308_v16 = vmul.bf16 %v12648_v52, %v6306_v36  ;;  %v6339_v19 = vsel %vm3003_vm5, %v6330_v49, %v6338_v22  ;;  %v10201_v52 = vld [vmem:[%s14708_s12 + $0x48] sm:$0xff]  }
 0x4bd   :  { %v6254_v23 = vadd.f32 %v13702_v45, %v6234_v54  ;;  %v6385_v54 = vmul.bf16 %v12760_v55, %v6339_v19  ;;  %v10204_v19 = vld [vmem:[%s14708_s12 + $0x68] sm:$0xff]  }
 0x4bf   :  { %v6267_v18 = vmax.f32 %v6254_v23, 0.0  ;;  %9493 = vmatmul.mubr.msk.bf16.vlgmr.msra.gmra.mxu1 %vm799_vm0, %v6384_v40  ;;  %v13792_v40 = vsel %vm2742_vm3, %v6288_v4, %v6289_v25 }
 0x4c0   :  { %9496 = vmatprep.mubr.msk.bf16.mxu1 %vm10438_vm1, %v14924_v6  ;;  %9557 = vmatpush3.bf16.msra.mxu1 %v10199_v39  ;;  %v10203_v39 = vld [vmem:[%s14708_s12 + $0x70] sm:$0xff]  }
 0x4c1   :  { %v13765_v20 = vpack.c.bf16 %v6267_v18, %v6266_v63  ;;  %9558 = vmatprep.subr.bf16.mxu1 %v14924_v6  ;;  %v10206_v18 = vld [vmem:[%s14708_s12 + $0x40] sm:$0xff]  }
 0x4c3   :  { %v13775_v1 = vshrl.u32 %v13765_v20, 16  ;;  %v6344_v56 = vshll.u32 %v13765_v20, 16  ;;  %9529 = vmatmul.mubr.msk.bf16.vlgmr.msra.gmra.mxu0 %vm799_vm0, %v6308_v16 }
 0x4c4   :  { %9532 = vmatprep.mubr.msk.bf16.mxu0 %vm10438_vm1, %v14924_v6  ;;  %9559 = vmatpush3.bf16.msra.mxu1 %v10200_v53 }
 0x4c5   :  { %v6343_v49 = vrot.slane %v13775_v1, 4  ;;  %v6346_v60 = vrot.slane %v6344_v56, 5  ;;  %9560 = vmatprep.subr.bf16.mxu1 %v14924_v6  ;;  %9593 = vmatpush3.bf16.msra.mxu0 %v10202_v27  ;;  %v14815_v23 = vrot.slane %v13775_v1, 7  ;;  %v7192_v36 = vrot.slane %v6344_v56, 1 }
 0x4c6   :  { %9594 = vmatprep.subr.bf16.mxu0 %v14924_v6  ;;  %v7568_v16 = vrot.slane %v13775_v1, 3  ;;  %v6309_v27 = vmul.bf16 %v12749_v21, %v13792_v40 }
 0x4c7   :  { %9497 = vmatmul.mubr.msk.bf16.gmra.mxu1 %vm799_vm0, %v6385_v54  ;;  %v13796_v55 = vor.u32 %v6346_v60, %v6343_v49  ;;  %v6854_v63 = vor.u32 %v14815_v23, %v6344_v56  ;;  %v13806_v4 = vsel %vm4568_vm4, %v7191_v14, %v7192_v36  ;;  %v13809_v53 = vor.u32 %v7192_v36, %v13775_v1 }
 0x4c8   :  { %9500 = vmatprep.mubr.msk.bf16.mxu1 %vm10438_vm1, %v14924_v6  ;;  %9561 = vmatpush3.bf16.msra.mxu1 %v10201_v52  ;;  %v7569_v52 = vrot.slane %v6344_v56, 4  ;;  %v6291_v49 = vrot.slane %v13765_v20, 4 }
 0x4c9   :  { %9595 = vmatpush3.bf16.msra.mxu0 %v10203_v39  ;;  %9562 = vmatprep.subr.bf16.mxu1 %v14924_v6  ;;  %v13821_v14 = vsel %vm3980_vm6, %v6850_v28, %v6854_v63  ;;  %v6348_v54 = vsel %vm3003_vm5, %v6338_v22, %v13796_v55  ;;  %v10205_v28 = vld [vmem:[%s14708_s12 + $0x60] sm:$0xff]  }
 0x4ca   :  { %9596 = vmatprep.subr.bf16.mxu0 %v14924_v6  ;;  %v13828_v21 = vor.u32 %v7569_v52, %v7568_v16  ;;  %v6386_v37 = vmul.bf16 %v12791_v0, %v6348_v54  ;;  %v13843_v56 = vsel %vm2742_vm3, %v6289_v25, %v6291_v49 }
 0x4cb   :  { %9533 = vmatmul.mubr.msk.bf16.gmra.mxu0 %vm799_vm0, %v6309_v27  ;;  %v6310_v60 = vmul.bf16 %v12783_v3, %v13843_v56 }
 0x4cc   :  { %9536 = vmatprep.mubr.msk.bf16.mxu0 %vm10438_vm1, %v14924_v6  ;;  %9563 = vmatpush3.bf16.msra.mxu1 %v10206_v18  ;;  %v13840_v22 = vsel %vm5407_vm7, %v13736_v50, %v13828_v21 }
 0x4cd   :  { %9597 = vmatpush3.bf16.msra.mxu0 %v10204_v19  ;;  %9628 = vmatprep.subr.bf16.mxu1 %v14924_v6 }
 0x4ce   :  { %9598 = vmatprep.subr.bf16.mxu0 %v14924_v6 }
 0x4cf   :  { %9501 = vmatmul.mubr.msk.bf16.gmra.mxu1 %vm799_vm0, %v6386_v37 }
 0x4d0   :  { %9504 = vmatprep.mubr.msk.bf16.mxu1 %vm10438_vm1, %v14924_v6 }
 0x4d1   :  { %v5795_v0 = vpop.f32.mrf.mxu1  ;;  %9599 = vmatpush3.bf16.msra.mxu0 %v10205_v28 }
 0x4d2   :  { %9664 = vmatprep.subr.bf16.mxu0 %v14924_v6  ;;  %v5831_v50 = vadd.f32 %v5795_v0, %v13679_v17 }
 0x4d3   :  { %v9434_v39 = vpop.f32.mrf.mxu1  ;;  %9537 = vmatmul.mubr.msk.bf16.gmra.mxu0 %vm799_vm0, %v6310_v60 }
 0x4d4   :  { %9540 = vmatprep.mubr.msk.bf16.mxu0 %vm10438_vm1, %v14924_v6 }
 0x4d5   :  { %v5798_v25 = vpop.f32.mrf.mxu1  ;;  %v6199_v36 = vpop.f32.mrf.mxu0 }
 0x4d6   :  { %v6235_v63 = vadd.f32 %v6199_v36, %v5831_v50  ;;  %v5832_v27 = vadd.f32 %v5798_v25, %v13681_v12 }
 0x4d7   :  { %v9435_v18 = vpop.f32.mrf.mxu1  ;;  %v9470_v16 = vpop.f32.mrf.mxu0 }
 0x4d8   :  { %v6255_v3 = vadd.f32 %v13702_v45, %v6235_v63 }
 0x4d9   :  { %v6202_v19 = vpop.f32.mrf.mxu0 }
 0x4da   :  { %v6236_v52 = vadd.f32 %v6202_v19, %v5832_v27  ;;  %v6268_v28 = vmax.f32 %v6255_v3, 0.0 }
 0x4db   :  { %v9471_v54 = vpop.f32.mrf.mxu0 }
 0x4dc   :  { %v6256_v37 = vadd.f32 %v13702_v45, %v6236_v52 }
 0x4de   :  { %v6269_v60 = vmax.f32 %v6256_v37, 0.0 }
 0x4e0   :  { %v13859_v17 = vpack.c.bf16 %v6269_v60, %v6268_v28 }
 0x4e1   :  { %v5803_v0 = vpop.f32.mrf.mxu1 }
 0x4e2   :  { %v13862_v39 = vshrl.u32 %v13859_v17, 16  ;;  %v6353_v50 = vshll.u32 %v13859_v17, 16  ;;  %v6293_v36 = vrot.slane %v13859_v17, 4  ;;  %v5833_v12 = vadd.f32 %v5803_v0, %v13685_v33 }
 0x4e3   :  { %v9438_v25 = vpop.f32.mrf.mxu1 }
 0x4e4   :  { %v13868_v63 = vsel %vm2742_vm3, %v6291_v49, %v6293_v36  ;;  %v6352_v18 = vrot.slane %v13862_v39, 4  ;;  %v6355_v16 = vrot.slane %v6353_v50, 5  ;;  %v14816_v27 = vrot.slane %v13862_v39, 7 }
 0x4e5   :  { %v5806_v19 = vpop.f32.mrf.mxu1  ;;  %v6207_v3 = vpop.f32.mrf.mxu0  ;;  %v6311_v52 = vmul.bf16 %v12810_v41, %v13868_v63  ;;  %v7195_v54 = vrot.slane %v6353_v50, 1 }
 0x4e6   :  { %v6237_v37 = vadd.f32 %v6207_v3, %v5833_v12  ;;  %v6356_v28 = vor.u32 %v6355_v16, %v6352_v18  ;;  %v6857_v33 = vor.u32 %v14816_v27, %v6353_v50  ;;  %v5834_v23 = vadd.f32 %v5806_v19, %v13688_v30 }
 0x4e7   :  { %v9439_v60 = vpop.f32.mrf.mxu1  ;;  %v9474_v0 = vpop.f32.mrf.mxu0  ;;  %9541 = vmatmul.mubr.msk.bf16.gmra.mxu0 %vm799_vm0, %v6311_v52  ;;  %v13879_v49 = vsel %vm4568_vm4, %v13809_v53, %v7195_v54  ;;  %v7197_v25 = vor.u32 %v7195_v54, %v13862_v39  ;;  %v14982_v12 = vrot.slane %v13775_v1, 7  ;;  %v7572_v53 = vrot.slane %v13862_v39, 3 }
 0x4e8   :  { %v6357_v41 = vsel %vm3003_vm5, %v13796_v55, %v6356_v28  ;;  %9544 = vmatprep.mubr.msk.bf16.mxu0 %vm10438_vm1, %v14924_v6  ;;  %v6257_v52 = vadd.f32 %v13702_v45, %v6237_v37  ;;  %v7573_v30 = vrot.slane %v6353_v50, 4 }
 0x4e9   :  { %v13890_v18 = vsel %vm3980_vm6, %v14982_v12, %v6857_v33  ;;  %v6210_v16 = vpop.f32.mrf.mxu0  ;;  %v6387_v3 = vmul.bf16 %v12820_v8, %v6357_v41 }
 0x4ea   :  { %v6238_v54 = vadd.f32 %v6210_v16, %v5834_v23  ;;  %v7574_v1 = vor.u32 %v7573_v30, %v7572_v53  ;;  %v6270_v33 = vmax.f32 %v6257_v52, 0.0 }
 0x4eb   :  { %v9475_v19 = vpop.f32.mrf.mxu0  ;;  %9505 = vmatmul.mubr.msk.bf16.gmra.mxu1 %vm799_vm0, %v6387_v3 }
 0x4ec   :  { %v6258_v55 = vadd.f32 %v13702_v45, %v6238_v54  ;;  %9508 = vmatprep.mubr.msk.bf16.mxu1 %vm10438_vm1, %v14924_v6  ;;  %v13901_v8 = vsel %vm5407_vm7, %v13828_v21, %v7574_v1 }
 0x4ee   :  { %v6271_v60 = vmax.f32 %v6258_v55, 0.0 }
 0x4f0   :  { %v13903_v0 = vpack.c.bf16 %v6271_v60, %v6270_v33 }
 0x4f1   :  { %v5811_v37 = vpop.f32.mrf.mxu1 }
 0x4f2   :  { %v13906_v23 = vshrl.u32 %v13903_v0, 16  ;;  %v13909_v50 = vshll.u32 %v13903_v0, 16  ;;  %v6295_v41 = vrot.slane %v13903_v0, 4  ;;  %v5835_v16 = vadd.f32 %v5811_v37, %v13691_v2 }
 0x4f3   :  { %v9442_v12 = vpop.f32.mrf.mxu1 }
 0x4f4   :  { %v13914_v3 = vsel %vm2742_vm3, %v6293_v36, %v6295_v41  ;;  %v6361_v21 = vrot.slane %v13906_v23, 4  ;;  %v6364_v53 = vrot.slane %v13909_v50, 5  ;;  %v7198_v19 = vrot.slane %v13909_v50, 1 }
 0x4f5   :  { %v5814_v52 = vpop.f32.mrf.mxu1  ;;  %v6215_v54 = vpop.f32.mrf.mxu0  ;;  %v6312_v30 = vmul.bf16 %v12889_v47, %v13914_v3 }
 0x4f6   :  { %v6239_v55 = vadd.f32 %v6215_v54, %v5835_v16  ;;  %v6365_v33 = vor.u32 %v6364_v53, %v6361_v21  ;;  %v13923_v2 = vsel %vm4568_vm4, %v7197_v25, %v7198_v19  ;;  %v7200_v36 = vor.u32 %v7198_v19, %v13906_v23 }
 0x4f7   :  { %v9443_v60 = vpop.f32.mrf.mxu1  ;;  %v9478_v12 = vpop.f32.mrf.mxu0  ;;  %9545 = vmatmul.mubr.msk.bf16.gmra.mxu0 %vm799_vm0, %v6312_v30  ;;  %v5836_v37 = vadd.f32 %v5814_v52, %v13694_v43  ;;  %v7576_v21 = vrot.slane %v13906_v23, 3  ;;  %v7577_v25 = vrot.slane %v13909_v50, 4 }
 0x4f8   :  { %v6366_v27 = vsel %vm3003_vm5, %v6356_v28, %v6365_v33  ;;  %9548 = vmatprep.mubr.msk.bf16.mxu0 %vm10438_vm1, %v14924_v6  ;;  %v6259_v53 = vadd.f32 %v13702_v45, %v6239_v55 }
 0x4f9   :  { %v6218_v47 = vpop.f32.mrf.mxu0  ;;  %v6388_v16 = vmul.bf16 %v12869_v57, %v6366_v27  ;;  %v7578_v28 = vor.u32 %v7577_v25, %v7576_v21 }
 0x4fa   :  { %v6240_v54 = vadd.f32 %v6218_v47, %v5836_v37  ;;  %v6272_v52 = vmax.f32 %v6259_v53, 0.0 }
 0x4fb   :  { %v9479_v30 = vpop.f32.mrf.mxu0  ;;  %9509 = vmatmul.mubr.msk.bf16.gmra.mxu1 %vm799_vm0, %v6388_v16  ;;  %v13939_v57 = vsel %vm5407_vm7, %v7574_v1, %v7578_v28 }
 0x4fc   :  { %v6260_v43 = vadd.f32 %v13702_v45, %v6240_v54  ;;  %9512 = vmatprep.mubr.msk.bf16.mxu1 %vm10438_vm1, %v14924_v6 }
 0x4fe   :  { %v6273_v19 = vmax.f32 %v6260_v43, 0.0 }
 0x500   :  { %v13941_v27 = vpack.c.bf16 %v6273_v19, %v6272_v52  ;;  %v6666_v19 = vrot.slane %v13707_v61, 5 }
 0x502   :  { %v13944_v55 = vshrl.u32 %v13941_v27, 16  ;;  %v13947_v60 = vshll.u32 %v13941_v27, 16  ;;  %v13950_v12 = vrot.slane %v13941_v27, 4 }
 0x504   :  { %v13954_v37 = vsel %vm2742_vm3, %v6295_v41, %v13950_v12  ;;  %v6370_v47 = vrot.slane %v13944_v55, 4  ;;  %v6373_v1 = vrot.slane %v13947_v60, 5  ;;  %v7201_v53 = vrot.slane %v13947_v60, 1 }
 0x505   :  { %v6313_v16 = vmul.bf16 %v12919_v31, %v13954_v37  ;;  %v7580_v54 = vrot.slane %v13944_v55, 3  ;;  %v7581_v43 = vrot.slane %v13947_v60, 4 }
 0x506   :  { %v6374_v21 = vor.u32 %v6373_v1, %v6370_v47  ;;  %v13967_v41 = vsel %vm4568_vm4, %v7200_v36, %v7201_v53  ;;  %v13970_v30 = vor.u32 %v7201_v53, %v13944_v55  ;;  %v6876_v47 = vsel %vm12961_vm11, 0, %v13714_v46  ;;  %v10215_v53 = vld [vmem:[%s14708_s12 + $0xa8] sm:$0xff]  }
 0x507   :  { %9549 = vmatmul.mubr.msk.bf16.gmra.mxu0 %vm799_vm0, %v6313_v16  ;;  %v13975_v52 = vor.u32 %v7581_v43, %v7580_v54  ;;  %v6684_v1 = vsel %vm3572_vm2, 0, %v6666_v19  ;;  %v6667_v16 = vrot.slane %v13717_v38, 5  ;;  %v6879_v43 = vmul.bf16 %v13125_v11, %v13821_v14 }
 0x508   :  { %v6375_v25 = vsel %vm3003_vm5, %v6365_v33, %v6374_v21  ;;  %9552 = vmatprep.mubr.msk.bf16.mxu0 %vm10438_vm1, %v14924_v6  ;;  %v6314_v33 = vmul.bf16 %v12937_v26, %v13950_v12  ;;  %v10211_v26 = vld [vmem:[%s14708_s12 + $0xb8] sm:$0xff]   ;;  %v6686_v46 = vmul.bf16 %v12989_v48, %v6684_v1  ;;  %v6878_v48 = vmul.bf16 %v13045_v35, %v13741_v9  ;;  %v10209_v35 = vld [vmem:[%s14708_s12 + $0x88] sm:$0xff]  }
 0x509   :  { %v6389_v31 = vmul.bf16 %v12926_v29, %v6375_v25  ;;  %v13983_v36 = vsel %vm5407_vm7, %v7578_v28, %v13975_v52  ;;  %v6390_v29 = vmul.bf16 %v12946_v62, %v6374_v21  ;;  %v6877_v28 = vmul.bf16 %v12973_v51, %v6876_v47  ;;  %v10207_v62 = vld [vmem:[%s14708_s12 + $0x98] sm:$0xff]   ;;  %v10213_v51 = vld [vmem:[%s14708_s12 + $0xb0] sm:$0xff]   ;;  %v10217_v25 = vld [vmem:[%s14708_s12 + $0xa0] sm:$0xff]  }
 0x50a   :  { %v10208_v21 = vld [vmem:[%s14708_s12 + $0x90] sm:$0xff]   ;;  %v6668_v54 = vsel %vm3572_vm2, %v6666_v19, %v6667_v16  ;;  %v6671_v19 = vrot.slane %v13859_v17, 5  ;;  %v6859_v11 = vrot.slane %v13906_v23, 7  ;;  %v6880_v14 = vmul.bf16 %v13187_v59, %v13890_v18 }
 0x50b   :  { %9513 = vmatmul.mubr.msk.bf16.gmra.mxu1 %vm799_vm0, %v6389_v31  ;;  %v6687_v9 = vmul.bf16 %v13041_v42, %v6668_v54  ;;  %v6669_v31 = vrot.slane %v13765_v20, 5  ;;  %v10210_v42 = vld [vmem:[%s14708_s12 + $0x80] sm:$0xff]   ;;  %v14983_v23 = vrot.slane %v13862_v39, 7  ;;  %v6673_v1 = vrot.slane %v13903_v0, 5 }
 0x50c   :  { %9516 = vmatprep.mubr.msk.bf16.mxu1 %vm10438_vm1, %v14924_v6 }
 0x50d   :  { %v6672_v47 = vsel %vm3572_vm2, %v6669_v31, %v6671_v19  ;;  %v6674_v18 = vsel %vm3572_vm2, %v6671_v19, %v6673_v1 }
 0x50e   :  { %v6690_v39 = vmul.bf16 %v13152_v34, %v6674_v18 }
 0x50f   :  { %9553 = vmatmul.mubr.msk.bf16.gmra.mxu0 %vm799_vm0, %v6314_v33  ;;  %v6670_v33 = vsel %vm3572_vm2, %v6667_v16, %v6669_v31  ;;  %v10218_v16 = vld [vmem:[%s14708_s12 + $0xc0] sm:$0xff]  }
 0x510   :  { %9600 = vmatprep.mubr.msk.bf16.mxu0 %vm10438_vm1, %v14924_v6 }
 0x513   :  { %9517 = vmatmul.mubr.msk.bf16.gmra.mxu1 %vm799_vm0, %v6390_v29  ;;  %v6688_v29 = vmul.bf16 %v13083_v15, %v6670_v33  ;;  %v6689_v15 = vmul.bf16 %v13121_v58, %v6672_v47 }
 0x514   :  { %9564 = vmatprep.mubr.msk.bf16.mxu1 %vm10438_vm1, %v14924_v6 }
 0x517   :  { %9601 = vmatmul.mubr.msk.bf16.vlgmr.msra.gmra.mxu0 %vm799_vm0, %v6877_v28 }
 0x518   :  { %9604 = vmatprep.mubr.msk.bf16.mxu0 %vm10438_vm1, %v14924_v6  ;;  %9665 = vmatpush3.bf16.msra.mxu0 %v10211_v26  ;;  %v6860_v26 = vor.u32 %v6859_v11, %v13909_v50 }
 0x519   :  { %9666 = vmatprep.subr.bf16.mxu0 %v14924_v6 }
 0x51a   :  { %v6861_v28 = vsel %vm3980_vm6, %v14983_v23, %v6860_v26  ;;  %v7380_v26 = vrot.slane %v13717_v38, 3 }
 0x51b   :  { %9565 = vmatmul.mubr.msk.bf16.vlgmr.msra.gmra.mxu1 %vm799_vm0, %v6686_v46  ;;  %v6881_v59 = vmul.bf16 %v13231_v5, %v6861_v28  ;;  %v6675_v46 = vrot.slane %v13941_v27, 5 }
 0x51c   :  { %9568 = vmatprep.mubr.msk.bf16.mxu1 %vm10438_vm1, %v14924_v6  ;;  %9629 = vmatpush3.bf16.msra.mxu1 %v10207_v62  ;;  %v6862_v62 = vrot.slane %v13944_v55, 7 }
 0x51d   :  { %9630 = vmatprep.subr.bf16.mxu1 %v14924_v6  ;;  %9667 = vmatpush3.bf16.msra.mxu0 %v10213_v51  ;;  %v6692_v51 = vmul.bf16 %v13209_v13, %v6675_v46  ;;  %v10216_v13 = vld [vmem:[%s14708_s12 + $0xc8] sm:$0xff]  }
 0x51e   :  { %9668 = vmatprep.subr.bf16.mxu0 %v14924_v6  ;;  %v6863_v58 = vor.u32 %v6862_v62, %v13947_v60  ;;  %v6676_v60 = vsel %vm3572_vm2, %v6673_v1, %v6675_v46 }
 0x51f   :  { %9605 = vmatmul.mubr.msk.bf16.gmra.mxu0 %vm799_vm0, %v6878_v48  ;;  %v6691_v34 = vmul.bf16 %v13183_v44, %v6676_v60  ;;  %v10214_v44 = vld [vmem:[%s14708_s12 + $0xd0] sm:$0xff]  }
 0x520   :  { %9608 = vmatprep.mubr.msk.bf16.mxu0 %vm10438_vm1, %v14924_v6  ;;  %9631 = vmatpush3.bf16.msra.mxu1 %v10208_v21  ;;  %v6864_v50 = vsel %vm3980_vm6, %v6859_v11, %v6863_v58 }
 0x521   :  { %9632 = vmatprep.subr.bf16.mxu1 %v14924_v6  ;;  %9669 = vmatpush3.bf16.msra.mxu0 %v10215_v53  ;;  %v6882_v5 = vmul.bf16 %v13324_v7, %v6864_v50  ;;  %v10212_v7 = vld [vmem:[%s14708_s12 + $0xd8] sm:$0xff]   ;;  %v14984_v53 = vld [vmem:[#allocation58_spill] sm:$0xff] }
 0x522   :  { %9670 = vmatprep.subr.bf16.mxu0 %v14924_v6 }
 0x523   :  { %9569 = vmatmul.mubr.msk.bf16.gmra.mxu1 %vm799_vm0, %v6687_v9 }
 0x524   :  { %9572 = vmatprep.mubr.msk.bf16.mxu1 %vm10438_vm1, %v14924_v6  ;;  %9633 = vmatpush3.bf16.msra.mxu1 %v10209_v35 }
 0x525   :  { %9634 = vmatprep.subr.bf16.mxu1 %v14924_v6  ;;  %9671 = vmatpush3.bf16.msra.mxu0 %v10217_v25 }
 0x526   :  { %9736 = vmatprep.subr.bf16.mxu0 %v14924_v6 }
 0x527   :  { %9609 = vmatmul.mubr.msk.bf16.gmra.mxu0 %vm799_vm0, %v6879_v43 }
 0x528   :  { %9612 = vmatprep.mubr.msk.bf16.mxu0 %vm10438_vm1, %v14924_v6  ;;  %9635 = vmatpush3.bf16.msra.mxu1 %v10210_v42 }
 0x529   :  { %9700 = vmatprep.subr.bf16.mxu1 %v14924_v6 }
 0x52b   :  { %9573 = vmatmul.mubr.msk.bf16.gmra.mxu1 %vm799_vm0, %v6688_v29 }
 0x52c   :  { %9576 = vmatprep.mubr.msk.bf16.mxu1 %vm10438_vm1, %v14924_v6 }
 0x52f   :  { %9613 = vmatmul.mubr.msk.bf16.gmra.mxu0 %vm799_vm0, %v6880_v14 }
 0x530   :  { %9616 = vmatprep.mubr.msk.bf16.mxu0 %vm10438_vm1, %v14924_v6 }
 0x533   :  { %9577 = vmatmul.mubr.msk.bf16.gmra.mxu1 %vm799_vm0, %v6689_v15 }
 0x534   :  { %9580 = vmatprep.mubr.msk.bf16.mxu1 %vm10438_vm1, %v14924_v6 }
 0x537   :  { %9617 = vmatmul.mubr.msk.bf16.gmra.mxu0 %vm799_vm0, %v6881_v59 }
 0x538   :  { %9620 = vmatprep.mubr.msk.bf16.mxu0 %vm10438_vm1, %v14924_v6 }
 0x53b   :  { %9581 = vmatmul.mubr.msk.bf16.gmra.mxu1 %vm799_vm0, %v6690_v39 }
 0x53c   :  { %9584 = vmatprep.mubr.msk.bf16.mxu1 %vm10438_vm1, %v14924_v6 }
 0x53f   :  { %9621 = vmatmul.mubr.msk.bf16.gmra.mxu0 %vm799_vm0, %v6882_v5  ;;  %v14985_v5 = vld [vmem:[#allocation6_spill] sm:$0xff] }
 0x540   :  { %9624 = vmatprep.mubr.msk.bf16.mxu0 %vm10438_vm1, %v14924_v6 }
 0x543   :  { %9585 = vmatmul.mubr.msk.bf16.gmra.mxu1 %vm799_vm0, %v6691_v34 }
 0x544   :  { %9588 = vmatprep.mubr.msk.bf16.mxu1 %vm10438_vm1, %v14924_v6 }
 0x54b   :  { %9589 = vmatmul.mubr.msk.bf16.gmra.mxu1 %vm799_vm0, %v6692_v51 }
 0x54c   :  { %9636 = vmatprep.mubr.msk.bf16.mxu1 %vm10438_vm1, %v14924_v6 }
 0x553   :  { %9637 = vmatmul.mubr.msk.bf16.vlgmr.msra.gmra.mxu1 %vm799_vm0, %v13707_v61 }
 0x554   :  { %9640 = vmatprep.mubr.msk.bf16.mxu1 %vm10438_vm1, %v14924_v6  ;;  %9701 = vmatpush3.bf16.msra.mxu1 %v10212_v7 }
 0x555   :  { %9702 = vmatprep.subr.bf16.mxu1 %v14924_v6 }
 0x558   :  { %9703 = vmatpush3.bf16.msra.mxu1 %v10214_v44 }
 0x559   :  { %9704 = vmatprep.subr.bf16.mxu1 %v14924_v6 }
 0x55b   :  { %9641 = vmatmul.mubr.msk.bf16.gmra.mxu1 %vm799_vm0, %v13717_v38 }
 0x55c   :  { %9644 = vmatprep.mubr.msk.bf16.mxu1 %vm10438_vm1, %v14924_v6  ;;  %9705 = vmatpush3.bf16.msra.mxu1 %v10216_v13 }
 0x55d   :  { %9706 = vmatprep.subr.bf16.mxu1 %v14924_v6 }
 0x560   :  { %9707 = vmatpush3.bf16.msra.mxu1 %v10218_v16  ;;  %v14986_v16 = vld [vmem:[#allocation12_spill] sm:$0xff] }
 0x561   :  { %9772 = vmatprep.subr.bf16.mxu1 %v14924_v6 }
 0x563   :  { %9645 = vmatmul.mubr.msk.bf16.gmra.mxu1 %vm799_vm0, %v13765_v20 }
 0x564   :  { %9648 = vmatprep.mubr.msk.bf16.mxu1 %vm10438_vm1, %v14924_v6 }
 0x56b   :  { %9649 = vmatmul.mubr.msk.bf16.gmra.mxu1 %vm799_vm0, %v13859_v17 }
 0x56c   :  { %9652 = vmatprep.mubr.msk.bf16.mxu1 %vm10438_vm1, %v14924_v6 }
 0x573   :  { %9653 = vmatmul.mubr.msk.bf16.gmra.mxu1 %vm799_vm0, %v13903_v0 }
 0x574   :  { %9656 = vmatprep.mubr.msk.bf16.mxu1 %vm10438_vm1, %v14924_v6 }
 0x577   :  { %v5819_v21 = vpop.f32.mrf.mxu1 }
 0x578   :  { %v5837_v54 = vadd.f32 %v5819_v21, %v14984_v53 }
 0x579   :  { %v9446_v48 = vpop.f32.mrf.mxu1 }
 0x57b   :  { %v5822_v35 = vpop.f32.mrf.mxu1  ;;  %v6223_v9 = vpop.f32.mrf.mxu0  ;;  %9657 = vmatmul.mubr.msk.bf16.gmra.mxu1 %vm799_vm0, %v13941_v27 }
 0x57c   :  { %v6241_v25 = vadd.f32 %v6223_v9, %v5837_v54  ;;  %9660 = vmatprep.mubr.msk.bf16.mxu1 %vm10438_vm1, %v14924_v6  ;;  %v7382_v54 = vrot.slane %v13765_v20, 3  ;;  %v10219_v20 = vld [vmem:[%s14708_s12 + $0xf8] sm:$0xff]  }
 0x57d   :  { %v9447_v31 = vpop.f32.mrf.mxu1  ;;  %v9482_v42 = vpop.f32.mrf.mxu0 }
 0x57e   :  { %v6261_v43 = vadd.f32 %v13702_v45, %v6241_v25  ;;  %v7379_v45 = vrot.slane %v13707_v61, 3  ;;  %v10222_v31 = vld [vmem:[%s14708_s12 + $0x110] sm:$0xff]  }
 0x57f   :  { %v6226_v33 = vpop.f32.mrf.mxu0  ;;  %v6479_v29 = vpop.f32.mrf.mxu1 }
 0x580   :  { %v6274_v19 = vmax.f32 %v6261_v43, 0.0  ;;  %v7381_v34 = vsel %vm4991_vm9, %v7379_v45, %v7380_v26 }
 0x581   :  { %v9483_v11 = vpop.f32.mrf.mxu0  ;;  %v9494_v14 = vpop.f32.mrf.mxu1  ;;  %v7400_v21 = vmul.bf16 %v14986_v16, %v7381_v34  ;;  %v7386_v16 = vrot.slane %v13903_v0, 3  ;;  %v7388_v0 = vrot.slane %v13941_v27, 3 }
 0x582   :  { %v14146_v47 = vpack.c.bf16 %v6274_v19, %v6274_v19  ;;  %v7383_v11 = vsel %vm4991_vm9, %v7380_v26, %v7382_v54 }
 0x583   :  { %v6482_v15 = vpop.f32.mrf.mxu1  ;;  %v6612_v23 = vpop.f32.mrf.mxu0 }
 0x584   :  { %v6866_v28 = vshll.u32 %v14146_v47, 16  ;;  %v14150_v1 = vadd.f32 %v6612_v23, %v6479_v29  ;;  %9661 = vmatmul.mubr.msk.bf16.gmra.mxu1 %vm799_vm0, %v14146_v47  ;;  %v7206_v58 = vshrl.u32 %v14146_v47, 16  ;;  %v14987_v29 = vld [vmem:[#allocation24_spill] sm:$0xff] }
 0x585   :  { %v9495_v59 = vpop.f32.mrf.mxu1  ;;  %v9530_v18 = vpop.f32.mrf.mxu0  ;;  %9708 = vmatprep.mubr.msk.bf16.mxu1 %vm10438_vm1, %v14924_v6  ;;  %v7216_v19 = vmul.bf16 %v14987_v29, %v13749_v24  ;;  %v10221_v24 = vld [vmem:[%s14708_s12 + $0xf0] sm:$0xff]  }
 0x586   :  { %v6868_v38 = vsel %vm3980_vm6, %v6862_v62, %v6866_v28  ;;  %v7204_v39 = vrot.slane %v6866_v28, 1  ;;  %v7584_v61 = vrot.slane %v7206_v58, 3  ;;  %v10220_v62 = vld [vmem:[%s14708_s12 + $0x118] sm:$0xff]   ;;  %v7585_v13 = vrot.slane %v6866_v28, 4 }
 0x587   :  { %v6487_v50 = vpop.f32.mrf.mxu1  ;;  %v6615_v46 = vpop.f32.mrf.mxu0  ;;  %v6883_v60 = vmul.bf16 %v14985_v5, %v6868_v38  ;;  %v14988_v28 = vld [vmem:[#allocation49_spill] sm:$0xff]  ;;  %v7384_v18 = vrot.slane %v13859_v17, 3  ;;  %v10223_v17 = vld [vmem:[%s14708_s12 + $0xe8] sm:$0xff]  }
 0x588   :  { %v14165_v51 = vadd.f32 %v6615_v46, %v6482_v15  ;;  %v14169_v7 = vsel %vm4568_vm4, %v13970_v30, %v7204_v39  ;;  %v7586_v30 = vor.u32 %v7585_v13, %v7584_v61  ;;  %v7401_v45 = vmul.bf16 %v14988_v28, %v7383_v11  ;;  %v10226_v46 = vld [vmem:[%s14708_s12 + $0x100] sm:$0xff]  }
 0x589   :  { %v9498_v44 = vpop.f32.mrf.mxu1  ;;  %v9531_v55 = vpop.f32.mrf.mxu0  ;;  %9625 = vmatmul.mubr.msk.bf16.gmra.mxu0 %vm799_vm0, %v6883_v60  ;;  %v14989_v60 = vld [vmem:[#allocation2_spill] sm:$0xff]  ;;  %v7385_v61 = vsel %vm4991_vm9, %v7382_v54, %v7384_v18  ;;  %v14992_v54 = vld [vmem:[#allocation37_spill] sm:$0xff] }
 0x58a   :  { %9672 = vmatprep.mubr.msk.bf16.mxu0 %vm10438_vm1, %v14924_v6  ;;  %v14189_v42 = vsel %vm5407_vm7, %v13975_v52, %v7586_v30  ;;  %v10224_v52 = vld [vmem:[%s14708_s12 + $0x108] sm:$0xff]   ;;  %v7217_v34 = vmul.bf16 %v14989_v60, %v13806_v4  ;;  %v10225_v4 = vld [vmem:[%s14708_s12 + $0xe0] sm:$0xff]  }
 0x58b   :  { %v6490_v48 = vpop.f32.mrf.mxu1  ;;  %v6620_v53 = vpop.f32.mrf.mxu0  ;;  %v14995_v28 = vld [vmem:[#allocation34_spill] sm:$0xff] }
 0x58c   :  { %v14179_v35 = vadd.f32 %v6620_v53, %v6487_v50  ;;  %9709 = vmatmul.mubr.msk.bf16.vlgmr.msra.gmra.mxu1 %vm799_vm0, %v7400_v21  ;;  %v14991_v21 = vld [vmem:[#allocation50_spill] sm:$0xff]  ;;  %v7387_v53 = vsel %vm4991_vm9, %v7384_v18, %v7386_v16  ;;  %v14996_v18 = vld [vmem:[#allocation47_spill] sm:$0xff] }
 0x58d   :  { %v9499_v9 = vpop.f32.mrf.mxu1  ;;  %v9534_v25 = vpop.f32.mrf.mxu0  ;;  %9712 = vmatprep.mubr.msk.bf16.mxu1 %vm10438_vm1, %v14924_v6  ;;  %9773 = vmatpush3.bf16.msra.mxu1 %v10220_v62  ;;  %v14990_v62 = vld [vmem:[#allocation51_spill] sm:$0xff]  ;;  %v7403_v30 = vmul.bf16 %v14992_v54, %v7387_v53  ;;  %v15000_v53 = vld [vmem:[#allocation28_spill] sm:$0xff] }
 0x58e   :  { %9774 = vmatprep.subr.bf16.mxu1 %v14924_v6  ;;  %v7402_v13 = vmul.bf16 %v14990_v62, %v7385_v61  ;;  %v14993_v25 = vld [vmem:[#allocation5_spill] sm:$0xff]  ;;  %v14998_v61 = vld [vmem:[#allocation44_spill] sm:$0xff]  ;;  %v7761_v54 = vmul.bf16 %v15000_v53, %v13792_v40 }
 0x58f   :  { %v6495_v43 = vpop.f32.mrf.mxu1  ;;  %v6623_v33 = vpop.f32.mrf.mxu0 }
 0x590   :  { %v14198_v14 = vadd.f32 %v6623_v33, %v6490_v48  ;;  %v7218_v48 = vmul.bf16 %v14991_v21, %v13879_v49  ;;  %v7219_v49 = vmul.bf16 %v14993_v25, %v13923_v2  ;;  %v14994_v33 = vld [vmem:[#allocation46_spill] sm:$0xff] }
 0x591   :  { %v9502_v15 = vpop.f32.mrf.mxu1  ;;  %v9535_v23 = vpop.f32.mrf.mxu0  ;;  %9673 = vmatmul.mubr.msk.bf16.vlgmr.msra.gmra.mxu0 %vm799_vm0, %v7216_v19  ;;  %9775 = vmatpush3.bf16.msra.mxu1 %v10222_v31  ;;  %v7389_v31 = vsel %vm4991_vm9, %v7386_v16, %v7388_v0 }
 0x592   :  { %9737 = vmatpush3.bf16.msra.mxu0 %v10219_v20  ;;  %9676 = vmatprep.mubr.msk.bf16.mxu0 %vm10438_vm1, %v14924_v6  ;;  %v7390_v20 = vrot.slane %v14146_v47, 3  ;;  %v7404_v29 = vmul.bf16 %v14994_v33, %v7389_v31 }
 0x593   :  { %v6498_v26 = vpop.f32.mrf.mxu1  ;;  %v6628_v59 = vpop.f32.mrf.mxu0  ;;  %9738 = vmatprep.subr.bf16.mxu0 %v14924_v6  ;;  %9776 = vmatprep.subr.bf16.mxu1 %v14924_v6 }
 0x594   :  { %v14213_v38 = vadd.f32 %v6628_v59, %v6495_v43  ;;  %9713 = vmatmul.mubr.msk.bf16.gmra.mxu1 %vm799_vm0, %v7401_v45  ;;  %v7391_v2 = vsel %vm4991_vm9, %v7388_v0, %v7390_v20  ;;  %v7220_v45 = vmul.bf16 %v14995_v28, %v13967_v41  ;;  %v14997_v41 = vld [vmem:[#allocation38_spill] sm:$0xff] }
 0x595   :  { %v9503_v39 = vpop.f32.mrf.mxu1  ;;  %v9538_v50 = vpop.f32.mrf.mxu0  ;;  %9716 = vmatprep.mubr.msk.bf16.mxu1 %vm10438_vm1, %v14924_v6  ;;  %9777 = vmatpush3.bf16.msra.mxu1 %v10224_v52 }
 0x596   :  { %9739 = vmatpush3.bf16.msra.mxu0 %v10221_v24  ;;  %9778 = vmatprep.subr.bf16.mxu1 %v14924_v6  ;;  %v7398_v24 = vsel %vm5010_vm12, %v7391_v2, 0 }
 0x597   :  { %v6631_v5 = vpop.f32.mrf.mxu0  ;;  %9740 = vmatprep.subr.bf16.mxu0 %v14924_v6  ;;  %v7405_v39 = vmul.bf16 %v14996_v18, %v7398_v24 }
 0x598   :  { %v14229_v44 = vadd.f32 %v6631_v5, %v6498_v26 }
 0x599   :  { %v9539_v55 = vpop.f32.mrf.mxu0  ;;  %9677 = vmatmul.mubr.msk.bf16.gmra.mxu0 %vm799_vm0, %v7217_v34  ;;  %9779 = vmatpush3.bf16.msra.mxu1 %v10226_v46  ;;  %v7221_v46 = vmul.bf16 %v14997_v41, %v14169_v7 }
 0x59a   :  { %9680 = vmatprep.mubr.msk.bf16.mxu0 %vm10438_vm1, %v14924_v6  ;;  %9741 = vmatpush3.bf16.msra.mxu0 %v10223_v17  ;;  %v7215_v55 = vsel %vm12961_vm11, %v7206_v58, 0  ;;  %v15001_v58 = vld [vmem:[#allocation52_spill] sm:$0xff] }
 0x59b   :  { %9742 = vmatprep.subr.bf16.mxu0 %v14924_v6 }
 0x59c   :  { %9717 = vmatmul.mubr.msk.bf16.gmra.mxu1 %vm799_vm0, %v7402_v13 }
 0x59d   :  { %9720 = vmatprep.mubr.msk.bf16.mxu1 %vm10438_vm1, %v14924_v6 }
 0x59e   :  { %9743 = vmatpush3.bf16.msra.mxu0 %v10225_v4  ;;  %v14999_v4 = vld [vmem:[#allocation41_spill] sm:$0xff] }
 0x59f   :  { %v7222_v16 = vmul.bf16 %v14999_v4, %v7215_v55 }
 0x5a1   :  { %9681 = vmatmul.mubr.msk.bf16.gmra.mxu0 %vm799_vm0, %v7218_v48 }
 0x5a2   :  { %9684 = vmatprep.mubr.msk.bf16.mxu0 %vm10438_vm1, %v14924_v6 }
 0x5a4   :  { %9721 = vmatmul.mubr.msk.bf16.gmra.mxu1 %vm799_vm0, %v7403_v30  ;;  %v7595_v30 = vmul.bf16 %v15001_v58, %v13756_v10 }
 0x5a5   :  { %9724 = vmatprep.mubr.msk.bf16.mxu1 %vm10438_vm1, %v14924_v6 }
 0x5a7   :  { %v6636_v9 = vpop.f32.mrf.mxu0 }
 0x5a9   :  { %v9542_v43 = vpop.f32.mrf.mxu0  ;;  %9685 = vmatmul.mubr.msk.bf16.gmra.mxu0 %vm799_vm0, %v7219_v49 }
 0x5aa   :  { %9688 = vmatprep.mubr.msk.bf16.mxu0 %vm10438_vm1, %v14924_v6 }
 0x5ab   :  { %v6503_v27 = vpop.f32.mrf.mxu1  ;;  %v6639_v19 = vpop.f32.mrf.mxu0 }
 0x5ac   :  { %v14262_v11 = vadd.f32 %v6636_v9, %v6503_v27  ;;  %9725 = vmatmul.mubr.msk.bf16.gmra.mxu1 %vm799_vm0, %v7404_v29  ;;  %v15002_v9 = vld [vmem:[#allocation29_spill] sm:$0xff]  ;;  %v15003_v29 = vld [vmem:[#allocation26_spill] sm:$0xff] }
 0x5ad   :  { %v9506_v15 = vpop.f32.mrf.mxu1  ;;  %v9543_v23 = vpop.f32.mrf.mxu0  ;;  %9728 = vmatprep.mubr.msk.bf16.mxu1 %vm10438_vm1, %v14924_v6  ;;  %v7762_v25 = vmul.bf16 %v15002_v9, %v13843_v56  ;;  %v7596_v27 = vmul.bf16 %v15003_v29, %v13840_v22 }
 0x5ae   :  { %v15004_v15 = vld [vmem:[#allocation35_spill] sm:$0xff] }
 0x5af   :  { %v6506_v52 = vpop.f32.mrf.mxu1  ;;  %v7763_v23 = vmul.bf16 %v15004_v15, %v13868_v63 }
 0x5b0   :  { %v14271_v26 = vadd.f32 %v6639_v19, %v6506_v52 }
 0x5b1   :  { %v9507_v59 = vpop.f32.mrf.mxu1  ;;  %9689 = vmatmul.mubr.msk.bf16.gmra.mxu0 %vm799_vm0, %v7220_v45 }
 0x5b2   :  { %9692 = vmatprep.mubr.msk.bf16.mxu0 %vm10438_vm1, %v14924_v6 }
 0x5b4   :  { %9729 = vmatmul.mubr.msk.bf16.gmra.mxu1 %vm799_vm0, %v7405_v39  ;;  %v15005_v39 = vld [vmem:[#allocation53_spill] sm:$0xff] }
 0x5b5   :  { %9732 = vmatprep.mubr.msk.bf16.mxu1 %vm10438_vm1, %v14924_v6 }
 0x5b7   :  { %v6644_v50 = vpop.f32.mrf.mxu0 }
 0x5b9   :  { %v9546_v17 = vpop.f32.mrf.mxu0  ;;  %9693 = vmatmul.mubr.msk.bf16.gmra.mxu0 %vm799_vm0, %v7221_v46  ;;  %v15006_v46 = vld [vmem:[#allocation40_spill] sm:$0xff] }
 0x5ba   :  { %9696 = vmatprep.mubr.msk.bf16.mxu0 %vm10438_vm1, %v14924_v6  ;;  %v7764_v17 = vmul.bf16 %v15006_v46, %v13914_v3  ;;  %v15007_v3 = vld [vmem:[#allocation31_spill] sm:$0xff] }
 0x5bb   :  { %v6511_v5 = vpop.f32.mrf.mxu1  ;;  %v6647_v60 = vpop.f32.mrf.mxu0  ;;  %v7598_v4 = vmul.bf16 %v15007_v3, %v13939_v57  ;;  %v15014_v3 = vld [vmem:[#allocation56_spill] sm:$0xff] }
 0x5bc   :  { %v14285_v34 = vadd.f32 %v6644_v50, %v6511_v5  ;;  %9733 = vmatmul.mubr.msk.bf16.gmra.mxu1 %vm799_vm0, %v14998_v61  ;;  %v7597_v50 = vmul.bf16 %v15005_v39, %v13901_v8 }
 0x5bd   :  { %v9510_v62 = vpop.f32.mrf.mxu1  ;;  %v9547_v7 = vpop.f32.mrf.mxu0  ;;  %9780 = vmatprep.mubr.msk.bf16.mxu1 %vm10438_vm1, %v14924_v6 }
 0x5bf   :  { %v6514_v13 = vpop.f32.mrf.mxu1 }
 0x5c0   :  { %v14296_v21 = vadd.f32 %v6647_v60, %v6514_v13 }
 0x5c1   :  { %v9511_v48 = vpop.f32.mrf.mxu1  ;;  %9697 = vmatmul.mubr.msk.bf16.gmra.mxu0 %vm799_vm0, %v7222_v16  ;;  %v7756_v16 = vrot.slane %v14146_v47, 4 }
 0x5c2   :  { %9744 = vmatprep.mubr.msk.bf16.mxu0 %vm10438_vm1, %v14924_v6 }
 0x5c3   :  { %v7757_v47 = vsel %vm2742_vm3, %v13950_v12, %v7756_v16  ;;  %v15010_v12 = vld [vmem:[#allocation55_spill] sm:$0xff] }
 0x5c4   :  { %9781 = vmatmul.mubr.msk.bf16.vlgmr.msra.gmra.mxu1 %vm799_vm0, %v7761_v54  ;;  %v15008_v54 = vld [vmem:[#allocation43_spill] sm:$0xff] }
 0x5c5   :  { %9784 = vmatprep.mubr.msk.bf16.mxu1 %vm10438_vm1, %v14924_v6 }
 0x5c7   :  { %v6652_v32 = vpop.f32.mrf.mxu0 }
 0x5c9   :  { %v9550_v0 = vpop.f32.mrf.mxu0  ;;  %9745 = vmatmul.mubr.msk.bf16.vlgmr.msra.gmra.mxu0 %vm799_vm0, %v7595_v30 }
 0x5ca   :  { %9748 = vmatprep.mubr.msk.bf16.mxu0 %vm10438_vm1, %v14924_v6 }
 0x5cb   :  { %v6519_v40 = vpop.f32.mrf.mxu1  ;;  %v6655_v49 = vpop.f32.mrf.mxu0 }
 0x5cc   :  { %v14313_v31 = vadd.f32 %v6652_v32, %v6519_v40  ;;  %9785 = vmatmul.mubr.msk.bf16.gmra.mxu1 %vm799_vm0, %v7762_v25  ;;  %v7765_v32 = vmul.bf16 %v15008_v54, %v13954_v37 }
 0x5cd   :  { %v9514_v20 = vpop.f32.mrf.mxu1  ;;  %v9551_v43 = vpop.f32.mrf.mxu0  ;;  %9788 = vmatprep.mubr.msk.bf16.mxu1 %vm10438_vm1, %v14924_v6 }
 0x5ce   :  { %v7759_v43 = vsel %vm4991_vm9, %v7757_v47, 0 }
 0x5cf   :  { %v6522_v10 = vpop.f32.mrf.mxu1  ;;  %v6660_v33 = vpop.f32.mrf.mxu0  ;;  %v7766_v29 = vmul.bf16 %v15010_v12, %v7759_v43 }
 0x5d0   :  { %v14320_v56 = vadd.f32 %v6655_v49, %v6522_v10  ;;  %v15009_v49 = vld [vmem:[#allocation39_spill] sm:$0xff] }
 0x5d1   :  { %v9515_v19 = vpop.f32.mrf.mxu1  ;;  %v9554_v2 = vpop.f32.mrf.mxu0  ;;  %9749 = vmatmul.mubr.msk.bf16.gmra.mxu0 %vm799_vm0, %v7596_v27  ;;  %v7599_v20 = vmul.bf16 %v15009_v49, %v13983_v36 }
 0x5d2   :  { %9752 = vmatprep.mubr.msk.bf16.mxu0 %vm10438_vm1, %v14924_v6 }
 0x5d3   :  { %v6527_v52 = vpop.f32.mrf.mxu1  ;;  %v6663_v28 = vpop.f32.mrf.mxu0 }
 0x5d4   :  { %v14327_v45 = vadd.f32 %v6660_v33, %v6527_v52  ;;  %9789 = vmatmul.mubr.msk.bf16.gmra.mxu1 %vm799_vm0, %v7763_v23 }
 0x5d5   :  { %v9518_v24 = vpop.f32.mrf.mxu1  ;;  %v9555_v22 = vpop.f32.mrf.mxu0  ;;  %9792 = vmatprep.mubr.msk.bf16.mxu1 %vm10438_vm1, %v14924_v6 }
 0x5d7   :  { %v6530_v59 = vpop.f32.mrf.mxu1  ;;  %v6972_v18 = vpop.f32.mrf.mxu0 }
 0x5d8   :  { %v15012_v59 = vld [vmem:[#allocation54_spill] sm:$0xff] }
 0x5d9   :  { %v9519_v63 = vpop.f32.mrf.mxu1  ;;  %v9602_v41 = vpop.f32.mrf.mxu0  ;;  %9753 = vmatmul.mubr.msk.bf16.gmra.mxu0 %vm799_vm0, %v7597_v50 }
 0x5da   :  { %9756 = vmatprep.mubr.msk.bf16.mxu0 %vm10438_vm1, %v14924_v6 }
 0x5db   :  { %v6781_v5 = vpop.f32.mrf.mxu1  ;;  %v6975_v60 = vpop.f32.mrf.mxu0 }
 0x5dc   :  { %v6835_v61 = vadd.f32 %v6781_v5, %v14150_v1  ;;  %9793 = vmatmul.mubr.msk.bf16.gmra.mxu1 %vm799_vm0, %v7764_v17  ;;  %v15013_v17 = vld [vmem:[#allocation57_spill] sm:$0xff] }
 0x5dd   :  { %v9566_v55 = vpop.f32.mrf.mxu1  ;;  %v9603_v62 = vpop.f32.mrf.mxu0  ;;  %9796 = vmatprep.mubr.msk.bf16.mxu1 %vm10438_vm1, %v14924_v6 }
 0x5de   :  { %v14343_v8 = vadd.f32 %v6972_v18, %v6835_v61 }
 0x5df   :  { %v6784_v7 = vpop.f32.mrf.mxu1  ;;  %v6980_v13 = vpop.f32.mrf.mxu0 }
 0x5e0   :  { %v6836_v48 = vadd.f32 %v6784_v7, %v14165_v51 }
 0x5e1   :  { %v9567_v53 = vpop.f32.mrf.mxu1  ;;  %v9606_v1 = vpop.f32.mrf.mxu0  ;;  %9757 = vmatmul.mubr.msk.bf16.gmra.mxu0 %vm799_vm0, %v7598_v4 }
 0x5e2   :  { %9760 = vmatprep.mubr.msk.bf16.mxu0 %vm10438_vm1, %v14924_v6  ;;  %v14354_v58 = vadd.f32 %v6975_v60, %v6836_v48 }
 0x5e3   :  { %v6789_v30 = vpop.f32.mrf.mxu1  ;;  %v6983_v0 = vpop.f32.mrf.mxu0 }
 0x5e4   :  { %v6837_v57 = vadd.f32 %v6789_v30, %v14179_v35  ;;  %9797 = vmatmul.mubr.msk.bf16.gmra.mxu1 %vm799_vm0, %v7765_v32 }
 0x5e5   :  { %v9570_v51 = vpop.f32.mrf.mxu1  ;;  %v9607_v9 = vpop.f32.mrf.mxu0  ;;  %9800 = vmatprep.mubr.msk.bf16.mxu1 %vm10438_vm1, %v14924_v6 }
 0x5e6   :  { %v14362_v37 = vadd.f32 %v6980_v13, %v6837_v57 }
 0x5e7   :  { %v6792_v25 = vpop.f32.mrf.mxu1  ;;  %v6988_v40 = vpop.f32.mrf.mxu0 }
 0x5e8   :  { %v6838_v35 = vadd.f32 %v6792_v25, %v14198_v14  ;;  %v7594_v14 = vsel %vm13468_vm14, %v14189_v42, 0 }
 0x5e9   :  { %v9571_v10 = vpop.f32.mrf.mxu1  ;;  %v9610_v33 = vpop.f32.mrf.mxu0  ;;  %9761 = vmatmul.mubr.msk.bf16.gmra.mxu0 %vm799_vm0, %v7599_v20  ;;  %v7600_v18 = vmul.bf16 %v15012_v59, %v7594_v14 }
 0x5ea   :  { %9764 = vmatprep.mubr.msk.bf16.mxu0 %vm10438_vm1, %v14924_v6  ;;  %v14372_v27 = vadd.f32 %v6983_v0, %v6838_v35 }
 0x5eb   :  { %v6797_v19 = vpop.f32.mrf.mxu1  ;;  %v6991_v2 = vpop.f32.mrf.mxu0 }
 0x5ec   :  { %v6839_v15 = vadd.f32 %v6797_v19, %v14213_v38  ;;  %9801 = vmatmul.mubr.msk.bf16.gmra.mxu1 %vm799_vm0, %v7766_v29 }
 0x5ed   :  { %v9574_v23 = vpop.f32.mrf.mxu1  ;;  %v9611_v52 = vpop.f32.mrf.mxu0  ;;  %9804 = vmatprep.mubr.msk.bf16.mxu1 %vm10438_vm1, %v14924_v6 }
 0x5ee   :  { %v14381_v28 = vadd.f32 %v6988_v40, %v6839_v15 }
 0x5ef   :  { %v6800_v24 = vpop.f32.mrf.mxu1  ;;  %v6996_v22 = vpop.f32.mrf.mxu0 }
 0x5f0   :  { %v6840_v39 = vadd.f32 %v6800_v24, %v14229_v44 }
 0x5f1   :  { %v9575_v38 = vpop.f32.mrf.mxu1  ;;  %v9614_v50 = vpop.f32.mrf.mxu0  ;;  %9765 = vmatmul.mubr.msk.bf16.gmra.mxu0 %vm799_vm0, %v7600_v18 }
 0x5f2   :  { %9768 = vmatprep.mubr.msk.bf16.mxu0 %vm10438_vm1, %v14924_v6  ;;  %v7031_v42 = vadd.f32 %v6991_v2, %v6840_v39 }
 0x5f3   :  { %v6805_v63 = vpop.f32.mrf.mxu1  ;;  %v6999_v41 = vpop.f32.mrf.mxu0 }
 0x5f4   :  { %v6841_v46 = vadd.f32 %v6805_v63, %v14262_v11  ;;  %9805 = vmatmul.mubr.msk.bf16.gmra.mxu1 %vm799_vm0, %v15013_v17 }
 0x5f5   :  { %v9578_v5 = vpop.f32.mrf.mxu1  ;;  %v9615_v60 = vpop.f32.mrf.mxu0 }
 0x5f6   :  { %v7032_v61 = vadd.f32 %v6996_v22, %v6841_v46 }
 0x5f7   :  { %v6808_v55 = vpop.f32.mrf.mxu1  ;;  %v7004_v44 = vpop.f32.mrf.mxu0 }
 0x5f8   :  { %v6842_v62 = vadd.f32 %v6808_v55, %v14271_v26 }
 0x5f9   :  { %v9579_v7 = vpop.f32.mrf.mxu1  ;;  %v9618_v13 = vpop.f32.mrf.mxu0  ;;  %9769 = vmatmul.mubr.msk.bf16.gmra.mxu0 %vm799_vm0, %v15014_v3 }
 0x5fa   :  { %v7033_v6 = vadd.f32 %v6999_v41, %v6842_v62 }
 0x5fb   :  { %v6813_v4 = vpop.f32.mrf.mxu1  ;;  %v7007_v16 = vpop.f32.mrf.mxu0 }
 0x5fc   :  { %v6843_v11 = vadd.f32 %v6813_v4, %v14285_v34 }
 0x5fd   :  { %v9582_v48 = vpop.f32.mrf.mxu1  ;;  %v9619_v53 = vpop.f32.mrf.mxu0 }
 0x5fe   :  { %v7034_v1 = vadd.f32 %v7004_v44, %v6843_v11 }
 0x5ff   :  { %v6816_v54 = vpop.f32.mrf.mxu1  ;;  %v7012_v32 = vpop.f32.mrf.mxu0 }
 0x600   :  { %v6844_v30 = vadd.f32 %v6816_v54, %v14296_v21 }
 0x601   :  { %v9583_v0 = vpop.f32.mrf.mxu1  ;;  %v9622_v57 = vpop.f32.mrf.mxu0 }
 0x602   :  { %v7035_v26 = vadd.f32 %v7007_v16, %v6844_v30 }
 0x603   :  { %v6821_v47 = vpop.f32.mrf.mxu1  ;;  %v7015_v51 = vpop.f32.mrf.mxu0 }
 0x604   :  { %v6845_v9 = vadd.f32 %v6821_v47, %v14313_v31 }
 0x605   :  { %v9586_v25 = vpop.f32.mrf.mxu1  ;;  %v9623_v40 = vpop.f32.mrf.mxu0 }
 0x606   :  { %v7036_v49 = vadd.f32 %v7012_v32, %v6845_v9 }
 0x607   :  { %v6824_v20 = vpop.f32.mrf.mxu1 }
 0x608   :  { %v6846_v34 = vadd.f32 %v6824_v20, %v14320_v56 }
 0x609   :  { %v9587_v43 = vpop.f32.mrf.mxu1 }
 0x60a   :  { %v7037_v35 = vadd.f32 %v7015_v51, %v6846_v34 }
 0x60b   :  { %v6829_v10 = vpop.f32.mrf.mxu1 }
 0x60c   :  { %v6847_v33 = vadd.f32 %v6829_v10, %v14327_v45 }
 0x60d   :  { %v9590_v12 = vpop.f32.mrf.mxu1 }
 0x60f   :  { %v6832_v21 = vpop.f32.mrf.mxu1 }
 0x611   :  { %v9591_v29 = vpop.f32.mrf.mxu1 }
 0x613   :  { %v7120_v19 = vpop.f32.mrf.mxu1 }
 0x614   :  { %v14400_v2 = vadd.f32 %v7120_v19, %v14343_v8 }
 0x615   :  { %v9638_v15 = vpop.f32.mrf.mxu1 }
 0x617   :  { %v7123_v31 = vpop.f32.mrf.mxu1 }
 0x618   :  { %v14403_v36 = vadd.f32 %v7123_v31, %v14354_v58 }
 0x619   :  { %v9639_v14 = vpop.f32.mrf.mxu1 }
 0x61b   :  { %v7128_v23 = vpop.f32.mrf.mxu1 }
 0x61c   :  { %v14406_v56 = vadd.f32 %v7128_v23, %v14362_v37 }
 0x61d   :  { %v9642_v52 = vpop.f32.mrf.mxu1 }
 0x61f   :  { %v7131_v24 = vpop.f32.mrf.mxu1 }
 0x620   :  { %v14409_v45 = vadd.f32 %v7131_v24, %v14372_v27 }
 0x621   :  { %v9643_v22 = vpop.f32.mrf.mxu1 }
 0x623   :  { %v7136_v59 = vpop.f32.mrf.mxu1 }
 0x624   :  { %v14412_v8 = vadd.f32 %v7136_v59, %v14381_v28 }
 0x625   :  { %v9646_v18 = vpop.f32.mrf.mxu1 }
 0x627   :  { %v7139_v39 = vpop.f32.mrf.mxu1 }
 0x628   :  { %v14414_v38 = vadd.f32 %v7139_v39, %v7031_v42 }
 0x629   :  { %v9647_v58 = vpop.f32.mrf.mxu1 }
 0x62b   :  { %v7144_v50 = vpop.f32.mrf.mxu1 }
 0x62c   :  { %v14416_v63 = vadd.f32 %v7144_v50, %v7032_v61 }
 0x62d   :  { %v9650_v37 = vpop.f32.mrf.mxu1 }
 0x62f   :  { %v7147_v41 = vpop.f32.mrf.mxu1 }
 0x630   :  { %v14418_v46 = vadd.f32 %v7147_v41, %v7033_v6 }
 0x631   :  { %v9651_v17 = vpop.f32.mrf.mxu1 }
 0x633   :  { %v7152_v27 = vpop.f32.mrf.mxu1 }
 0x634   :  { %v14420_v5 = vadd.f32 %v7152_v27, %v7034_v1 }
 0x635   :  { %v9654_v60 = vpop.f32.mrf.mxu1 }
 0x637   :  { %v7155_v55 = vpop.f32.mrf.mxu1 }
 0x638   :  { %v14422_v28 = vadd.f32 %v7155_v55, %v7035_v26 }
 0x639   :  { %v9655_v44 = vpop.f32.mrf.mxu1 }
 0x63b   :  { %v7160_v62 = vpop.f32.mrf.mxu1 }
 0x63c   :  { %v14424_v42 = vadd.f32 %v7160_v62, %v7036_v49 }
 0x63d   :  { %v9658_v7 = vpop.f32.mrf.mxu1 }
 0x63f   :  { %v7163_v13 = vpop.f32.mrf.mxu1 }
 0x640   :  { %v14426_v61 = vadd.f32 %v7163_v13, %v7037_v35 }
 0x641   :  { %v9659_v3 = vpop.f32.mrf.mxu1 }
 0x644   :  { %v7168_v4 = vpop.f32.mrf.mxu1 }
 0x646   :  { %v9662_v6 = vpop.f32.mrf.mxu1 }
 0x648   :  { %v7171_v16 = vpop.f32.mrf.mxu1 }
 0x649   :  { %v7020_v11 = vpop.f32.mrf.mxu0 }
 0x64a   :  { %v7038_v48 = vadd.f32 %v7020_v11, %v6847_v33  ;;  %v9663_v53 = vpop.f32.mrf.mxu1 }
 0x64b   :  { %v9626_v1 = vpop.f32.mrf.mxu0 }
 0x64c   :  { %v14428_v54 = vpop.f32.mrf.mxu1  ;;  %v14430_v32 = vadd.f32 %v7168_v4, %v7038_v48 }
 0x64d   :  { %v7023_v30 = vpop.f32.mrf.mxu0 }
 0x64e   :  { %v9710_v0 = vpop.f32.mrf.mxu1 }
 0x64f   :  { %v9627_v57 = vpop.f32.mrf.mxu0 }
 0x650   :  { %v14432_v26 = vpop.f32.mrf.mxu1 }
 0x651   :  { %v7311_v47 = vpop.f32.mrf.mxu0 }
 0x652   :  { %v9711_v51 = vpop.f32.mrf.mxu1 }
 0x653   :  { %v9674_v9 = vpop.f32.mrf.mxu0 }
 0x654   :  { %v14434_v25 = vpop.f32.mrf.mxu1 }
 0x655   :  { %v7314_v40 = vpop.f32.mrf.mxu0 }
 0x656   :  { %v9714_v49 = vpop.f32.mrf.mxu1 }
 0x657   :  { %v9675_v20 = vpop.f32.mrf.mxu0  ;;  %v7365_v49 = vadd.f32 %v7311_v47, %v14400_v2 }
 0x658   :  { %v14436_v34 = vpop.f32.mrf.mxu1 }
 0x659   :  { %v7319_v43 = vpop.f32.mrf.mxu0 }
 0x65a   :  { %v9715_v35 = vpop.f32.mrf.mxu1  ;;  %v7367_v2 = vadd.f32 %v7319_v43, %v14406_v56 }
 0x65b   :  { %v9678_v10 = vpop.f32.mrf.mxu0 }
 0x65c   :  { %v14438_v33 = vpop.f32.mrf.mxu1 }
 0x65d   :  { %v7322_v12 = vpop.f32.mrf.mxu0 }
 0x65e   :  { %v9718_v21 = vpop.f32.mrf.mxu1 }
 0x65f   :  { %v9679_v29 = vpop.f32.mrf.mxu0 }
 0x660   :  { %v14440_v19 = vpop.f32.mrf.mxu1  ;;  %v7366_v29 = vadd.f32 %v7314_v40, %v14403_v36 }
 0x661   :  { %v14442_v15 = vpop.f32.mrf.mxu0 }
 0x662   :  { %v9719_v31 = vpop.f32.mrf.mxu1 }
 0x663   :  { %v9682_v14 = vpop.f32.mrf.mxu0 }
 0x664   :  { %v14444_v23 = vpop.f32.mrf.mxu1  ;;  %v7548_v14 = vadd.f32 %v14428_v54, %v7365_v49 }
 0x665   :  { %v14446_v52 = vpop.f32.mrf.mxu0 }
 0x666   :  { %v9722_v24 = vpop.f32.mrf.mxu1 }
 0x667   :  { %v9683_v22 = vpop.f32.mrf.mxu0 }
 0x668   :  { %v14448_v59 = vpop.f32.mrf.mxu1 }
 0x669   :  { %v14450_v18 = vpop.f32.mrf.mxu0 }
 0x66a   :  { %v9723_v39 = vpop.f32.mrf.mxu1 }
 0x66b   :  { %v9686_v58 = vpop.f32.mrf.mxu0 }
 0x66c   :  { %v14452_v50 = vpop.f32.mrf.mxu1  ;;  %v14480_v58 = vld [vmem:[%s14710_s13] ss:$0 sm:$0xff] }
 0x66d   :  { %v14454_v37 = vpop.f32.mrf.mxu0 }
 0x66e   :  { %v9726_v41 = vpop.f32.mrf.mxu1 }
 0x66f   :  { %v9687_v17 = vpop.f32.mrf.mxu0 }
 0x670   :  { %v14456_v27 = vpop.f32.mrf.mxu1 }
 0x671   :  { %v14458_v60 = vpop.f32.mrf.mxu0 }
 0x672   :  { %v9727_v55 = vpop.f32.mrf.mxu1 }
 0x673   :  { %v9690_v44 = vpop.f32.mrf.mxu0  ;;  %v7549_v55 = vadd.f32 %v14432_v26, %v7366_v29 }
 0x674   :  { %v14460_v62 = vpop.f32.mrf.mxu1 }
 0x675   :  { %v14462_v7 = vpop.f32.mrf.mxu0 }
 0x676   :  { %v9730_v13 = vpop.f32.mrf.mxu1 }
 0x677   :  { %v9691_v3 = vpop.f32.mrf.mxu0 }
 0x678   :  { %v14464_v4 = vpop.f32.mrf.mxu1  ;;  %v7368_v3 = vadd.f32 %v7322_v12, %v14409_v45 }
 0x679   :  { %v14466_v6 = vpop.f32.mrf.mxu0 }
 0x67a   :  { %v9731_v16 = vpop.f32.mrf.mxu1  ;;  %v7551_v45 = vadd.f32 %v14436_v34, %v7368_v3 }
 0x67b   :  { %v9694_v11 = vpop.f32.mrf.mxu0 }
 0x67c   :  { %v14468_v48 = vpop.f32.mrf.mxu1 }
 0x67d   :  { %v14470_v53 = vpop.f32.mrf.mxu0 }
 0x67e   :  { %v9734_v1 = vpop.f32.mrf.mxu1 }
 0x67f   :  { %v9695_v30 = vpop.f32.mrf.mxu0 }
 0x680   :  { %v7545_v0 = vpop.f32.mrf.mxu1  ;;  %v7550_v30 = vadd.f32 %v14434_v25, %v7367_v2 }
 0x681   :  { %v14472_v57 = vpop.f32.mrf.mxu0 }
 0x682   :  { %v9735_v51 = vpop.f32.mrf.mxu1 }
 0x683   :  { %v9698_v9 = vpop.f32.mrf.mxu0 }
 0x684   :  { %v7855_v20 = vpop.f32.mrf.mxu1  ;;  %v7369_v9 = vadd.f32 %v14442_v15, %v14412_v8 }
 0x685   :  { %v7362_v35 = vpop.f32.mrf.mxu0 }
 0x686   :  { %v9782_v10 = vpop.f32.mrf.mxu1  ;;  %v7552_v8 = vadd.f32 %v14438_v33, %v7369_v9 }
 0x687   :  { %v9699_v21 = vpop.f32.mrf.mxu0 }
 0x688   :  { %v7858_v31 = vpop.f32.mrf.mxu1 }
 0x689   :  { %v7689_v24 = vpop.f32.mrf.mxu0 }
 0x68a   :  { %v7743_v22 = vadd.f32 %v7689_v24, %v7548_v14  ;;  %v9783_v39 = vpop.f32.mrf.mxu1 }
 0x68b   :  { %v9746_v41 = vpop.f32.mrf.mxu0 }
 0x68c   :  { %v7909_v47 = vadd.f32 %v7855_v20, %v7743_v22  ;;  %v7863_v17 = vpop.f32.mrf.mxu1 }
 0x68d   :  { %v7692_v44 = vpop.f32.mrf.mxu0 }
 0x68e   :  { %v7929_v36 = vadd.f32 %v14480_v58, %v7909_v47  ;;  %v7744_v40 = vadd.f32 %v7692_v44, %v7549_v55  ;;  %v9786_v54 = vpop.f32.mrf.mxu1  ;;  %v7371_v47 = vadd.f32 %v14450_v18, %v14416_v63 }
 0x68f   :  { %v9747_v13 = vpop.f32.mrf.mxu0 }
 0x690   :  { %v7942_v16 = vmax.f32 %v7929_v36, 0.0  ;;  %v7910_v11 = vadd.f32 %v7858_v31, %v7744_v40  ;;  %v7866_v1 = vpop.f32.mrf.mxu1  ;;  %v7370_v31 = vadd.f32 %v14446_v52, %v14414_v38  ;;  %v7372_v13 = vadd.f32 %v14454_v37, %v14418_v46 }
 0x691   :  { %v7697_v0 = vpop.f32.mrf.mxu0  ;;  %v7554_v63 = vadd.f32 %v14444_v23, %v7371_v47 }
 0x692   :  { %v7930_v56 = vadd.f32 %v14480_v58, %v7910_v11  ;;  %v7745_v43 = vadd.f32 %v7697_v0, %v7550_v30  ;;  %7968 = vrot.lane.b32.xlu0 %v7942_v16, %s10436_s29  ;;  %v9787_v26 = vpop.f32.mrf.mxu1  ;;  %v7553_v38 = vadd.f32 %v14440_v19, %v7370_v31  ;;  %v7555_v46 = vadd.f32 %v14448_v59, %v7372_v13 }
 0x693   :  { %v9750_v51 = vpop.f32.mrf.mxu0  ;;  %v7375_v31 = vadd.f32 %v14466_v6, %v14424_v42 }
 0x694   :  { %v7943_v49 = vmax.f32 %v7930_v56, 0.0  ;;  %v7911_v20 = vadd.f32 %v7863_v17, %v7745_v43  ;;  %v7871_v35 = vpop.f32.mrf.mxu1  ;;  %v7373_v56 = vadd.f32 %v14458_v60, %v14420_v5 }
 0x695   :  { %v7700_v12 = vpop.f32.mrf.mxu0  ;;  %v7558_v42 = vadd.f32 %v14460_v62, %v7375_v31 }
 0x696   :  { %v7931_v10 = vadd.f32 %v14480_v58, %v7911_v20  ;;  %v7746_v25 = vadd.f32 %v7700_v12, %v7551_v45  ;;  %7970 = vrot.lane.b32.xlu1 %v7943_v49, %s10436_s29  ;;  %v9790_v21 = vpop.f32.mrf.mxu1  ;;  %v7556_v5 = vadd.f32 %v14452_v50, %v7373_v56 }
 0x697   :  { %v9751_v29 = vpop.f32.mrf.mxu0 }
 0x698   :  { %v7944_v14 = vmax.f32 %v7931_v10, 0.0  ;;  %v7912_v24 = vadd.f32 %v7866_v1, %v7746_v25  ;;  %v7874_v22 = vpop.f32.mrf.mxu1 }
 0x699   :  { %v7705_v15 = vpop.f32.mrf.mxu0 }
 0x69a   :  { %v7932_v39 = vadd.f32 %v14480_v58, %v7912_v24  ;;  %v7747_v34 = vadd.f32 %v7705_v15, %v7552_v8  ;;  %7972 = vrot.lane.b32.xlu0 %v7944_v14, %s10436_s29  ;;  %v9791_v41 = vpop.f32.mrf.mxu1 }
 0x69b   :  { %v9754_v2 = vpop.f32.mrf.mxu0 }
 0x69c   :  { %v7945_v17 = vmax.f32 %v7932_v39, 0.0  ;;  %v7913_v55 = vadd.f32 %v7871_v35, %v7747_v34  ;;  %v7879_v44 = vpop.f32.mrf.mxu1  ;;  %v7374_v35 = vadd.f32 %v14462_v7, %v14422_v28  ;;  %v7376_v34 = vadd.f32 %v14470_v53, %v14426_v61 }
 0x69d   :  { %v7708_v52 = vpop.f32.mrf.mxu0 }
 0x69e   :  { %v7933_v36 = vadd.f32 %v14480_v58, %v7913_v55  ;;  %v7748_v33 = vadd.f32 %v7708_v52, %v7553_v38  ;;  %7974 = vrot.lane.b32.xlu1 %v7945_v17, %s10436_s29  ;;  %v9794_v40 = vpop.f32.mrf.mxu1  ;;  %v7557_v28 = vadd.f32 %v14456_v27, %v7374_v35  ;;  %v7377_v38 = vadd.f32 %v14472_v57, %v14430_v32  ;;  %v15024_v35 = vld [vmem:[#allocation15_spill] sm:$0xff] }
 0x69f   :  { %v9755_v54 = vpop.f32.mrf.mxu0  ;;  %v7559_v61 = vadd.f32 %v14464_v4, %v7376_v34  ;;  %v15031_v34 = vld [vmem:[#allocation22_spill] sm:$0xff] }
 0x6a0   :  { %v7946_v3 = vmax.f32 %v7933_v36, 0.0  ;;  %v7914_v16 = vadd.f32 %v7874_v22, %v7748_v33  ;;  %v7882_v11 = vpop.f32.mrf.mxu1 }
 0x6a1   :  { %v7713_v18 = vpop.f32.mrf.mxu0 }
 0x6a2   :  { %v7934_v1 = vadd.f32 %v14480_v58, %v7914_v16  ;;  %v7749_v19 = vadd.f32 %v7713_v18, %v7554_v63  ;;  %7976 = vrot.lane.b32.xlu0 %v7946_v3, %s10436_s29  ;;  %v9795_v30 = vpop.f32.mrf.mxu1  ;;  %v7560_v63 = vadd.f32 %v14468_v48, %v7377_v38  ;;  %v15016_v48 = vld [vmem:[#allocation16_spill] sm:$0xff] }
 0x6a3   :  { %v9758_v0 = vpop.f32.mrf.mxu0 }
 0x6a4   :  { %v7947_v43 = vmax.f32 %v7934_v1, 0.0  ;;  %v7915_v26 = vadd.f32 %v7879_v44, %v7749_v19  ;;  %v7887_v51 = vpop.f32.mrf.mxu1 }
 0x6a5   :  { %v7716_v37 = vpop.f32.mrf.mxu0 }
 0x6a6   :  { %v7935_v9 = vadd.f32 %v14480_v58, %v7915_v26  ;;  %v7750_v23 = vadd.f32 %v7716_v37, %v7555_v46  ;;  %7978 = vrot.lane.b32.xlu1 %v7947_v43, %s10436_s29  ;;  %v9798_v49 = vpop.f32.mrf.mxu1  ;;  %v15017_v46 = vld [vmem:[#allocation11_spill] sm:$0xff] }
 0x6a7   :  { %v9759_v20 = vpop.f32.mrf.mxu0  ;;  %v15018_v37 = vld [vmem:[#allocation7_spill] sm:$0xff]  ;;  %v15022_v49 = vld [vmem:[#allocation25_spill] sm:$0xff]  ;;  %10409 = vtanh.f32 %v15017_v46 }
 0x6a8   :  { %v7948_v45 = vmax.f32 %v7935_v9, 0.0  ;;  %v7916_v12 = vadd.f32 %v7882_v11, %v7750_v23  ;;  %v7890_v10 = vpop.f32.mrf.mxu1  ;;  %v15020_v9 = vld [vmem:[#allocation4_spill] sm:$0xff]  ;;  %v15021_v23 = vld [vmem:[#allocation21_spill] sm:$0xff] }
 0x6a9   :  { %v7721_v60 = vpop.f32.mrf.mxu0  ;;  %v15023_v20 = vld [vmem:[#allocation8_spill] sm:$0xff] }
 0x6aa   :  { %v7936_v25 = vadd.f32 %v14480_v58, %v7916_v12  ;;  %v7751_v59 = vadd.f32 %v7721_v60, %v7556_v5  ;;  %7980 = vrot.lane.b32.xlu0 %v7948_v45, %s10436_s29  ;;  %v9799_v21 = vpop.f32.mrf.mxu1  ;;  %v15025_v45 = vld [vmem:[#allocation18_spill] sm:$0xff]  ;;  %v15026_v5 = vld [vmem:[#allocation13_spill] sm:$0xff] }
 0x6ab   :  { %v9762_v29 = vpop.f32.mrf.mxu0 }
 0x6ac   :  { %v7949_v14 = vmax.f32 %v7936_v25, 0.0  ;;  %v7917_v24 = vadd.f32 %v7887_v51, %v7751_v59  ;;  %v7895_v22 = vpop.f32.mrf.mxu1  ;;  %v15015_v51 = vld [vmem:[#allocation14_spill] sm:$0xff]  ;;  %v15027_v25 = vld [vmem:[#allocation23_spill] sm:$0xff] }
 0x6ad   :  { %v7724_v7 = vpop.f32.mrf.mxu0  ;;  %10411 = vtanh.f32 %v15015_v51 }
 0x6ae   :  { %v7937_v8 = vadd.f32 %v14480_v58, %v7917_v24  ;;  %v7752_v50 = vadd.f32 %v7724_v7, %v7557_v28  ;;  %7982 = vrot.lane.b32.xlu1 %v7949_v14, %s10436_s29  ;;  %v9802_v15 = vpop.f32.mrf.mxu1  ;;  %v15028_v14 = vld [vmem:[#allocation10_spill] sm:$0xff] }
 0x6af   :  { %v9763_v39 = vpop.f32.mrf.mxu0  ;;  %v15030_v15 = vld [vmem:[#allocation17_spill] sm:$0xff] }
 0x6b0   :  { %v7950_v41 = vmax.f32 %v7937_v8, 0.0  ;;  %v7918_v2 = vadd.f32 %v7890_v10, %v7752_v50  ;;  %v7898_v47 = vpop.f32.mrf.mxu1 }
 0x6b1   :  { %v7729_v6 = vpop.f32.mrf.mxu0 }
 0x6b2   :  { %v7938_v17 = vadd.f32 %v14480_v58, %v7918_v2  ;;  %v7753_v27 = vadd.f32 %v7729_v6, %v7558_v42  ;;  %7984 = vrot.lane.b32.xlu0 %v7950_v41, %s10436_s29  ;;  %v9803_v55 = vpop.f32.mrf.mxu1  ;;  %v15032_v6 = vld [vmem:[#allocation19_spill] sm:$0xff] }
 0x6b3   :  { %v9766_v44 = vpop.f32.mrf.mxu0 }
 0x6b4   :  { %v7951_v52 = vmax.f32 %v7938_v17, 0.0  ;;  %v7919_v36 = vadd.f32 %v7895_v22, %v7753_v27  ;;  %v7903_v33 = vpop.f32.mrf.mxu1  ;;  %v15029_v22 = vld [vmem:[#allocation20_spill] sm:$0xff]  ;;  %v15033_v27 = vld [vmem:[#allocation27_spill] sm:$0xff] }
 0x6b5   :  { %v7732_v53 = vpop.f32.mrf.mxu0 }
 0x6b6   :  { %v7939_v40 = vadd.f32 %v14480_v58, %v7919_v36  ;;  %v7754_v62 = vadd.f32 %v7732_v53, %v7559_v61  ;;  %7986 = vrot.lane.b32.xlu1 %v7951_v52, %s10436_s29  ;;  %v9806_v54 = vpop.f32.mrf.mxu1  ;;  %v15034_v36 = vld [vmem:[#allocation30_spill] sm:$0xff]  ;;  %v15035_v61 = vld [vmem:[#allocation32_spill] sm:$0xff] }
 0x6b7   :  { %v9767_v13 = vpop.f32.mrf.mxu0 }
 0x6b8   :  { %v7952_v3 = vmax.f32 %v7939_v40, 0.0  ;;  %v7920_v16 = vadd.f32 %v7898_v47, %v7754_v62  ;;  %v7906_v11 = vpop.f32.mrf.mxu1  ;;  %v15036_v13 = vld [vmem:[#allocation33_spill] sm:$0xff] }
 0x6b9   :  { %v7737_v18 = vpop.f32.mrf.mxu0 }
 0x6ba   :  { %v7940_v32 = vadd.f32 %v14480_v58, %v7920_v16  ;;  %v7755_v57 = vadd.f32 %v7737_v18, %v7560_v63  ;;  %7988 = vrot.lane.b32.xlu0 %v7952_v3, %s10436_s29  ;;  %v9807_v4 = vpop.f32.mrf.mxu1  ;;  %v15037_v16 = vld [vmem:[#allocation36_spill] sm:$0xff] }
 0x6bb   :  { %v9770_v1 = vpop.f32.mrf.mxu0 }
 0x6bc   :  { %v7953_v19 = vmax.f32 %v7940_v32, 0.0  ;;  %v7921_v30 = vadd.f32 %v7903_v33, %v7755_v57  ;;  %v15038_v57 = vld [vmem:[#allocation48_spill] sm:$0xff] }
 0x6bd   :  { %v7740_v0 = vpop.f32.mrf.mxu0 }
 0x6be   :  { %v7941_v56 = vadd.f32 %v14480_v58, %v7921_v30  ;;  %7990 = vrot.lane.b32.xlu1 %v7953_v19, %s10436_s29  ;;  %v15019_v58 = vld [vmem:[#allocation3_spill] sm:$0xff]  ;;  %v15039_v30 = vld [vmem:[#allocation45_spill] sm:$0xff] }
 0x6bf   :  { %v9771_v43 = vpop.f32.mrf.mxu0  ;;  %v15040_v0 = vld [vmem:[#allocation9_spill] sm:$0xff]  ;;  %10413 = vtanh.f32 %v15019_v58 }
 0x6c0   :  { %v7954_v26 = vmax.f32 %v7941_v56, 0.0  ;;  %10415 = vtanh.f32 %v15016_v48 }
 0x6c1   :  { %10417 = vtanh.f32 %v15018_v37 }
 0x6c2   :  { %2678 = vrot.lane.b32.xlu1 %v15015_v51, %s10436_s29  ;;  %7992 = vrot.lane.b32.xlu0 %v7954_v26, %s10436_s29  ;;  %10419 = vtanh.f32 %v15021_v23 }
 0x6c3   :  { %10421 = vtanh.f32 %v15023_v20 }
 0x6c4   :  { %10423 = vtanh.f32 %v15020_v9 }
 0x6c5   :  { %10425 = vtanh.f32 %v15024_v35 }
 0x6c6   :  { %2682 = vrot.lane.b32.xlu1 %v15016_v48, %s10436_s29  ;;  %2676 = vrot.lane.b32.xlu0 %v15017_v46, %s10436_s29  ;;  %10427 = vtanh.f32 %v15022_v49 }
 0x6c7   :  { %10429 = vtanh.f32 %v15025_v45 }
 0x6c8   :  { %10431 = vtanh.f32 %v15040_v0 }
 0x6c9   :  { %10433 = vtanh.f32 %v15039_v30 }
 0x6ca   :  { %2686 = vrot.lane.b32.xlu1 %v15018_v37, %s10436_s29  ;;  %2680 = vrot.lane.b32.xlu0 %v15019_v58, %s10436_s29 }
 0x6ce   :  { %2690 = vrot.lane.b32.xlu1 %v15020_v9, %s10436_s29  ;;  %2684 = vrot.lane.b32.xlu0 %v15021_v23, %s10436_s29 }
 0x6d2   :  { %2694 = vrot.lane.b32.xlu1 %v15022_v49, %s10436_s29  ;;  %2688 = vrot.lane.b32.xlu0 %v15023_v20, %s10436_s29 }
 0x6d6   :  { %2692 = vrot.lane.b32.xlu0 %v15024_v35, %s10436_s29 }
 0x6da   :  { %2696 = vrot.lane.b32.xlu0 %v15025_v45, %s10436_s29 }
 0x704   :  { %v7969_v12 = vpop.permute.xlu0 %7968 }
 0x705   :  { %v8007_v60 = vadd.f32 %v15026_v5, %v7969_v12 }
 0x708   :  { %v7971_v10 = vpop.permute.xlu1 %7970 }
 0x709   :  { %v8008_v59 = vadd.f32 %v15027_v25, %v7971_v10 }
 0x70b   :  { %v9815_v21 = vpack.i.bf16 %v8008_v59, %v8007_v60 }
 0x70c   :  { %v7973_v29 = vpop.permute.xlu0 %7972 }
 0x70d   :  { %9816 = vrot.lane.b32.xlu1 %v9815_v21, %s10436_s29  ;;  %v8009_v24 = vadd.f32 %v15028_v14, %v7973_v29  ;;  %v10410_v29 = vpop.eup %10409 }
 0x710   :  { %v7975_v31 = vpop.permute.xlu1 %7974 }
 0x711   :  { %v8010_v28 = vadd.f32 %v15029_v22, %v7975_v31  ;;  %v10412_v31 = vpop.eup %10411 }
 0x712   :  { %v10414_v48 = vpop.eup %10413 }
 0x713   :  { %v9820_v7 = vpack.i.bf16 %v8010_v28, %v8009_v24  ;;  %v2650_v28 = vmul.f32 %v10410_v29, %v15026_v5 }
 0x714   :  { %v7977_v8 = vpop.permute.xlu0 %7976 }
 0x715   :  { %9821 = vrot.lane.b32.xlu0 %v9820_v7, %s10436_s29  ;;  %v8011_v39 = vadd.f32 %v15030_v15, %v7977_v8  ;;  %v2651_v7 = vmul.f32 %v10412_v31, %v15027_v25  ;;  %v2652_v25 = vmul.f32 %v10414_v48, %v15028_v14 }
 0x718   :  { %v7979_v50 = vpop.permute.xlu1 %7978 }
 0x719   :  { %v8012_v41 = vadd.f32 %v15031_v34, %v7979_v50 }
 0x71b   :  { %v9825_v2 = vpack.i.bf16 %v8012_v41, %v8011_v39  ;;  %v10416_v39 = vpop.eup %10415 }
 0x71c   :  { %v7981_v47 = vpop.permute.xlu0 %7980  ;;  %v2653_v41 = vmul.f32 %v10416_v39, %v15029_v22 }
 0x71d   :  { %9826 = vrot.lane.b32.xlu1 %v9825_v2, %s10436_s29  ;;  %v8013_v17 = vadd.f32 %v15032_v6, %v7981_v47 }
 0x720   :  { %v7983_v42 = vpop.permute.xlu1 %7982 }
 0x721   :  { %v8014_v55 = vadd.f32 %v15033_v27, %v7983_v42 }
 0x723   :  { %v9830_v44 = vpack.i.bf16 %v8014_v55, %v8013_v17  ;;  %v10418_v17 = vpop.eup %10417 }
 0x724   :  { %v7985_v38 = vpop.permute.xlu0 %7984  ;;  %v10420_v55 = vpop.eup %10419 }
 0x725   :  { %9831 = vrot.lane.b32.xlu0 %v9830_v44, %s10436_s29  ;;  %v8015_v33 = vadd.f32 %v15034_v36, %v7985_v38  ;;  %v2654_v22 = vmul.f32 %v10420_v55, %v15030_v15  ;;  %v2655_v44 = vmul.f32 %v10418_v17, %v15031_v34 }
 0x728   :  { %v7987_v52 = vpop.permute.xlu1 %7986 }
 0x729   :  { %v8016_v53 = vadd.f32 %v15035_v61, %v7987_v52 }
 0x72b   :  { %v9835_v40 = vpack.i.bf16 %v8016_v53, %v8015_v33  ;;  %v10422_v53 = vpop.eup %10421 }
 0x72c   :  { %v7989_v62 = vpop.permute.xlu0 %7988  ;;  %v2656_v34 = vmul.f32 %v10422_v53, %v15032_v6 }
 0x72d   :  { %9836 = vrot.lane.b32.xlu1 %v9835_v40, %s10436_s29  ;;  %v8017_v3 = vadd.f32 %v15036_v13, %v7989_v62  ;;  %v10424_v40 = vpop.eup %10423 }
 0x72e   :  { %v2657_v35 = vmul.f32 %v10424_v40, %v15033_v27  ;;  %v10426_v45 = vpop.eup %10425 }
 0x72f   :  { %v2658_v27 = vmul.f32 %v10426_v45, %v15034_v36 }
 0x730   :  { %v7991_v54 = vpop.permute.xlu1 %7990 }
 0x731   :  { %v8018_v11 = vadd.f32 %v15037_v16, %v7991_v54 }
 0x733   :  { %v9840_v63 = vpack.i.bf16 %v8018_v11, %v8017_v3 }
 0x734   :  { %v2679_v18 = vpop.permute.xlu1 %2678  ;;  %v7993_v32 = vpop.permute.xlu0 %7992 }
 0x735   :  { %2716 = vst.msk [vmem:[%s14711_s15 + $0x8] sm:$0xff] %vm799_vm0, %v2679_v18  ;;  %v8019_v4 = vadd.f32 %v15038_v57, %v7993_v32  ;;  %9841 = vrot.lane.b32.xlu0 %v9840_v63, %s10436_s29  ;;  %v10428_v63 = vpop.eup %10427 }
 0x736   :  { %v2659_v18 = vmul.f32 %v10428_v63, %v15035_v61 }
 0x737   :  { %8057 = vrot.lane.b32.xlu1 %v8019_v4, %s10436_s29 }
 0x738   :  { %v2683_v1 = vpop.permute.xlu1 %2682  ;;  %v2677_v19 = vpop.permute.xlu0 %2676 }
 0x739   :  { %2718 = vst.msk [vmem:[%s14711_s15 + $0x18] sm:$0xff] %vm799_vm0, %v2683_v1  ;;  %2715 = vst.msk [vmem:[%s14711_s15] sm:$0xff] %vm799_vm0, %v2677_v19  ;;  %2700 = vrot.lane.b32.xlu0 %v15039_v30, %s10436_s29 }
 0x73b   :  { %2698 = vrot.lane.b32.xlu1 %v15040_v0, %s10436_s29  ;;  %v10430_v0 = vpop.eup %10429 }
 0x73c   :  { %v2687_v56 = vpop.permute.xlu1 %2686  ;;  %v2681_v43 = vpop.permute.xlu0 %2680 }
 0x73d   :  { %2720 = vst.msk [vmem:[%s14711_s15 + $0x28] sm:$0xff] %vm799_vm0, %v2687_v56  ;;  %2717 = vst.msk [vmem:[%s14711_s15 + $0x10] sm:$0xff] %vm799_vm0, %v2681_v43  ;;  %v10432_v56 = vpop.eup %10431 }
 0x73e   :  { %v10434_v43 = vpop.eup %10433  ;;  %v2661_v36 = vmul.f32 %v10432_v56, %v15037_v16 }
 0x740   :  { %v2691_v26 = vpop.permute.xlu1 %2690  ;;  %v2685_v12 = vpop.permute.xlu0 %2684 }
 0x741   :  { %2722 = vst.msk [vmem:[%s14711_s15 + $0x38] sm:$0xff] %vm799_vm0, %v2691_v26  ;;  %2719 = vst.msk [vmem:[%s14711_s15 + $0x20] sm:$0xff] %vm799_vm0, %v2685_v12  ;;  %v2660_v26 = vmul.f32 %v10430_v0, %v15036_v13 }
 0x744   :  { %v2695_v10 = vpop.permute.xlu1 %2694  ;;  %v2689_v60 = vpop.permute.xlu0 %2688 }
 0x745   :  { %2724 = vst.msk [vmem:[%s14711_s15 + $0x48] sm:$0xff] %vm799_vm0, %v2695_v10  ;;  %2721 = vst.msk [vmem:[%s14711_s15 + $0x30] sm:$0xff] %vm799_vm0, %v2689_v60  ;;  %v2662_v60 = vmul.f32 %v10434_v43, %v15038_v57 }
 0x748   :  { %v2693_v59 = vpop.permute.xlu0 %2692 }
 0x749   :  { %2723 = vst.msk [vmem:[%s14711_s15 + $0x40] sm:$0xff] %vm799_vm0, %v2693_v59 }
 0x74c   :  { %v2697_v21 = vpop.permute.xlu0 %2696 }
 0x74d   :  { %2725 = vst.msk [vmem:[%s14711_s15 + $0x50] sm:$0xff] %vm799_vm0, %v2697_v21 }
 0x77f   :  { %v9817_v24 = vpop.permute.xlu1 %9816 }
 0x780   :  { %v9819_v8 = vunpack.i.h.bf16 %v9817_v24  ;;  %v9818_v50 = vunpack.i.l.bf16 %v9817_v24 }
 0x782   :  { %v8073_v46 = vsel %vm799_vm0, %v9819_v8, %v2651_v7  ;;  %v8072_v51 = vsel %vm799_vm0, %v9818_v50, %v2650_v28 }
 0x783   :  { %v8930_v58 = vpack.c.bf16 %v8073_v46, %v8072_v51 }
 0x785   :  { %8931 = vst [vmem:[%s14712_s14] sm:$0xff] %v8930_v58  }
 0x787   :  { %v9822_v5 = vpop.permute.xlu0 %9821 }
 0x788   :  { %v9824_v2 = vunpack.i.h.bf16 %v9822_v5  ;;  %v9823_v37 = vunpack.i.l.bf16 %v9822_v5 }
 0x78a   :  { %v8075_v23 = vsel %vm799_vm0, %v9824_v2, %v2653_v41  ;;  %v8074_v47 = vsel %vm799_vm0, %v9823_v37, %v2652_v25 }
 0x78b   :  { %v8935_v42 = vpack.c.bf16 %v8075_v23, %v8074_v47 }
 0x78d   :  { %8957 = vst [vmem:[%s14712_s14 + $0x8] sm:$0xff] %v8935_v42  }
 0x78f   :  { %v9827_v14 = vpop.permute.xlu1 %9826 }
 0x790   :  { %v9829_v38 = vunpack.i.h.bf16 %v9827_v14  ;;  %v9828_v20 = vunpack.i.l.bf16 %v9827_v14 }
 0x792   :  { %v8077_v9 = vsel %vm799_vm0, %v9829_v38, %v2655_v44  ;;  %v8076_v52 = vsel %vm799_vm0, %v9828_v20, %v2654_v22 }
 0x793   :  { %v8940_v33 = vpack.c.bf16 %v8077_v9, %v8076_v52 }
 0x795   :  { %8958 = vst [vmem:[%s14712_s14 + $0x10] sm:$0xff] %v8940_v33  }
 0x797   :  { %v9832_v15 = vpop.permute.xlu0 %9831 }
 0x798   :  { %v9834_v62 = vunpack.i.h.bf16 %v9832_v15  ;;  %v9833_v49 = vunpack.i.l.bf16 %v9832_v15 }
 0x79a   :  { %v8079_v54 = vsel %vm799_vm0, %v9834_v62, %v2657_v35  ;;  %v8078_v3 = vsel %vm799_vm0, %v9833_v49, %v2656_v34 }
 0x79b   :  { %v8945_v11 = vpack.c.bf16 %v8079_v54, %v8078_v3 }
 0x79d   :  { %8959 = vst [vmem:[%s14712_s14 + $0x18] sm:$0xff] %v8945_v11  }
 0x79f   :  { %v9837_v6 = vpop.permute.xlu1 %9836 }
 0x7a0   :  { %v9839_v32 = vunpack.i.h.bf16 %v9837_v6  ;;  %v9838_v4 = vunpack.i.l.bf16 %v9837_v6 }
 0x7a2   :  { %v8081_v1 = vsel %vm799_vm0, %v9839_v32, %v2659_v18  ;;  %v8080_v19 = vsel %vm799_vm0, %v9838_v4, %v2658_v27 }
 0x7a3   :  { %v8950_v30 = vpack.c.bf16 %v8081_v1, %v8080_v19 }
 0x7a5   :  { %8960 = vst [vmem:[%s14712_s14 + $0x20] sm:$0xff] %v8950_v30  }
 0x7a7   :  { %v9842_v12 = vpop.permute.xlu0 %9841 }
 0x7a8   :  { %v9844_v61 = vunpack.i.h.bf16 %v9842_v12  ;;  %v9843_v10 = vunpack.i.l.bf16 %v9842_v12 }
 0x7a9   :  { %v8058_v59 = vpop.permute.xlu1 %8057 }
 0x7aa   :  { %v8083_v21 = vsel %vm799_vm0, %v9844_v61, %v2661_v36  ;;  %v8082_v29 = vsel %vm799_vm0, %v9843_v10, %v2660_v26  ;;  %v8084_v31 = vsel %vm799_vm0, %v8058_v59, %v2662_v60 }
 0x7ab   :  { %v8955_v24 = vpack.c.bf16 %v8083_v21, %v8082_v29  ;;  %v8926_v28 = vpack.c.bf16 %v8084_v31, %v8084_v31  ;;  %v2701_v7 = vpop.permute.xlu0 %2700 }
 0x7ac   :  { %2728 = vst.msk [vmem:[%s14711_s15 + $0x60] sm:$0x3] %vm2727_vm15, %v2701_v7 }
 0x7ad   :  { %8961 = vst [vmem:[%s14712_s14 + $0x28] sm:$0xff] %v8955_v24   ;;  %8150 = vst [vmem:[%s14712_s14 + $0x30] sm:$0x1] %v8926_v28  ;;  %v2699_v13 = vpop.permute.xlu1 %2698 }
 0x7ae   :  { %2726 = vst.msk [vmem:[%s14711_s15 + $0x58] sm:$0xff] %vm799_vm0, %v2699_v13 }

// kernel: ppo_lstm_forward.3
= control target key start
LH: loop header
LB: loop body
LE: loop exit
PB: predicated region body
PF: predicated region fallthrough
CT: control target
= control target key end

     0   :  { %v811_v36 = vlaneseq  ;;  %v8472_v37 = vmov 1966171168   ;;  %vm4940_vm0 = vcmask 523264   ;;  %vm6369_vm3 = vcmask 1041408   ;;  %s11219_s1 = inlined_call_operand.vmem [shape: bf16[3136,512], index: 1, kind: input, shape index: {}]   ;;  %s11220_s0 = inlined_call_operand.vmem [shape: bf16[2,3136], index: 0, kind: input, shape index: {}]   ;;  %s11221_s2 = inlined_call_operand.vmem [shape: f32[1,512], index: 2, kind: input, shape index: {}]   ;;  %s11222_s3 = inlined_call_operand.vmem [shape: bf16[512,128], index: 3, kind: input, shape index: {}]   ;;  %s11223_s4 = inlined_call_operand.vmem [shape: f32[1,128], index: 4, kind: input, shape index: {}]   ;;  %s11224_s5 = inlined_call_operand.vmem [shape: f32[2,128], index: 5, kind: output, shape index: {}]  }
   0x1   :  { %v7256_v0 = vld [vmem:[%s11219_s1 + $0xe4] ss:$16 sps:$4 sm:$0xff]   ;;  %v7260_v2 = vld [vmem:[%s11219_s1 + $0xe0] ss:$16 sps:$4 sm:$0xff]   ;;  %v837_v38 = vunpack.c.l.s4 %v8472_v37 }
   0x2   :  { %v7258_v1 = vld [vmem:[%s11219_s1 + $0x2e4] ss:$16 sps:$4 sm:$0xff]   ;;  %4944 = vmatprep.subr.bf16.mxu0 %v7256_v0  ;;  %v7261_v3 = vld [vmem:[%s11219_s1 + $0x2e0] ss:$16 sps:$4 sm:$0xff]   ;;  %v8622_v42 = vshrl.u32 %v811_v36, 7 }
   0x3   :  { %4985 = vmatprep.subr.bf16.mxu1 %v7258_v1  ;;  %v7262_v4 = vld [vmem:[%s11219_s1 + $0xc4] ss:$16 sps:$4 sm:$0xff]   ;;  %4945 = vmatpush1.bf16.msra.mxu0 %v7260_v2  ;;  %v7266_v6 = vld [vmem:[%s11219_s1 + $0xc0] ss:$16 sps:$4 sm:$0xff]   ;;  %v838_v43 = vunpack.c.0.s8 %v837_v38 }
   0x4   :  { %4986 = vmatpush1.bf16.msra.mxu1 %v7261_v3  ;;  %v7264_v5 = vld [vmem:[%s11219_s1 + $0x2c4] ss:$16 sps:$4 sm:$0xff]   ;;  %4946 = vmatprep.subr.bf16.mxu0 %v7262_v4  ;;  %v7267_v7 = vld [vmem:[%s11219_s1 + $0x2c0] ss:$16 sps:$4 sm:$0xff]  }
   0x5   :  { %4987 = vmatprep.subr.bf16.mxu1 %v7264_v5  ;;  %v7268_v8 = vld [vmem:[%s11219_s1 + $0xa4] ss:$16 sps:$4 sm:$0xff]   ;;  %v7272_v10 = vld [vmem:[%s11219_s1 + $0xa0] ss:$16 sps:$4 sm:$0xff]   ;;  %v8640_v49 = vsub.s32 %v838_v43, %v8622_v42 }
   0x6   :  { %v7270_v9 = vld [vmem:[%s11219_s1 + $0x2a4] ss:$16 sps:$4 sm:$0xff]   ;;  %v7273_v11 = vld [vmem:[%s11219_s1 + $0x2a0] ss:$16 sps:$4 sm:$0xff]  }
   0x7   :  { %4947 = vmatpush1.bf16.msra.mxu0 %v7266_v6  ;;  %v7274_v12 = vld [vmem:[%s11219_s1 + $0x84] ss:$16 sps:$4 sm:$0xff]   ;;  %v7278_v14 = vld [vmem:[%s11219_s1 + $0x80] ss:$16 sps:$4 sm:$0xff]  }
   0x8   :  { %4988 = vmatpush1.bf16.msra.mxu1 %v7267_v7  ;;  %4948 = vmatprep.subr.bf16.mxu0 %v7268_v8  ;;  %v7276_v13 = vld [vmem:[%s11219_s1 + $0x284] ss:$16 sps:$4 sm:$0xff]   ;;  %v7279_v15 = vld [vmem:[%s11219_s1 + $0x280] ss:$16 sps:$4 sm:$0xff]  }
   0x9   :  { %4989 = vmatprep.subr.bf16.mxu1 %v7270_v9  ;;  %v7280_v16 = vld [vmem:[%s11219_s1 + $0x64] ss:$16 sps:$4 sm:$0xff]   ;;  %v7284_v18 = vld [vmem:[%s11219_s1 + $0x60] ss:$16 sps:$4 sm:$0xff]  }
   0xa   :  { %v7282_v17 = vld [vmem:[%s11219_s1 + $0x264] ss:$16 sps:$4 sm:$0xff]   ;;  %v7285_v19 = vld [vmem:[%s11219_s1 + $0x260] ss:$16 sps:$4 sm:$0xff]  }
   0xb   :  { %4949 = vmatpush1.bf16.msra.mxu0 %v7272_v10  ;;  %v7286_v20 = vld [vmem:[%s11219_s1 + $0x44] ss:$16 sps:$4 sm:$0xff]   ;;  %v7290_v22 = vld [vmem:[%s11219_s1 + $0x40] ss:$16 sps:$4 sm:$0xff]  }
   0xc   :  { %4990 = vmatpush1.bf16.msra.mxu1 %v7273_v11  ;;  %4950 = vmatprep.subr.bf16.mxu0 %v7274_v12  ;;  %v7288_v21 = vld [vmem:[%s11219_s1 + $0x244] ss:$16 sps:$4 sm:$0xff]   ;;  %v7291_v23 = vld [vmem:[%s11219_s1 + $0x240] ss:$16 sps:$4 sm:$0xff]  }
   0xd   :  { %4991 = vmatprep.subr.bf16.mxu1 %v7276_v13  ;;  %v7292_v24 = vld [vmem:[%s11219_s1 + $0x24] ss:$16 sps:$4 sm:$0xff]   ;;  %v7296_v26 = vld [vmem:[%s11219_s1 + $0x20] ss:$16 sps:$4 sm:$0xff]  }
   0xe   :  { %v7294_v25 = vld [vmem:[%s11219_s1 + $0x224] ss:$16 sps:$4 sm:$0xff]   ;;  %v7297_v27 = vld [vmem:[%s11219_s1 + $0x220] ss:$16 sps:$4 sm:$0xff]  }
   0xf   :  { %4951 = vmatpush1.bf16.msra.mxu0 %v7278_v14  ;;  %v7298_v28 = vld [vmem:[%s11219_s1 + $0x4] ss:$16 sps:$4 sm:$0xff]   ;;  %v7302_v30 = vld [vmem:[%s11219_s1] ss:$16 sps:$4 sm:$0xff]  }
  0x10   :  { %4992 = vmatpush1.bf16.msra.mxu1 %v7279_v15  ;;  %4952 = vmatprep.subr.bf16.mxu0 %v7280_v16  ;;  %v7300_v29 = vld [vmem:[%s11219_s1 + $0x204] ss:$16 sps:$4 sm:$0xff]   ;;  %v7303_v31 = vld [vmem:[%s11219_s1 + $0x200] ss:$16 sps:$4 sm:$0xff]  }
  0x11   :  { %4993 = vmatprep.subr.bf16.mxu1 %v7282_v17  ;;  %v7304_v32 = vld [vmem:[%s11219_s1 + $0x1e4] ss:$16 sps:$4 sm:$0xff]   ;;  %v7308_v34 = vld [vmem:[%s11219_s1 + $0x1e0] ss:$16 sps:$4 sm:$0xff]  }
  0x12   :  { %v7306_v33 = vld [vmem:[%s11219_s1 + $0x3e4] ss:$16 sps:$4 sm:$0xff]   ;;  %v7309_v35 = vld [vmem:[%s11219_s1 + $0x3e0] ss:$16 sps:$4 sm:$0xff]  }
  0x13   :  { %4953 = vmatpush1.bf16.msra.mxu0 %v7284_v18  ;;  %v7310_v39 = vld [vmem:[%s11219_s1 + $0x1c4] ss:$16 sps:$4 sm:$0xff]   ;;  %v7314_v41 = vld [vmem:[%s11219_s1 + $0x1c0] ss:$16 sps:$4 sm:$0xff]  }
  0x14   :  { %4994 = vmatpush1.bf16.msra.mxu1 %v7285_v19  ;;  %4954 = vmatprep.subr.bf16.mxu0 %v7286_v20  ;;  %v7312_v40 = vld [vmem:[%s11219_s1 + $0x3c4] ss:$16 sps:$4 sm:$0xff]   ;;  %v7315_v44 = vld [vmem:[%s11219_s1 + $0x3c0] ss:$16 sps:$4 sm:$0xff]  }
  0x15   :  { %4995 = vmatprep.subr.bf16.mxu1 %v7288_v21  ;;  %v7316_v45 = vld [vmem:[%s11219_s1 + $0x1a4] ss:$16 sps:$4 sm:$0xff]   ;;  %v7320_v47 = vld [vmem:[%s11219_s1 + $0x1a0] ss:$16 sps:$4 sm:$0xff]  }
  0x16   :  { %v7318_v46 = vld [vmem:[%s11219_s1 + $0x3a4] ss:$16 sps:$4 sm:$0xff]   ;;  %v7321_v48 = vld [vmem:[%s11219_s1 + $0x3a0] ss:$16 sps:$4 sm:$0xff]  }
  0x17   :  { %4955 = vmatpush1.bf16.msra.mxu0 %v7290_v22  ;;  %v7322_v50 = vld [vmem:[%s11219_s1 + $0x184] ss:$16 sps:$4 sm:$0xff]   ;;  %v7326_v53 = vld [vmem:[%s11219_s1 + $0x180] ss:$16 sps:$4 sm:$0xff]  }
  0x18   :  { %4996 = vmatpush1.bf16.msra.mxu1 %v7291_v23  ;;  %4956 = vmatprep.subr.bf16.mxu0 %v7292_v24  ;;  %v7324_v51 = vld [vmem:[%s11219_s1 + $0x384] ss:$16 sps:$4 sm:$0xff]   ;;  %v7327_v55 = vld [vmem:[%s11219_s1 + $0x380] ss:$16 sps:$4 sm:$0xff]  }
  0x19   :  { %4997 = vmatprep.subr.bf16.mxu1 %v7294_v25  ;;  %v21_v52 = vld [vmem:[%s11220_s0] sm:$0xff] }
  0x1a   :  { %v842_v54 = vrot.slane %v21_v52, %v8640_v49  ;;  %v7328_v56 = vld [vmem:[%s11219_s1 + $0x164] ss:$16 sps:$4 sm:$0xff]   ;;  %v7332_v59 = vld [vmem:[%s11219_s1 + $0x160] ss:$16 sps:$4 sm:$0xff]   ;;  %v835_v1 = vcombine.high %v21_v52, %v21_v52 }
  0x1b   :  { %4957 = vmatpush1.bf16.msra.mxu0 %v7296_v26  ;;  %v7330_v57 = vld [vmem:[%s11219_s1 + $0x364] ss:$16 sps:$4 sm:$0xff]   ;;  %v7333_v61 = vld [vmem:[%s11219_s1 + $0x360] ss:$16 sps:$4 sm:$0xff]  }
  0x1c   :  { %4998 = vmatpush1.bf16.msra.mxu1 %v7297_v27  ;;  %4958 = vmatprep.subr.bf16.mxu0 %v7298_v28  ;;  %v850_v58 = vcombine.high %v842_v54, %v842_v54  ;;  %v7334_v62 = vld [vmem:[%s11219_s1 + $0x144] ss:$16 sps:$4 sm:$0xff]   ;;  %v7338_v2 = vld [vmem:[%s11219_s1 + $0x140] ss:$16 sps:$4 sm:$0xff]   ;;  %v8698_v6 = vrot.slane %v835_v1, %v8640_v49  ;;  %v8718_v13 = vrot.slane %v842_v54, %v8640_v49 }
  0x1d   :  { %4999 = vmatprep.subr.bf16.mxu1 %v7300_v29  ;;  %v7336_v63 = vld [vmem:[%s11219_s1 + $0x344] ss:$16 sps:$4 sm:$0xff]   ;;  %v7339_v3 = vld [vmem:[%s11219_s1 + $0x340] ss:$16 sps:$4 sm:$0xff]  }
  0x1e   :  { %v8668_v60 = vrot.slane %v850_v58, %v8640_v49  ;;  %v7340_v4 = vld [vmem:[%s11219_s1 + $0x124] ss:$16 sps:$4 sm:$0xff]   ;;  %v7344_v7 = vld [vmem:[%s11219_s1 + $0x120] ss:$16 sps:$4 sm:$0xff]   ;;  %v851_v11 = vcombine.high %v8698_v6, %v8698_v6  ;;  %v8734_v18 = vcombine.high %v8718_v13, %v8718_v13 }
  0x1f   :  { %4959 = vmatpush1.bf16.msra.mxu0 %v7302_v30  ;;  %v7342_v5 = vld [vmem:[%s11219_s1 + $0x324] ss:$16 sps:$4 sm:$0xff]   ;;  %v7345_v8 = vld [vmem:[%s11219_s1 + $0x320] ss:$16 sps:$4 sm:$0xff]  }
  0x20   :  { %5000 = vmatpush1.bf16.msra.mxu1 %v7303_v31  ;;  %4960 = vmatprep.subr.bf16.mxu0 %v7304_v32  ;;  %v8681_v0 = vcombine.high %v8668_v60, %v8668_v60  ;;  %v7346_v9 = vld [vmem:[%s11219_s1 + $0x104] ss:$16 sps:$4 sm:$0xff]   ;;  %v7350_v12 = vld [vmem:[%s11219_s1 + $0x100] ss:$16 sps:$4 sm:$0xff]   ;;  %v8730_v17 = vrot.slane %v851_v11, %v8640_v49 }
  0x21   :  { %5001 = vmatprep.subr.bf16.mxu1 %v7306_v33  ;;  %4976 = vmatprep.mubr.bf16.mxu0 %v8668_v60  ;;  %v7348_v10 = vld [vmem:[%s11219_s1 + $0x304] ss:$16 sps:$4 sm:$0xff]   ;;  %v7351_v14 = vld [vmem:[%s11219_s1 + $0x300] ss:$16 sps:$4 sm:$0xff]  }
  0x22   :  { %5017 = vmatprep.mubr.bf16.mxu1 %v8681_v0  ;;  %v7354_v15 = vld [vmem:[%s11219_s1 + $0x4e4] ss:$16 sps:$4 sm:$0xff]   ;;  %v7352_v19 = vld [vmem:[%s11219_s1 + $0x4e0] ss:$16 sps:$4 sm:$0xff]   ;;  %v8750_v23 = vcombine.high %v8730_v17, %v8730_v17 }
  0x23   :  { %4961 = vmatpush2.bf16.msra.mxu0 %v7308_v34  ;;  %v7357_v16 = vld [vmem:[%s11219_s1 + $0x6e4] ss:$16 sps:$4 sm:$0xff]   ;;  %v7355_v20 = vld [vmem:[%s11219_s1 + $0x6e0] ss:$16 sps:$4 sm:$0xff]  }
  0x24   :  { %5002 = vmatpush2.bf16.msra.mxu1 %v7309_v35  ;;  %4962 = vmatprep.subr.bf16.mxu0 %v7310_v39  ;;  %v7360_v21 = vld [vmem:[%s11219_s1 + $0x4c4] ss:$16 sps:$4 sm:$0xff]   ;;  %v7358_v24 = vld [vmem:[%s11219_s1 + $0x4c0] ss:$16 sps:$4 sm:$0xff]  }
  0x25   :  { %5003 = vmatprep.subr.bf16.mxu1 %v7312_v40  ;;  %v7363_v22 = vld [vmem:[%s11219_s1 + $0x6c4] ss:$16 sps:$4 sm:$0xff]   ;;  %v7361_v25 = vld [vmem:[%s11219_s1 + $0x6c0] ss:$16 sps:$4 sm:$0xff]  }
  0x26   :  { %v7366_v26 = vld [vmem:[%s11219_s1 + $0x4a4] ss:$16 sps:$4 sm:$0xff]   ;;  %v7364_v28 = vld [vmem:[%s11219_s1 + $0x4a0] ss:$16 sps:$4 sm:$0xff]  }
  0x27   :  { %4963 = vmatpush2.bf16.msra.mxu0 %v7314_v41  ;;  %v7369_v27 = vld [vmem:[%s11219_s1 + $0x6a4] ss:$16 sps:$4 sm:$0xff]   ;;  %v7367_v29 = vld [vmem:[%s11219_s1 + $0x6a0] ss:$16 sps:$4 sm:$0xff]  }
  0x28   :  { %5004 = vmatpush2.bf16.msra.mxu1 %v7315_v44  ;;  %4964 = vmatprep.subr.bf16.mxu0 %v7316_v45  ;;  %v7372_v30 = vld [vmem:[%s11219_s1 + $0x484] ss:$16 sps:$4 sm:$0xff]   ;;  %v7370_v32 = vld [vmem:[%s11219_s1 + $0x480] ss:$16 sps:$4 sm:$0xff]  }
  0x29   :  { %5005 = vmatprep.subr.bf16.mxu1 %v7318_v46  ;;  %v7375_v31 = vld [vmem:[%s11219_s1 + $0x684] ss:$16 sps:$4 sm:$0xff]   ;;  %v7373_v33 = vld [vmem:[%s11219_s1 + $0x680] ss:$16 sps:$4 sm:$0xff]  }
  0x2a   :  { %v7378_v34 = vld [vmem:[%s11219_s1 + $0x464] ss:$16 sps:$4 sm:$0xff]   ;;  %v7376_v37 = vld [vmem:[%s11219_s1 + $0x460] ss:$16 sps:$4 sm:$0xff]  }
  0x2b   :  { %4965 = vmatpush2.bf16.msra.mxu0 %v7320_v47  ;;  %v7381_v35 = vld [vmem:[%s11219_s1 + $0x664] ss:$16 sps:$4 sm:$0xff]   ;;  %v7379_v38 = vld [vmem:[%s11219_s1 + $0x660] ss:$16 sps:$4 sm:$0xff]  }
  0x2c   :  { %5006 = vmatpush2.bf16.msra.mxu1 %v7321_v48  ;;  %4966 = vmatprep.subr.bf16.mxu0 %v7322_v50  ;;  %v7384_v39 = vld [vmem:[%s11219_s1 + $0x444] ss:$16 sps:$4 sm:$0xff]   ;;  %v7382_v41 = vld [vmem:[%s11219_s1 + $0x440] ss:$16 sps:$4 sm:$0xff]  }
  0x2d   :  { %5007 = vmatprep.subr.bf16.mxu1 %v7324_v51  ;;  %v7387_v40 = vld [vmem:[%s11219_s1 + $0x644] ss:$16 sps:$4 sm:$0xff]   ;;  %v7385_v43 = vld [vmem:[%s11219_s1 + $0x640] ss:$16 sps:$4 sm:$0xff]  }
  0x2e   :  { %v7390_v44 = vld [vmem:[%s11219_s1 + $0x424] ss:$16 sps:$4 sm:$0xff]   ;;  %v7388_v46 = vld [vmem:[%s11219_s1 + $0x420] ss:$16 sps:$4 sm:$0xff]  }
  0x2f   :  { %4967 = vmatpush2.bf16.msra.mxu0 %v7326_v53  ;;  %v7393_v45 = vld [vmem:[%s11219_s1 + $0x624] ss:$16 sps:$4 sm:$0xff]   ;;  %v7391_v47 = vld [vmem:[%s11219_s1 + $0x620] ss:$16 sps:$4 sm:$0xff]  }
  0x30   :  { %5008 = vmatpush2.bf16.msra.mxu1 %v7327_v55  ;;  %4968 = vmatprep.subr.bf16.mxu0 %v7328_v56  ;;  %v7396_v48 = vld [vmem:[%s11219_s1 + $0x404] ss:$16 sps:$4 sm:$0xff]   ;;  %v7394_v51 = vld [vmem:[%s11219_s1 + $0x400] ss:$16 sps:$4 sm:$0xff]  }
  0x31   :  { %5009 = vmatprep.subr.bf16.mxu1 %v7330_v57  ;;  %v7399_v50 = vld [vmem:[%s11219_s1 + $0x604] ss:$16 sps:$4 sm:$0xff]   ;;  %v7397_v52 = vld [vmem:[%s11219_s1 + $0x600] ss:$16 sps:$4 sm:$0xff]  }
  0x32   :  { %v7402_v53 = vld [vmem:[%s11219_s1 + $0x5e4] ss:$16 sps:$4 sm:$0xff]   ;;  %v7400_v55 = vld [vmem:[%s11219_s1 + $0x5e0] ss:$16 sps:$4 sm:$0xff]  }
  0x33   :  { %4969 = vmatpush2.bf16.msra.mxu0 %v7332_v59  ;;  %v7405_v54 = vld [vmem:[%s11219_s1 + $0x7e4] ss:$16 sps:$4 sm:$0xff]   ;;  %v7403_v56 = vld [vmem:[%s11219_s1 + $0x7e0] ss:$16 sps:$4 sm:$0xff]  }
  0x34   :  { %5010 = vmatpush2.bf16.msra.mxu1 %v7333_v61  ;;  %4970 = vmatprep.subr.bf16.mxu0 %v7334_v62  ;;  %v7408_v57 = vld [vmem:[%s11219_s1 + $0x5c4] ss:$16 sps:$4 sm:$0xff]   ;;  %v7406_v59 = vld [vmem:[%s11219_s1 + $0x5c0] ss:$16 sps:$4 sm:$0xff]  }
  0x35   :  { %5011 = vmatprep.subr.bf16.mxu1 %v7336_v63  ;;  %v7411_v58 = vld [vmem:[%s11219_s1 + $0x7c4] ss:$16 sps:$4 sm:$0xff]   ;;  %v7409_v61 = vld [vmem:[%s11219_s1 + $0x7c0] ss:$16 sps:$4 sm:$0xff]  }
  0x36   :  { %v7414_v62 = vld [vmem:[%s11219_s1 + $0x5a4] ss:$16 sps:$4 sm:$0xff]   ;;  %v7412_v1 = vld [vmem:[%s11219_s1 + $0x5a0] ss:$16 sps:$4 sm:$0xff]  }
  0x37   :  { %4971 = vmatpush2.bf16.msra.mxu0 %v7338_v2  ;;  %v7417_v63 = vld [vmem:[%s11219_s1 + $0x7a4] ss:$16 sps:$4 sm:$0xff]   ;;  %v7415_v2 = vld [vmem:[%s11219_s1 + $0x7a0] ss:$16 sps:$4 sm:$0xff]  }
  0x38   :  { %5012 = vmatpush2.bf16.msra.mxu1 %v7339_v3  ;;  %4972 = vmatprep.subr.bf16.mxu0 %v7340_v4  ;;  %v7420_v3 = vld [vmem:[%s11219_s1 + $0x584] ss:$16 sps:$4 sm:$0xff]   ;;  %v7427_v11 = vld [vmem:[%s11219_s1 + $0x760] ss:$16 sps:$4 sm:$0xff]  }
  0x39   :  { %5013 = vmatprep.subr.bf16.mxu1 %v7342_v5  ;;  %v7423_v4 = vld [vmem:[%s11219_s1 + $0x784] ss:$16 sps:$4 sm:$0xff]   ;;  %v7418_v5 = vld [vmem:[%s11219_s1 + $0x580] ss:$16 sps:$4 sm:$0xff]  }
  0x3b   :  { %4973 = vmatpush2.bf16.msra.mxu0 %v7344_v7  ;;  %v7421_v7 = vld [vmem:[%s11219_s1 + $0x780] ss:$16 sps:$4 sm:$0xff]  }
  0x3c   :  { %5014 = vmatpush2.bf16.msra.mxu1 %v7345_v8  ;;  %4974 = vmatprep.subr.bf16.mxu0 %v7346_v9  ;;  %v7426_v8 = vld [vmem:[%s11219_s1 + $0x564] ss:$16 sps:$4 sm:$0xff]  }
  0x3d   :  { %5015 = vmatprep.subr.bf16.mxu1 %v7348_v10  ;;  %v7429_v9 = vld [vmem:[%s11219_s1 + $0x764] ss:$16 sps:$4 sm:$0xff]   ;;  %v7424_v10 = vld [vmem:[%s11219_s1 + $0x560] ss:$16 sps:$4 sm:$0xff]  }
  0x3f   :  { %4975 = vmatpush2.bf16.msra.mxu0 %v7350_v12  ;;  %v7432_v12 = vld [vmem:[%s11219_s1 + $0x544] ss:$16 sps:$4 sm:$0xff]  }
  0x40   :  { %5016 = vmatpush2.bf16.msra.mxu1 %v7351_v14  ;;  %5026 = vmatprep.subr.bf16.mxu0 %v7354_v15  ;;  %v7435_v14 = vld [vmem:[%s11219_s1 + $0x744] ss:$16 sps:$4 sm:$0xff]   ;;  %v7430_v15 = vld [vmem:[%s11219_s1 + $0x540] ss:$16 sps:$4 sm:$0xff]  }
  0x41   :  { %5067 = vmatprep.subr.bf16.mxu1 %v7357_v16  ;;  %v7433_v16 = vld [vmem:[%s11219_s1 + $0x740] ss:$16 sps:$4 sm:$0xff]  }
  0x42   :  { %4977 = vmatmul.mubr.bf16.vlgmr.msra.gmra.mxu0 %v8718_v13 }
  0x43   :  { %5018 = vmatmul.mubr.bf16.vlgmr.msra.gmra.mxu1 %v8734_v18  ;;  %5027 = vmatpush1.bf16.msra.mxu0 %v7352_v19  ;;  %v7438_v19 = vld [vmem:[%s11219_s1 + $0x524] ss:$16 sps:$4 sm:$0xff]  }
  0x44   :  { %5068 = vmatpush1.bf16.msra.mxu1 %v7355_v20  ;;  %5028 = vmatprep.subr.bf16.mxu0 %v7360_v21  ;;  %v7441_v20 = vld [vmem:[%s11219_s1 + $0x724] ss:$16 sps:$4 sm:$0xff]   ;;  %v7436_v21 = vld [vmem:[%s11219_s1 + $0x520] ss:$16 sps:$4 sm:$0xff]  }
  0x45   :  { %5069 = vmatprep.subr.bf16.mxu1 %v7363_v22  ;;  %5058 = vmatprep.mubr.bf16.mxu0 %v8730_v17  ;;  %v7439_v22 = vld [vmem:[%s11219_s1 + $0x720] ss:$16 sps:$4 sm:$0xff]  }
  0x46   :  { %5099 = vmatprep.mubr.bf16.mxu1 %v8750_v23 }
  0x47   :  { %5029 = vmatpush1.bf16.msra.mxu0 %v7358_v24  ;;  %v7444_v24 = vld [vmem:[%s11219_s1 + $0x504] ss:$16 sps:$4 sm:$0xff]  }
  0x48   :  { %5070 = vmatpush1.bf16.msra.mxu1 %v7361_v25  ;;  %5030 = vmatprep.subr.bf16.mxu0 %v7366_v26  ;;  %v7447_v25 = vld [vmem:[%s11219_s1 + $0x704] ss:$16 sps:$4 sm:$0xff]   ;;  %v7442_v26 = vld [vmem:[%s11219_s1 + $0x500] ss:$16 sps:$4 sm:$0xff]  }
  0x49   :  { %5071 = vmatprep.subr.bf16.mxu1 %v7369_v27  ;;  %v8929_v27 = vrot.slane %v8698_v6, %v8640_v49 }
  0x4b   :  { %5031 = vmatpush1.bf16.msra.mxu0 %v7364_v28  ;;  %v7445_v28 = vld [vmem:[%s11219_s1 + $0x700] ss:$16 sps:$4 sm:$0xff]   ;;  %v8942_v6 = vcombine.high %v8929_v27, %v8929_v27 }
  0x4c   :  { %5072 = vmatpush1.bf16.msra.mxu1 %v7367_v29  ;;  %5032 = vmatprep.subr.bf16.mxu0 %v7372_v30  ;;  %v7451_v29 = vld [vmem:[%s11219_s1 + $0x8e4] ss:$16 sps:$4 sm:$0xff]  }
  0x4d   :  { %5073 = vmatprep.subr.bf16.mxu1 %v7375_v31  ;;  %v7454_v30 = vld [vmem:[%s11219_s1 + $0xae4] ss:$16 sps:$4 sm:$0xff]   ;;  %v7449_v31 = vld [vmem:[%s11219_s1 + $0x8e0] ss:$16 sps:$4 sm:$0xff]  }
  0x4f   :  { %5033 = vmatpush1.bf16.msra.mxu0 %v7370_v32  ;;  %v7452_v32 = vld [vmem:[%s11219_s1 + $0xae0] ss:$16 sps:$4 sm:$0xff]  }
  0x50   :  { %5074 = vmatpush1.bf16.msra.mxu1 %v7373_v33  ;;  %5034 = vmatprep.subr.bf16.mxu0 %v7378_v34  ;;  %v8953_v33 = vld [vmem:[%s11220_s0 + $0x8] sm:$0xff]  ;;  %v7457_v34 = vld [vmem:[%s11219_s1 + $0x8c4] ss:$16 sps:$4 sm:$0xff]  }
  0x51   :  { %5075 = vmatprep.subr.bf16.mxu1 %v7381_v35  ;;  %v7460_v35 = vld [vmem:[%s11219_s1 + $0xac4] ss:$16 sps:$4 sm:$0xff]  }
  0x53   :  { %5035 = vmatpush1.bf16.msra.mxu0 %v7376_v37  ;;  %v8963_v37 = vrot.slane %v8953_v33, %v8640_v49 }
  0x54   :  { %5076 = vmatpush1.bf16.msra.mxu1 %v7379_v38  ;;  %5036 = vmatprep.subr.bf16.mxu0 %v7384_v39  ;;  %v7455_v39 = vld [vmem:[%s11219_s1 + $0x8c0] ss:$16 sps:$4 sm:$0xff]  }
  0x55   :  { %5077 = vmatprep.subr.bf16.mxu1 %v7387_v40  ;;  %v899_v38 = vcombine.high %v8963_v37, %v8963_v37  ;;  %v7458_v40 = vld [vmem:[%s11219_s1 + $0xac0] ss:$16 sps:$4 sm:$0xff]  }
  0x57   :  { %5037 = vmatpush1.bf16.msra.mxu0 %v7382_v41  ;;  %v7463_v41 = vld [vmem:[%s11219_s1 + $0x8a4] ss:$16 sps:$4 sm:$0xff]  }
  0x58   :  { %5078 = vmatpush1.bf16.msra.mxu1 %v7385_v43  ;;  %5038 = vmatprep.subr.bf16.mxu0 %v7390_v44  ;;  %v7466_v43 = vld [vmem:[%s11219_s1 + $0xaa4] ss:$16 sps:$4 sm:$0xff]   ;;  %v8982_v44 = vrot.slane %v899_v38, %v8640_v49  ;;  %v884_v38 = vcombine.high %v8953_v33, %v8953_v33 }
  0x59   :  { %5079 = vmatprep.subr.bf16.mxu1 %v7393_v45  ;;  %v7538_v33 = vld [vmem:[%s11219_s1 + $0xb24] ss:$16 sps:$4 sm:$0xff]  }
  0x5a   :  { %v8987_v45 = vcombine.high %v8982_v44, %v8982_v44 }
  0x5b   :  { %5039 = vmatpush1.bf16.msra.mxu0 %v7388_v46  ;;  %v7461_v46 = vld [vmem:[%s11219_s1 + $0x8a0] ss:$16 sps:$4 sm:$0xff]  }
  0x5c   :  { %5080 = vmatpush1.bf16.msra.mxu1 %v7391_v47  ;;  %5040 = vmatprep.subr.bf16.mxu0 %v7396_v48  ;;  %v7464_v47 = vld [vmem:[%s11219_s1 + $0xaa0] ss:$16 sps:$4 sm:$0xff]   ;;  %v7469_v48 = vld [vmem:[%s11219_s1 + $0x884] ss:$16 sps:$4 sm:$0xff]  }
  0x5d   :  { %5081 = vmatprep.subr.bf16.mxu1 %v7399_v50  ;;  %v7472_v50 = vld [vmem:[%s11219_s1 + $0xa84] ss:$16 sps:$4 sm:$0xff]  }
  0x5f   :  { %5041 = vmatpush1.bf16.msra.mxu0 %v7394_v51  ;;  %v7467_v51 = vld [vmem:[%s11219_s1 + $0x880] ss:$16 sps:$4 sm:$0xff]  }
  0x60   :  { %5082 = vmatpush1.bf16.msra.mxu1 %v7397_v52  ;;  %5042 = vmatprep.subr.bf16.mxu0 %v7402_v53  ;;  %v7470_v52 = vld [vmem:[%s11219_s1 + $0xa80] ss:$16 sps:$4 sm:$0xff]   ;;  %v7475_v53 = vld [vmem:[%s11219_s1 + $0x864] ss:$16 sps:$4 sm:$0xff]  }
  0x61   :  { %5083 = vmatprep.subr.bf16.mxu1 %v7405_v54  ;;  %v7478_v54 = vld [vmem:[%s11219_s1 + $0xa64] ss:$16 sps:$4 sm:$0xff]  }
  0x63   :  { %5043 = vmatpush2.bf16.msra.mxu0 %v7400_v55  ;;  %v7473_v55 = vld [vmem:[%s11219_s1 + $0x860] ss:$16 sps:$4 sm:$0xff]  }
  0x64   :  { %5084 = vmatpush2.bf16.msra.mxu1 %v7403_v56  ;;  %5044 = vmatprep.subr.bf16.mxu0 %v7408_v57  ;;  %v7476_v56 = vld [vmem:[%s11219_s1 + $0xa60] ss:$16 sps:$4 sm:$0xff]   ;;  %v7481_v57 = vld [vmem:[%s11219_s1 + $0x844] ss:$16 sps:$4 sm:$0xff]  }
  0x65   :  { %5085 = vmatprep.subr.bf16.mxu1 %v7411_v58  ;;  %v7484_v58 = vld [vmem:[%s11219_s1 + $0xa44] ss:$16 sps:$4 sm:$0xff]  }
  0x67   :  { %5045 = vmatpush2.bf16.msra.mxu0 %v7406_v59  ;;  %v7479_v59 = vld [vmem:[%s11219_s1 + $0x840] ss:$16 sps:$4 sm:$0xff]  }
  0x68   :  { %5086 = vmatpush2.bf16.msra.mxu1 %v7409_v61  ;;  %5046 = vmatprep.subr.bf16.mxu0 %v7414_v62  ;;  %v7482_v61 = vld [vmem:[%s11219_s1 + $0xa40] ss:$16 sps:$4 sm:$0xff]   ;;  %v7487_v62 = vld [vmem:[%s11219_s1 + $0x824] ss:$16 sps:$4 sm:$0xff]  }
  0x69   :  { %5087 = vmatprep.subr.bf16.mxu1 %v7417_v63  ;;  %v7490_v63 = vld [vmem:[%s11219_s1 + $0xa24] ss:$16 sps:$4 sm:$0xff]  }
  0x6b   :  { %5047 = vmatpush2.bf16.msra.mxu0 %v7412_v1  ;;  %v7485_v1 = vld [vmem:[%s11219_s1 + $0x820] ss:$16 sps:$4 sm:$0xff]  }
  0x6c   :  { %5088 = vmatpush2.bf16.msra.mxu1 %v7415_v2  ;;  %5048 = vmatprep.subr.bf16.mxu0 %v7420_v3  ;;  %v7488_v2 = vld [vmem:[%s11219_s1 + $0xa20] ss:$16 sps:$4 sm:$0xff]   ;;  %v7493_v3 = vld [vmem:[%s11219_s1 + $0x804] ss:$16 sps:$4 sm:$0xff]  }
  0x6d   :  { %5089 = vmatprep.subr.bf16.mxu1 %v7423_v4  ;;  %v7496_v4 = vld [vmem:[%s11219_s1 + $0xa04] ss:$16 sps:$4 sm:$0xff]  }
  0x6f   :  { %5049 = vmatpush2.bf16.msra.mxu0 %v7418_v5  ;;  %v7491_v5 = vld [vmem:[%s11219_s1 + $0x800] ss:$16 sps:$4 sm:$0xff]  }
  0x70   :  { %5090 = vmatpush2.bf16.msra.mxu1 %v7421_v7  ;;  %5050 = vmatprep.subr.bf16.mxu0 %v7426_v8  ;;  %v7494_v7 = vld [vmem:[%s11219_s1 + $0xa00] ss:$16 sps:$4 sm:$0xff]   ;;  %v7499_v8 = vld [vmem:[%s11219_s1 + $0x9e4] ss:$16 sps:$4 sm:$0xff]  }
  0x71   :  { %5091 = vmatprep.subr.bf16.mxu1 %v7429_v9  ;;  %v7502_v9 = vld [vmem:[%s11219_s1 + $0xbe4] ss:$16 sps:$4 sm:$0xff]  }
  0x73   :  { %5051 = vmatpush2.bf16.msra.mxu0 %v7424_v10  ;;  %v7497_v10 = vld [vmem:[%s11219_s1 + $0x9e0] ss:$16 sps:$4 sm:$0xff]  }
  0x74   :  { %5092 = vmatpush2.bf16.msra.mxu1 %v7427_v11  ;;  %5052 = vmatprep.subr.bf16.mxu0 %v7432_v12  ;;  %v7500_v11 = vld [vmem:[%s11219_s1 + $0xbe0] ss:$16 sps:$4 sm:$0xff]   ;;  %v7505_v12 = vld [vmem:[%s11219_s1 + $0x9c4] ss:$16 sps:$4 sm:$0xff]  }
  0x75   :  { %5093 = vmatprep.subr.bf16.mxu1 %v7435_v14  ;;  %v7508_v14 = vld [vmem:[%s11219_s1 + $0xbc4] ss:$16 sps:$4 sm:$0xff]  }
  0x77   :  { %5053 = vmatpush2.bf16.msra.mxu0 %v7430_v15  ;;  %v7503_v15 = vld [vmem:[%s11219_s1 + $0x9c0] ss:$16 sps:$4 sm:$0xff]  }
  0x78   :  { %5094 = vmatpush2.bf16.msra.mxu1 %v7433_v16  ;;  %5054 = vmatprep.subr.bf16.mxu0 %v7438_v19  ;;  %v7506_v16 = vld [vmem:[%s11219_s1 + $0xbc0] ss:$16 sps:$4 sm:$0xff]   ;;  %v7511_v19 = vld [vmem:[%s11219_s1 + $0x9a4] ss:$16 sps:$4 sm:$0xff]  }
  0x79   :  { %5095 = vmatprep.subr.bf16.mxu1 %v7441_v20  ;;  %v7514_v20 = vld [vmem:[%s11219_s1 + $0xba4] ss:$16 sps:$4 sm:$0xff]  }
  0x7b   :  { %5055 = vmatpush2.bf16.msra.mxu0 %v7436_v21  ;;  %v7509_v21 = vld [vmem:[%s11219_s1 + $0x9a0] ss:$16 sps:$4 sm:$0xff]  }
  0x7c   :  { %5096 = vmatpush2.bf16.msra.mxu1 %v7439_v22  ;;  %5056 = vmatprep.subr.bf16.mxu0 %v7444_v24  ;;  %v7512_v22 = vld [vmem:[%s11219_s1 + $0xba0] ss:$16 sps:$4 sm:$0xff]   ;;  %v7517_v24 = vld [vmem:[%s11219_s1 + $0x984] ss:$16 sps:$4 sm:$0xff]  }
  0x7d   :  { %5097 = vmatprep.subr.bf16.mxu1 %v7447_v25  ;;  %v7520_v25 = vld [vmem:[%s11219_s1 + $0xb84] ss:$16 sps:$4 sm:$0xff]  }
  0x7f   :  { %5057 = vmatpush2.bf16.msra.mxu0 %v7442_v26  ;;  %v7515_v26 = vld [vmem:[%s11219_s1 + $0x980] ss:$16 sps:$4 sm:$0xff]  }
  0x80   :  { %5098 = vmatpush2.bf16.msra.mxu1 %v7445_v28  ;;  %5108 = vmatprep.subr.bf16.mxu0 %v7451_v29  ;;  %v7518_v28 = vld [vmem:[%s11219_s1 + $0xb80] ss:$16 sps:$4 sm:$0xff]   ;;  %v7523_v29 = vld [vmem:[%s11219_s1 + $0x964] ss:$16 sps:$4 sm:$0xff]  }
  0x81   :  { %5149 = vmatprep.subr.bf16.mxu1 %v7454_v30  ;;  %v7526_v30 = vld [vmem:[%s11219_s1 + $0xb64] ss:$16 sps:$4 sm:$0xff]  }
  0x82   :  { %5059 = vmatmul.mubr.bf16.vlgmr.msra.gmra.mxu0 %v8929_v27 }
  0x83   :  { %5100 = vmatmul.mubr.bf16.vlgmr.msra.gmra.mxu1 %v8942_v6  ;;  %5109 = vmatpush1.bf16.msra.mxu0 %v7449_v31  ;;  %v7521_v31 = vld [vmem:[%s11219_s1 + $0x960] ss:$16 sps:$4 sm:$0xff]  }
  0x84   :  { %5150 = vmatpush1.bf16.msra.mxu1 %v7452_v32  ;;  %5110 = vmatprep.subr.bf16.mxu0 %v7457_v34  ;;  %v7524_v32 = vld [vmem:[%s11219_s1 + $0xb60] ss:$16 sps:$4 sm:$0xff]   ;;  %v7529_v34 = vld [vmem:[%s11219_s1 + $0x944] ss:$16 sps:$4 sm:$0xff]  }
  0x85   :  { %5151 = vmatprep.subr.bf16.mxu1 %v7460_v35  ;;  %5140 = vmatprep.mubr.bf16.mxu0 %v8982_v44  ;;  %v7532_v35 = vld [vmem:[%s11219_s1 + $0xb44] ss:$16 sps:$4 sm:$0xff]  }
  0x86   :  { %5181 = vmatprep.mubr.bf16.mxu1 %v8987_v45 }
  0x87   :  { %5111 = vmatpush1.bf16.msra.mxu0 %v7455_v39  ;;  %v7527_v39 = vld [vmem:[%s11219_s1 + $0x940] ss:$16 sps:$4 sm:$0xff]  }
  0x88   :  { %5152 = vmatpush1.bf16.msra.mxu1 %v7458_v40  ;;  %5112 = vmatprep.subr.bf16.mxu0 %v7463_v41  ;;  %v7530_v40 = vld [vmem:[%s11219_s1 + $0xb40] ss:$16 sps:$4 sm:$0xff]   ;;  %v7535_v41 = vld [vmem:[%s11219_s1 + $0x924] ss:$16 sps:$4 sm:$0xff]  }
  0x89   :  { %5153 = vmatprep.subr.bf16.mxu1 %v7466_v43  ;;  %v9137_v43 = vrot.slane %v884_v38, %v8640_v49  ;;  %v7593_v38 = vld [vmem:[%s11219_s1 + $0xde0] ss:$16 sps:$4 sm:$0xff]  }
  0x8b   :  { %5113 = vmatpush1.bf16.msra.mxu0 %v7461_v46  ;;  %v7533_v46 = vld [vmem:[%s11219_s1 + $0x920] ss:$16 sps:$4 sm:$0xff]  }
  0x8c   :  { %5154 = vmatpush1.bf16.msra.mxu1 %v7464_v47  ;;  %5114 = vmatprep.subr.bf16.mxu0 %v7469_v48  ;;  %v7536_v47 = vld [vmem:[%s11219_s1 + $0xb20] ss:$16 sps:$4 sm:$0xff]   ;;  %v7541_v48 = vld [vmem:[%s11219_s1 + $0x904] ss:$16 sps:$4 sm:$0xff]  }
  0x8d   :  { %5155 = vmatprep.subr.bf16.mxu1 %v7472_v50  ;;  %v7544_v50 = vld [vmem:[%s11219_s1 + $0xb04] ss:$16 sps:$4 sm:$0xff]  }
  0x8f   :  { %5115 = vmatpush1.bf16.msra.mxu0 %v7467_v51  ;;  %v900_v51 = vcombine.high %v9137_v43, %v9137_v43 }
  0x90   :  { %5156 = vmatpush1.bf16.msra.mxu1 %v7470_v52  ;;  %5116 = vmatprep.subr.bf16.mxu0 %v7475_v53  ;;  %v7539_v52 = vld [vmem:[%s11219_s1 + $0x900] ss:$16 sps:$4 sm:$0xff]   ;;  %v9158_v53 = vrot.slane %v8963_v37, %v8640_v49 }
  0x91   :  { %5157 = vmatprep.subr.bf16.mxu1 %v7478_v54  ;;  %v7542_v54 = vld [vmem:[%s11219_s1 + $0xb00] ss:$16 sps:$4 sm:$0xff]  }
  0x92   :  { %v9174_v37 = vcombine.high %v9158_v53, %v9158_v53 }
  0x93   :  { %5117 = vmatpush1.bf16.msra.mxu0 %v7473_v55  ;;  %v7547_v55 = vld [vmem:[%s11219_s1 + $0xce4] ss:$16 sps:$4 sm:$0xff]  }
  0x94   :  { %5158 = vmatpush1.bf16.msra.mxu1 %v7476_v56  ;;  %5118 = vmatprep.subr.bf16.mxu0 %v7481_v57  ;;  %v7550_v56 = vld [vmem:[%s11219_s1 + $0xee4] ss:$16 sps:$4 sm:$0xff]   ;;  %v9170_v57 = vrot.slane %v900_v51, %v8640_v49  ;;  %v7608_v51 = vld [vmem:[%s11219_s1 + $0xfa0] ss:$16 sps:$4 sm:$0xff]  }
  0x95   :  { %5159 = vmatprep.subr.bf16.mxu1 %v7484_v58  ;;  %v7545_v58 = vld [vmem:[%s11219_s1 + $0xce0] ss:$16 sps:$4 sm:$0xff]  }
  0x97   :  { %5119 = vmatpush1.bf16.msra.mxu0 %v7479_v59  ;;  %v7548_v59 = vld [vmem:[%s11219_s1 + $0xee0] ss:$16 sps:$4 sm:$0xff]  }
  0x98   :  { %5160 = vmatpush1.bf16.msra.mxu1 %v7482_v61  ;;  %5120 = vmatprep.subr.bf16.mxu0 %v7487_v62  ;;  %v7553_v61 = vld [vmem:[%s11219_s1 + $0xcc4] ss:$16 sps:$4 sm:$0xff]  }
  0x99   :  { %5161 = vmatprep.subr.bf16.mxu1 %v7490_v63  ;;  %v7556_v62 = vld [vmem:[%s11219_s1 + $0xec4] ss:$16 sps:$4 sm:$0xff]   ;;  %v9190_v63 = vcombine.high %v9170_v57, %v9170_v57 }
  0x9b   :  { %5121 = vmatpush1.bf16.msra.mxu0 %v7485_v1  ;;  %v7551_v1 = vld [vmem:[%s11219_s1 + $0xcc0] ss:$16 sps:$4 sm:$0xff]  }
  0x9c   :  { %5162 = vmatpush1.bf16.msra.mxu1 %v7488_v2  ;;  %5122 = vmatprep.subr.bf16.mxu0 %v7493_v3  ;;  %v7554_v2 = vld [vmem:[%s11219_s1 + $0xec0] ss:$16 sps:$4 sm:$0xff]   ;;  %v7559_v3 = vld [vmem:[%s11219_s1 + $0xca4] ss:$16 sps:$4 sm:$0xff]  }
  0x9d   :  { %5163 = vmatprep.subr.bf16.mxu1 %v7496_v4  ;;  %v7562_v4 = vld [vmem:[%s11219_s1 + $0xea4] ss:$16 sps:$4 sm:$0xff]  }
  0x9f   :  { %5123 = vmatpush1.bf16.msra.mxu0 %v7491_v5  ;;  %v7557_v5 = vld [vmem:[%s11219_s1 + $0xca0] ss:$16 sps:$4 sm:$0xff]  }
  0xa0   :  { %5164 = vmatpush1.bf16.msra.mxu1 %v7494_v7  ;;  %5124 = vmatprep.subr.bf16.mxu0 %v7499_v8  ;;  %v7560_v7 = vld [vmem:[%s11219_s1 + $0xea0] ss:$16 sps:$4 sm:$0xff]   ;;  %v7565_v8 = vld [vmem:[%s11219_s1 + $0xc84] ss:$16 sps:$4 sm:$0xff]  }
  0xa1   :  { %5165 = vmatprep.subr.bf16.mxu1 %v7502_v9  ;;  %v7568_v9 = vld [vmem:[%s11219_s1 + $0xe84] ss:$16 sps:$4 sm:$0xff]  }
  0xa3   :  { %5125 = vmatpush2.bf16.msra.mxu0 %v7497_v10  ;;  %v7563_v10 = vld [vmem:[%s11219_s1 + $0xc80] ss:$16 sps:$4 sm:$0xff]  }
  0xa4   :  { %5166 = vmatpush2.bf16.msra.mxu1 %v7500_v11  ;;  %5126 = vmatprep.subr.bf16.mxu0 %v7505_v12  ;;  %v7566_v11 = vld [vmem:[%s11219_s1 + $0xe80] ss:$16 sps:$4 sm:$0xff]   ;;  %v7571_v12 = vld [vmem:[%s11219_s1 + $0xc64] ss:$16 sps:$4 sm:$0xff]  }
  0xa5   :  { %5167 = vmatprep.subr.bf16.mxu1 %v7508_v14  ;;  %v7574_v14 = vld [vmem:[%s11219_s1 + $0xe64] ss:$16 sps:$4 sm:$0xff]  }
  0xa7   :  { %5127 = vmatpush2.bf16.msra.mxu0 %v7503_v15  ;;  %v7569_v15 = vld [vmem:[%s11219_s1 + $0xc60] ss:$16 sps:$4 sm:$0xff]  }
  0xa8   :  { %5168 = vmatpush2.bf16.msra.mxu1 %v7506_v16  ;;  %5128 = vmatprep.subr.bf16.mxu0 %v7511_v19  ;;  %v7572_v16 = vld [vmem:[%s11219_s1 + $0xe60] ss:$16 sps:$4 sm:$0xff]   ;;  %v7577_v19 = vld [vmem:[%s11219_s1 + $0xc44] ss:$16 sps:$4 sm:$0xff]  }
  0xa9   :  { %5169 = vmatprep.subr.bf16.mxu1 %v7514_v20  ;;  %v7580_v20 = vld [vmem:[%s11219_s1 + $0xe44] ss:$16 sps:$4 sm:$0xff]  }
  0xab   :  { %5129 = vmatpush2.bf16.msra.mxu0 %v7509_v21  ;;  %v7575_v21 = vld [vmem:[%s11219_s1 + $0xc40] ss:$16 sps:$4 sm:$0xff]  }
  0xac   :  { %5170 = vmatpush2.bf16.msra.mxu1 %v7512_v22  ;;  %5130 = vmatprep.subr.bf16.mxu0 %v7517_v24  ;;  %v7578_v22 = vld [vmem:[%s11219_s1 + $0xe40] ss:$16 sps:$4 sm:$0xff]   ;;  %v7583_v24 = vld [vmem:[%s11219_s1 + $0xc24] ss:$16 sps:$4 sm:$0xff]  }
  0xad   :  { %5171 = vmatprep.subr.bf16.mxu1 %v7520_v25  ;;  %v7586_v25 = vld [vmem:[%s11219_s1 + $0xe24] ss:$16 sps:$4 sm:$0xff]  }
  0xaf   :  { %5131 = vmatpush2.bf16.msra.mxu0 %v7515_v26  ;;  %v7581_v26 = vld [vmem:[%s11219_s1 + $0xc20] ss:$16 sps:$4 sm:$0xff]  }
  0xb0   :  { %5172 = vmatpush2.bf16.msra.mxu1 %v7518_v28  ;;  %5132 = vmatprep.subr.bf16.mxu0 %v7523_v29  ;;  %v7584_v28 = vld [vmem:[%s11219_s1 + $0xe20] ss:$16 sps:$4 sm:$0xff]   ;;  %v7589_v29 = vld [vmem:[%s11219_s1 + $0xc04] ss:$16 sps:$4 sm:$0xff]  }
  0xb1   :  { %5173 = vmatprep.subr.bf16.mxu1 %v7526_v30  ;;  %v7592_v30 = vld [vmem:[%s11219_s1 + $0xe04] ss:$16 sps:$4 sm:$0xff]  }
  0xb3   :  { %5133 = vmatpush2.bf16.msra.mxu0 %v7521_v31  ;;  %v7587_v31 = vld [vmem:[%s11219_s1 + $0xc00] ss:$16 sps:$4 sm:$0xff]  }
  0xb4   :  { %5174 = vmatpush2.bf16.msra.mxu1 %v7524_v32  ;;  %5134 = vmatprep.subr.bf16.mxu0 %v7529_v34  ;;  %v7590_v32 = vld [vmem:[%s11219_s1 + $0xe00] ss:$16 sps:$4 sm:$0xff]   ;;  %v7595_v34 = vld [vmem:[%s11219_s1 + $0xde4] ss:$16 sps:$4 sm:$0xff]  }
  0xb5   :  { %5175 = vmatprep.subr.bf16.mxu1 %v7532_v35  ;;  %v7598_v35 = vld [vmem:[%s11219_s1 + $0xfe4] ss:$16 sps:$4 sm:$0xff]  }
  0xb7   :  { %5135 = vmatpush2.bf16.msra.mxu0 %v7527_v39  ;;  %v7596_v39 = vld [vmem:[%s11219_s1 + $0xfe0] ss:$16 sps:$4 sm:$0xff]  }
  0xb8   :  { %5176 = vmatpush2.bf16.msra.mxu1 %v7530_v40  ;;  %5136 = vmatprep.subr.bf16.mxu0 %v7535_v41  ;;  %v7601_v40 = vld [vmem:[%s11219_s1 + $0xdc4] ss:$16 sps:$4 sm:$0xff]  }
  0xb9   :  { %5177 = vmatprep.subr.bf16.mxu1 %v7538_v33  ;;  %v7604_v41 = vld [vmem:[%s11219_s1 + $0xfc4] ss:$16 sps:$4 sm:$0xff]   ;;  %v7599_v33 = vld [vmem:[%s11219_s1 + $0xdc0] ss:$16 sps:$4 sm:$0xff]  }
  0xbb   :  { %5137 = vmatpush2.bf16.msra.mxu0 %v7533_v46  ;;  %v7602_v46 = vld [vmem:[%s11219_s1 + $0xfc0] ss:$16 sps:$4 sm:$0xff]  }
  0xbc   :  { %5178 = vmatpush2.bf16.msra.mxu1 %v7536_v47  ;;  %5138 = vmatprep.subr.bf16.mxu0 %v7541_v48  ;;  %v7607_v47 = vld [vmem:[%s11219_s1 + $0xda4] ss:$16 sps:$4 sm:$0xff]  }
  0xbd   :  { %5179 = vmatprep.subr.bf16.mxu1 %v7544_v50  ;;  %v7610_v48 = vld [vmem:[%s11219_s1 + $0xfa4] ss:$16 sps:$4 sm:$0xff]   ;;  %v7605_v50 = vld [vmem:[%s11219_s1 + $0xda0] ss:$16 sps:$4 sm:$0xff]  }
  0xbf   :  { %5139 = vmatpush2.bf16.msra.mxu0 %v7539_v52  ;;  %v7613_v52 = vld [vmem:[%s11219_s1 + $0xd84] ss:$16 sps:$4 sm:$0xff]  }
  0xc0   :  { %5180 = vmatpush2.bf16.msra.mxu1 %v7542_v54  ;;  %5190 = vmatprep.subr.bf16.mxu0 %v7547_v55  ;;  %v7616_v54 = vld [vmem:[%s11219_s1 + $0xf84] ss:$16 sps:$4 sm:$0xff]   ;;  %v7611_v55 = vld [vmem:[%s11219_s1 + $0xd80] ss:$16 sps:$4 sm:$0xff]  }
  0xc1   :  { %5231 = vmatprep.subr.bf16.mxu1 %v7550_v56  ;;  %v7614_v56 = vld [vmem:[%s11219_s1 + $0xf80] ss:$16 sps:$4 sm:$0xff]  }
  0xc2   :  { %5141 = vmatmul.mubr.bf16.vlgmr.msra.gmra.mxu0 %v9158_v53 }
  0xc3   :  { %5182 = vmatmul.mubr.bf16.vlgmr.msra.gmra.mxu1 %v9174_v37  ;;  %5191 = vmatpush1.bf16.msra.mxu0 %v7545_v58  ;;  %v7619_v58 = vld [vmem:[%s11219_s1 + $0xd64] ss:$16 sps:$4 sm:$0xff]  }
  0xc4   :  { %5232 = vmatpush1.bf16.msra.mxu1 %v7548_v59  ;;  %5192 = vmatprep.subr.bf16.mxu0 %v7553_v61  ;;  %v7622_v59 = vld [vmem:[%s11219_s1 + $0xf64] ss:$16 sps:$4 sm:$0xff]   ;;  %v7617_v61 = vld [vmem:[%s11219_s1 + $0xd60] ss:$16 sps:$4 sm:$0xff]  }
  0xc5   :  { %5233 = vmatprep.subr.bf16.mxu1 %v7556_v62  ;;  %5222 = vmatprep.mubr.bf16.mxu0 %v9170_v57  ;;  %v7620_v62 = vld [vmem:[%s11219_s1 + $0xf60] ss:$16 sps:$4 sm:$0xff]  }
  0xc6   :  { %5263 = vmatprep.mubr.bf16.mxu1 %v9190_v63 }
  0xc7   :  { %5193 = vmatpush1.bf16.msra.mxu0 %v7551_v1  ;;  %v7625_v1 = vld [vmem:[%s11219_s1 + $0xd44] ss:$16 sps:$4 sm:$0xff]  }
  0xc8   :  { %5234 = vmatpush1.bf16.msra.mxu1 %v7554_v2  ;;  %5194 = vmatprep.subr.bf16.mxu0 %v7559_v3  ;;  %v7628_v2 = vld [vmem:[%s11219_s1 + $0xf44] ss:$16 sps:$4 sm:$0xff]   ;;  %v7623_v3 = vld [vmem:[%s11219_s1 + $0xd40] ss:$16 sps:$4 sm:$0xff]  }
  0xc9   :  { %5235 = vmatprep.subr.bf16.mxu1 %v7562_v4  ;;  %v7626_v4 = vld [vmem:[%s11219_s1 + $0xf40] ss:$16 sps:$4 sm:$0xff]  }
  0xcb   :  { %5195 = vmatpush1.bf16.msra.mxu0 %v7557_v5  ;;  %v9349_v5 = vld [vmem:[%s11220_s0 + $0x10] sm:$0xff] }
  0xcc   :  { %5236 = vmatpush1.bf16.msra.mxu1 %v7560_v7  ;;  %5196 = vmatprep.subr.bf16.mxu0 %v7565_v8  ;;  %v7631_v7 = vld [vmem:[%s11219_s1 + $0xd24] ss:$16 sps:$4 sm:$0xff]  }
  0xcd   :  { %5237 = vmatprep.subr.bf16.mxu1 %v7568_v9  ;;  %v7634_v8 = vld [vmem:[%s11219_s1 + $0xf24] ss:$16 sps:$4 sm:$0xff]   ;;  %v9359_v9 = vrot.slane %v9349_v5, %v8640_v49 }
  0xcf   :  { %5197 = vmatpush1.bf16.msra.mxu0 %v7563_v10  ;;  %v7629_v10 = vld [vmem:[%s11219_s1 + $0xd20] ss:$16 sps:$4 sm:$0xff]  }
  0xd0   :  { %5238 = vmatpush1.bf16.msra.mxu1 %v7566_v11  ;;  %5198 = vmatprep.subr.bf16.mxu0 %v7571_v12  ;;  %v7632_v11 = vld [vmem:[%s11219_s1 + $0xf20] ss:$16 sps:$4 sm:$0xff]   ;;  %v7637_v12 = vld [vmem:[%s11219_s1 + $0xd04] ss:$16 sps:$4 sm:$0xff]  }
  0xd1   :  { %5239 = vmatprep.subr.bf16.mxu1 %v7574_v14  ;;  %v7640_v14 = vld [vmem:[%s11219_s1 + $0xf04] ss:$16 sps:$4 sm:$0xff]  }
  0xd3   :  { %5199 = vmatpush1.bf16.msra.mxu0 %v7569_v15  ;;  %v7635_v15 = vld [vmem:[%s11219_s1 + $0xd00] ss:$16 sps:$4 sm:$0xff]  }
  0xd4   :  { %5240 = vmatpush1.bf16.msra.mxu1 %v7572_v16  ;;  %5200 = vmatprep.subr.bf16.mxu0 %v7577_v19  ;;  %v948_v16 = vcombine.high %v9359_v9, %v9359_v9  ;;  %v7638_v19 = vld [vmem:[%s11219_s1 + $0xf00] ss:$16 sps:$4 sm:$0xff]  }
  0xd5   :  { %5241 = vmatprep.subr.bf16.mxu1 %v7580_v20  ;;  %v809_v20 = vld [vmem:[%s11221_s2] sm:$0xf] }
  0xd7   :  { %5201 = vmatpush1.bf16.msra.mxu0 %v7575_v21  ;;  %v9386_v21 = vrot.slane %v9137_v43, %v8640_v49 }
  0xd8   :  { %5242 = vmatpush1.bf16.msra.mxu1 %v7578_v22  ;;  %5202 = vmatprep.subr.bf16.mxu0 %v7583_v24  ;;  %v813_v22 = vsub.s32 0, %v8622_v42  ;;  %v7644_v24 = vld [vmem:[%s11219_s1 + $0x10e4] ss:$16 sps:$4 sm:$0xff]  }
  0xd9   :  { %5243 = vmatprep.subr.bf16.mxu1 %v7586_v25  ;;  %v7647_v25 = vld [vmem:[%s11219_s1 + $0x12e4] ss:$16 sps:$4 sm:$0xff]   ;;  %v9401_v43 = vcombine.high %v9386_v21, %v9386_v21 }
  0xdb   :  { %5203 = vmatpush1.bf16.msra.mxu0 %v7581_v26  ;;  %v817_v26 = vsub.s32 1, %v8622_v42 }
  0xdc   :  { %5244 = vmatpush1.bf16.msra.mxu1 %v7584_v28  ;;  %5204 = vmatprep.subr.bf16.mxu0 %v7589_v29  ;;  %v9397_v28 = vrot.slane %v948_v16, %v8640_v49  ;;  %v7642_v29 = vld [vmem:[%s11219_s1 + $0x10e0] ss:$16 sps:$4 sm:$0xff]  }
  0xdd   :  { %5245 = vmatprep.subr.bf16.mxu1 %v7592_v30  ;;  %v7645_v30 = vld [vmem:[%s11219_s1 + $0x12e0] ss:$16 sps:$4 sm:$0xff]  }
  0xde   :  { %v7672_v16 = vld [vmem:[%s11219_s1 + $0x1040] ss:$16 sps:$4 sm:$0xff]  }
  0xdf   :  { %5205 = vmatpush1.bf16.msra.mxu0 %v7587_v31  ;;  %v814_v31 = vrot.slane %v809_v20, %v813_v22  ;;  %v7683_v22 = vld [vmem:[%s11219_s1 + $0x1224] ss:$16 sps:$4 sm:$0xff]  }
  0xe0   :  { %5246 = vmatpush1.bf16.msra.mxu1 %v7590_v32  ;;  %5206 = vmatprep.subr.bf16.mxu0 %v7595_v34  ;;  %v7650_v32 = vld [vmem:[%s11219_s1 + $0x10c4] ss:$16 sps:$4 sm:$0xff]  }
  0xe1   :  { %5247 = vmatprep.subr.bf16.mxu1 %v7598_v35  ;;  %v7653_v34 = vld [vmem:[%s11219_s1 + $0x12c4] ss:$16 sps:$4 sm:$0xff]   ;;  %v818_v35 = vrot.slane %v809_v20, %v817_v26 }
  0xe2   :  { %v7680_v20 = vld [vmem:[%s11219_s1 + $0x1024] ss:$16 sps:$4 sm:$0xff]  }
  0xe3   :  { %5207 = vmatpush2.bf16.msra.mxu0 %v7593_v38  ;;  %v9417_v38 = vcombine.high %v9397_v28, %v9397_v28  ;;  %v7686_v26 = vld [vmem:[%s11219_s1 + $0x1004] ss:$16 sps:$4 sm:$0xff]  }
  0xe4   :  { %5248 = vmatpush2.bf16.msra.mxu1 %v7596_v39  ;;  %5208 = vmatprep.subr.bf16.mxu0 %v7601_v40 }
  0xe5   :  { %5249 = vmatprep.subr.bf16.mxu1 %v7604_v41  ;;  %v7648_v41 = vld [vmem:[%s11219_s1 + $0x10c0] ss:$16 sps:$4 sm:$0xff]  }
  0xe7   :  { %5209 = vmatpush2.bf16.msra.mxu0 %v7599_v33  ;;  %v7651_v33 = vld [vmem:[%s11219_s1 + $0x12c0] ss:$16 sps:$4 sm:$0xff]  }
  0xe8   :  { %5250 = vmatpush2.bf16.msra.mxu1 %v7602_v46  ;;  %5210 = vmatprep.subr.bf16.mxu0 %v7607_v47 }
  0xe9   :  { %5251 = vmatprep.subr.bf16.mxu1 %v7610_v48 }
  0xeb   :  { %5211 = vmatpush2.bf16.msra.mxu0 %v7605_v50  ;;  %v7656_v50 = vld [vmem:[%s11219_s1 + $0x10a4] ss:$16 sps:$4 sm:$0xff]  }
  0xec   :  { %5252 = vmatpush2.bf16.msra.mxu1 %v7608_v51  ;;  %5212 = vmatprep.subr.bf16.mxu0 %v7613_v52  ;;  %v7659_v51 = vld [vmem:[%s11219_s1 + $0x12a4] ss:$16 sps:$4 sm:$0xff]  }
  0xed   :  { %5253 = vmatprep.subr.bf16.mxu1 %v7616_v54 }
  0xef   :  { %5213 = vmatpush2.bf16.msra.mxu0 %v7611_v55  ;;  %v7654_v55 = vld [vmem:[%s11219_s1 + $0x10a0] ss:$16 sps:$4 sm:$0xff]  }
  0xf0   :  { %5254 = vmatpush2.bf16.msra.mxu1 %v7614_v56  ;;  %5214 = vmatprep.subr.bf16.mxu0 %v7619_v58  ;;  %v7657_v56 = vld [vmem:[%s11219_s1 + $0x12a0] ss:$16 sps:$4 sm:$0xff]  }
  0xf1   :  { %5255 = vmatprep.subr.bf16.mxu1 %v7622_v59 }
  0xf3   :  { %5215 = vmatpush2.bf16.msra.mxu0 %v7617_v61 }
  0xf4   :  { %5256 = vmatpush2.bf16.msra.mxu1 %v7620_v62  ;;  %5216 = vmatprep.subr.bf16.mxu0 %v7625_v1 }
  0xf5   :  { %5257 = vmatprep.subr.bf16.mxu1 %v7628_v2  ;;  %v7662_v2 = vld [vmem:[%s11219_s1 + $0x1084] ss:$16 sps:$4 sm:$0xff]  }
  0xf7   :  { %5217 = vmatpush2.bf16.msra.mxu0 %v7623_v3  ;;  %v7665_v3 = vld [vmem:[%s11219_s1 + $0x1284] ss:$16 sps:$4 sm:$0xff]  }
  0xf8   :  { %5258 = vmatpush2.bf16.msra.mxu1 %v7626_v4  ;;  %5218 = vmatprep.subr.bf16.mxu0 %v7631_v7  ;;  %v7660_v4 = vld [vmem:[%s11219_s1 + $0x1080] ss:$16 sps:$4 sm:$0xff]  }
  0xf9   :  { %5259 = vmatprep.subr.bf16.mxu1 %v7634_v8  ;;  %v7663_v7 = vld [vmem:[%s11219_s1 + $0x1280] ss:$16 sps:$4 sm:$0xff]   ;;  %v7668_v8 = vld [vmem:[%s11219_s1 + $0x1064] ss:$16 sps:$4 sm:$0xff]  }
  0xfb   :  { %5219 = vmatpush2.bf16.msra.mxu0 %v7629_v10  ;;  %v7671_v10 = vld [vmem:[%s11219_s1 + $0x1264] ss:$16 sps:$4 sm:$0xff]  }
  0xfc   :  { %5260 = vmatpush2.bf16.msra.mxu1 %v7632_v11  ;;  %5220 = vmatprep.subr.bf16.mxu0 %v7637_v12  ;;  %v7666_v11 = vld [vmem:[%s11219_s1 + $0x1060] ss:$16 sps:$4 sm:$0xff]  }
  0xfd   :  { %5261 = vmatprep.subr.bf16.mxu1 %v7640_v14  ;;  %v7669_v12 = vld [vmem:[%s11219_s1 + $0x1260] ss:$16 sps:$4 sm:$0xff]   ;;  %v7674_v14 = vld [vmem:[%s11219_s1 + $0x1044] ss:$16 sps:$4 sm:$0xff]  }
  0xff   :  { %5221 = vmatpush2.bf16.msra.mxu0 %v7635_v15  ;;  %v7677_v15 = vld [vmem:[%s11219_s1 + $0x1244] ss:$16 sps:$4 sm:$0xff]  }
 0x100   :  { %5262 = vmatpush2.bf16.msra.mxu1 %v7638_v19  ;;  %5272 = vmatprep.subr.bf16.mxu0 %v7644_v24  ;;  %v7675_v19 = vld [vmem:[%s11219_s1 + $0x1240] ss:$16 sps:$4 sm:$0xff]  }
 0x101   :  { %5313 = vmatprep.subr.bf16.mxu1 %v7647_v25  ;;  %v7678_v24 = vld [vmem:[%s11219_s1 + $0x1020] ss:$16 sps:$4 sm:$0xff]  }
 0x102   :  { %v4978_v39 = vpop.f32.mrf.mxu0  ;;  %5223 = vmatmul.mubr.bf16.vlgmr.msra.gmra.mxu0 %v9386_v21  ;;  %v7681_v25 = vld [vmem:[%s11219_s1 + $0x1220] ss:$16 sps:$4 sm:$0xff]  }
 0x103   :  { %v5019_v40 = vpop.f32.mrf.mxu1  ;;  %5264 = vmatmul.mubr.bf16.vlgmr.msra.gmra.mxu1 %v9401_v43  ;;  %v4979_v46 = vadd.f32 %v4978_v39, %v814_v31  ;;  %5273 = vmatpush1.bf16.msra.mxu0 %v7642_v29  ;;  %v7689_v29 = vld [vmem:[%s11219_s1 + $0x1204] ss:$16 sps:$4 sm:$0xff]   ;;  %v7687_v31 = vld [vmem:[%s11219_s1 + $0x1200] ss:$16 sps:$4 sm:$0xff]  }
 0x104   :  { %5314 = vmatpush1.bf16.msra.mxu1 %v7645_v30  ;;  %v4980_v47 = vpop.f32.mrf.mxu0  ;;  %5274 = vmatprep.subr.bf16.mxu0 %v7650_v32  ;;  %v7684_v30 = vld [vmem:[%s11219_s1 + $0x1000] ss:$16 sps:$4 sm:$0xff]   ;;  %v7692_v32 = vld [vmem:[%s11219_s1 + $0x11e4] ss:$16 sps:$4 sm:$0xff]  }
 0x105   :  { %v5021_v48 = vpop.f32.mrf.mxu1  ;;  %5315 = vmatprep.subr.bf16.mxu1 %v7653_v34  ;;  %v9433_v52 = vadd.f32 %v5019_v40, %v4979_v46  ;;  %v4981_v54 = vadd.f32 %v4980_v47, %v818_v35  ;;  %5304 = vmatprep.mubr.bf16.mxu0 %v9397_v28  ;;  %v7695_v34 = vld [vmem:[%s11219_s1 + $0x13e4] ss:$16 sps:$4 sm:$0xff]   ;;  %v7690_v35 = vld [vmem:[%s11219_s1 + $0x11e0] ss:$16 sps:$4 sm:$0xff]  }
 0x106   :  { %5345 = vmatprep.mubr.bf16.mxu1 %v9417_v38  ;;  %v4982_v58 = vpop.f32.mrf.mxu0  ;;  %v7693_v39 = vld [vmem:[%s11219_s1 + $0x13e0] ss:$16 sps:$4 sm:$0xff]   ;;  %v7698_v40 = vld [vmem:[%s11219_s1 + $0x11c4] ss:$16 sps:$4 sm:$0xff]  }
 0x107   :  { %v5023_v59 = vpop.f32.mrf.mxu1  ;;  %v9443_v61 = vadd.f32 %v5021_v48, %v4981_v54  ;;  %5275 = vmatpush1.bf16.msra.mxu0 %v7648_v41  ;;  %v7701_v41 = vld [vmem:[%s11219_s1 + $0x13c4] ss:$16 sps:$4 sm:$0xff]   ;;  %v7699_v46 = vld [vmem:[%s11219_s1 + $0x13c0] ss:$16 sps:$4 sm:$0xff]  }
 0x108   :  { %5316 = vmatpush1.bf16.msra.mxu1 %v7651_v33  ;;  %v4983_v62 = vpop.f32.mrf.mxu0  ;;  %5276 = vmatprep.subr.bf16.mxu0 %v7656_v50  ;;  %v7696_v33 = vld [vmem:[%s11219_s1 + $0x11c0] ss:$16 sps:$4 sm:$0xff]   ;;  %v7704_v47 = vld [vmem:[%s11219_s1 + $0x11a4] ss:$16 sps:$4 sm:$0xff]  }
 0x109   :  { %v5024_v1 = vpop.f32.mrf.mxu1  ;;  %5317 = vmatprep.subr.bf16.mxu1 %v7659_v51  ;;  %v7707_v48 = vld [vmem:[%s11219_s1 + $0x13a4] ss:$16 sps:$4 sm:$0xff]   ;;  %v7702_v50 = vld [vmem:[%s11219_s1 + $0x11a0] ss:$16 sps:$4 sm:$0xff]  }
 0x10a   :  { %v7705_v51 = vld [vmem:[%s11219_s1 + $0x13a0] ss:$16 sps:$4 sm:$0xff]   ;;  %v7710_v54 = vld [vmem:[%s11219_s1 + $0x1184] ss:$16 sps:$4 sm:$0xff]  }
 0x10b   :  { %5277 = vmatpush1.bf16.msra.mxu0 %v7654_v55  ;;  %v7713_v55 = vld [vmem:[%s11219_s1 + $0x1384] ss:$16 sps:$4 sm:$0xff]   ;;  %v7711_v58 = vld [vmem:[%s11219_s1 + $0x1380] ss:$16 sps:$4 sm:$0xff]  }
 0x10c   :  { %5318 = vmatpush1.bf16.msra.mxu1 %v7657_v56  ;;  %5278 = vmatprep.subr.bf16.mxu0 %v7662_v2  ;;  %v7708_v56 = vld [vmem:[%s11219_s1 + $0x1180] ss:$16 sps:$4 sm:$0xff]   ;;  %v7716_v59 = vld [vmem:[%s11219_s1 + $0x1164] ss:$16 sps:$4 sm:$0xff]  }
 0x10d   :  { %5319 = vmatprep.subr.bf16.mxu1 %v7665_v3  ;;  %v7719_v62 = vld [vmem:[%s11219_s1 + $0x1364] ss:$16 sps:$4 sm:$0xff]   ;;  %v7714_v1 = vld [vmem:[%s11219_s1 + $0x1160] ss:$16 sps:$4 sm:$0xff]  }
 0x10e   :  { %v7717_v2 = vld [vmem:[%s11219_s1 + $0x1360] ss:$16 sps:$4 sm:$0xff]   ;;  %v7722_v3 = vld [vmem:[%s11219_s1 + $0x1144] ss:$16 sps:$4 sm:$0xff]  }
 0x10f   :  { %5279 = vmatpush1.bf16.msra.mxu0 %v7660_v4  ;;  %v7725_v4 = vld [vmem:[%s11219_s1 + $0x1344] ss:$16 sps:$4 sm:$0xff]  }
 0x110   :  { %5320 = vmatpush1.bf16.msra.mxu1 %v7663_v7  ;;  %5280 = vmatprep.subr.bf16.mxu0 %v7668_v8  ;;  %v933_v7 = vcombine.high %v9349_v5, %v9349_v5  ;;  %v7720_v8 = vld [vmem:[%s11219_s1 + $0x1140] ss:$16 sps:$4 sm:$0xff]   ;;  %v7731_v5 = vld [vmem:[%s11219_s1 + $0x1324] ss:$16 sps:$4 sm:$0xff]  }
 0x111   :  { %5321 = vmatprep.subr.bf16.mxu1 %v7671_v10  ;;  %v7723_v10 = vld [vmem:[%s11219_s1 + $0x1340] ss:$16 sps:$4 sm:$0xff]  }
 0x113   :  { %5281 = vmatpush1.bf16.msra.mxu0 %v7666_v11  ;;  %v7728_v11 = vld [vmem:[%s11219_s1 + $0x1124] ss:$16 sps:$4 sm:$0xff]  }
 0x114   :  { %5322 = vmatpush1.bf16.msra.mxu1 %v7669_v12  ;;  %5282 = vmatprep.subr.bf16.mxu0 %v7674_v14  ;;  %v9586_v12 = vrot.slane %v933_v7, %v8640_v49  ;;  %v7726_v14 = vld [vmem:[%s11219_s1 + $0x1120] ss:$16 sps:$4 sm:$0xff]  }
 0x115   :  { %5323 = vmatprep.subr.bf16.mxu1 %v7677_v15  ;;  %v7729_v15 = vld [vmem:[%s11219_s1 + $0x1320] ss:$16 sps:$4 sm:$0xff]  }
 0x116   :  { %v7756_v7 = vld [vmem:[%s11219_s1 + $0x1480] ss:$16 sps:$4 sm:$0xff]  }
 0x117   :  { %5283 = vmatpush1.bf16.msra.mxu0 %v7672_v16  ;;  %v7734_v16 = vld [vmem:[%s11219_s1 + $0x1104] ss:$16 sps:$4 sm:$0xff]  }
 0x118   :  { %5324 = vmatpush1.bf16.msra.mxu1 %v7675_v19  ;;  %5284 = vmatprep.subr.bf16.mxu0 %v7680_v20  ;;  %v7737_v19 = vld [vmem:[%s11219_s1 + $0x1304] ss:$16 sps:$4 sm:$0xff]   ;;  %v949_v20 = vcombine.high %v9586_v12, %v9586_v12 }
 0x119   :  { %5325 = vmatprep.subr.bf16.mxu1 %v7683_v22  ;;  %v9604_v22 = vrot.slane %v9359_v9, %v8640_v49  ;;  %v7743_v9 = vld [vmem:[%s11219_s1 + $0x16e4] ss:$16 sps:$4 sm:$0xff]  }
 0x11b   :  { %5285 = vmatpush1.bf16.msra.mxu0 %v7678_v24  ;;  %v7732_v24 = vld [vmem:[%s11219_s1 + $0x1100] ss:$16 sps:$4 sm:$0xff]  }
 0x11c   :  { %5326 = vmatpush1.bf16.msra.mxu1 %v7681_v25  ;;  %5286 = vmatprep.subr.bf16.mxu0 %v7686_v26  ;;  %v7735_v25 = vld [vmem:[%s11219_s1 + $0x1300] ss:$16 sps:$4 sm:$0xff]   ;;  %v7740_v26 = vld [vmem:[%s11219_s1 + $0x14e4] ss:$16 sps:$4 sm:$0xff]  }
 0x11d   :  { %5327 = vmatprep.subr.bf16.mxu1 %v7689_v29  ;;  %v7738_v29 = vld [vmem:[%s11219_s1 + $0x14e0] ss:$16 sps:$4 sm:$0xff]  }
 0x11f   :  { %5287 = vmatpush1.bf16.msra.mxu0 %v7684_v30  ;;  %v7741_v30 = vld [vmem:[%s11219_s1 + $0x16e0] ss:$16 sps:$4 sm:$0xff]  }
 0x120   :  { %5328 = vmatpush1.bf16.msra.mxu1 %v7687_v31  ;;  %5288 = vmatprep.subr.bf16.mxu0 %v7692_v32  ;;  %v9625_v31 = vrot.slane %v949_v20, %v8640_v49  ;;  %v9629_v32 = vcombine.high %v9604_v22, %v9604_v22  ;;  %v7771_v20 = vld [vmem:[%s11219_s1 + $0x1640] ss:$16 sps:$4 sm:$0xff]  }
 0x121   :  { %5329 = vmatprep.subr.bf16.mxu1 %v7695_v34  ;;  %v7746_v34 = vld [vmem:[%s11219_s1 + $0x14c4] ss:$16 sps:$4 sm:$0xff]  }
 0x123   :  { %5289 = vmatpush2.bf16.msra.mxu0 %v7690_v35  ;;  %v7749_v35 = vld [vmem:[%s11219_s1 + $0x16c4] ss:$16 sps:$4 sm:$0xff]  }
 0x124   :  { %5330 = vmatpush2.bf16.msra.mxu1 %v7693_v39  ;;  %5290 = vmatprep.subr.bf16.mxu0 %v7698_v40  ;;  %v7744_v39 = vld [vmem:[%s11219_s1 + $0x14c0] ss:$16 sps:$4 sm:$0xff]  }
 0x125   :  { %5331 = vmatprep.subr.bf16.mxu1 %v7701_v41  ;;  %v7747_v40 = vld [vmem:[%s11219_s1 + $0x16c0] ss:$16 sps:$4 sm:$0xff]   ;;  %v9645_v41 = vcombine.high %v9625_v31, %v9625_v31 }
 0x127   :  { %5291 = vmatpush2.bf16.msra.mxu0 %v7696_v33 }
 0x128   :  { %5332 = vmatpush2.bf16.msra.mxu1 %v7699_v46  ;;  %5292 = vmatprep.subr.bf16.mxu0 %v7704_v47 }
 0x129   :  { %5333 = vmatprep.subr.bf16.mxu1 %v7707_v48 }
 0x12b   :  { %5293 = vmatpush2.bf16.msra.mxu0 %v7702_v50 }
 0x12c   :  { %5334 = vmatpush2.bf16.msra.mxu1 %v7705_v51  ;;  %5294 = vmatprep.subr.bf16.mxu0 %v7710_v54  ;;  %v7752_v51 = vld [vmem:[%s11219_s1 + $0x14a4] ss:$16 sps:$4 sm:$0xff]  }
 0x12d   :  { %5335 = vmatprep.subr.bf16.mxu1 %v7713_v55  ;;  %v7755_v54 = vld [vmem:[%s11219_s1 + $0x16a4] ss:$16 sps:$4 sm:$0xff]  }
 0x12f   :  { %5295 = vmatpush2.bf16.msra.mxu0 %v7708_v56 }
 0x130   :  { %5336 = vmatpush2.bf16.msra.mxu1 %v7711_v58  ;;  %5296 = vmatprep.subr.bf16.mxu0 %v7716_v59  ;;  %v7753_v58 = vld [vmem:[%s11219_s1 + $0x16a0] ss:$16 sps:$4 sm:$0xff]  }
 0x131   :  { %5337 = vmatprep.subr.bf16.mxu1 %v7719_v62 }
 0x133   :  { %5297 = vmatpush2.bf16.msra.mxu0 %v7714_v1 }
 0x134   :  { %5338 = vmatpush2.bf16.msra.mxu1 %v7717_v2  ;;  %5298 = vmatprep.subr.bf16.mxu0 %v7722_v3  ;;  %v7758_v3 = vld [vmem:[%s11219_s1 + $0x1484] ss:$16 sps:$4 sm:$0xff]  }
 0x135   :  { %5339 = vmatprep.subr.bf16.mxu1 %v7725_v4  ;;  %v7761_v4 = vld [vmem:[%s11219_s1 + $0x1684] ss:$16 sps:$4 sm:$0xff]  }
 0x137   :  { %5299 = vmatpush2.bf16.msra.mxu0 %v7720_v8  ;;  %v7759_v8 = vld [vmem:[%s11219_s1 + $0x1680] ss:$16 sps:$4 sm:$0xff]  }
 0x138   :  { %5340 = vmatpush2.bf16.msra.mxu1 %v7723_v10  ;;  %5300 = vmatprep.subr.bf16.mxu0 %v7728_v11  ;;  %v7764_v10 = vld [vmem:[%s11219_s1 + $0x1464] ss:$16 sps:$4 sm:$0xff]  }
 0x139   :  { %5341 = vmatprep.subr.bf16.mxu1 %v7731_v5  ;;  %v7767_v11 = vld [vmem:[%s11219_s1 + $0x1664] ss:$16 sps:$4 sm:$0xff]   ;;  %v7762_v5 = vld [vmem:[%s11219_s1 + $0x1460] ss:$16 sps:$4 sm:$0xff]  }
 0x13b   :  { %5301 = vmatpush2.bf16.msra.mxu0 %v7726_v14  ;;  %v7765_v14 = vld [vmem:[%s11219_s1 + $0x1660] ss:$16 sps:$4 sm:$0xff]  }
 0x13c   :  { %5342 = vmatpush2.bf16.msra.mxu1 %v7729_v15  ;;  %5302 = vmatprep.subr.bf16.mxu0 %v7734_v16  ;;  %v7770_v15 = vld [vmem:[%s11219_s1 + $0x1444] ss:$16 sps:$4 sm:$0xff]  }
 0x13d   :  { %5343 = vmatprep.subr.bf16.mxu1 %v7737_v19  ;;  %v7773_v16 = vld [vmem:[%s11219_s1 + $0x1644] ss:$16 sps:$4 sm:$0xff]   ;;  %v7768_v19 = vld [vmem:[%s11219_s1 + $0x1440] ss:$16 sps:$4 sm:$0xff]  }
 0x13f   :  { %5303 = vmatpush2.bf16.msra.mxu0 %v7732_v24  ;;  %v7776_v24 = vld [vmem:[%s11219_s1 + $0x1424] ss:$16 sps:$4 sm:$0xff]  }
 0x140   :  { %5344 = vmatpush2.bf16.msra.mxu1 %v7735_v25  ;;  %5354 = vmatprep.subr.bf16.mxu0 %v7740_v26  ;;  %v7779_v25 = vld [vmem:[%s11219_s1 + $0x1624] ss:$16 sps:$4 sm:$0xff]   ;;  %v7774_v26 = vld [vmem:[%s11219_s1 + $0x1420] ss:$16 sps:$4 sm:$0xff]  }
 0x141   :  { %5395 = vmatprep.subr.bf16.mxu1 %v7743_v9  ;;  %v7777_v9 = vld [vmem:[%s11219_s1 + $0x1620] ss:$16 sps:$4 sm:$0xff]  }
 0x142   :  { %v5060_v33 = vpop.f32.mrf.mxu0  ;;  %5305 = vmatmul.mubr.bf16.vlgmr.msra.gmra.mxu0 %v9604_v22 }
 0x143   :  { %v5101_v46 = vpop.f32.mrf.mxu1  ;;  %5346 = vmatmul.mubr.bf16.vlgmr.msra.gmra.mxu1 %v9629_v32  ;;  %v5061_v47 = vadd.f32 %v5060_v33, %v9433_v52  ;;  %5355 = vmatpush1.bf16.msra.mxu0 %v7738_v29  ;;  %v7750_v52 = vld [vmem:[%s11219_s1 + $0x14a0] ss:$16 sps:$4 sm:$0xff]   ;;  %v7782_v29 = vld [vmem:[%s11219_s1 + $0x1404] ss:$16 sps:$4 sm:$0xff]  }
 0x144   :  { %5396 = vmatpush1.bf16.msra.mxu1 %v7741_v30  ;;  %v5062_v48 = vpop.f32.mrf.mxu0  ;;  %5356 = vmatprep.subr.bf16.mxu0 %v7746_v34  ;;  %v7785_v30 = vld [vmem:[%s11219_s1 + $0x1604] ss:$16 sps:$4 sm:$0xff]   ;;  %v7780_v34 = vld [vmem:[%s11219_s1 + $0x1400] ss:$16 sps:$4 sm:$0xff]  }
 0x145   :  { %v5103_v50 = vpop.f32.mrf.mxu1  ;;  %5397 = vmatprep.subr.bf16.mxu1 %v7749_v35  ;;  %v9656_v55 = vadd.f32 %v5101_v46, %v5061_v47  ;;  %v5063_v56 = vadd.f32 %v5062_v48, %v9443_v61  ;;  %5386 = vmatprep.mubr.bf16.mxu0 %v9625_v31  ;;  %v7783_v35 = vld [vmem:[%s11219_s1 + $0x1600] ss:$16 sps:$4 sm:$0xff]   ;;  %v7794_v47 = vld [vmem:[%s11219_s1 + $0x15c4] ss:$16 sps:$4 sm:$0xff]  }
 0x146   :  { %5427 = vmatprep.mubr.bf16.mxu1 %v9645_v41  ;;  %v5064_v59 = vpop.f32.mrf.mxu0  ;;  %v7786_v33 = vld [vmem:[%s11219_s1 + $0x15e0] ss:$16 sps:$4 sm:$0xff]   ;;  %v7797_v48 = vld [vmem:[%s11219_s1 + $0x17c4] ss:$16 sps:$4 sm:$0xff]  }
 0x147   :  { %v5105_v62 = vpop.f32.mrf.mxu1  ;;  %v9667_v1 = vadd.f32 %v5103_v50, %v5063_v56  ;;  %5357 = vmatpush1.bf16.msra.mxu0 %v7744_v39  ;;  %v7788_v39 = vld [vmem:[%s11219_s1 + $0x15e4] ss:$16 sps:$4 sm:$0xff]   ;;  %v7789_v46 = vld [vmem:[%s11219_s1 + $0x17e0] ss:$16 sps:$4 sm:$0xff]  }
 0x148   :  { %5398 = vmatpush1.bf16.msra.mxu1 %v7747_v40  ;;  %v5065_v2 = vpop.f32.mrf.mxu0  ;;  %5358 = vmatprep.subr.bf16.mxu0 %v7752_v51  ;;  %v7791_v40 = vld [vmem:[%s11219_s1 + $0x17e4] ss:$16 sps:$4 sm:$0xff]   ;;  %v7792_v50 = vld [vmem:[%s11219_s1 + $0x15c0] ss:$16 sps:$4 sm:$0xff]  }
 0x149   :  { %v5106_v61 = vpop.f32.mrf.mxu1  ;;  %5399 = vmatprep.subr.bf16.mxu1 %v7755_v54  ;;  %v7795_v51 = vld [vmem:[%s11219_s1 + $0x17c0] ss:$16 sps:$4 sm:$0xff]   ;;  %v7800_v54 = vld [vmem:[%s11219_s1 + $0x15a4] ss:$16 sps:$4 sm:$0xff]  }
 0x14a   :  { %v7803_v56 = vld [vmem:[%s11219_s1 + $0x17a4] ss:$16 sps:$4 sm:$0xff]   ;;  %v7804_v2 = vld [vmem:[%s11219_s1 + $0x1580] ss:$16 sps:$4 sm:$0xff]  }
 0x14b   :  { %5359 = vmatpush1.bf16.msra.mxu0 %v7750_v52  ;;  %v7798_v52 = vld [vmem:[%s11219_s1 + $0x15a0] ss:$16 sps:$4 sm:$0xff]   ;;  %v7806_v59 = vld [vmem:[%s11219_s1 + $0x1584] ss:$16 sps:$4 sm:$0xff]  }
 0x14c   :  { %5400 = vmatpush1.bf16.msra.mxu1 %v7753_v58  ;;  %5360 = vmatprep.subr.bf16.mxu0 %v7758_v3  ;;  %v7801_v58 = vld [vmem:[%s11219_s1 + $0x17a0] ss:$16 sps:$4 sm:$0xff]   ;;  %v7809_v62 = vld [vmem:[%s11219_s1 + $0x1784] ss:$16 sps:$4 sm:$0xff]  }
 0x14d   :  { %5401 = vmatprep.subr.bf16.mxu1 %v7761_v4  ;;  %v7807_v61 = vld [vmem:[%s11219_s1 + $0x1780] ss:$16 sps:$4 sm:$0xff]   ;;  %v7812_v3 = vld [vmem:[%s11219_s1 + $0x1564] ss:$16 sps:$4 sm:$0xff]  }
 0x14e   :  { %v7815_v4 = vld [vmem:[%s11219_s1 + $0x1764] ss:$16 sps:$4 sm:$0xff]  }
 0x14f   :  { %5361 = vmatpush1.bf16.msra.mxu0 %v7756_v7  ;;  %v7810_v7 = vld [vmem:[%s11219_s1 + $0x1560] ss:$16 sps:$4 sm:$0xff]  }
 0x150   :  { %5402 = vmatpush1.bf16.msra.mxu1 %v7759_v8  ;;  %5362 = vmatprep.subr.bf16.mxu0 %v7764_v10  ;;  %v7813_v8 = vld [vmem:[%s11219_s1 + $0x1760] ss:$16 sps:$4 sm:$0xff]   ;;  %v7818_v10 = vld [vmem:[%s11219_s1 + $0x1544] ss:$16 sps:$4 sm:$0xff]  }
 0x151   :  { %5403 = vmatprep.subr.bf16.mxu1 %v7767_v11  ;;  %v7821_v11 = vld [vmem:[%s11219_s1 + $0x1744] ss:$16 sps:$4 sm:$0xff]  }
 0x153   :  { %5363 = vmatpush1.bf16.msra.mxu0 %v7762_v5  ;;  %v7816_v5 = vld [vmem:[%s11219_s1 + $0x1540] ss:$16 sps:$4 sm:$0xff]  }
 0x154   :  { %5404 = vmatpush1.bf16.msra.mxu1 %v7765_v14  ;;  %5364 = vmatprep.subr.bf16.mxu0 %v7770_v15  ;;  %v7819_v14 = vld [vmem:[%s11219_s1 + $0x1740] ss:$16 sps:$4 sm:$0xff]   ;;  %v7824_v15 = vld [vmem:[%s11219_s1 + $0x1524] ss:$16 sps:$4 sm:$0xff]  }
 0x155   :  { %5405 = vmatprep.subr.bf16.mxu1 %v7773_v16  ;;  %v7827_v16 = vld [vmem:[%s11219_s1 + $0x1724] ss:$16 sps:$4 sm:$0xff]  }
 0x157   :  { %5365 = vmatpush1.bf16.msra.mxu0 %v7768_v19  ;;  %v7822_v19 = vld [vmem:[%s11219_s1 + $0x1520] ss:$16 sps:$4 sm:$0xff]  }
 0x158   :  { %5406 = vmatpush1.bf16.msra.mxu1 %v7771_v20  ;;  %5366 = vmatprep.subr.bf16.mxu0 %v7776_v24  ;;  %v7825_v20 = vld [vmem:[%s11219_s1 + $0x1720] ss:$16 sps:$4 sm:$0xff]   ;;  %v7830_v24 = vld [vmem:[%s11219_s1 + $0x1504] ss:$16 sps:$4 sm:$0xff]  }
 0x159   :  { %5407 = vmatprep.subr.bf16.mxu1 %v7779_v25  ;;  %v7833_v25 = vld [vmem:[%s11219_s1 + $0x1704] ss:$16 sps:$4 sm:$0xff]  }
 0x15b   :  { %5367 = vmatpush1.bf16.msra.mxu0 %v7774_v26  ;;  %v9821_v26 = vrot.slane %v9586_v12, %v8640_v49  ;;  %v7840_v12 = vld [vmem:[%s11219_s1 + $0xec] ss:$16 sps:$4 sm:$0xff]  }
 0x15c   :  { %5408 = vmatpush1.bf16.msra.mxu1 %v7777_v9  ;;  %5368 = vmatprep.subr.bf16.mxu0 %v7782_v29  ;;  %v7828_v9 = vld [vmem:[%s11219_s1 + $0x1500] ss:$16 sps:$4 sm:$0xff]  }
 0x15d   :  { %5409 = vmatprep.subr.bf16.mxu1 %v7785_v30  ;;  %v7831_v29 = vld [vmem:[%s11219_s1 + $0x1700] ss:$16 sps:$4 sm:$0xff]   ;;  %v7837_v30 = vld [vmem:[%s11219_s1 + $0x1864] ss:$16 sps:$4 sm:$0xff]  }
 0x15f   :  { %5369 = vmatpush1.bf16.msra.mxu0 %v7780_v34  ;;  %v7835_v34 = vld [vmem:[%s11219_s1 + $0x1860] ss:$16 sps:$4 sm:$0xff]  }
 0x160   :  { %5410 = vmatpush1.bf16.msra.mxu1 %v7783_v35  ;;  %5370 = vmatprep.subr.bf16.mxu0 %v7788_v39  ;;  %v7838_v35 = vld [vmem:[%s11219_s1 + $0xe8] ss:$16 sps:$4 sm:$0xff]   ;;  %v9843_v39 = vcombine.high %v9821_v26, %v9821_v26 }
 0x161   :  { %5411 = vmatprep.subr.bf16.mxu1 %v7791_v40  ;;  %v7843_v40 = vld [vmem:[%s11219_s1 + $0x1844] ss:$16 sps:$4 sm:$0xff]  }
 0x163   :  { %5371 = vmatpush2.bf16.msra.mxu0 %v7786_v33  ;;  %v7846_v33 = vld [vmem:[%s11219_s1 + $0xcc] ss:$16 sps:$4 sm:$0xff]  }
 0x164   :  { %5412 = vmatpush2.bf16.msra.mxu1 %v7789_v46  ;;  %5372 = vmatprep.subr.bf16.mxu0 %v7794_v47  ;;  %v7841_v46 = vld [vmem:[%s11219_s1 + $0x1840] ss:$16 sps:$4 sm:$0xff]   ;;  %v7844_v47 = vld [vmem:[%s11219_s1 + $0xc8] ss:$16 sps:$4 sm:$0xff]  }
 0x165   :  { %5413 = vmatprep.subr.bf16.mxu1 %v7797_v48 }
 0x167   :  { %5373 = vmatpush2.bf16.msra.mxu0 %v7792_v50 }
 0x168   :  { %5414 = vmatpush2.bf16.msra.mxu1 %v7795_v51  ;;  %5374 = vmatprep.subr.bf16.mxu0 %v7800_v54 }
 0x169   :  { %5415 = vmatprep.subr.bf16.mxu1 %v7803_v56 }
 0x16b   :  { %5375 = vmatpush2.bf16.msra.mxu0 %v7798_v52  ;;  %v7849_v52 = vld [vmem:[%s11219_s1 + $0x1824] ss:$16 sps:$4 sm:$0xff]  }
 0x16c   :  { %5416 = vmatpush2.bf16.msra.mxu1 %v7801_v58  ;;  %5376 = vmatprep.subr.bf16.mxu0 %v7806_v59  ;;  %v7852_v58 = vld [vmem:[%s11219_s1 + $0xac] ss:$16 sps:$4 sm:$0xff]  }
 0x16d   :  { %5417 = vmatprep.subr.bf16.mxu1 %v7809_v62 }
 0x16f   :  { %5377 = vmatpush2.bf16.msra.mxu0 %v7804_v2  ;;  %v7850_v2 = vld [vmem:[%s11219_s1 + $0xa8] ss:$16 sps:$4 sm:$0xff]  }
 0x170   :  { %5418 = vmatpush2.bf16.msra.mxu1 %v7807_v61  ;;  %5378 = vmatprep.subr.bf16.mxu0 %v7812_v3  ;;  %v8473_v61 = vmov 0  }
 0x171   :  { %5419 = vmatprep.subr.bf16.mxu1 %v7815_v4 }
 0x173   :  { %5379 = vmatpush2.bf16.msra.mxu0 %v7810_v7 }
 0x174   :  { %5420 = vmatpush2.bf16.msra.mxu1 %v7813_v8  ;;  %5380 = vmatprep.subr.bf16.mxu0 %v7818_v10  ;;  %v7855_v10 = vld [vmem:[%s11219_s1 + $0x1804] ss:$16 sps:$4 sm:$0xff]  }
 0x175   :  { %5421 = vmatprep.subr.bf16.mxu1 %v7821_v11  ;;  %v7858_v11 = vld [vmem:[%s11219_s1 + $0x8c] ss:$16 sps:$4 sm:$0xff]  }
 0x177   :  { %5381 = vmatpush2.bf16.msra.mxu0 %v7816_v5  ;;  %v7856_v5 = vld [vmem:[%s11219_s1 + $0x88] ss:$16 sps:$4 sm:$0xff]  }
 0x178   :  { %5422 = vmatpush2.bf16.msra.mxu1 %v7819_v14  ;;  %5382 = vmatprep.subr.bf16.mxu0 %v7824_v15  ;;  %v6390_v14 = vld.sshfl [vmem:[%s11220_s0 + $0x18] sm:$0x1 pattern:$0x75316420]  ;;  %v7861_v15 = vld [vmem:[%s11219_s1 + $0x6c] ss:$16 sps:$4 sm:$0xff]  }
 0x179   :  { %5423 = vmatprep.subr.bf16.mxu1 %v7827_v16  ;;  %v7864_v16 = vld [vmem:[%s11219_s1 + $0x2ec] ss:$16 sps:$4 sm:$0xff]  }
 0x17b   :  { %5383 = vmatpush2.bf16.msra.mxu0 %v7822_v19  ;;  %v7859_v19 = vld [vmem:[%s11219_s1 + $0x68] ss:$16 sps:$4 sm:$0xff]  }
 0x17c   :  { %5424 = vmatpush2.bf16.msra.mxu1 %v7825_v20  ;;  %5384 = vmatprep.subr.bf16.mxu0 %v7830_v24  ;;  %v7862_v20 = vld [vmem:[%s11219_s1 + $0x2e8] ss:$16 sps:$4 sm:$0xff]   ;;  %v9907_v24 = vrot.slane %v6390_v14, %v8640_v49 }
 0x17d   :  { %5425 = vmatprep.subr.bf16.mxu1 %v7833_v25  ;;  %v7867_v25 = vld [vmem:[%s11219_s1 + $0x4c] ss:$16 sps:$4 sm:$0xff]   ;;  %v7865_v49 = vld [vmem:[%s11219_s1 + $0x48] ss:$16 sps:$4 sm:$0xff]  }
 0x17e   :  { %v7910_v14 = vld [vmem:[%s11219_s1 + $0x3e8] ss:$16 sps:$4 sm:$0xff]  }
 0x17f   :  { %5385 = vmatpush2.bf16.msra.mxu0 %v7828_v9  ;;  %v7870_v9 = vld [vmem:[%s11219_s1 + $0x2cc] ss:$16 sps:$4 sm:$0xff]  }
 0x180   :  { %5426 = vmatpush2.bf16.msra.mxu1 %v7831_v29  ;;  %5444 = vmatprep.subr.bf16.mxu0 %v7837_v30  ;;  %v7868_v29 = vld [vmem:[%s11219_s1 + $0x2c8] ss:$16 sps:$4 sm:$0xff]   ;;  %v7873_v30 = vld [vmem:[%s11219_s1 + $0x2c] ss:$16 sps:$4 sm:$0xff]  }
 0x181   :  { %5477 = vmatprep.subr.bf16.mxu1 %v7840_v12  ;;  %v7876_v12 = vld [vmem:[%s11219_s1 + $0x2ac] ss:$16 sps:$4 sm:$0xff]  }
 0x182   :  { %v5142_v48 = vpop.f32.mrf.mxu0  ;;  %5387 = vmatmul.mubr.bf16.vlgmr.msra.gmra.mxu0 %v9821_v26 }
 0x183   :  { %v5183_v50 = vpop.f32.mrf.mxu1  ;;  %5428 = vmatmul.mubr.bf16.vlgmr.msra.gmra.mxu1 %v9843_v39  ;;  %v5143_v51 = vadd.f32 %v5142_v48, %v9656_v55  ;;  %5445 = vmatpush1.bf16.msra.mxu0 %v7835_v34  ;;  %v7847_v55 = vld [vmem:[%s11219_s1 + $0x1820] ss:$16 sps:$4 sm:$0xff]   ;;  %v7871_v34 = vld [vmem:[%s11219_s1 + $0x28] ss:$16 sps:$4 sm:$0xff]   ;;  %v7888_v48 = vld [vmem:[%s11219_s1 + $0x26c] ss:$16 sps:$4 sm:$0xff]  }
 0x184   :  { %5478 = vmatpush1.bf16.msra.mxu1 %v7838_v35  ;;  %v5144_v54 = vpop.f32.mrf.mxu0  ;;  %5446 = vmatprep.subr.bf16.mxu0 %v7843_v40  ;;  %v7874_v35 = vld [vmem:[%s11219_s1 + $0x2a8] ss:$16 sps:$4 sm:$0xff]   ;;  %v7879_v40 = vld [vmem:[%s11219_s1 + $0xc] ss:$16 sps:$4 sm:$0xff]  }
 0x185   :  { %v5185_v56 = vpop.f32.mrf.mxu1  ;;  %5479 = vmatprep.subr.bf16.mxu1 %v7846_v33  ;;  %v9866_v59 = vadd.f32 %v5183_v50, %v5143_v51  ;;  %v5145_v62 = vadd.f32 %v5144_v54, %v9667_v1  ;;  %5468 = vmatprep.mubr.bf16.mxu0 %v8473_v61  ;;  %v7877_v33 = vld [vmem:[%s11219_s1 + $0x8] ss:$16 sps:$4 sm:$0xff]   ;;  %v7891_v54 = vld [vmem:[%s11219_s1 + $0x1cc] ss:$16 sps:$4 sm:$0xff]  }
 0x186   :  { %5509 = vmatprep.mubr.bf16.mxu1 %v8668_v60  ;;  %v5146_v3 = vpop.f32.mrf.mxu0  ;;  %v7853_v60 = vld [vmem:[%s11219_s1 + $0x1800] ss:$16 sps:$4 sm:$0xff]   ;;  %v7883_v50 = vld [vmem:[%s11219_s1 + $0x1e8] ss:$16 sps:$4 sm:$0xff]  }
 0x187   :  { %v5187_v4 = vpop.f32.mrf.mxu1  ;;  %v9877_v7 = vadd.f32 %v5185_v56, %v5145_v62  ;;  %5447 = vmatpush1.bf16.msra.mxu0 %v7841_v46  ;;  %v7880_v46 = vld [vmem:[%s11219_s1 + $0x288] ss:$16 sps:$4 sm:$0xff]   ;;  %v7894_v56 = vld [vmem:[%s11219_s1 + $0x24c] ss:$16 sps:$4 sm:$0xff]  }
 0x188   :  { %5480 = vmatpush1.bf16.msra.mxu1 %v7844_v47  ;;  %v5147_v1 = vpop.f32.mrf.mxu0  ;;  %5448 = vmatprep.subr.bf16.mxu0 %v7849_v52  ;;  %v7885_v47 = vld [vmem:[%s11219_s1 + $0x1ec] ss:$16 sps:$4 sm:$0xff]   ;;  %v7886_v51 = vld [vmem:[%s11219_s1 + $0x268] ss:$16 sps:$4 sm:$0xff]  }
 0x189   :  { %v5188_v8 = vpop.f32.mrf.mxu1  ;;  %5481 = vmatprep.subr.bf16.mxu1 %v7852_v58  ;;  %v7889_v52 = vld [vmem:[%s11219_s1 + $0x1c8] ss:$16 sps:$4 sm:$0xff]   ;;  %v7897_v62 = vld [vmem:[%s11219_s1 + $0x1ac] ss:$16 sps:$4 sm:$0xff]  }
 0x18a   :  { %v7892_v58 = vld [vmem:[%s11219_s1 + $0x248] ss:$16 sps:$4 sm:$0xff]   ;;  %v7903_v4 = vld [vmem:[%s11219_s1 + $0x18c] ss:$16 sps:$4 sm:$0xff]  }
 0x18b   :  { %5449 = vmatpush1.bf16.msra.mxu0 %v7847_v55  ;;  %v7900_v55 = vld [vmem:[%s11219_s1 + $0x22c] ss:$16 sps:$4 sm:$0xff]   ;;  %v7898_v3 = vld [vmem:[%s11219_s1 + $0x228] ss:$16 sps:$4 sm:$0xff]  }
 0x18c   :  { %5482 = vmatpush1.bf16.msra.mxu1 %v7850_v2  ;;  %5450 = vmatprep.subr.bf16.mxu0 %v7855_v10  ;;  %v7895_v2 = vld [vmem:[%s11219_s1 + $0x1a8] ss:$16 sps:$4 sm:$0xff]   ;;  %v7906_v1 = vld [vmem:[%s11219_s1 + $0x20c] ss:$16 sps:$4 sm:$0xff]  }
 0x18d   :  { %5483 = vmatprep.subr.bf16.mxu1 %v7858_v11  ;;  %v7901_v8 = vld [vmem:[%s11219_s1 + $0x188] ss:$16 sps:$4 sm:$0xff]   ;;  %v7909_v11 = vld [vmem:[%s11219_s1 + $0x16c] ss:$16 sps:$4 sm:$0xff]  }
 0x18e   :  { %v7904_v10 = vld [vmem:[%s11219_s1 + $0x208] ss:$16 sps:$4 sm:$0xff]  }
 0x18f   :  { %5451 = vmatpush1.bf16.msra.mxu0 %v7853_v60  ;;  %v7912_v60 = vld [vmem:[%s11219_s1 + $0x3ec] ss:$16 sps:$4 sm:$0xff]  }
 0x190   :  { %5484 = vmatpush1.bf16.msra.mxu1 %v7856_v5  ;;  %5518 = vmatprep.subr.bf16.mxu0 %v7864_v16  ;;  %v7907_v5 = vld [vmem:[%s11219_s1 + $0x168] ss:$16 sps:$4 sm:$0xff]   ;;  %v7918_v16 = vld [vmem:[%s11219_s1 + $0x3cc] ss:$16 sps:$4 sm:$0xff]  }
 0x191   :  { %5485 = vmatprep.subr.bf16.mxu1 %v7861_v15  ;;  %v7915_v15 = vld [vmem:[%s11219_s1 + $0x14c] ss:$16 sps:$4 sm:$0xff]  }
 0x192   :  { %7175 = vmatmul.mubr.msk.bf16.vlgmr.msra.gmra.mxu0 %vm4940_vm0, %v9907_v24 }
 0x193   :  { %5519 = vmatpush1.bf16.msra.mxu0 %v7862_v20  ;;  %5550 = vmatprep.mubr.bf16.mxu0 %v8681_v0  ;;  %v7882_v0 = vld [vmem:[%s11219_s1 + $0x28c] ss:$16 sps:$4 sm:$0xff]   ;;  %v7916_v20 = vld [vmem:[%s11219_s1 + $0x3c8] ss:$16 sps:$4 sm:$0xff]  }
 0x194   :  { %5486 = vmatpush1.bf16.msra.mxu1 %v7859_v19  ;;  %5520 = vmatprep.subr.bf16.mxu0 %v7870_v9  ;;  %v7913_v19 = vld [vmem:[%s11219_s1 + $0x148] ss:$16 sps:$4 sm:$0xff]   ;;  %v7924_v9 = vld [vmem:[%s11219_s1 + $0x3ac] ss:$16 sps:$4 sm:$0xff]  }
 0x195   :  { %5487 = vmatprep.subr.bf16.mxu1 %v7867_v25  ;;  %v7921_v25 = vld [vmem:[%s11219_s1 + $0x12c] ss:$16 sps:$4 sm:$0xff]  }
 0x197   :  { %5521 = vmatpush1.bf16.msra.mxu0 %v7868_v29  ;;  %v7922_v29 = vld [vmem:[%s11219_s1 + $0x3a8] ss:$16 sps:$4 sm:$0xff]  }
 0x198   :  { %5488 = vmatpush1.bf16.msra.mxu1 %v7865_v49  ;;  %5522 = vmatprep.subr.bf16.mxu0 %v7876_v12  ;;  %v7919_v49 = vld [vmem:[%s11219_s1 + $0x128] ss:$16 sps:$4 sm:$0xff]   ;;  %v7930_v12 = vld [vmem:[%s11219_s1 + $0x38c] ss:$16 sps:$4 sm:$0xff]  }
 0x199   :  { %5489 = vmatprep.subr.bf16.mxu1 %v7873_v30  ;;  %v7927_v30 = vld [vmem:[%s11219_s1 + $0x10c] ss:$16 sps:$4 sm:$0xff]  }
 0x19b   :  { %5523 = vmatpush1.bf16.msra.mxu0 %v7874_v35  ;;  %v7928_v35 = vld [vmem:[%s11219_s1 + $0x388] ss:$16 sps:$4 sm:$0xff]  }
 0x19c   :  { %5490 = vmatpush1.bf16.msra.mxu1 %v7871_v34  ;;  %5524 = vmatprep.subr.bf16.mxu0 %v7882_v0  ;;  %v7925_v34 = vld [vmem:[%s11219_s1 + $0x108] ss:$16 sps:$4 sm:$0xff]   ;;  %v7936_v0 = vld [vmem:[%s11219_s1 + $0x4ec] ss:$16 sps:$4 sm:$0xff]  }
 0x19d   :  { %5491 = vmatprep.subr.bf16.mxu1 %v7879_v40  ;;  %v7933_v40 = vld [vmem:[%s11219_s1 + $0x36c] ss:$16 sps:$4 sm:$0xff]  }
 0x19f   :  { %5525 = vmatpush1.bf16.msra.mxu0 %v7880_v46  ;;  %v7934_v46 = vld [vmem:[%s11219_s1 + $0x4e8] ss:$16 sps:$4 sm:$0xff]  }
 0x1a0   :  { %5492 = vmatpush1.bf16.msra.mxu1 %v7877_v33  ;;  %5526 = vmatprep.subr.bf16.mxu0 %v7888_v48  ;;  %v7931_v33 = vld [vmem:[%s11219_s1 + $0x368] ss:$16 sps:$4 sm:$0xff]   ;;  %v7942_v48 = vld [vmem:[%s11219_s1 + $0x4cc] ss:$16 sps:$4 sm:$0xff]  }
 0x1a1   :  { %5493 = vmatprep.subr.bf16.mxu1 %v7885_v47  ;;  %v7939_v47 = vld [vmem:[%s11219_s1 + $0x34c] ss:$16 sps:$4 sm:$0xff]  }
 0x1a3   :  { %5527 = vmatpush1.bf16.msra.mxu0 %v7886_v51  ;;  %v7940_v51 = vld [vmem:[%s11219_s1 + $0x4c8] ss:$16 sps:$4 sm:$0xff]  }
 0x1a4   :  { %5494 = vmatpush2.bf16.msra.mxu1 %v7883_v50  ;;  %5528 = vmatprep.subr.bf16.mxu0 %v7894_v56  ;;  %v7937_v50 = vld [vmem:[%s11219_s1 + $0x348] ss:$16 sps:$4 sm:$0xff]  }
 0x1a5   :  { %5495 = vmatprep.subr.bf16.mxu1 %v7891_v54 }
 0x1a7   :  { %5529 = vmatpush1.bf16.msra.mxu0 %v7892_v58 }
 0x1a8   :  { %5496 = vmatpush2.bf16.msra.mxu1 %v7889_v52  ;;  %5530 = vmatprep.subr.bf16.mxu0 %v7900_v55  ;;  %v7945_v55 = vld [vmem:[%s11219_s1 + $0x32c] ss:$16 sps:$4 sm:$0xff]  }
 0x1a9   :  { %5497 = vmatprep.subr.bf16.mxu1 %v7897_v62 }
 0x1ab   :  { %5531 = vmatpush1.bf16.msra.mxu0 %v7898_v3 }
 0x1ac   :  { %5498 = vmatpush2.bf16.msra.mxu1 %v7895_v2  ;;  %5532 = vmatprep.subr.bf16.mxu0 %v7906_v1  ;;  %v7948_v2 = vld [vmem:[%s11219_s1 + $0x4ac] ss:$16 sps:$4 sm:$0xff]  }
 0x1ad   :  { %5499 = vmatprep.subr.bf16.mxu1 %v7903_v4  ;;  %v7946_v4 = vld [vmem:[%s11219_s1 + $0x4a8] ss:$16 sps:$4 sm:$0xff]  }
 0x1af   :  { %5533 = vmatpush1.bf16.msra.mxu0 %v7904_v10 }
 0x1b0   :  { %5500 = vmatpush2.bf16.msra.mxu1 %v7901_v8  ;;  %5534 = vmatprep.subr.bf16.mxu0 %v7912_v60 }
 0x1b1   :  { %5501 = vmatprep.subr.bf16.mxu1 %v7909_v11 }
 0x1b3   :  { %5535 = vmatpush2.bf16.msra.mxu0 %v7910_v14  ;;  %v7952_v14 = vld [vmem:[%s11219_s1 + $0x488] ss:$16 sps:$4 sm:$0xff]  }
 0x1b4   :  { %5502 = vmatpush2.bf16.msra.mxu1 %v7907_v5  ;;  %5536 = vmatprep.subr.bf16.mxu0 %v7918_v16  ;;  %v7954_v5 = vld [vmem:[%s11219_s1 + $0x48c] ss:$16 sps:$4 sm:$0xff]  }
 0x1b5   :  { %5503 = vmatprep.subr.bf16.mxu1 %v7915_v15  ;;  %v7957_v15 = vld [vmem:[%s11219_s1 + $0x46c] ss:$16 sps:$4 sm:$0xff]  }
 0x1b6   :  { %v7960_v16 = vld [vmem:[%s11219_s1 + $0x6ec] ss:$16 sps:$4 sm:$0xff]  }
 0x1b7   :  { %5537 = vmatpush2.bf16.msra.mxu0 %v7916_v20  ;;  %v7958_v20 = vld [vmem:[%s11219_s1 + $0x6e8] ss:$16 sps:$4 sm:$0xff]  }
 0x1b8   :  { %5504 = vmatpush2.bf16.msra.mxu1 %v7913_v19  ;;  %5538 = vmatprep.subr.bf16.mxu0 %v7924_v9  ;;  %v7955_v19 = vld [vmem:[%s11219_s1 + $0x468] ss:$16 sps:$4 sm:$0xff]   ;;  %v7966_v9 = vld [vmem:[%s11219_s1 + $0x6cc] ss:$16 sps:$4 sm:$0xff]  }
 0x1b9   :  { %5505 = vmatprep.subr.bf16.mxu1 %v7921_v25  ;;  %v7963_v25 = vld [vmem:[%s11219_s1 + $0x44c] ss:$16 sps:$4 sm:$0xff]  }
 0x1bb   :  { %5539 = vmatpush2.bf16.msra.mxu0 %v7922_v29  ;;  %v7964_v29 = vld [vmem:[%s11219_s1 + $0x6c8] ss:$16 sps:$4 sm:$0xff]  }
 0x1bc   :  { %5506 = vmatpush2.bf16.msra.mxu1 %v7919_v49  ;;  %5540 = vmatprep.subr.bf16.mxu0 %v7930_v12  ;;  %v7961_v49 = vld [vmem:[%s11219_s1 + $0x448] ss:$16 sps:$4 sm:$0xff]  }
 0x1bd   :  { %5507 = vmatprep.subr.bf16.mxu1 %v7927_v30  ;;  %v7969_v30 = vld [vmem:[%s11219_s1 + $0x42c] ss:$16 sps:$4 sm:$0xff]   ;;  %v7967_v12 = vld [vmem:[%s11219_s1 + $0x428] ss:$16 sps:$4 sm:$0xff]  }
 0x1bf   :  { %5541 = vmatpush2.bf16.msra.mxu0 %v7928_v35  ;;  %v7975_v35 = vld [vmem:[%s11219_s1 + $0x40c] ss:$16 sps:$4 sm:$0xff]  }
 0x1c0   :  { %5508 = vmatpush2.bf16.msra.mxu1 %v7925_v34  ;;  %5542 = vmatprep.subr.bf16.mxu0 %v7933_v40  ;;  %v7970_v34 = vld [vmem:[%s11219_s1 + $0x6a8] ss:$16 sps:$4 sm:$0xff]  }
 0x1c1   :  { %5559 = vmatprep.subr.bf16.mxu1 %v7936_v0  ;;  %v7973_v40 = vld [vmem:[%s11219_s1 + $0x408] ss:$16 sps:$4 sm:$0xff]  }
 0x1c2   :  { %v5224_v54 = vpop.f32.mrf.mxu0  ;;  %v7976_v0 = vld [vmem:[%s11219_s1 + $0x688] ss:$16 sps:$4 sm:$0xff]  }
 0x1c3   :  { %v5265_v56 = vpop.f32.mrf.mxu1  ;;  %5510 = vmatmul.mubr.bf16.vlgmr.msra.gmra.mxu1 %v8718_v13  ;;  %v5225_v52 = vadd.f32 %v5224_v54, %v9866_v59  ;;  %5543 = vmatpush2.bf16.msra.mxu0 %v7931_v33  ;;  %v7943_v59 = vld [vmem:[%s11219_s1 + $0x328] ss:$16 sps:$4 sm:$0xff]   ;;  %v7981_v33 = vld [vmem:[%s11219_s1 + $0x5ec] ss:$16 sps:$4 sm:$0xff]  }
 0x1c4   :  { %5560 = vmatpush1.bf16.msra.mxu1 %v7934_v46  ;;  %v5226_v58 = vpop.f32.mrf.mxu0  ;;  %5544 = vmatprep.subr.bf16.mxu0 %v7939_v47  ;;  %v7984_v46 = vld [vmem:[%s11219_s1 + $0x66c] ss:$16 sps:$4 sm:$0xff]   ;;  %v7979_v47 = vld [vmem:[%s11219_s1 + $0x5e8] ss:$16 sps:$4 sm:$0xff]  }
 0x1c5   :  { %v5267_v62 = vpop.f32.mrf.mxu1  ;;  %5561 = vmatprep.subr.bf16.mxu1 %v7942_v48  ;;  %v10076_v3 = vadd.f32 %v5265_v56, %v5225_v52  ;;  %v5227_v13 = vadd.f32 %v5226_v58, %v9877_v7  ;;  %5591 = vmatprep.mubr.bf16.mxu1 %v8730_v17  ;;  %v7951_v7 = vld [vmem:[%s11219_s1 + $0x30c] ss:$16 sps:$4 sm:$0xff]   ;;  %v7949_v17 = vld [vmem:[%s11219_s1 + $0x308] ss:$16 sps:$4 sm:$0xff]  }
 0x1c6   :  { %v5228_v1 = vpop.f32.mrf.mxu0  ;;  %v7982_v48 = vld [vmem:[%s11219_s1 + $0x668] ss:$16 sps:$4 sm:$0xff]   ;;  %v7993_v52 = vld [vmem:[%s11219_s1 + $0x5ac] ss:$16 sps:$4 sm:$0xff]  }
 0x1c7   :  { %v5269_v8 = vpop.f32.mrf.mxu1  ;;  %v10086_v10 = vadd.f32 %v5267_v62, %v5227_v13  ;;  %5545 = vmatpush2.bf16.msra.mxu0 %v7937_v50  ;;  %v7987_v50 = vld [vmem:[%s11219_s1 + $0x5cc] ss:$16 sps:$4 sm:$0xff]   ;;  %v7985_v54 = vld [vmem:[%s11219_s1 + $0x5c8] ss:$16 sps:$4 sm:$0xff]  }
 0x1c8   :  { %5562 = vmatpush1.bf16.msra.mxu1 %v7940_v51  ;;  %v5229_v11 = vpop.f32.mrf.mxu0  ;;  %5546 = vmatprep.subr.bf16.mxu0 %v7945_v55  ;;  %v7990_v51 = vld [vmem:[%s11219_s1 + $0x64c] ss:$16 sps:$4 sm:$0xff]   ;;  %v7988_v56 = vld [vmem:[%s11219_s1 + $0x648] ss:$16 sps:$4 sm:$0xff]  }
 0x1c9   :  { %v5270_v60 = vpop.f32.mrf.mxu1  ;;  %5563 = vmatprep.subr.bf16.mxu1 %v7948_v2  ;;  %v7996_v58 = vld [vmem:[%s11219_s1 + $0x62c] ss:$16 sps:$4 sm:$0xff]   ;;  %v7991_v62 = vld [vmem:[%s11219_s1 + $0x5a8] ss:$16 sps:$4 sm:$0xff]  }
 0x1ca   :  { %v7994_v55 = vld [vmem:[%s11219_s1 + $0x628] ss:$16 sps:$4 sm:$0xff]   ;;  %v7999_v2 = vld [vmem:[%s11219_s1 + $0x58c] ss:$16 sps:$4 sm:$0xff]  }
 0x1cb   :  { %5547 = vmatpush2.bf16.msra.mxu0 %v7943_v59  ;;  %v8002_v13 = vld [vmem:[%s11219_s1 + $0x60c] ss:$16 sps:$4 sm:$0xff]   ;;  %v7997_v59 = vld [vmem:[%s11219_s1 + $0x588] ss:$16 sps:$4 sm:$0xff]  }
 0x1cc   :  { %5564 = vmatpush1.bf16.msra.mxu1 %v7946_v4  ;;  %5548 = vmatprep.subr.bf16.mxu0 %v7951_v7  ;;  %v8000_v4 = vld [vmem:[%s11219_s1 + $0x608] ss:$16 sps:$4 sm:$0xff]   ;;  %v8005_v1 = vld [vmem:[%s11219_s1 + $0x56c] ss:$16 sps:$4 sm:$0xff]  }
 0x1cd   :  { %5565 = vmatprep.subr.bf16.mxu1 %v7954_v5  ;;  %v8008_v8 = vld [vmem:[%s11219_s1 + $0x7ec] ss:$16 sps:$4 sm:$0xff]   ;;  %v8003_v11 = vld [vmem:[%s11219_s1 + $0x568] ss:$16 sps:$4 sm:$0xff]  }
 0x1ce   :  { %v8006_v60 = vld [vmem:[%s11219_s1 + $0x7e8] ss:$16 sps:$4 sm:$0xff]   ;;  %v8011_v7 = vld [vmem:[%s11219_s1 + $0x54c] ss:$16 sps:$4 sm:$0xff]  }
 0x1cf   :  { %5549 = vmatpush2.bf16.msra.mxu0 %v7949_v17  ;;  %v8014_v5 = vld [vmem:[%s11219_s1 + $0x7cc] ss:$16 sps:$4 sm:$0xff]   ;;  %v8009_v17 = vld [vmem:[%s11219_s1 + $0x548] ss:$16 sps:$4 sm:$0xff]  }
 0x1d0   :  { %5566 = vmatpush1.bf16.msra.mxu1 %v7952_v14  ;;  %5600 = vmatprep.subr.bf16.mxu0 %v7960_v16  ;;  %v8012_v14 = vld [vmem:[%s11219_s1 + $0x7c8] ss:$16 sps:$4 sm:$0xff]   ;;  %v8020_v16 = vld [vmem:[%s11219_s1 + $0x7ac] ss:$16 sps:$4 sm:$0xff]  }
 0x1d1   :  { %5567 = vmatprep.subr.bf16.mxu1 %v7957_v15  ;;  %v8017_v15 = vld [vmem:[%s11219_s1 + $0x52c] ss:$16 sps:$4 sm:$0xff]  }
 0x1d2   :  { %5551 = vmatmul.mubr.bf16.vlgmr.msra.gmra.mxu0 %v8734_v18  ;;  %v7972_v18 = vld [vmem:[%s11219_s1 + $0x6ac] ss:$16 sps:$4 sm:$0xff]  }
 0x1d3   :  { %5601 = vmatpush1.bf16.msra.mxu0 %v7958_v20  ;;  %5632 = vmatprep.mubr.bf16.mxu0 %v8750_v23  ;;  %v7978_v23 = vld [vmem:[%s11219_s1 + $0x68c] ss:$16 sps:$4 sm:$0xff]   ;;  %v8018_v20 = vld [vmem:[%s11219_s1 + $0x7a8] ss:$16 sps:$4 sm:$0xff]  }
 0x1d4   :  { %5568 = vmatpush1.bf16.msra.mxu1 %v7955_v19  ;;  %5602 = vmatprep.subr.bf16.mxu0 %v7966_v9  ;;  %v8015_v19 = vld [vmem:[%s11219_s1 + $0x528] ss:$16 sps:$4 sm:$0xff]   ;;  %v8026_v9 = vld [vmem:[%s11219_s1 + $0x78c] ss:$16 sps:$4 sm:$0xff]  }
 0x1d5   :  { %5569 = vmatprep.subr.bf16.mxu1 %v7963_v25  ;;  %v8023_v25 = vld [vmem:[%s11219_s1 + $0x50c] ss:$16 sps:$4 sm:$0xff]  }
 0x1d7   :  { %5603 = vmatpush1.bf16.msra.mxu0 %v7964_v29  ;;  %v8024_v29 = vld [vmem:[%s11219_s1 + $0x788] ss:$16 sps:$4 sm:$0xff]  }
 0x1d8   :  { %5570 = vmatpush1.bf16.msra.mxu1 %v7961_v49  ;;  %5604 = vmatprep.subr.bf16.mxu0 %v7972_v18  ;;  %v8021_v49 = vld [vmem:[%s11219_s1 + $0x508] ss:$16 sps:$4 sm:$0xff]   ;;  %v8032_v18 = vld [vmem:[%s11219_s1 + $0x8ec] ss:$16 sps:$4 sm:$0xff]  }
 0x1d9   :  { %5571 = vmatprep.subr.bf16.mxu1 %v7969_v30  ;;  %v8029_v30 = vld [vmem:[%s11219_s1 + $0x76c] ss:$16 sps:$4 sm:$0xff]  }
 0x1db   :  { %5605 = vmatpush1.bf16.msra.mxu0 %v7970_v34  ;;  %v8030_v34 = vld [vmem:[%s11219_s1 + $0x8e8] ss:$16 sps:$4 sm:$0xff]  }
 0x1dc   :  { %5572 = vmatpush1.bf16.msra.mxu1 %v7967_v12  ;;  %5606 = vmatprep.subr.bf16.mxu0 %v7978_v23  ;;  %v8027_v12 = vld [vmem:[%s11219_s1 + $0x768] ss:$16 sps:$4 sm:$0xff]   ;;  %v8038_v23 = vld [vmem:[%s11219_s1 + $0x8cc] ss:$16 sps:$4 sm:$0xff]  }
 0x1dd   :  { %5573 = vmatprep.subr.bf16.mxu1 %v7975_v35  ;;  %v8035_v35 = vld [vmem:[%s11219_s1 + $0x74c] ss:$16 sps:$4 sm:$0xff]  }
 0x1df   :  { %5607 = vmatpush1.bf16.msra.mxu0 %v7976_v0 }
 0x1e0   :  { %5574 = vmatpush1.bf16.msra.mxu1 %v7973_v40  ;;  %5608 = vmatprep.subr.bf16.mxu0 %v7984_v46  ;;  %v8033_v46 = vld [vmem:[%s11219_s1 + $0x748] ss:$16 sps:$4 sm:$0xff]  }
 0x1e1   :  { %5575 = vmatprep.subr.bf16.mxu1 %v7981_v33 }
 0x1e3   :  { %5609 = vmatpush1.bf16.msra.mxu0 %v7982_v48 }
 0x1e4   :  { %5576 = vmatpush2.bf16.msra.mxu1 %v7979_v47  ;;  %5610 = vmatprep.subr.bf16.mxu0 %v7990_v51  ;;  %v8036_v47 = vld [vmem:[%s11219_s1 + $0x8c8] ss:$16 sps:$4 sm:$0xff]  }
 0x1e5   :  { %5577 = vmatprep.subr.bf16.mxu1 %v7987_v50 }
 0x1e7   :  { %5611 = vmatpush1.bf16.msra.mxu0 %v7988_v56 }
 0x1e8   :  { %5578 = vmatpush2.bf16.msra.mxu1 %v7985_v54  ;;  %5612 = vmatprep.subr.bf16.mxu0 %v7996_v58 }
 0x1e9   :  { %5579 = vmatprep.subr.bf16.mxu1 %v7993_v52 }
 0x1eb   :  { %5613 = vmatpush1.bf16.msra.mxu0 %v7994_v55  ;;  %v8042_v55 = vld [vmem:[%s11219_s1 + $0x8a8] ss:$16 sps:$4 sm:$0xff]  }
 0x1ec   :  { %5580 = vmatpush2.bf16.msra.mxu1 %v7991_v62  ;;  %5614 = vmatprep.subr.bf16.mxu0 %v8002_v13  ;;  %v8039_v62 = vld [vmem:[%s11219_s1 + $0x728] ss:$16 sps:$4 sm:$0xff]  }
 0x1ed   :  { %5581 = vmatprep.subr.bf16.mxu1 %v7999_v2 }
 0x1ef   :  { %5615 = vmatpush1.bf16.msra.mxu0 %v8000_v4  ;;  %v8048_v4 = vld [vmem:[%s11219_s1 + $0x888] ss:$16 sps:$4 sm:$0xff]  }
 0x1f0   :  { %5582 = vmatpush2.bf16.msra.mxu1 %v7997_v59  ;;  %5616 = vmatprep.subr.bf16.mxu0 %v8008_v8  ;;  %v8045_v59 = vld [vmem:[%s11219_s1 + $0x708] ss:$16 sps:$4 sm:$0xff]   ;;  %v8056_v8 = vld [vmem:[%s11219_s1 + $0xaec] ss:$16 sps:$4 sm:$0xff]  }
 0x1f1   :  { %5583 = vmatprep.subr.bf16.mxu1 %v8005_v1  ;;  %v8053_v1 = vld [vmem:[%s11219_s1 + $0x86c] ss:$16 sps:$4 sm:$0xff]  }
 0x1f3   :  { %5617 = vmatpush2.bf16.msra.mxu0 %v8006_v60  ;;  %v8054_v60 = vld [vmem:[%s11219_s1 + $0xae8] ss:$16 sps:$4 sm:$0xff]  }
 0x1f4   :  { %5584 = vmatpush2.bf16.msra.mxu1 %v8003_v11  ;;  %5618 = vmatprep.subr.bf16.mxu0 %v8014_v5  ;;  %v8051_v11 = vld [vmem:[%s11219_s1 + $0x868] ss:$16 sps:$4 sm:$0xff]   ;;  %v8062_v5 = vld [vmem:[%s11219_s1 + $0xacc] ss:$16 sps:$4 sm:$0xff]  }
 0x1f5   :  { %5585 = vmatprep.subr.bf16.mxu1 %v8011_v7  ;;  %v8059_v7 = vld [vmem:[%s11219_s1 + $0x84c] ss:$16 sps:$4 sm:$0xff]  }
 0x1f7   :  { %5619 = vmatpush2.bf16.msra.mxu0 %v8012_v14  ;;  %v8060_v14 = vld [vmem:[%s11219_s1 + $0xac8] ss:$16 sps:$4 sm:$0xff]  }
 0x1f8   :  { %5586 = vmatpush2.bf16.msra.mxu1 %v8009_v17  ;;  %5620 = vmatprep.subr.bf16.mxu0 %v8020_v16  ;;  %v8057_v17 = vld [vmem:[%s11219_s1 + $0x848] ss:$16 sps:$4 sm:$0xff]  }
 0x1f9   :  { %5587 = vmatprep.subr.bf16.mxu1 %v8017_v15  ;;  %v8065_v15 = vld [vmem:[%s11219_s1 + $0x82c] ss:$16 sps:$4 sm:$0xff]   ;;  %v8063_v16 = vld [vmem:[%s11219_s1 + $0x828] ss:$16 sps:$4 sm:$0xff]  }
 0x1fb   :  { %5621 = vmatpush2.bf16.msra.mxu0 %v8018_v20  ;;  %v8071_v20 = vld [vmem:[%s11219_s1 + $0x80c] ss:$16 sps:$4 sm:$0xff]  }
 0x1fc   :  { %5588 = vmatpush2.bf16.msra.mxu1 %v8015_v19  ;;  %5622 = vmatprep.subr.bf16.mxu0 %v8026_v9  ;;  %v8066_v19 = vld [vmem:[%s11219_s1 + $0xaa8] ss:$16 sps:$4 sm:$0xff]  }
 0x1fd   :  { %5589 = vmatprep.subr.bf16.mxu1 %v8023_v25  ;;  %v8069_v25 = vld [vmem:[%s11219_s1 + $0x808] ss:$16 sps:$4 sm:$0xff]  }
 0x1fe   :  { %v8072_v9 = vld [vmem:[%s11219_s1 + $0xa88] ss:$16 sps:$4 sm:$0xff]  }
 0x1ff   :  { %5623 = vmatpush2.bf16.msra.mxu0 %v8024_v29  ;;  %v8080_v29 = vld [vmem:[%s11219_s1 + $0xa6c] ss:$16 sps:$4 sm:$0xff]  }
 0x200   :  { %5590 = vmatpush2.bf16.msra.mxu1 %v8021_v49  ;;  %5624 = vmatprep.subr.bf16.mxu0 %v8029_v30  ;;  %v8077_v49 = vld [vmem:[%s11219_s1 + $0x9ec] ss:$16 sps:$4 sm:$0xff]   ;;  %v8075_v30 = vld [vmem:[%s11219_s1 + $0x9e8] ss:$16 sps:$4 sm:$0xff]  }
 0x201   :  { %5641 = vmatprep.subr.bf16.mxu1 %v8032_v18  ;;  %v8078_v18 = vld [vmem:[%s11219_s1 + $0xa68] ss:$16 sps:$4 sm:$0xff]  }
 0x202   :  { %v5306_v40 = vpop.f32.mrf.mxu0 }
 0x203   :  { %v5347_v0 = vpop.f32.mrf.mxu1  ;;  %5592 = vmatmul.mubr.bf16.vlgmr.msra.gmra.mxu1 %v8929_v27  ;;  %v5307_v33 = vadd.f32 %v5306_v40, %v10076_v3  ;;  %5625 = vmatpush2.bf16.msra.mxu0 %v8027_v12  ;;  %v8041_v27 = vld [vmem:[%s11219_s1 + $0x72c] ss:$16 sps:$4 sm:$0xff]  }
 0x204   :  { %5642 = vmatpush1.bf16.msra.mxu1 %v8030_v34  ;;  %v5308_v48 = vpop.f32.mrf.mxu0  ;;  %5626 = vmatprep.subr.bf16.mxu0 %v8035_v35  ;;  %v8044_v3 = vld [vmem:[%s11219_s1 + $0x8ac] ss:$16 sps:$4 sm:$0xff]   ;;  %v8081_v35 = vld [vmem:[%s11219_s1 + $0x9c8] ss:$16 sps:$4 sm:$0xff]  }
 0x205   :  { %v5349_v50 = vpop.f32.mrf.mxu1  ;;  %5643 = vmatprep.subr.bf16.mxu1 %v8038_v23  ;;  %v10278_v51 = vadd.f32 %v5347_v0, %v5307_v33  ;;  %v5309_v54 = vadd.f32 %v5308_v48, %v10086_v10  ;;  %5673 = vmatprep.mubr.bf16.mxu1 %v8982_v44  ;;  %v8047_v44 = vld [vmem:[%s11219_s1 + $0x70c] ss:$16 sps:$4 sm:$0xff]   ;;  %v8084_v23 = vld [vmem:[%s11219_s1 + $0xa48] ss:$16 sps:$4 sm:$0xff]  }
 0x206   :  { %v5310_v56 = vpop.f32.mrf.mxu0  ;;  %v8050_v10 = vld [vmem:[%s11219_s1 + $0x88c] ss:$16 sps:$4 sm:$0xff]   ;;  %v8087_v33 = vld [vmem:[%s11219_s1 + $0x9a8] ss:$16 sps:$4 sm:$0xff]  }
 0x207   :  { %v5351_v52 = vpop.f32.mrf.mxu1  ;;  %v10282_v58 = vadd.f32 %v5349_v50, %v5309_v54  ;;  %5627 = vmatpush2.bf16.msra.mxu0 %v8033_v46  ;;  %v8083_v12 = vld [vmem:[%s11219_s1 + $0x9cc] ss:$16 sps:$4 sm:$0xff]   ;;  %v8090_v46 = vld [vmem:[%s11219_s1 + $0xa28] ss:$16 sps:$4 sm:$0xff]  }
 0x208   :  { %5644 = vmatpush1.bf16.msra.mxu1 %v8036_v47  ;;  %v5311_v2 = vpop.f32.mrf.mxu0  ;;  %5628 = vmatprep.subr.bf16.mxu0 %v8041_v27  ;;  %v8086_v34 = vld [vmem:[%s11219_s1 + $0xa4c] ss:$16 sps:$4 sm:$0xff]   ;;  %v8093_v50 = vld [vmem:[%s11219_s1 + $0x988] ss:$16 sps:$4 sm:$0xff]  }
 0x209   :  { %v5352_v13 = vpop.f32.mrf.mxu1  ;;  %5645 = vmatprep.subr.bf16.mxu1 %v8044_v3  ;;  %v8089_v40 = vld [vmem:[%s11219_s1 + $0x9ac] ss:$16 sps:$4 sm:$0xff]   ;;  %v8096_v27 = vld [vmem:[%s11219_s1 + $0xa08] ss:$16 sps:$4 sm:$0xff]  }
 0x20a   :  { %v8092_v0 = vld [vmem:[%s11219_s1 + $0xa2c] ss:$16 sps:$4 sm:$0xff]   ;;  %v8099_v56 = vld [vmem:[%s11219_s1 + $0x968] ss:$16 sps:$4 sm:$0xff]  }
 0x20b   :  { %5629 = vmatpush2.bf16.msra.mxu0 %v8039_v62  ;;  %v8095_v47 = vld [vmem:[%s11219_s1 + $0x98c] ss:$16 sps:$4 sm:$0xff]   ;;  %v8102_v52 = vld [vmem:[%s11219_s1 + $0xbe8] ss:$16 sps:$4 sm:$0xff]  }
 0x20c   :  { %5646 = vmatpush1.bf16.msra.mxu1 %v8042_v55  ;;  %5630 = vmatprep.subr.bf16.mxu0 %v8047_v44  ;;  %v8098_v48 = vld [vmem:[%s11219_s1 + $0xa0c] ss:$16 sps:$4 sm:$0xff]   ;;  %v8105_v2 = vld [vmem:[%s11219_s1 + $0x948] ss:$16 sps:$4 sm:$0xff]  }
 0x20d   :  { %5647 = vmatprep.subr.bf16.mxu1 %v8050_v10  ;;  %v8101_v3 = vld [vmem:[%s11219_s1 + $0x96c] ss:$16 sps:$4 sm:$0xff]   ;;  %v8108_v13 = vld [vmem:[%s11219_s1 + $0xbc8] ss:$16 sps:$4 sm:$0xff]  }
 0x20e   :  { %v8104_v54 = vld [vmem:[%s11219_s1 + $0xbec] ss:$16 sps:$4 sm:$0xff]  }
 0x20f   :  { %5631 = vmatpush2.bf16.msra.mxu0 %v8045_v59  ;;  %v8107_v62 = vld [vmem:[%s11219_s1 + $0x94c] ss:$16 sps:$4 sm:$0xff]   ;;  %v8111_v59 = vld [vmem:[%s11219_s1 + $0x928] ss:$16 sps:$4 sm:$0xff]  }
 0x210   :  { %5648 = vmatpush1.bf16.msra.mxu1 %v8048_v4  ;;  %5682 = vmatprep.subr.bf16.mxu0 %v8056_v8  ;;  %v8110_v55 = vld [vmem:[%s11219_s1 + $0xbcc] ss:$16 sps:$4 sm:$0xff]   ;;  %v8114_v4 = vld [vmem:[%s11219_s1 + $0xba8] ss:$16 sps:$4 sm:$0xff]  }
 0x211   :  { %5649 = vmatprep.subr.bf16.mxu1 %v8053_v1  ;;  %v8113_v44 = vld [vmem:[%s11219_s1 + $0x92c] ss:$16 sps:$4 sm:$0xff]  }
 0x212   :  { %5633 = vmatmul.mubr.bf16.vlgmr.msra.gmra.mxu0 %v8942_v6  ;;  %v8068_v6 = vld [vmem:[%s11219_s1 + $0xaac] ss:$16 sps:$4 sm:$0xff]  }
 0x213   :  { %5683 = vmatpush1.bf16.msra.mxu0 %v8054_v60  ;;  %5714 = vmatprep.mubr.bf16.mxu0 %v8987_v45  ;;  %v8074_v45 = vld [vmem:[%s11219_s1 + $0xa8c] ss:$16 sps:$4 sm:$0xff]   ;;  %v8120_v60 = vld [vmem:[%s11219_s1 + $0xb88] ss:$16 sps:$4 sm:$0xff]  }
 0x214   :  { %5650 = vmatpush1.bf16.msra.mxu1 %v8051_v11  ;;  %5684 = vmatprep.subr.bf16.mxu0 %v8062_v5  ;;  %v8116_v10 = vld [vmem:[%s11219_s1 + $0xbac] ss:$16 sps:$4 sm:$0xff]   ;;  %v8117_v11 = vld [vmem:[%s11219_s1 + $0x908] ss:$16 sps:$4 sm:$0xff]  }
 0x215   :  { %5651 = vmatprep.subr.bf16.mxu1 %v8059_v7  ;;  %v8119_v1 = vld [vmem:[%s11219_s1 + $0x90c] ss:$16 sps:$4 sm:$0xff]  }
 0x216   :  { %v8122_v8 = vld [vmem:[%s11219_s1 + $0xb8c] ss:$16 sps:$4 sm:$0xff]  }
 0x217   :  { %5685 = vmatpush1.bf16.msra.mxu0 %v8060_v14  ;;  %v8125_v7 = vld [vmem:[%s11219_s1 + $0xb6c] ss:$16 sps:$4 sm:$0xff]   ;;  %v8126_v14 = vld [vmem:[%s11219_s1 + $0xce8] ss:$16 sps:$4 sm:$0xff]  }
 0x218   :  { %5652 = vmatpush1.bf16.msra.mxu1 %v8057_v17  ;;  %5686 = vmatprep.subr.bf16.mxu0 %v8068_v6  ;;  %v8128_v5 = vld [vmem:[%s11219_s1 + $0xcec] ss:$16 sps:$4 sm:$0xff]   ;;  %v8123_v17 = vld [vmem:[%s11219_s1 + $0xb68] ss:$16 sps:$4 sm:$0xff]  }
 0x219   :  { %5653 = vmatprep.subr.bf16.mxu1 %v8065_v15  ;;  %v8131_v15 = vld [vmem:[%s11219_s1 + $0xb4c] ss:$16 sps:$4 sm:$0xff]  }
 0x21a   :  { %v8134_v6 = vld [vmem:[%s11219_s1 + $0xccc] ss:$16 sps:$4 sm:$0xff]  }
 0x21b   :  { %5687 = vmatpush1.bf16.msra.mxu0 %v8066_v19 }
 0x21c   :  { %5654 = vmatpush1.bf16.msra.mxu1 %v8063_v16  ;;  %5688 = vmatprep.subr.bf16.mxu0 %v8074_v45  ;;  %v8129_v45 = vld [vmem:[%s11219_s1 + $0xb48] ss:$16 sps:$4 sm:$0xff]  }
 0x21d   :  { %5655 = vmatprep.subr.bf16.mxu1 %v8071_v20 }
 0x21f   :  { %5689 = vmatpush1.bf16.msra.mxu0 %v8072_v9 }
 0x220   :  { %5656 = vmatpush1.bf16.msra.mxu1 %v8069_v25  ;;  %5690 = vmatprep.subr.bf16.mxu0 %v8080_v29  ;;  %v8132_v25 = vld [vmem:[%s11219_s1 + $0xcc8] ss:$16 sps:$4 sm:$0xff]  }
 0x221   :  { %5657 = vmatprep.subr.bf16.mxu1 %v8077_v49 }
 0x223   :  { %5691 = vmatpush1.bf16.msra.mxu0 %v8078_v18 }
 0x224   :  { %5658 = vmatpush2.bf16.msra.mxu1 %v8075_v30  ;;  %5692 = vmatprep.subr.bf16.mxu0 %v8086_v34 }
 0x225   :  { %5659 = vmatprep.subr.bf16.mxu1 %v8083_v12 }
 0x227   :  { %5693 = vmatpush1.bf16.msra.mxu0 %v8084_v23  ;;  %v8138_v23 = vld [vmem:[%s11219_s1 + $0xca8] ss:$16 sps:$4 sm:$0xff]  }
 0x228   :  { %5660 = vmatpush2.bf16.msra.mxu1 %v8081_v35  ;;  %5694 = vmatprep.subr.bf16.mxu0 %v8092_v0  ;;  %v8135_v35 = vld [vmem:[%s11219_s1 + $0xb28] ss:$16 sps:$4 sm:$0xff]  }
 0x229   :  { %5661 = vmatprep.subr.bf16.mxu1 %v8089_v40 }
 0x22b   :  { %5695 = vmatpush1.bf16.msra.mxu0 %v8090_v46  ;;  %v8144_v46 = vld [vmem:[%s11219_s1 + $0xc88] ss:$16 sps:$4 sm:$0xff]  }
 0x22c   :  { %5662 = vmatpush2.bf16.msra.mxu1 %v8087_v33  ;;  %5696 = vmatprep.subr.bf16.mxu0 %v8098_v48  ;;  %v8141_v33 = vld [vmem:[%s11219_s1 + $0xb08] ss:$16 sps:$4 sm:$0xff]   ;;  %v8152_v48 = vld [vmem:[%s11219_s1 + $0xeec] ss:$16 sps:$4 sm:$0xff]  }
 0x22d   :  { %5663 = vmatprep.subr.bf16.mxu1 %v8095_v47  ;;  %v8149_v47 = vld [vmem:[%s11219_s1 + $0xc6c] ss:$16 sps:$4 sm:$0xff]  }
 0x22f   :  { %5697 = vmatpush1.bf16.msra.mxu0 %v8096_v27  ;;  %v8150_v27 = vld [vmem:[%s11219_s1 + $0xee8] ss:$16 sps:$4 sm:$0xff]  }
 0x230   :  { %5664 = vmatpush2.bf16.msra.mxu1 %v8093_v50  ;;  %5698 = vmatprep.subr.bf16.mxu0 %v8104_v54  ;;  %v8147_v50 = vld [vmem:[%s11219_s1 + $0xc68] ss:$16 sps:$4 sm:$0xff]   ;;  %v8158_v54 = vld [vmem:[%s11219_s1 + $0xecc] ss:$16 sps:$4 sm:$0xff]  }
 0x231   :  { %5665 = vmatprep.subr.bf16.mxu1 %v8101_v3  ;;  %v8155_v3 = vld [vmem:[%s11219_s1 + $0xc4c] ss:$16 sps:$4 sm:$0xff]  }
 0x233   :  { %5699 = vmatpush2.bf16.msra.mxu0 %v8102_v52 }
 0x234   :  { %5666 = vmatpush2.bf16.msra.mxu1 %v8099_v56  ;;  %5700 = vmatprep.subr.bf16.mxu0 %v8110_v55  ;;  %v8156_v55 = vld [vmem:[%s11219_s1 + $0xec8] ss:$16 sps:$4 sm:$0xff]  }
 0x235   :  { %5667 = vmatprep.subr.bf16.mxu1 %v8107_v62  ;;  %v8153_v62 = vld [vmem:[%s11219_s1 + $0xc48] ss:$16 sps:$4 sm:$0xff]  }
 0x237   :  { %5701 = vmatpush2.bf16.msra.mxu0 %v8108_v13  ;;  %v8161_v13 = vld [vmem:[%s11219_s1 + $0xc2c] ss:$16 sps:$4 sm:$0xff]  }
 0x238   :  { %5668 = vmatpush2.bf16.msra.mxu1 %v8105_v2  ;;  %5702 = vmatprep.subr.bf16.mxu0 %v8116_v10 }
 0x239   :  { %5669 = vmatprep.subr.bf16.mxu1 %v8113_v44 }
 0x23b   :  { %5703 = vmatpush2.bf16.msra.mxu0 %v8114_v4  ;;  %v8162_v4 = vld [vmem:[%s11219_s1 + $0xea8] ss:$16 sps:$4 sm:$0xff]  }
 0x23c   :  { %5670 = vmatpush2.bf16.msra.mxu1 %v8111_v59  ;;  %5704 = vmatprep.subr.bf16.mxu0 %v8122_v8  ;;  %v8159_v59 = vld [vmem:[%s11219_s1 + $0xc28] ss:$16 sps:$4 sm:$0xff]   ;;  %v8167_v8 = vld [vmem:[%s11219_s1 + $0xc0c] ss:$16 sps:$4 sm:$0xff]  }
 0x23d   :  { %5671 = vmatprep.subr.bf16.mxu1 %v8119_v1 }
 0x23f   :  { %5705 = vmatpush2.bf16.msra.mxu0 %v8120_v60  ;;  %v8168_v60 = vld [vmem:[%s11219_s1 + $0xe88] ss:$16 sps:$4 sm:$0xff]  }
 0x240   :  { %5672 = vmatpush2.bf16.msra.mxu1 %v8117_v11  ;;  %5706 = vmatprep.subr.bf16.mxu0 %v8125_v7  ;;  %v8165_v11 = vld [vmem:[%s11219_s1 + $0xc08] ss:$16 sps:$4 sm:$0xff]   ;;  %v8173_v7 = vld [vmem:[%s11219_s1 + $0xdec] ss:$16 sps:$4 sm:$0xff]  }
 0x241   :  { %5723 = vmatprep.subr.bf16.mxu1 %v8128_v5  ;;  %v8176_v5 = vld [vmem:[%s11219_s1 + $0xe6c] ss:$16 sps:$4 sm:$0xff]  }
 0x242   :  { %v5388_v16 = vpop.f32.mrf.mxu0 }
 0x243   :  { %v5429_v19 = vpop.f32.mrf.mxu1  ;;  %5674 = vmatmul.mubr.bf16.vlgmr.msra.gmra.mxu1 %v9158_v53  ;;  %v5389_v20 = vadd.f32 %v5388_v16, %v10278_v51  ;;  %5707 = vmatpush2.bf16.msra.mxu0 %v8123_v17  ;;  %v8137_v53 = vld [vmem:[%s11219_s1 + $0xb2c] ss:$16 sps:$4 sm:$0xff]   ;;  %v8171_v17 = vld [vmem:[%s11219_s1 + $0xde8] ss:$16 sps:$4 sm:$0xff]  }
 0x244   :  { %5724 = vmatpush1.bf16.msra.mxu1 %v8126_v14  ;;  %v5390_v9 = vpop.f32.mrf.mxu0  ;;  %5708 = vmatprep.subr.bf16.mxu0 %v8131_v15  ;;  %v8140_v51 = vld [vmem:[%s11219_s1 + $0xcac] ss:$16 sps:$4 sm:$0xff]   ;;  %v8174_v14 = vld [vmem:[%s11219_s1 + $0xe68] ss:$16 sps:$4 sm:$0xff]  }
 0x245   :  { %v5431_v49 = vpop.f32.mrf.mxu1  ;;  %5725 = vmatprep.subr.bf16.mxu1 %v8134_v6  ;;  %v5430_v29 = vadd.f32 %v5429_v19, %v5389_v20  ;;  %v5391_v30 = vadd.f32 %v5390_v9, %v10282_v58  ;;  %5755 = vmatprep.mubr.bf16.mxu1 %v9170_v57  ;;  %v8143_v57 = vld [vmem:[%s11219_s1 + $0xb0c] ss:$16 sps:$4 sm:$0xff]   ;;  %v8177_v16 = vld [vmem:[%s11219_s1 + $0xdc8] ss:$16 sps:$4 sm:$0xff]  }
 0x246   :  { %v5392_v18 = vpop.f32.mrf.mxu0  ;;  %v8146_v58 = vld [vmem:[%s11219_s1 + $0xc8c] ss:$16 sps:$4 sm:$0xff]   ;;  %v8180_v19 = vld [vmem:[%s11219_s1 + $0xe48] ss:$16 sps:$4 sm:$0xff]  }
 0x247   :  { %v5433_v12 = vpop.f32.mrf.mxu1  ;;  %v5432_v34 = vadd.f32 %v5431_v49, %v5391_v30  ;;  %5709 = vmatpush2.bf16.msra.mxu0 %v8129_v45  ;;  %v8179_v15 = vld [vmem:[%s11219_s1 + $0xdcc] ss:$16 sps:$4 sm:$0xff]   ;;  %v8186_v9 = vld [vmem:[%s11219_s1 + $0xe28] ss:$16 sps:$4 sm:$0xff]  }
 0x248   :  { %5726 = vmatpush1.bf16.msra.mxu1 %v8132_v25  ;;  %v5393_v40 = vpop.f32.mrf.mxu0  ;;  %5710 = vmatprep.subr.bf16.mxu0 %v8137_v53  ;;  %v8182_v6 = vld [vmem:[%s11219_s1 + $0xe4c] ss:$16 sps:$4 sm:$0xff]   ;;  %v8183_v25 = vld [vmem:[%s11219_s1 + $0xda8] ss:$16 sps:$4 sm:$0xff]  }
 0x249   :  { %v5434_v0 = vpop.f32.mrf.mxu1  ;;  %5727 = vmatprep.subr.bf16.mxu1 %v8140_v51  ;;  %v8185_v20 = vld [vmem:[%s11219_s1 + $0xdac] ss:$16 sps:$4 sm:$0xff]   ;;  %v8189_v51 = vld [vmem:[%s11219_s1 + $0xd88] ss:$16 sps:$4 sm:$0xff]  }
 0x24a   :  { %v8188_v45 = vld [vmem:[%s11219_s1 + $0xe2c] ss:$16 sps:$4 sm:$0xff]   ;;  %v8195_v12 = vld [vmem:[%s11219_s1 + $0xd68] ss:$16 sps:$4 sm:$0xff]  }
 0x24b   :  { %5711 = vmatpush2.bf16.msra.mxu0 %v8135_v35  ;;  %v8191_v49 = vld [vmem:[%s11219_s1 + $0xd8c] ss:$16 sps:$4 sm:$0xff]   ;;  %v8201_v40 = vld [vmem:[%s11219_s1 + $0xd48] ss:$16 sps:$4 sm:$0xff]  }
 0x24c   :  { %5728 = vmatpush1.bf16.msra.mxu1 %v8138_v23  ;;  %5712 = vmatprep.subr.bf16.mxu0 %v8143_v57  ;;  %v8194_v53 = vld [vmem:[%s11219_s1 + $0xe0c] ss:$16 sps:$4 sm:$0xff]   ;;  %v8204_v0 = vld [vmem:[%s11219_s1 + $0xfc8] ss:$16 sps:$4 sm:$0xff]  }
 0x24d   :  { %5729 = vmatprep.subr.bf16.mxu1 %v8146_v58  ;;  %v8197_v30 = vld [vmem:[%s11219_s1 + $0xd6c] ss:$16 sps:$4 sm:$0xff]  }
 0x24e   :  { %v8200_v18 = vld [vmem:[%s11219_s1 + $0xfec] ss:$16 sps:$4 sm:$0xff]  }
 0x24f   :  { %5713 = vmatpush2.bf16.msra.mxu0 %v8141_v33  ;;  %v8203_v35 = vld [vmem:[%s11219_s1 + $0xd4c] ss:$16 sps:$4 sm:$0xff]   ;;  %v8207_v33 = vld [vmem:[%s11219_s1 + $0xd28] ss:$16 sps:$4 sm:$0xff]  }
 0x250   :  { %5730 = vmatpush1.bf16.msra.mxu1 %v8144_v46  ;;  %5764 = vmatprep.subr.bf16.mxu0 %v8152_v48  ;;  %v8206_v23 = vld [vmem:[%s11219_s1 + $0xfcc] ss:$16 sps:$4 sm:$0xff]   ;;  %v8210_v46 = vld [vmem:[%s11219_s1 + $0xfa8] ss:$16 sps:$4 sm:$0xff]  }
 0x251   :  { %5731 = vmatprep.subr.bf16.mxu1 %v8149_v47  ;;  %v8209_v57 = vld [vmem:[%s11219_s1 + $0xd2c] ss:$16 sps:$4 sm:$0xff]  }
 0x252   :  { %v5470_v56 = vpop.f32.mrf.mxu0  ;;  %5715 = vmatmul.mubr.bf16.vlgmr.msra.gmra.mxu0 %v9174_v37  ;;  %v8164_v37 = vld [vmem:[%s11219_s1 + $0xeac] ss:$16 sps:$4 sm:$0xff]  }
 0x253   :  { %v10519_v52 = vadd.f32 %v5470_v56, %v5430_v29  ;;  %5765 = vmatpush1.bf16.msra.mxu0 %v8150_v27  ;;  %5796 = vmatprep.mubr.bf16.mxu0 %v9190_v63  ;;  %v8170_v63 = vld [vmem:[%s11219_s1 + $0xe8c] ss:$16 sps:$4 sm:$0xff]   ;;  %v8192_v29 = vld [vmem:[%s11219_s1 + $0xe08] ss:$16 sps:$4 sm:$0xff]  }
 0x254   :  { %5732 = vmatpush1.bf16.msra.mxu1 %v8147_v50  ;;  %v5472_v2 = vpop.f32.mrf.mxu0  ;;  %5766 = vmatprep.subr.bf16.mxu0 %v8158_v54  ;;  %v8212_v58 = vld [vmem:[%s11219_s1 + $0xfac] ss:$16 sps:$4 sm:$0xff]   ;;  %v8213_v50 = vld [vmem:[%s11219_s1 + $0xd08] ss:$16 sps:$4 sm:$0xff]  }
 0x255   :  { %5733 = vmatprep.subr.bf16.mxu1 %v8155_v3  ;;  %v10533_v44 = vadd.f32 %v5472_v2, %v5432_v34  ;;  %v8198_v34 = vld [vmem:[%s11219_s1 + $0xfe8] ss:$16 sps:$4 sm:$0xff]   ;;  %v8215_v47 = vld [vmem:[%s11219_s1 + $0xd0c] ss:$16 sps:$4 sm:$0xff]  }
 0x256   :  { %v5474_v10 = vpop.f32.mrf.mxu0  ;;  %v8218_v48 = vld [vmem:[%s11219_s1 + $0xf8c] ss:$16 sps:$4 sm:$0xff]   ;;  %v8216_v27 = vld [vmem:[%s11219_s1 + $0xf88] ss:$16 sps:$4 sm:$0xff]  }
 0x257   :  { %5767 = vmatpush1.bf16.msra.mxu0 %v8156_v55  ;;  %v8221_v3 = vld [vmem:[%s11219_s1 + $0xf6c] ss:$16 sps:$4 sm:$0xff]   ;;  %v8219_v56 = vld [vmem:[%s11219_s1 + $0xf68] ss:$16 sps:$4 sm:$0xff]  }
 0x258   :  { %5734 = vmatpush1.bf16.msra.mxu1 %v8153_v62  ;;  %v5475_v1 = vpop.f32.mrf.mxu0  ;;  %5768 = vmatprep.subr.bf16.mxu0 %v8164_v37  ;;  %v8224_v54 = vld [vmem:[%s11219_s1 + $0x10ec] ss:$16 sps:$4 sm:$0xff]   ;;  %v8222_v62 = vld [vmem:[%s11219_s1 + $0x10e8] ss:$16 sps:$4 sm:$0xff]  }
 0x259   :  { %5735 = vmatprep.subr.bf16.mxu1 %v8161_v13  ;;  %v8227_v55 = vld [vmem:[%s11219_s1 + $0xf4c] ss:$16 sps:$4 sm:$0xff]   ;;  %v8225_v37 = vld [vmem:[%s11219_s1 + $0xf48] ss:$16 sps:$4 sm:$0xff]  }
 0x25a   :  { %v8230_v2 = vld [vmem:[%s11219_s1 + $0x10cc] ss:$16 sps:$4 sm:$0xff]   ;;  %v8228_v10 = vld [vmem:[%s11219_s1 + $0x10c8] ss:$16 sps:$4 sm:$0xff]  }
 0x25b   :  { %5769 = vmatpush1.bf16.msra.mxu0 %v8162_v4  ;;  %v8233_v4 = vld [vmem:[%s11219_s1 + $0xf2c] ss:$16 sps:$4 sm:$0xff]  }
 0x25c   :  { %5736 = vmatpush1.bf16.msra.mxu1 %v8159_v59  ;;  %5770 = vmatprep.subr.bf16.mxu0 %v8170_v63  ;;  %v8234_v63 = vld [vmem:[%s11219_s1 + $0x10a8] ss:$16 sps:$4 sm:$0xff]  }
 0x25d   :  { %5737 = vmatprep.subr.bf16.mxu1 %v8167_v8  ;;  %v8231_v8 = vld [vmem:[%s11219_s1 + $0xf28] ss:$16 sps:$4 sm:$0xff]  }
 0x25f   :  { %5771 = vmatpush1.bf16.msra.mxu0 %v8168_v60  ;;  %v8239_v60 = vld [vmem:[%s11219_s1 + $0xf0c] ss:$16 sps:$4 sm:$0xff]  }
 0x260   :  { %5738 = vmatpush1.bf16.msra.mxu1 %v8165_v11  ;;  %5772 = vmatprep.subr.bf16.mxu0 %v8176_v5  ;;  %v825_v5 = vsub.s32 3, %v8622_v42 }
 0x261   :  { %5739 = vmatprep.subr.bf16.mxu1 %v8173_v7  ;;  %v821_v7 = vsub.s32 2, %v8622_v42  ;;  %v8248_v42 = vld [vmem:[%s11219_s1 + $0x12ec] ss:$16 sps:$4 sm:$0xff]  }
 0x263   :  { %5773 = vmatpush1.bf16.msra.mxu0 %v8174_v14  ;;  %v8240_v14 = vld [vmem:[%s11219_s1 + $0x1088] ss:$16 sps:$4 sm:$0xff]  }
 0x264   :  { %5740 = vmatpush2.bf16.msra.mxu1 %v8171_v17  ;;  %5774 = vmatprep.subr.bf16.mxu0 %v8182_v6  ;;  %v8237_v17 = vld [vmem:[%s11219_s1 + $0xf08] ss:$16 sps:$4 sm:$0xff]   ;;  %v8471_v6 = vld [vmem:[%s11221_s2] sm:$0xf] }
 0x265   :  { %5741 = vmatprep.subr.bf16.mxu1 %v8179_v15  ;;  %v8245_v15 = vld [vmem:[%s11219_s1 + $0x106c] ss:$16 sps:$4 sm:$0xff]  }
 0x267   :  { %5775 = vmatpush1.bf16.msra.mxu0 %v8180_v19  ;;  %v826_v19 = vrot.slane %v8471_v6, %v825_v5  ;;  %v8300_v5 = vld [vmem:[%s11219_s1 + $0x13c8] ss:$16 sps:$4 sm:$0xff]  }
 0x268   :  { %5742 = vmatpush2.bf16.msra.mxu1 %v8177_v16  ;;  %5776 = vmatprep.subr.bf16.mxu0 %v8188_v45  ;;  %v822_v16 = vrot.slane %v8471_v6, %v821_v7  ;;  %v8246_v45 = vld [vmem:[%s11219_s1 + $0x12e8] ss:$16 sps:$4 sm:$0xff]   ;;  %v8311_v6 = vld [vmem:[%s11219_s1 + $0x110c] ss:$16 sps:$4 sm:$0xff]  }
 0x269   :  { %5743 = vmatprep.subr.bf16.mxu1 %v8185_v20  ;;  %v8243_v20 = vld [vmem:[%s11219_s1 + $0x1068] ss:$16 sps:$4 sm:$0xff]  }
 0x26a   :  { %v8297_v7 = vld [vmem:[%s11219_s1 + $0x1148] ss:$16 sps:$4 sm:$0xff]  }
 0x26b   :  { %5777 = vmatpush1.bf16.msra.mxu0 %v8186_v9  ;;  %v8254_v9 = vld [vmem:[%s11219_s1 + $0x12cc] ss:$16 sps:$4 sm:$0xff]  }
 0x26c   :  { %5744 = vmatpush2.bf16.msra.mxu1 %v8183_v25  ;;  %5778 = vmatprep.subr.bf16.mxu0 %v8194_v53  ;;  %v8251_v25 = vld [vmem:[%s11219_s1 + $0x104c] ss:$16 sps:$4 sm:$0xff]   ;;  %v8249_v53 = vld [vmem:[%s11219_s1 + $0x1048] ss:$16 sps:$4 sm:$0xff]  }
 0x26d   :  { %5745 = vmatprep.subr.bf16.mxu1 %v8191_v49 }
 0x26f   :  { %5779 = vmatpush1.bf16.msra.mxu0 %v8192_v29 }
 0x270   :  { %5746 = vmatpush2.bf16.msra.mxu1 %v8189_v51  ;;  %5780 = vmatprep.subr.bf16.mxu0 %v8200_v18  ;;  %v8252_v51 = vld [vmem:[%s11219_s1 + $0x12c8] ss:$16 sps:$4 sm:$0xff]  }
 0x271   :  { %5747 = vmatprep.subr.bf16.mxu1 %v8197_v30  ;;  %v8257_v30 = vld [vmem:[%s11219_s1 + $0x102c] ss:$16 sps:$4 sm:$0xff]  }
 0x273   :  { %5781 = vmatpush2.bf16.msra.mxu0 %v8198_v34 }
 0x274   :  { %5748 = vmatpush2.bf16.msra.mxu1 %v8195_v12  ;;  %5782 = vmatprep.subr.bf16.mxu0 %v8206_v23 }
 0x275   :  { %5749 = vmatprep.subr.bf16.mxu1 %v8203_v35  ;;  %v8260_v35 = vld [vmem:[%s11219_s1 + $0x12ac] ss:$16 sps:$4 sm:$0xff]  }
 0x277   :  { %5783 = vmatpush2.bf16.msra.mxu0 %v8204_v0 }
 0x278   :  { %5750 = vmatpush2.bf16.msra.mxu1 %v8201_v40  ;;  %5784 = vmatprep.subr.bf16.mxu0 %v8212_v58  ;;  %v8258_v40 = vld [vmem:[%s11219_s1 + $0x12a8] ss:$16 sps:$4 sm:$0xff]   ;;  %v8263_v58 = vld [vmem:[%s11219_s1 + $0x100c] ss:$16 sps:$4 sm:$0xff]  }
 0x279   :  { %5751 = vmatprep.subr.bf16.mxu1 %v8209_v57 }
 0x27b   :  { %5785 = vmatpush2.bf16.msra.mxu0 %v8210_v46  ;;  %v8261_v46 = vld [vmem:[%s11219_s1 + $0x1008] ss:$16 sps:$4 sm:$0xff]  }
 0x27c   :  { %5752 = vmatpush2.bf16.msra.mxu1 %v8207_v33  ;;  %5786 = vmatprep.subr.bf16.mxu0 %v8218_v48  ;;  %v8266_v33 = vld [vmem:[%s11219_s1 + $0x128c] ss:$16 sps:$4 sm:$0xff]  }
 0x27d   :  { %5753 = vmatprep.subr.bf16.mxu1 %v8215_v47  ;;  %v8269_v47 = vld [vmem:[%s11219_s1 + $0x11ec] ss:$16 sps:$4 sm:$0xff]  }
 0x27e   :  { %v8272_v48 = vld [vmem:[%s11219_s1 + $0x126c] ss:$16 sps:$4 sm:$0xff]  }
 0x27f   :  { %5787 = vmatpush2.bf16.msra.mxu0 %v8216_v27  ;;  %v8270_v27 = vld [vmem:[%s11219_s1 + $0x1268] ss:$16 sps:$4 sm:$0xff]  }
 0x280   :  { %5754 = vmatpush2.bf16.msra.mxu1 %v8213_v50  ;;  %5788 = vmatprep.subr.bf16.mxu0 %v8221_v3  ;;  %v8267_v50 = vld [vmem:[%s11219_s1 + $0x11e8] ss:$16 sps:$4 sm:$0xff]   ;;  %v8275_v3 = vld [vmem:[%s11219_s1 + $0x11cc] ss:$16 sps:$4 sm:$0xff]  }
 0x281   :  { %5805 = vmatprep.subr.bf16.mxu1 %v8224_v54  ;;  %v8278_v54 = vld [vmem:[%s11219_s1 + $0x124c] ss:$16 sps:$4 sm:$0xff]  }
 0x283   :  { %v5511_v13 = vpop.f32.mrf.mxu1  ;;  %5756 = vmatmul.mubr.bf16.vlgmr.msra.gmra.mxu1 %v9386_v21  ;;  %5789 = vmatpush2.bf16.msra.mxu0 %v8219_v56  ;;  %v8236_v21 = vld [vmem:[%s11219_s1 + $0x10ac] ss:$16 sps:$4 sm:$0xff]   ;;  %v8273_v56 = vld [vmem:[%s11219_s1 + $0x11c8] ss:$16 sps:$4 sm:$0xff]  }
 0x284   :  { %5806 = vmatpush1.bf16.msra.mxu1 %v8222_v62  ;;  %5790 = vmatprep.subr.bf16.mxu0 %v8227_v55  ;;  %v5512_v49 = vadd.f32 %v5511_v13, %v822_v16  ;;  %v8276_v62 = vld [vmem:[%s11219_s1 + $0x1248] ss:$16 sps:$4 sm:$0xff]   ;;  %v8281_v55 = vld [vmem:[%s11219_s1 + $0x11ac] ss:$16 sps:$4 sm:$0xff]  }
 0x285   :  { %v5513_v59 = vpop.f32.mrf.mxu1  ;;  %5807 = vmatprep.subr.bf16.mxu1 %v8230_v2  ;;  %5837 = vmatprep.mubr.bf16.mxu1 %v9397_v28  ;;  %v8242_v28 = vld [vmem:[%s11219_s1 + $0x108c] ss:$16 sps:$4 sm:$0xff]   ;;  %v8279_v13 = vld [vmem:[%s11219_s1 + $0x11a8] ss:$16 sps:$4 sm:$0xff]  }
 0x286   :  { %v5514_v18 = vadd.f32 %v5513_v59, %v826_v19  ;;  %v8284_v2 = vld [vmem:[%s11219_s1 + $0x122c] ss:$16 sps:$4 sm:$0xff]   ;;  %v8309_v19 = vld [vmem:[%s11219_s1 + $0x1108] ss:$16 sps:$4 sm:$0xff]  }
 0x287   :  { %v5515_v1 = vpop.f32.mrf.mxu1  ;;  %5791 = vmatpush2.bf16.msra.mxu0 %v8225_v37  ;;  %v8282_v37 = vld [vmem:[%s11219_s1 + $0x1228] ss:$16 sps:$4 sm:$0xff]   ;;  %v8290_v59 = vld [vmem:[%s11219_s1 + $0x120c] ss:$16 sps:$4 sm:$0xff]  }
 0x288   :  { %5808 = vmatpush1.bf16.msra.mxu1 %v8228_v10  ;;  %5792 = vmatprep.subr.bf16.mxu0 %v8233_v4  ;;  %v8287_v10 = vld [vmem:[%s11219_s1 + $0x118c] ss:$16 sps:$4 sm:$0xff]   ;;  %v8285_v4 = vld [vmem:[%s11219_s1 + $0x1188] ss:$16 sps:$4 sm:$0xff]  }
 0x289   :  { %v5516_v11 = vpop.f32.mrf.mxu1  ;;  %5809 = vmatprep.subr.bf16.mxu1 %v8236_v21  ;;  %v8288_v21 = vld [vmem:[%s11219_s1 + $0x1208] ss:$16 sps:$4 sm:$0xff]   ;;  %v8293_v1 = vld [vmem:[%s11219_s1 + $0x116c] ss:$16 sps:$4 sm:$0xff]  }
 0x28a   :  { %v8294_v11 = vld [vmem:[%s11219_s1 + $0x13e8] ss:$16 sps:$4 sm:$0xff]   ;;  %v8314_v16 = vld [vmem:[%s11219_s1 + $0x138c] ss:$16 sps:$4 sm:$0xff]  }
 0x28b   :  { %5793 = vmatpush2.bf16.msra.mxu0 %v8231_v8  ;;  %v8296_v8 = vld [vmem:[%s11219_s1 + $0x13ec] ss:$16 sps:$4 sm:$0xff]  }
 0x28c   :  { %5810 = vmatpush1.bf16.msra.mxu1 %v8234_v63  ;;  %5794 = vmatprep.subr.bf16.mxu0 %v8239_v60  ;;  %v8291_v63 = vld [vmem:[%s11219_s1 + $0x1168] ss:$16 sps:$4 sm:$0xff]   ;;  %v8299_v60 = vld [vmem:[%s11219_s1 + $0x114c] ss:$16 sps:$4 sm:$0xff]  }
 0x28d   :  { %5811 = vmatprep.subr.bf16.mxu1 %v8242_v28  ;;  %v8302_v28 = vld [vmem:[%s11219_s1 + $0x13cc] ss:$16 sps:$4 sm:$0xff]  }
 0x28f   :  { %5795 = vmatpush2.bf16.msra.mxu0 %v8237_v17  ;;  %v8305_v17 = vld [vmem:[%s11219_s1 + $0x112c] ss:$16 sps:$4 sm:$0xff]  }
 0x290   :  { %5812 = vmatpush1.bf16.msra.mxu1 %v8240_v14  ;;  %5846 = vmatprep.subr.bf16.mxu0 %v8248_v42  ;;  %v8308_v14 = vld [vmem:[%s11219_s1 + $0x13ac] ss:$16 sps:$4 sm:$0xff]   ;;  %v8306_v42 = vld [vmem:[%s11219_s1 + $0x13a8] ss:$16 sps:$4 sm:$0xff]  }
 0x291   :  { %5813 = vmatprep.subr.bf16.mxu1 %v8245_v15  ;;  %v8303_v15 = vld [vmem:[%s11219_s1 + $0x1128] ss:$16 sps:$4 sm:$0xff]  }
 0x292   :  { %v5552_v29 = vpop.f32.mrf.mxu0  ;;  %5797 = vmatmul.mubr.bf16.vlgmr.msra.gmra.mxu0 %v9401_v43  ;;  %v8255_v43 = vld [vmem:[%s11219_s1 + $0x1028] ss:$16 sps:$4 sm:$0xff]  }
 0x293   :  { %v10733_v12 = vadd.f32 %v5552_v29, %v5512_v49  ;;  %5847 = vmatpush1.bf16.msra.mxu0 %v8246_v45  ;;  %5878 = vmatprep.mubr.bf16.mxu0 %v9417_v38  ;;  %v8264_v38 = vld [vmem:[%s11219_s1 + $0x1288] ss:$16 sps:$4 sm:$0xff]   ;;  %v8317_v45 = vld [vmem:[%s11219_s1 + $0x136c] ss:$16 sps:$4 sm:$0xff]  }
 0x294   :  { %5814 = vmatpush1.bf16.msra.mxu1 %v8243_v20  ;;  %v5554_v34 = vpop.f32.mrf.mxu0  ;;  %5848 = vmatprep.subr.bf16.mxu0 %v8254_v9  ;;  %v8312_v20 = vld [vmem:[%s11219_s1 + $0x1388] ss:$16 sps:$4 sm:$0xff]  }
 0x295   :  { %5815 = vmatprep.subr.bf16.mxu1 %v8251_v25  ;;  %v10738_v23 = vadd.f32 %v5554_v34, %v5514_v18  ;;  %v8320_v25 = vld [vmem:[%s11219_s1 + $0x14ec] ss:$16 sps:$4 sm:$0xff]   ;;  %v8315_v9 = vld [vmem:[%s11219_s1 + $0x1368] ss:$16 sps:$4 sm:$0xff]  }
 0x296   :  { %v5556_v0 = vpop.f32.mrf.mxu0  ;;  %v8318_v49 = vld [vmem:[%s11219_s1 + $0x14e8] ss:$16 sps:$4 sm:$0xff]  }
 0x297   :  { %5849 = vmatpush1.bf16.msra.mxu0 %v8252_v51  ;;  %v8326_v51 = vld [vmem:[%s11219_s1 + $0x14cc] ss:$16 sps:$4 sm:$0xff]   ;;  %v8321_v18 = vld [vmem:[%s11219_s1 + $0x1348] ss:$16 sps:$4 sm:$0xff]  }
 0x298   :  { %5816 = vmatpush1.bf16.msra.mxu1 %v8249_v53  ;;  %v5557_v57 = vpop.f32.mrf.mxu0  ;;  %5850 = vmatprep.subr.bf16.mxu0 %v8260_v35  ;;  %v8323_v53 = vld [vmem:[%s11219_s1 + $0x134c] ss:$16 sps:$4 sm:$0xff]   ;;  %v8324_v34 = vld [vmem:[%s11219_s1 + $0x14c8] ss:$16 sps:$4 sm:$0xff]  }
 0x299   :  { %5817 = vmatprep.subr.bf16.mxu1 %v8257_v30  ;;  %v8327_v0 = vld [vmem:[%s11219_s1 + $0x1328] ss:$16 sps:$4 sm:$0xff]  }
 0x29a   :  { %v8330_v57 = vld [vmem:[%s11219_s1 + $0x14a8] ss:$16 sps:$4 sm:$0xff]  }
 0x29b   :  { %5851 = vmatpush1.bf16.msra.mxu0 %v8258_v40 }
 0x29c   :  { %5818 = vmatpush1.bf16.msra.mxu1 %v8255_v43  ;;  %5852 = vmatprep.subr.bf16.mxu0 %v8266_v33  ;;  %v8329_v43 = vld [vmem:[%s11219_s1 + $0x132c] ss:$16 sps:$4 sm:$0xff]   ;;  %v8333_v33 = vld [vmem:[%s11219_s1 + $0x1308] ss:$16 sps:$4 sm:$0xff]  }
 0x29d   :  { %5819 = vmatprep.subr.bf16.mxu1 %v8263_v58 }
 0x29f   :  { %5853 = vmatpush1.bf16.msra.mxu0 %v8264_v38  ;;  %v8341_v38 = vld [vmem:[%s11219_s1 + $0x146c] ss:$16 sps:$4 sm:$0xff]  }
 0x2a0   :  { %5820 = vmatpush1.bf16.msra.mxu1 %v8261_v46  ;;  %5854 = vmatprep.subr.bf16.mxu0 %v8272_v48  ;;  %v8336_v46 = vld [vmem:[%s11219_s1 + $0x1488] ss:$16 sps:$4 sm:$0xff]  }
 0x2a1   :  { %5821 = vmatprep.subr.bf16.mxu1 %v8269_v47  ;;  %v8344_v47 = vld [vmem:[%s11219_s1 + $0x16ec] ss:$16 sps:$4 sm:$0xff]   ;;  %v8339_v48 = vld [vmem:[%s11219_s1 + $0x1468] ss:$16 sps:$4 sm:$0xff]  }
 0x2a3   :  { %5855 = vmatpush1.bf16.msra.mxu0 %v8270_v27  ;;  %v8347_v27 = vld [vmem:[%s11219_s1 + $0x144c] ss:$16 sps:$4 sm:$0xff]  }
 0x2a4   :  { %5822 = vmatpush2.bf16.msra.mxu1 %v8267_v50  ;;  %5856 = vmatprep.subr.bf16.mxu0 %v8278_v54  ;;  %v8342_v50 = vld [vmem:[%s11219_s1 + $0x16e8] ss:$16 sps:$4 sm:$0xff]  }
 0x2a5   :  { %5823 = vmatprep.subr.bf16.mxu1 %v8275_v3  ;;  %v8350_v3 = vld [vmem:[%s11219_s1 + $0x16cc] ss:$16 sps:$4 sm:$0xff]  }
 0x2a7   :  { %5857 = vmatpush1.bf16.msra.mxu0 %v8276_v62  ;;  %v8345_v62 = vld [vmem:[%s11219_s1 + $0x1448] ss:$16 sps:$4 sm:$0xff]  }
 0x2a8   :  { %5824 = vmatpush2.bf16.msra.mxu1 %v8273_v56  ;;  %5858 = vmatprep.subr.bf16.mxu0 %v8284_v2 }
 0x2a9   :  { %5825 = vmatprep.subr.bf16.mxu1 %v8281_v55  ;;  %v8348_v55 = vld [vmem:[%s11219_s1 + $0x16c8] ss:$16 sps:$4 sm:$0xff]  }
 0x2ab   :  { %5859 = vmatpush1.bf16.msra.mxu0 %v8282_v37 }
 0x2ac   :  { %5826 = vmatpush2.bf16.msra.mxu1 %v8279_v13  ;;  %5860 = vmatprep.subr.bf16.mxu0 %v8290_v59  ;;  %v8353_v13 = vld [vmem:[%s11219_s1 + $0x142c] ss:$16 sps:$4 sm:$0xff]   ;;  %v8351_v59 = vld [vmem:[%s11219_s1 + $0x1428] ss:$16 sps:$4 sm:$0xff]  }
 0x2ad   :  { %5827 = vmatprep.subr.bf16.mxu1 %v8287_v10 }
 0x2af   :  { %5861 = vmatpush1.bf16.msra.mxu0 %v8288_v21 }
 0x2b0   :  { %5828 = vmatpush2.bf16.msra.mxu1 %v8285_v4  ;;  %5862 = vmatprep.subr.bf16.mxu0 %v8296_v8  ;;  %v8354_v4 = vld [vmem:[%s11219_s1 + $0x16a8] ss:$16 sps:$4 sm:$0xff]  }
 0x2b1   :  { %5829 = vmatprep.subr.bf16.mxu1 %v8293_v1  ;;  %v8359_v1 = vld [vmem:[%s11219_s1 + $0x140c] ss:$16 sps:$4 sm:$0xff]   ;;  %v8357_v8 = vld [vmem:[%s11219_s1 + $0x1408] ss:$16 sps:$4 sm:$0xff]  }
 0x2b3   :  { %5863 = vmatpush2.bf16.msra.mxu0 %v8294_v11  ;;  %v8365_v11 = vld [vmem:[%s11219_s1 + $0x15ec] ss:$16 sps:$4 sm:$0xff]  }
 0x2b4   :  { %5830 = vmatpush2.bf16.msra.mxu1 %v8291_v63  ;;  %5864 = vmatprep.subr.bf16.mxu0 %v8302_v28  ;;  %v8360_v63 = vld [vmem:[%s11219_s1 + $0x1688] ss:$16 sps:$4 sm:$0xff]  }
 0x2b5   :  { %5831 = vmatprep.subr.bf16.mxu1 %v8299_v60  ;;  %v8368_v60 = vld [vmem:[%s11219_s1 + $0x166c] ss:$16 sps:$4 sm:$0xff]   ;;  %v8363_v28 = vld [vmem:[%s11219_s1 + $0x15e8] ss:$16 sps:$4 sm:$0xff]  }
 0x2b7   :  { %5865 = vmatpush2.bf16.msra.mxu0 %v8300_v5  ;;  %v8371_v5 = vld [vmem:[%s11219_s1 + $0x15cc] ss:$16 sps:$4 sm:$0xff]  }
 0x2b8   :  { %5832 = vmatpush2.bf16.msra.mxu1 %v8297_v7  ;;  %5866 = vmatprep.subr.bf16.mxu0 %v8308_v14  ;;  %v8366_v7 = vld [vmem:[%s11219_s1 + $0x1668] ss:$16 sps:$4 sm:$0xff]  }
 0x2b9   :  { %5833 = vmatprep.subr.bf16.mxu1 %v8305_v17  ;;  %v8374_v17 = vld [vmem:[%s11219_s1 + $0x164c] ss:$16 sps:$4 sm:$0xff]   ;;  %v8369_v14 = vld [vmem:[%s11219_s1 + $0x15c8] ss:$16 sps:$4 sm:$0xff]  }
 0x2bb   :  { %5867 = vmatpush2.bf16.msra.mxu0 %v8306_v42  ;;  %v8377_v42 = vld [vmem:[%s11219_s1 + $0x15ac] ss:$16 sps:$4 sm:$0xff]  }
 0x2bc   :  { %5834 = vmatpush2.bf16.msra.mxu1 %v8303_v15  ;;  %5868 = vmatprep.subr.bf16.mxu0 %v8314_v16  ;;  %v8372_v15 = vld [vmem:[%s11219_s1 + $0x1648] ss:$16 sps:$4 sm:$0xff]  }
 0x2bd   :  { %5835 = vmatprep.subr.bf16.mxu1 %v8311_v6  ;;  %v8380_v6 = vld [vmem:[%s11219_s1 + $0x162c] ss:$16 sps:$4 sm:$0xff]   ;;  %v8375_v16 = vld [vmem:[%s11219_s1 + $0x15a8] ss:$16 sps:$4 sm:$0xff]  }
 0x2bf   :  { %5869 = vmatpush2.bf16.msra.mxu0 %v8312_v20  ;;  %v8383_v20 = vld [vmem:[%s11219_s1 + $0x158c] ss:$16 sps:$4 sm:$0xff]  }
 0x2c0   :  { %5836 = vmatpush2.bf16.msra.mxu1 %v8309_v19  ;;  %5870 = vmatprep.subr.bf16.mxu0 %v8317_v45  ;;  %v8378_v19 = vld [vmem:[%s11219_s1 + $0x1628] ss:$16 sps:$4 sm:$0xff]   ;;  %v8386_v45 = vld [vmem:[%s11219_s1 + $0x160c] ss:$16 sps:$4 sm:$0xff]  }
 0x2c1   :  { %5887 = vmatprep.subr.bf16.mxu1 %v8320_v25  ;;  %v8381_v25 = vld [vmem:[%s11219_s1 + $0x1588] ss:$16 sps:$4 sm:$0xff]  }
 0x2c3   :  { %v5593_v29 = vpop.f32.mrf.mxu1  ;;  %5838 = vmatmul.mubr.bf16.vlgmr.msra.gmra.mxu1 %v9604_v22  ;;  %5871 = vmatpush2.bf16.msra.mxu0 %v8315_v9  ;;  %v8332_v22 = vld [vmem:[%s11219_s1 + $0x14ac] ss:$16 sps:$4 sm:$0xff]   ;;  %v8384_v9 = vld [vmem:[%s11219_s1 + $0x1608] ss:$16 sps:$4 sm:$0xff]  }
 0x2c4   :  { %v5594_v30 = vadd.f32 %v5593_v29, %v10733_v12  ;;  %5888 = vmatpush1.bf16.msra.mxu1 %v8318_v49  ;;  %5872 = vmatprep.subr.bf16.mxu0 %v8323_v53  ;;  %v8389_v49 = vld [vmem:[%s11219_s1 + $0x156c] ss:$16 sps:$4 sm:$0xff]   ;;  %v8390_v29 = vld [vmem:[%s11219_s1 + $0x17e8] ss:$16 sps:$4 sm:$0xff]  }
 0x2c5   :  { %v5595_v35 = vpop.f32.mrf.mxu1  ;;  %5889 = vmatprep.subr.bf16.mxu1 %v8326_v51  ;;  %5919 = vmatprep.mubr.bf16.mxu1 %v9625_v31  ;;  %v8338_v31 = vld [vmem:[%s11219_s1 + $0x148c] ss:$16 sps:$4 sm:$0xff]   ;;  %v8387_v51 = vld [vmem:[%s11219_s1 + $0x1568] ss:$16 sps:$4 sm:$0xff]  }
 0x2c6   :  { %v5596_v12 = vadd.f32 %v5595_v35, %v10738_v23  ;;  %v8335_v23 = vld [vmem:[%s11219_s1 + $0x130c] ss:$16 sps:$4 sm:$0xff]   ;;  %v8396_v35 = vld [vmem:[%s11219_s1 + $0x17c8] ss:$16 sps:$4 sm:$0xff]  }
 0x2c7   :  { %v5597_v40 = vpop.f32.mrf.mxu1  ;;  %5873 = vmatpush2.bf16.msra.mxu0 %v8321_v18  ;;  %v8392_v53 = vld [vmem:[%s11219_s1 + $0x17ec] ss:$16 sps:$4 sm:$0xff]  }
 0x2c8   :  { %5890 = vmatpush1.bf16.msra.mxu1 %v8324_v34  ;;  %5874 = vmatprep.subr.bf16.mxu0 %v8329_v43  ;;  %v8398_v18 = vld [vmem:[%s11219_s1 + $0x17cc] ss:$16 sps:$4 sm:$0xff]   ;;  %v8393_v34 = vld [vmem:[%s11219_s1 + $0x1548] ss:$16 sps:$4 sm:$0xff]  }
 0x2c9   :  { %v5598_v58 = vpop.f32.mrf.mxu1  ;;  %5891 = vmatprep.subr.bf16.mxu1 %v8332_v22  ;;  %v8401_v43 = vld [vmem:[%s11219_s1 + $0x152c] ss:$16 sps:$4 sm:$0xff]   ;;  %v8402_v40 = vld [vmem:[%s11219_s1 + $0x17a8] ss:$16 sps:$4 sm:$0xff]  }
 0x2ca   :  { %v8404_v22 = vld [vmem:[%s11219_s1 + $0x17ac] ss:$16 sps:$4 sm:$0xff]   ;;  %v8405_v58 = vld [vmem:[%s11219_s1 + $0x1508] ss:$16 sps:$4 sm:$0xff]  }
 0x2cb   :  { %5875 = vmatpush2.bf16.msra.mxu0 %v8327_v0  ;;  %v8407_v0 = vld [vmem:[%s11219_s1 + $0x150c] ss:$16 sps:$4 sm:$0xff]  }
 0x2cc   :  { %5892 = vmatpush1.bf16.msra.mxu1 %v8330_v57  ;;  %5876 = vmatprep.subr.bf16.mxu0 %v8335_v23  ;;  %v8410_v57 = vld [vmem:[%s11219_s1 + $0x178c] ss:$16 sps:$4 sm:$0xff]   ;;  %v8408_v23 = vld [vmem:[%s11219_s1 + $0x1788] ss:$16 sps:$4 sm:$0xff]  }
 0x2cd   :  { %5893 = vmatprep.subr.bf16.mxu1 %v8338_v31  ;;  %v8413_v31 = vld [vmem:[%s11219_s1 + $0x176c] ss:$16 sps:$4 sm:$0xff]  }
 0x2cf   :  { %5877 = vmatpush2.bf16.msra.mxu0 %v8333_v33  ;;  %v8416_v33 = vld [vmem:[%s11219_s1 + $0x186c] ss:$16 sps:$4 sm:$0xff]  }
 0x2d0   :  { %5894 = vmatpush1.bf16.msra.mxu1 %v8336_v46  ;;  %5928 = vmatprep.subr.bf16.mxu0 %v8344_v47  ;;  %v8411_v46 = vld [vmem:[%s11219_s1 + $0x1768] ss:$16 sps:$4 sm:$0xff]   ;;  %v8419_v47 = vld [vmem:[%s11219_s1 + $0x174c] ss:$16 sps:$4 sm:$0xff]  }
 0x2d1   :  { %5895 = vmatprep.subr.bf16.mxu1 %v8341_v38  ;;  %v8414_v38 = vld [vmem:[%s11219_s1 + $0x1868] ss:$16 sps:$4 sm:$0xff]  }
 0x2d2   :  { %v5634_v54 = vpop.f32.mrf.mxu0  ;;  %5879 = vmatmul.mubr.bf16.vlgmr.msra.gmra.mxu0 %v9629_v32  ;;  %v8356_v32 = vld [vmem:[%s11219_s1 + $0x16ac] ss:$16 sps:$4 sm:$0xff]  }
 0x2d3   :  { %v10926_v56 = vadd.f32 %v5634_v54, %v5594_v30  ;;  %5929 = vmatpush1.bf16.msra.mxu0 %v8342_v50  ;;  %5960 = vmatprep.mubr.bf16.mxu0 %v9645_v41  ;;  %v8362_v41 = vld [vmem:[%s11219_s1 + $0x168c] ss:$16 sps:$4 sm:$0xff]   ;;  %v8420_v54 = vld [vmem:[%s11219_s1 + $0x1848] ss:$16 sps:$4 sm:$0xff]  }
 0x2d4   :  { %5896 = vmatpush1.bf16.msra.mxu1 %v8339_v48  ;;  %v5636_v2 = vpop.f32.mrf.mxu0  ;;  %5930 = vmatprep.subr.bf16.mxu0 %v8350_v3  ;;  %v8395_v30 = vld [vmem:[%s11219_s1 + $0x154c] ss:$16 sps:$4 sm:$0xff]   ;;  %v8417_v3 = vld [vmem:[%s11219_s1 + $0x1748] ss:$16 sps:$4 sm:$0xff]  }
 0x2d5   :  { %5897 = vmatprep.subr.bf16.mxu1 %v8347_v27  ;;  %v10940_v37 = vadd.f32 %v5636_v2, %v5596_v12  ;;  %v8399_v12 = vld [vmem:[%s11219_s1 + $0x1528] ss:$16 sps:$4 sm:$0xff]   ;;  %v8422_v48 = vld [vmem:[%s11219_s1 + $0x184c] ss:$16 sps:$4 sm:$0xff]  }
 0x2d6   :  { %v5638_v10 = vpop.f32.mrf.mxu0 }
 0x2d7   :  { %5931 = vmatpush1.bf16.msra.mxu0 %v8348_v55  ;;  %v8425_v55 = vld [vmem:[%s11219_s1 + $0x172c] ss:$16 sps:$4 sm:$0xff]  }
 0x2d8   :  { %5898 = vmatpush1.bf16.msra.mxu1 %v8345_v62  ;;  %v5639_v21 = vpop.f32.mrf.mxu0  ;;  %5932 = vmatprep.subr.bf16.mxu0 %v8356_v32  ;;  %v8426_v32 = vld [vmem:[%s11219_s1 + $0x1828] ss:$16 sps:$4 sm:$0xff]  }
 0x2d9   :  { %5899 = vmatprep.subr.bf16.mxu1 %v8353_v13  ;;  %v8423_v13 = vld [vmem:[%s11219_s1 + $0x1728] ss:$16 sps:$4 sm:$0xff]  }
 0x2da   :  { %v8432_v21 = vld [vmem:[%s11219_s1 + $0x1808] ss:$16 sps:$4 sm:$0xff]  }
 0x2db   :  { %5933 = vmatpush1.bf16.msra.mxu0 %v8354_v4  ;;  %v8429_v4 = vld [vmem:[%s11219_s1 + $0x1708] ss:$16 sps:$4 sm:$0xff]  }
 0x2dc   :  { %5900 = vmatpush1.bf16.msra.mxu1 %v8351_v59  ;;  %5934 = vmatprep.subr.bf16.mxu0 %v8362_v41  ;;  %v6011_v59 = vmul.f32 0.01, %v10533_v44 }
 0x2dd   :  { %5901 = vmatprep.subr.bf16.mxu1 %v8359_v1  ;;  %v8435_v1 = vld [vmem:[%s11222_s3 + $0x78] sm:$0xff]  }
 0x2de   :  { %v6015_v41 = vmax.f32 %v10533_v44, %v6011_v59  ;;  %v8438_v44 = vld [vmem:[%s11222_s3 + $0x30] sm:$0xff]  }
 0x2df   :  { %5935 = vmatpush1.bf16.msra.mxu0 %v8360_v63  ;;  %v8437_v63 = vld [vmem:[%s11222_s3 + $0x70] sm:$0xff]  }
 0x2e0   :  { %5902 = vmatpush1.bf16.msra.mxu1 %v8357_v8  ;;  %5936 = vmatprep.subr.bf16.mxu0 %v8368_v60  ;;  %v8436_v8 = vld [vmem:[%s11222_s3 + $0x38] sm:$0xff]  }
 0x2e1   :  { %5903 = vmatprep.subr.bf16.mxu1 %v8365_v11  ;;  %v6019_v11 = vpack.c.bf16 %v6015_v41, %v6015_v41 }
 0x2e3   :  { %5937 = vmatpush1.bf16.msra.mxu0 %v8366_v7 }
 0x2e4   :  { %5904 = vmatpush2.bf16.msra.mxu1 %v8363_v28  ;;  %5938 = vmatprep.subr.bf16.mxu0 %v8374_v17 }
 0x2e5   :  { %5905 = vmatprep.subr.bf16.mxu1 %v8371_v5  ;;  %v8439_v5 = vld [vmem:[%s11222_s3 + $0x68] sm:$0xff]  }
 0x2e7   :  { %5939 = vmatpush1.bf16.msra.mxu0 %v8372_v15  ;;  %v8441_v15 = vld [vmem:[%s11222_s3 + $0x60] sm:$0xff]  }
 0x2e8   :  { %5906 = vmatpush2.bf16.msra.mxu1 %v8369_v14  ;;  %5940 = vmatprep.subr.bf16.mxu0 %v8380_v6  ;;  %v8452_v6 = vld [vmem:[%s11222_s3 + $0xb8] sm:$0xff]  }
 0x2e9   :  { %5907 = vmatprep.subr.bf16.mxu1 %v8377_v42  ;;  %v8451_v42 = vld [vmem:[%s11222_s3 + $0xf8] sm:$0xff]  }
 0x2eb   :  { %5941 = vmatpush1.bf16.msra.mxu0 %v8378_v19  ;;  %v8443_v19 = vld [vmem:[%s11222_s3 + $0x58] sm:$0xff]  }
 0x2ec   :  { %5908 = vmatpush2.bf16.msra.mxu1 %v8375_v16  ;;  %5942 = vmatprep.subr.bf16.mxu0 %v8386_v45  ;;  %v8442_v16 = vld [vmem:[%s11222_s3 + $0x20] sm:$0xff]   ;;  %v8445_v45 = vld [vmem:[%s11222_s3 + $0x50] sm:$0xff]  }
 0x2ed   :  { %5909 = vmatprep.subr.bf16.mxu1 %v8383_v20  ;;  %v8444_v20 = vld [vmem:[%s11222_s3 + $0x18] sm:$0xff]  }
 0x2ef   :  { %5943 = vmatpush1.bf16.msra.mxu0 %v8384_v9  ;;  %v8447_v9 = vld [vmem:[%s11222_s3 + $0x48] sm:$0xff]  }
 0x2f0   :  { %5910 = vmatpush2.bf16.msra.mxu1 %v8381_v25  ;;  %5944 = vmatprep.subr.bf16.mxu0 %v8392_v53  ;;  %v8446_v25 = vld [vmem:[%s11222_s3 + $0x10] sm:$0xff]   ;;  %v6010_v53 = vmul.f32 0.01, %v10519_v52 }
 0x2f1   :  { %5911 = vmatprep.subr.bf16.mxu1 %v8389_v49  ;;  %v8448_v49 = vld [vmem:[%s11222_s3 + $0x8] sm:$0xff]  }
 0x2f3   :  { %5945 = vmatpush2.bf16.msra.mxu0 %v8390_v29  ;;  %v8450_v29 = vld [vmem:[%s11222_s3] sm:$0xff]  }
 0x2f4   :  { %5912 = vmatpush2.bf16.msra.mxu1 %v8387_v51  ;;  %5946 = vmatprep.subr.bf16.mxu0 %v8398_v18  ;;  %v8449_v51 = vld [vmem:[%s11222_s3 + $0x40] sm:$0xff]  }
 0x2f5   :  { %5913 = vmatprep.subr.bf16.mxu1 %v8395_v30  ;;  %v6014_v30 = vmax.f32 %v10519_v52, %v6010_v53  ;;  %v8455_v52 = vld [vmem:[%s11222_s3 + $0xe8] sm:$0xff]  }
 0x2f7   :  { %5947 = vmatpush2.bf16.msra.mxu0 %v8396_v35  ;;  %v6018_v18 = vpack.c.bf16 %v6014_v30, %v6014_v30  ;;  %v8453_v35 = vld [vmem:[%s11222_s3 + $0xf0] sm:$0xff]  }
 0x2f8   :  { %5914 = vmatpush2.bf16.msra.mxu1 %v8393_v34  ;;  %5948 = vmatprep.subr.bf16.mxu0 %v8404_v22  ;;  %v8454_v22 = vld [vmem:[%s11222_s3 + $0xb0] sm:$0xff]  }
 0x2f9   :  { %5915 = vmatprep.subr.bf16.mxu1 %v8401_v43 }
 0x2fb   :  { %5949 = vmatpush2.bf16.msra.mxu0 %v8402_v40 }
 0x2fc   :  { %5916 = vmatpush2.bf16.msra.mxu1 %v8399_v12  ;;  %5950 = vmatprep.subr.bf16.mxu0 %v8410_v57  ;;  %v8456_v57 = vld [vmem:[%s11222_s3 + $0xa8] sm:$0xff]  }
 0x2fd   :  { %5917 = vmatprep.subr.bf16.mxu1 %v8407_v0 }
 0x2ff   :  { %5951 = vmatpush2.bf16.msra.mxu0 %v8408_v23  ;;  %v8457_v23 = vld [vmem:[%s11222_s3 + $0xe0] sm:$0xff]  }
 0x300   :  { %5918 = vmatpush2.bf16.msra.mxu1 %v8405_v58  ;;  %5952 = vmatprep.subr.bf16.mxu0 %v8413_v31  ;;  %v8458_v31 = vld [vmem:[%s11222_s3 + $0xa0] sm:$0xff]  }
 0x301   :  { %5977 = vmatprep.subr.bf16.mxu1 %v8416_v33  ;;  %v8459_v33 = vld [vmem:[%s11222_s3 + $0xd8] sm:$0xff]  }
 0x303   :  { %v5675_v50 = vpop.f32.mrf.mxu1  ;;  %5920 = vmatmul.mubr.bf16.vlgmr.msra.gmra.mxu1 %v9821_v26  ;;  %5953 = vmatpush2.bf16.msra.mxu0 %v8411_v46  ;;  %v8428_v26 = vld [vmem:[%s11219_s1 + $0x182c] ss:$16 sps:$4 sm:$0xff]  }
 0x304   :  { %v5676_v27 = vadd.f32 %v5675_v50, %v10926_v56  ;;  %5978 = vmatpush1.bf16.msra.mxu1 %v8414_v38  ;;  %5954 = vmatprep.subr.bf16.mxu0 %v8419_v47  ;;  %v8460_v46 = vld [vmem:[%s11222_s3 + $0x98] sm:$0xff]   ;;  %v8461_v47 = vld [vmem:[%s11222_s3 + $0xd0] sm:$0xff]  }
 0x305   :  { %v5677_v62 = vpop.f32.mrf.mxu1  ;;  %5979 = vmatprep.subr.bf16.mxu1 %v8422_v48  ;;  %6001 = vmatprep.mubr.bf16.mxu1 %v8473_v61  ;;  %v8434_v61 = vld [vmem:[%s11219_s1 + $0x180c] ss:$16 sps:$4 sm:$0xff]   ;;  %v8462_v50 = vld [vmem:[%s11222_s3 + $0x90] sm:$0xff]  }
 0x306   :  { %v5678_v56 = vadd.f32 %v5677_v62, %v10940_v37  ;;  %v8431_v37 = vld [vmem:[%s11219_s1 + $0x170c] ss:$16 sps:$4 sm:$0xff]  }
 0x307   :  { %v5679_v2 = vpop.f32.mrf.mxu1  ;;  %5955 = vmatpush2.bf16.msra.mxu0 %v8417_v3  ;;  %v8463_v62 = vld [vmem:[%s11222_s3 + $0xc8] sm:$0xff]  }
 0x308   :  { %5980 = vmatpush1.bf16.msra.mxu1 %v8420_v54  ;;  %5956 = vmatprep.subr.bf16.mxu0 %v8425_v55  ;;  %v8464_v55 = vld [vmem:[%s11222_s3 + $0x88] sm:$0xff]   ;;  %v8466_v2 = vld [vmem:[%s11222_s3 + $0x80] sm:$0xff]  }
 0x309   :  { %v5680_v10 = vpop.f32.mrf.mxu1  ;;  %5981 = vmatprep.subr.bf16.mxu1 %v8428_v26 }
 0x30b   :  { %5957 = vmatpush2.bf16.msra.mxu0 %v8423_v13 }
 0x30c   :  { %5982 = vmatpush1.bf16.msra.mxu1 %v8426_v32  ;;  %5958 = vmatprep.subr.bf16.mxu0 %v8431_v37 }
 0x30d   :  { %5983 = vmatprep.subr.bf16.mxu1 %v8434_v61 }
 0x30f   :  { %5959 = vmatpush2.bf16.msra.mxu0 %v8429_v4 }
 0x310   :  { %5984 = vmatpush1.bf16.msra.mxu1 %v8432_v21  ;;  %7210 = vmatprep.subr.bf16.mxu0 %v8435_v1 }
 0x311   :  { %7232 = vmatprep.subr.bf16.mxu1 %v8451_v42 }
 0x312   :  { %v5716_v60 = vpop.f32.mrf.mxu0  ;;  %5961 = vmatmul.mubr.bf16.vlgmr.msra.gmra.mxu0 %v9843_v39  ;;  %v8440_v39 = vld [vmem:[%s11222_s3 + $0x28] sm:$0xff]  }
 0x313   :  { %7176 = vmatmul.mubr.msk.bf16.vlgmr.msra.gmra.mxu1 %vm4940_vm0, %v9907_v24  ;;  %v5717_v28 = vadd.f32 %v5716_v60, %v5676_v27  ;;  %7211 = vmatpush3.bf16.msra.mxu0 %v8436_v8 }
 0x314   :  { %6317 = vmatprep.mubr.bf16.mxu0 %v6019_v11  ;;  %v5718_v7 = vpop.f32.mrf.mxu0  ;;  %7212 = vmatprep.subr.bf16.mxu0 %v8437_v63 }
 0x315   :  { %v5719_v17 = vadd.f32 %v5718_v7, %v5678_v56  ;;  %7233 = vmatpush3.bf16.msra.mxu1 %v8452_v6  ;;  %v8465_v56 = vld [vmem:[%s11222_s3 + $0xc0] sm:$0xff]  }
 0x316   :  { %v5720_v14 = vpop.f32.mrf.mxu0  ;;  %7234 = vmatprep.subr.bf16.mxu1 %v8453_v35 }
 0x317   :  { %7213 = vmatpush3.bf16.msra.mxu0 %v8438_v44 }
 0x318   :  { %v5721_v24 = vpop.f32.mrf.mxu0  ;;  %7214 = vmatprep.subr.bf16.mxu0 %v8439_v5 }
 0x319   :  { %7235 = vmatpush3.bf16.msra.mxu1 %v8454_v22 }
 0x31a   :  { %7236 = vmatprep.subr.bf16.mxu1 %v8455_v52 }
 0x31b   :  { %7215 = vmatpush3.bf16.msra.mxu0 %v8440_v39 }
 0x31c   :  { %7216 = vmatprep.subr.bf16.mxu0 %v8441_v15 }
 0x31d   :  { %7237 = vmatpush3.bf16.msra.mxu1 %v8456_v57 }
 0x31e   :  { %7238 = vmatprep.subr.bf16.mxu1 %v8457_v23 }
 0x31f   :  { %7217 = vmatpush3.bf16.msra.mxu0 %v8442_v16 }
 0x320   :  { %7218 = vmatprep.subr.bf16.mxu0 %v8443_v19 }
 0x321   :  { %7239 = vmatpush3.bf16.msra.mxu1 %v8458_v31 }
 0x322   :  { %7240 = vmatprep.subr.bf16.mxu1 %v8459_v33 }
 0x323   :  { %7219 = vmatpush3.bf16.msra.mxu0 %v8444_v20 }
 0x324   :  { %7220 = vmatprep.subr.bf16.mxu0 %v8445_v45 }
 0x325   :  { %7241 = vmatpush3.bf16.msra.mxu1 %v8460_v46 }
 0x326   :  { %7242 = vmatprep.subr.bf16.mxu1 %v8461_v47 }
 0x327   :  { %7221 = vmatpush3.bf16.msra.mxu0 %v8446_v25 }
 0x328   :  { %7222 = vmatprep.subr.bf16.mxu0 %v8447_v9 }
 0x329   :  { %7243 = vmatpush3.bf16.msra.mxu1 %v8462_v50 }
 0x32a   :  { %7244 = vmatprep.subr.bf16.mxu1 %v8463_v62 }
 0x32b   :  { %7223 = vmatpush3.bf16.msra.mxu0 %v8448_v49 }
 0x32c   :  { %7224 = vmatprep.subr.bf16.mxu0 %v8449_v51 }
 0x32d   :  { %7245 = vmatpush3.bf16.msra.mxu1 %v8464_v55 }
 0x32e   :  { %7246 = vmatprep.subr.bf16.mxu1 %v8465_v56 }
 0x32f   :  { %7225 = vmatpush3.bf16.msra.mxu0 %v8450_v29 }
 0x331   :  { %7247 = vmatpush3.bf16.msra.mxu1 %v8466_v2 }
 0x332   :  { %6318 = vmatmul.mubr.bf16.vlgmr.msra.gmra.mxu0 %v6018_v18 }
 0x343   :  { %v5757_v34 = vpop.f32.mrf.mxu1 }
 0x344   :  { %v5758_v43 = vadd.f32 %v5757_v34, %v5717_v28 }
 0x345   :  { %v5759_v12 = vpop.f32.mrf.mxu1 }
 0x346   :  { %v5760_v40 = vadd.f32 %v5759_v12, %v5719_v17  ;;  %v7177_v12 = vld [vmem:[%s11223_s4] ss:$0 sm:$0xff] }
 0x347   :  { %v5761_v0 = vpop.f32.mrf.mxu1 }
 0x348   :  { %v6366_v0 = vand.u32 127, %v811_v36 }
 0x349   :  { %v5762_v58 = vpop.f32.mrf.mxu1 }
 0x34a   :  { %vm6367_vm1 = vcmp.lt.s32.totalorder %v6366_v0, 4  ;;  %vm6382_vm2 = vcmp.eq.s32.totalorder %v6366_v0, 4 }
 0x352   :  { %v5798_v38 = vpop.f32.mrf.mxu0 }
 0x353   :  { %v5799_v48 = vadd.f32 %v5798_v38, %v5758_v43 }
 0x354   :  { %v5800_v27 = vpop.f32.mrf.mxu0 }
 0x355   :  { %v5801_v3 = vadd.f32 %v5800_v27, %v5760_v40 }
 0x356   :  { %v5802_v54 = vpop.f32.mrf.mxu0 }
 0x358   :  { %v5803_v26 = vpop.f32.mrf.mxu0 }
 0x383   :  { %v5839_v13 = vpop.f32.mrf.mxu1 }
 0x384   :  { %v5840_v32 = vadd.f32 %v5839_v13, %v5799_v48 }
 0x385   :  { %v5841_v10 = vpop.f32.mrf.mxu1 }
 0x386   :  { %v5842_v37 = vadd.f32 %v5841_v10, %v5801_v3 }
 0x387   :  { %v5843_v61 = vpop.f32.mrf.mxu1 }
 0x389   :  { %v5844_v59 = vpop.f32.mrf.mxu1 }
 0x392   :  { %v5880_v4 = vpop.f32.mrf.mxu0 }
 0x393   :  { %v5881_v28 = vadd.f32 %v5880_v4, %v5840_v32 }
 0x394   :  { %v5882_v21 = vpop.f32.mrf.mxu0 }
 0x395   :  { %v5883_v44 = vadd.f32 %v5882_v21, %v5842_v37 }
 0x396   :  { %v5884_v1 = vpop.f32.mrf.mxu0 }
 0x398   :  { %v5885_v41 = vpop.f32.mrf.mxu0 }
 0x3c3   :  { %v5921_v8 = vpop.f32.mrf.mxu1 }
 0x3c4   :  { %v5922_v7 = vadd.f32 %v5921_v8, %v5881_v28 }
 0x3c5   :  { %v5923_v63 = vpop.f32.mrf.mxu1 }
 0x3c6   :  { %v5924_v14 = vadd.f32 %v5923_v63, %v5883_v44 }
 0x3c7   :  { %v5925_v11 = vpop.f32.mrf.mxu1 }
 0x3c9   :  { %v5926_v60 = vpop.f32.mrf.mxu1 }
 0x3d2   :  { %v5962_v5 = vpop.f32.mrf.mxu0 }
 0x3d3   :  { %v6003_v17 = vpop.f32.mrf.mxu1  ;;  %v5963_v39 = vadd.f32 %v5962_v5, %v5922_v7 }
 0x3d4   :  { %v5964_v24 = vpop.f32.mrf.mxu0 }
 0x3d5   :  { %v6005_v15 = vpop.f32.mrf.mxu1  ;;  %v6004_v42 = vadd.f32 %v6003_v17, %v5963_v39  ;;  %v5965_v6 = vadd.f32 %v5964_v24, %v5924_v14 }
 0x3d6   :  { %v5966_v16 = vpop.f32.mrf.mxu0 }
 0x3d7   :  { %v6007_v19 = vpop.f32.mrf.mxu1  ;;  %v6012_v20 = vmul.f32 0.01, %v6004_v42  ;;  %v6006_v45 = vadd.f32 %v6005_v15, %v5965_v6 }
 0x3d8   :  { %v5967_v25 = vpop.f32.mrf.mxu0 }
 0x3d9   :  { %v6008_v9 = vpop.f32.mrf.mxu1  ;;  %v6013_v49 = vmul.f32 0.01, %v6006_v45  ;;  %v6016_v53 = vmax.f32 %v6004_v42, %v6012_v20 }
 0x3db   :  { %v6017_v51 = vmax.f32 %v6006_v45, %v6013_v49  ;;  %v6020_v30 = vpack.c.bf16 %v6016_v53, %v6016_v53 }
 0x3dd   :  { %v6021_v29 = vpack.c.bf16 %v6017_v51, %v6017_v51 }
 0x3df   :  { %6357 = vmatprep.mubr.bf16.mxu1 %v6021_v29 }
 0x3e0   :  { %6358 = vmatmul.mubr.bf16.vlgmr.msra.gmra.mxu1 %v6020_v30 }
 0x3f2   :  { %v7226_v18 = vpop.f32.mrf.mxu0 }
 0x3f4   :  { %v7227_v34 = vpop.f32.mrf.mxu0 }
 0x3f5   :  { %v7228_v35 = vadd.f32 %v7227_v34, %v7226_v18 }
 0x3f6   :  { %v7229_v43 = vpop.f32.mrf.mxu0 }
 0x3f7   :  { %v6320_v57 = vadd.f32 %v7228_v35, %v7177_v12 }
 0x3f8   :  { %v7230_v22 = vpop.f32.mrf.mxu0 }
 0x4a0   :  { %v7248_v40 = vpop.f32.mrf.mxu1 }
 0x4a2   :  { %v7249_v52 = vpop.f32.mrf.mxu1 }
 0x4a3   :  { %v7250_v58 = vadd.f32 %v7249_v52, %v7248_v40 }
 0x4a4   :  { %v7251_v23 = vpop.f32.mrf.mxu1 }
 0x4a5   :  { %v6360_v31 = vadd.f32 %v7250_v58, %v6320_v57 }
 0x4a6   :  { %v7252_v33 = vpop.f32.mrf.mxu1 }
 0x4a7   :  { %v6368_v46 = vsel %vm6367_vm1, %v6360_v31, -1e+30  ;;  %v6383_v38 = vsel %vm6382_vm2, %v6360_v31, 0.0 }
 0x4a8   :  { %v6370_v47 = vsel %vm6369_vm3, %v6368_v46, -inf }
 0x4a9   :  { %6371 = vmax.xlane.f32.xlu0 %v6370_v47 }
 0x532   :  { %v6372_v48 = vpop.xlane.xlu0 %6371 }
 0x533   :  { %v6373_v50 = vsub.f32 %v6368_v46, %v6372_v48 }
 0x535   :  { %v6374_v27 = vmul.f32 1.442695, %v6373_v50 }
 0x537   :  { %8467 = vpow2.f32 %v6374_v27 }
 0x544   :  { %v8468_v3 = vpop.eup %8467 }
 0x545   :  { %v6376_v54 = vsel %vm6367_vm1, %v8468_v3, 0.0 }
 0x546   :  { %v6377_v36 = vsel %vm6369_vm3, %v6376_v54, 0.0 }
 0x547   :  { %6378 = vadd.xlane.f32.xlu0 %v6377_v36 }
 0x5d0   :  { %v6379_v62 = vpop.xlane.xlu0 %6378 }
 0x5d1   :  { %8469 = vrcp.f32 %v6379_v62 }
 0x5de   :  { %v8470_v55 = vpop.eup %8469 }
 0x5df   :  { %v6381_v26 = vmul.f32 %v8470_v55, %v6376_v54 }
 0x5e1   :  { %v6384_v56 = vadd.f32 %v6383_v38, %v6381_v26 }
 0x5e3   :  { %6385 = vst [vmem:[%s11224_s5] sm:$0x3] %v6384_v56 }

</bundles_post_ra>
